<compile_context>
chip_gen: v6e
topology: v6e:2x2x1
jax: 0.10.0
libtpu: 0.0.40
codegen_flags: <defaults>
</compile_context>

<pallas_src>
import functools
import math

import jax
import jax.numpy as jnp
from jax.experimental import pallas as pl
from jax.experimental.pallas import tpu as pltpu


LANE = 128                 # TPU lane width (last dim tiling)
SUBLANE = 8                # sublane tiling (second-to-last dim)
B_TILE_MAX = 256           # fill the MXU rows when batch allows (tunable)
VMEM_BUDGET = 40 << 20     # sizing budget; safe on v7x (64 MiB physical VMEM)


def _round_up(x, m):
    return (x + m - 1) // m * m


def _nbytes(a):
    return math.prod(a.shape) * jnp.dtype(a.dtype).itemsize


# ----------------------------------------------------------------------------
# Fused multi-layer GRU (layer wavefront) + Linear kernel
# ----------------------------------------------------------------------------
def make_grunet_kernel(num_layers, seq_len, b_tile, h_pad, unroll):
    L, T = num_layers, seq_len
    H3 = 3 * h_pad

    def kernel(*refs):
        x_ref = refs[0]                          # (T, b_tile, d_pad)
        w_refs = refs[1:1 + 4 * L]               # per layer: wih, whh, bih, bhh
        w_out_ref = refs[1 + 4 * L]              # (h_pad, o_pad)
        b_out_ref = refs[2 + 4 * L]              # (1, o_pad)
        out_ref = refs[3 + 4 * L]                # (b_tile, o_pad)
        gi0_ref = refs[4 + 4 * L]                # scratch (T, b_tile, 3*h_pad)

        d_pad = x_ref.shape[-1]
        wih0_ref, _, bih0_ref, _ = w_refs[0:4]

        # Layer-0 input projection for ALL time steps in one MXU matmul
        # (hoisted off the sequential critical path); bias folded in once.
        # TODO(synk): for very long T, chunk this projection over time with a
        # double-buffered scratch instead of materializing all T at once.
        x_all = x_ref[...].reshape(T * b_tile, d_pad)
        gi0 = (jnp.dot(x_all.astype(wih0_ref.dtype), wih0_ref[...],
                       preferred_element_type=jnp.float32)
               + bih0_ref[...])
        gi0_ref[...] = gi0.reshape(T, b_tile, H3)

        # Hoist bias broadcasts out of the time loop (broadcast_in_dim is not
        # CSE'd if left inside the loop).
        bhh_b = [jnp.broadcast_to(w_refs[4 * l + 3][...], (b_tile, H3))
                 for l in range(L)]
        bih_b = [None] + [jnp.broadcast_to(w_refs[4 * l + 2][...], (b_tile, H3))
                          for l in range(1, L)]

        def gru_cell(l, gi, h):
            whh_ref = w_refs[4 * l + 1]
            gh = (jnp.dot(h.astype(whh_ref.dtype), whh_ref[...],
                          preferred_element_type=jnp.float32) + bhh_b[l])
            # gate slices fall on 128-lane boundaries (h_pad % 128 == 0)
            r = jax.nn.sigmoid(gi[:, :h_pad] + gh[:, :h_pad])
            z = jax.nn.sigmoid(gi[:, h_pad:2 * h_pad] + gh[:, h_pad:2 * h_pad])
            n = jnp.tanh(gi[:, 2 * h_pad:] + r * gh[:, 2 * h_pad:])
            return n + z * (h - n)               # == (1-z)*n + z*h, 1 fewer vmul

        # Wavefront over layers: at global step s, layer l handles t = s - l
        # using layer l-1's output from the PREVIOUS global step.  All per-step
        # matmuls are mutually independent -> serial chain ~ T + L, not L*T.
        def body(s, carry):
            hs = list(carry[:L])                 # per-layer hidden state
            ys = list(carry[L:])                 # prev-step outputs, layers 0..L-2
            new_hs, new_ys = list(hs), list(ys)
            for l in range(L):
                t = s - l
                if l == 0:
                    active = t < T               # t >= 0 always for layer 0
                    gi = gi0_ref[jnp.minimum(t, T - 1)]
                else:
                    active = jnp.logical_and(t >= 0, t < T)
                    wih_ref = w_refs[4 * l]
                    gi = (jnp.dot(ys[l - 1].astype(wih_ref.dtype), wih_ref[...],
                                  preferred_element_type=jnp.float32)
                          + bih_b[l])
                h_new = gru_cell(l, gi, hs[l])
                new_hs[l] = jnp.where(active, h_new, hs[l])
                if l < L - 1:
                    new_ys[l] = jnp.where(active, h_new, ys[l])
            return tuple(new_hs) + tuple(new_ys)

        zeros = jnp.zeros((b_tile, h_pad), jnp.float32)
        init = tuple([zeros] * L) + tuple([zeros] * (L - 1))
        carry = jax.lax.fori_loop(0, T + L - 1, body, init, unroll=unroll)
        h_last = carry[L - 1]                    # last layer, last time step

        # Fused output Linear on the final hidden state (lane-dense store).
        out_ref[...] = (jnp.dot(h_last.astype(w_out_ref.dtype), w_out_ref[...],
                                preferred_element_type=jnp.float32)
                        + b_out_ref[...]).astype(out_ref.dtype)

    return kernel


# ----------------------------------------------------------------------------
# One-time parameter packing: transpose, pad, lane-align gates
# ----------------------------------------------------------------------------
def pack_params(params, hidden_size, output_size, dtype=jnp.float32):
    """dtype=jnp.bfloat16 halves weight VMEM/DMA on v6e/v7x (f32 accumulate);
    default f32 keeps the tight reference tolerance."""
    H = hidden_size
    h_pad = _round_up(H, LANE)
    layers = []
    for w_ih, w_hh, b_ih, b_hh in params["gru"]:
        d_in = w_ih.shape[1]
        d_pad = _round_up(d_in, LANE)
        wih_t = jnp.zeros((d_pad, 3 * h_pad), jnp.float32)
        whh_t = jnp.zeros((h_pad, 3 * h_pad), jnp.float32)
        bih_p = jnp.zeros((1, 3 * h_pad), jnp.float32)
        bhh_p = jnp.zeros((1, 3 * h_pad), jnp.float32)
        for g in range(3):                     # PyTorch gate order [r, z, n]
            col = g * h_pad                    # lane-aligned gate offset
            wih_t = wih_t.at[:d_in, col:col + H].set(w_ih[g * H:(g + 1) * H, :].T)
            whh_t = whh_t.at[:H, col:col + H].set(w_hh[g * H:(g + 1) * H, :].T)
            bih_p = bih_p.at[0, col:col + H].set(b_ih[g * H:(g + 1) * H])
            bhh_p = bhh_p.at[0, col:col + H].set(b_hh[g * H:(g + 1) * H])
        layers.append((wih_t.astype(dtype), whh_t.astype(dtype), bih_p, bhh_p))
    o_pad = _round_up(output_size, LANE)
    w_out_t = (jnp.zeros((h_pad, o_pad), jnp.float32)
               .at[:H, :output_size].set(params["w_out"].T)).astype(dtype)
    b_out_p = (jnp.zeros((1, o_pad), jnp.float32)
               .at[0, :output_size].set(params["b_out"]))
    return {"layers": tuple(layers), "w_out": w_out_t, "b_out": b_out_p}


# ----------------------------------------------------------------------------
# VMEM sizing (generation-aware: budget chosen to fit v7x's 64 MiB)
# ----------------------------------------------------------------------------
def _estimate_vmem_bytes(b_tile, T, d_pad, h_pad, o_pad, num_layers, w_bytes):
    f32 = 4
    x_blk = 2 * T * b_tile * d_pad * f32            # double-buffered input block
    gi0 = T * b_tile * 3 * h_pad * f32              # scratch (single buffer)
    wts = 2 * w_bytes                               # constants may be 2x-buffered
    out_blk = 2 * b_tile * o_pad * f32
    live = (4 * num_layers + 8) * b_tile * 3 * h_pad * f32   # biases/gates/carry
    return x_blk + gi0 + wts + out_blk + live


# ----------------------------------------------------------------------------
# Forward pass
# ----------------------------------------------------------------------------
@functools.partial(jax.jit, static_argnames=("output_size", "b_tile"))
def grunet_forward(x, packed, *, output_size, b_tile=None):
    """x: (B, T, input_size) float32 -> (B, output_size) float32."""
    B, T, D = x.shape
    layers = packed["layers"]
    num_layers = len(layers)
    d_pad = layers[0][0].shape[0]
    h_pad = layers[0][1].shape[0]
    o_pad = packed["w_out"].shape[1]

    weight_bytes = sum(_nbytes(a) for lyr in layers for a in lyr)
    weight_bytes += _nbytes(packed["w_out"]) + _nbytes(packed["b_out"])

    # Tunable batch tile: grow toward B_TILE_MAX (MXU rows), shrink to budget.
    if b_tile is None:
        b_tile = min(_round_up(B, SUBLANE), B_TILE_MAX)
        while (b_tile > SUBLANE
               and _estimate_vmem_bytes(b_tile, T, d_pad, h_pad, o_pad,
                                        num_layers, weight_bytes) > VMEM_BUDGET):
            b_tile = max(SUBLANE, _round_up(b_tile // 2, SUBLANE))
    num_tiles = pl.cdiv(B, b_tile)
    b_pad = num_tiles * b_tile

    vmem_need = _estimate_vmem_bytes(b_tile, T, d_pad, h_pad, o_pad,
                                     num_layers, weight_bytes)
    vmem_limit = int(min(max(int(vmem_need * 1.3), 32 << 20), 100 << 20))

    # Single fused pad(transpose): one HBM pass over x, time-major + padded.
    x_p = jnp.pad(jnp.transpose(x.astype(jnp.float32), (1, 0, 2)),
                  ((0, 0), (0, b_pad - B), (0, d_pad - D)))

    flat_args = [x_p]
    in_specs = [pl.BlockSpec((T, b_tile, d_pad), lambda b: (0, b, 0))]
    for wih, whh, bih, bhh in layers:
        flat_args += [wih, whh, bih, bhh]
        in_specs += [pl.BlockSpec(wih.shape, lambda b: (0, 0)),
                     pl.BlockSpec(whh.shape, lambda b: (0, 0)),
                     pl.BlockSpec(bih.shape, lambda b: (0, 0)),
                     pl.BlockSpec(bhh.shape, lambda b: (0, 0))]
    flat_args += [packed["w_out"], packed["b_out"]]
    in_specs += [pl.BlockSpec(packed["w_out"].shape, lambda b: (0, 0)),
                 pl.BlockSpec(packed["b_out"].shape, lambda b: (0, 0))]

    total_steps = T + num_layers - 1
    unroll = True if (total_steps <= 12 and b_tile <= 64) else min(8, total_steps)

    out = pl.pallas_call(
        make_grunet_kernel(num_layers, T, b_tile, h_pad, unroll),
        out_shape=jax.ShapeDtypeStruct((b_pad, o_pad), jnp.float32),
        grid=(num_tiles,),
        in_specs=in_specs,
        out_specs=pl.BlockSpec((b_tile, o_pad), lambda b: (b, 0)),
        scratch_shapes=[pltpu.VMEM((T, b_tile, 3 * h_pad), jnp.float32)],
        compiler_params=pltpu.CompilerParams(
            # batch tiles are independent; swap to pltpu.CORE_PARALLEL on v7x
            # when num_tiles >= 2 to shard tiles across both TensorCores.
            dimension_semantics=("parallel",),
            vmem_limit_bytes=vmem_limit),
    )(*flat_args)

    return out[:B, :output_size]


# ----------------------------------------------------------------------------
# Deterministic parameter init (PyTorch GRU/Linear layout & uniform ranges)
# ----------------------------------------------------------------------------
def init_params(key, input_size, hidden_size, num_layers, output_size):
    params = {"gru": []}
    bound = 1.0 / jnp.sqrt(jnp.float32(hidden_size))
    for layer in range(num_layers):
        d_in = input_size if layer == 0 else hidden_size
        key, k1, k2, k3, k4 = jax.random.split(key, 5)
        w_ih = jax.random.uniform(k1, (3 * hidden_size, d_in),
                                  minval=-bound, maxval=bound, dtype=jnp.float32)
        w_hh = jax.random.uniform(k2, (3 * hidden_size, hidden_size),
                                  minval=-bound, maxval=bound, dtype=jnp.float32)
        b_ih = jax.random.uniform(k3, (3 * hidden_size,),
                                  minval=-bound, maxval=bound, dtype=jnp.float32)
        b_hh = jax.random.uniform(k4, (3 * hidden_size,),
                                  minval=-bound, maxval=bound, dtype=jnp.float32)
        params["gru"].append((w_ih, w_hh, b_ih, b_hh))
    key, k5, k6 = jax.random.split(key, 3)
    params["w_out"] = jax.random.uniform(k5, (output_size, hidden_size),
                                         minval=-bound, maxval=bound,
                                         dtype=jnp.float32)
    params["b_out"] = jax.random.uniform(k6, (output_size,),
                                         minval=-bound, maxval=bound,
                                         dtype=jnp.float32)
    return params


# ----------------------------------------------------------------------------
# Pure-JAX reference (mirrors torch.nn.GRU math) for correctness check
# ----------------------------------------------------------------------------
def grunet_reference(x, params, num_layers, hidden_size):
    B, T, _ = x.shape
    H = hidden_size
    seq = x
    for layer in range(num_layers):
        w_ih, w_hh, b_ih, b_hh = params["gru"][layer]
        h = jnp.zeros((B, H), jnp.float32)
        outs = []
        for t in range(T):
            xt = seq[:, t, :]
            gi = xt @ w_ih.T + b_ih
            gh = h @ w_hh.T + b_hh
            r = jax.nn.sigmoid(gi[:, :H] + gh[:, :H])
            z = jax.nn.sigmoid(gi[:, H:2 * H] + gh[:, H:2 * H])
            n = jnp.tanh(gi[:, 2 * H:] + r * gh[:, 2 * H:])
            h = (1.0 - z) * n + z * h
            outs.append(h)
        seq = jnp.stack(outs, axis=1)
    return seq[:, -1, :] @ params["w_out"].T + params["b_out"]


if __name__ == "__main__":
    batch, seq_len, input_size = 2, 8, 4
    hidden_size, num_layers, output_size = 32, 2, 4

    key = jax.random.PRNGKey(0)
    key, kx = jax.random.split(key)
    x = jax.random.normal(kx, (batch, seq_len, input_size), dtype=jnp.float32)

    params = init_params(key, input_size, hidden_size, num_layers, output_size)
    packed = pack_params(params, hidden_size, output_size)   # one-time packing

    out = grunet_forward(x, packed, output_size=output_size)
    out = jax.block_until_ready(out)

    ref = grunet_reference(x, params, num_layers, hidden_size)
    assert out.shape == (batch, output_size)
    assert jnp.allclose(out, ref, atol=1e-4, rtol=1e-4), "mismatch vs reference"

    print("KERNEL_OK")
</pallas_src>

<mosaic_0001>
module attributes {stable_mosaic.version = 11 : i64} {
  func.func @kernel(%arg0: i32, %arg1: memref<8x8x128xf32, #tpu.memory_space<vmem>>, %arg2: memref<128x384xf32, #tpu.memory_space<vmem>>, %arg3: memref<128x384xf32, #tpu.memory_space<vmem>>, %arg4: memref<1x384xf32, #tpu.memory_space<vmem>>, %arg5: memref<1x384xf32, #tpu.memory_space<vmem>>, %arg6: memref<128x384xf32, #tpu.memory_space<vmem>>, %arg7: memref<128x384xf32, #tpu.memory_space<vmem>>, %arg8: memref<1x384xf32, #tpu.memory_space<vmem>>, %arg9: memref<1x384xf32, #tpu.memory_space<vmem>>, %arg10: memref<128x128xf32, #tpu.memory_space<vmem>>, %arg11: memref<1x128xf32, #tpu.memory_space<vmem>>, %arg12: memref<8x128xf32, #tpu.memory_space<vmem>>, %arg13: memref<8x8x384xf32, #tpu.memory_space<vmem>>) attributes {dimension_semantics = [#tpu.dimension_semantics<parallel>], iteration_bounds = array<i64: 1>, scalar_prefetch = 0 : i64, scratch_operands = 1 : i64, tpu.core_type = #tpu.core_type<tc>, window_params = [{transform_indices = @transform_0, window_bounds = array<i64: 8, 8, 128>}, {pipeline_mode = #tpu.pipeline_mode<synchronous>, transform_indices = @transform_1, window_bounds = array<i64: 128, 384>}, {pipeline_mode = #tpu.pipeline_mode<synchronous>, transform_indices = @transform_2, window_bounds = array<i64: 128, 384>}, {pipeline_mode = #tpu.pipeline_mode<synchronous>, transform_indices = @transform_3, window_bounds = array<i64: 1, 384>}, {pipeline_mode = #tpu.pipeline_mode<synchronous>, transform_indices = @transform_4, window_bounds = array<i64: 1, 384>}, {pipeline_mode = #tpu.pipeline_mode<synchronous>, transform_indices = @transform_5, window_bounds = array<i64: 128, 384>}, {pipeline_mode = #tpu.pipeline_mode<synchronous>, transform_indices = @transform_6, window_bounds = array<i64: 128, 384>}, {pipeline_mode = #tpu.pipeline_mode<synchronous>, transform_indices = @transform_7, window_bounds = array<i64: 1, 384>}, {pipeline_mode = #tpu.pipeline_mode<synchronous>, transform_indices = @transform_8, window_bounds = array<i64: 1, 384>}, {pipeline_mode = #tpu.pipeline_mode<synchronous>, transform_indices = @transform_9, window_bounds = array<i64: 128, 128>}, {pipeline_mode = #tpu.pipeline_mode<synchronous>, transform_indices = @transform_10, window_bounds = array<i64: 1, 128>}, {transform_indices = @transform_11, window_bounds = array<i64: 8, 128>}]} {
    %c0 = arith.constant 0 : index
    %c0_0 = arith.constant 0 : index
    %c0_1 = arith.constant 0 : index
    %0 = vector.load %arg1[%c0, %c0_0, %c0_1] : memref<8x8x128xf32, #tpu.memory_space<vmem>>, vector<8x8x128xf32>
    %1 = vector.shape_cast %0 : vector<8x8x128xf32> to vector<64x128xf32>
    %c0_2 = arith.constant 0 : index
    %c0_3 = arith.constant 0 : index
    %2 = vector.load %arg2[%c0_2, %c0_3] : memref<128x384xf32, #tpu.memory_space<vmem>>, vector<128x384xf32>
    %cst = arith.constant dense<0.000000e+00> : vector<64x384xf32>
    %3 = tpu.matmul %1, %2, %cst {dimension_numbers = #tpu.dot_dimension_numbers<[1], [0], [0], [1], [0, 0, 1, 1], [], []>} : vector<64x128xf32>, vector<128x384xf32>, vector<64x384xf32> -> vector<64x384xf32>
    %c0_4 = arith.constant 0 : index
    %c0_5 = arith.constant 0 : index
    %4 = vector.load %arg4[%c0_4, %c0_5] : memref<1x384xf32, #tpu.memory_space<vmem>>, vector<1x384xf32>
    %5 = vector.broadcast %4 : vector<1x384xf32> to vector<64x384xf32>
    %6 = arith.addf %3, %5 : vector<64x384xf32>
    %7 = vector.shape_cast %6 : vector<64x384xf32> to vector<8x8x384xf32>
    %c0_6 = arith.constant 0 : index
    %c0_7 = arith.constant 0 : index
    %c0_8 = arith.constant 0 : index
    %8 = vector.load %arg13[%c0_6, %c0_7, %c0_8] : memref<8x8x384xf32, #tpu.memory_space<vmem>>, vector<8x8x384xf32>
    tpu.vector_store %arg13[%c0_6, %c0_7, %c0_8], %7 {strides = array<i32>} : memref<8x8x384xf32, #tpu.memory_space<vmem>>, vector<8x8x384xf32>,
    %c0_9 = arith.constant 0 : index
    %c0_10 = arith.constant 0 : index
    %9 = vector.load %arg5[%c0_9, %c0_10] : memref<1x384xf32, #tpu.memory_space<vmem>>, vector<1x384xf32>
    %10 = vector.shape_cast %9 : vector<1x384xf32> to vector<1x384xf32>
    %11 = vector.broadcast %10 : vector<1x384xf32> to vector<8x384xf32>
    %c0_11 = arith.constant 0 : index
    %c0_12 = arith.constant 0 : index
    %12 = vector.load %arg9[%c0_11, %c0_12] : memref<1x384xf32, #tpu.memory_space<vmem>>, vector<1x384xf32>
    %13 = vector.shape_cast %12 : vector<1x384xf32> to vector<1x384xf32>
    %14 = vector.broadcast %13 : vector<1x384xf32> to vector<8x384xf32>
    %c0_13 = arith.constant 0 : index
    %c0_14 = arith.constant 0 : index
    %15 = vector.load %arg8[%c0_13, %c0_14] : memref<1x384xf32, #tpu.memory_space<vmem>>, vector<1x384xf32>
    %16 = vector.shape_cast %15 : vector<1x384xf32> to vector<1x384xf32>
    %17 = vector.broadcast %16 : vector<1x384xf32> to vector<8x384xf32>
    %cst_15 = arith.constant 0.000000e+00 : f32
    %18 = vector.broadcast %cst_15 : f32 to vector<8x128xf32>
    %c0_i32 = arith.constant 0 : i32
    %c0_i32_16 = arith.constant 0 : i32
    %19 = arith.subi %c0_i32, %c0_i32_16 : i32
    %c8_i32 = arith.constant 8 : i32
    %20 = arith.cmpi slt, %19, %c8_i32 : i32
    %c7_i32 = arith.constant 7 : i32
    %21 = arith.minsi %19, %c7_i32 : i32
    %22 = arith.index_cast %21 : i32 to index
    %c0_17 = arith.constant 0 : index
    %c0_18 = arith.constant 0 : index
    %23 = vector.load %arg13[%22, %c0_17, %c0_18] : memref<8x8x384xf32, #tpu.memory_space<vmem>>, vector<1x8x384xf32>
    %24 = vector.shape_cast %23 : vector<1x8x384xf32> to vector<8x384xf32>
    %c0_19 = arith.constant 0 : index
    %c0_20 = arith.constant 0 : index
    %25 = vector.load %arg3[%c0_19, %c0_20] : memref<128x384xf32, #tpu.memory_space<vmem>>, vector<128x384xf32>
    %cst_21 = arith.constant dense<0.000000e+00> : vector<8x384xf32>
    %26 = tpu.matmul %18, %25, %cst_21 {dimension_numbers = #tpu.dot_dimension_numbers<[1], [0], [0], [1], [0, 0, 1, 1], [], []>} : vector<8x128xf32>, vector<128x384xf32>, vector<8x384xf32> -> vector<8x384xf32>
    %27 = arith.addf %26, %11 : vector<8x384xf32>
    %28 = vector.extract_strided_slice %24 {offsets = [0, 0], sizes = [8, 128], strides = [1, 1]} : vector<8x384xf32> to vector<8x128xf32>
    %29 = vector.extract_strided_slice %27 {offsets = [0, 0], sizes = [8, 128], strides = [1, 1]} : vector<8x384xf32> to vector<8x128xf32>
    %30 = arith.addf %28, %29 : vector<8x128xf32>
    %31 = arith.negf %30 : vector<8x128xf32>
    %32 = math.exp %31 : vector<8x128xf32>
    %cst_22 = arith.constant 1.000000e+00 : f32
    %33 = vector.broadcast %cst_22 : f32 to vector<8x128xf32>
    %34 = arith.addf %33, %32 : vector<8x128xf32>
    %35 = arith.divf %33, %34 : vector<8x128xf32>
    %36 = vector.extract_strided_slice %24 {offsets = [0, 128], sizes = [8, 128], strides = [1, 1]} : vector<8x384xf32> to vector<8x128xf32>
    %37 = vector.extract_strided_slice %27 {offsets = [0, 128], sizes = [8, 128], strides = [1, 1]} : vector<8x384xf32> to vector<8x128xf32>
    %38 = arith.addf %36, %37 : vector<8x128xf32>
    %39 = arith.negf %38 : vector<8x128xf32>
    %40 = math.exp %39 : vector<8x128xf32>
    %cst_23 = arith.constant 1.000000e+00 : f32
    %41 = vector.broadcast %cst_23 : f32 to vector<8x128xf32>
    %42 = arith.addf %41, %40 : vector<8x128xf32>
    %43 = arith.divf %41, %42 : vector<8x128xf32>
    %44 = vector.extract_strided_slice %24 {offsets = [0, 256], sizes = [8, 128], strides = [1, 1]} : vector<8x384xf32> to vector<8x128xf32>
    %45 = vector.extract_strided_slice %27 {offsets = [0, 256], sizes = [8, 128], strides = [1, 1]} : vector<8x384xf32> to vector<8x128xf32>
    %46 = arith.mulf %35, %45 : vector<8x128xf32>
    %47 = arith.addf %44, %46 : vector<8x128xf32>
    %48 = math.tanh %47 : vector<8x128xf32>
    %49 = arith.subf %18, %48 : vector<8x128xf32>
    %50 = arith.mulf %43, %49 : vector<8x128xf32>
    %51 = arith.addf %48, %50 : vector<8x128xf32>
    %52 = arith.select %20, %51, %18 : vector<8x128xf32>
    %53 = arith.select %20, %51, %18 : vector<8x128xf32>
    %c1_i32 = arith.constant 1 : i32
    %54 = arith.subi %c0_i32, %c1_i32 : i32
    %c0_i32_24 = arith.constant 0 : i32
    %55 = arith.cmpi sge, %54, %c0_i32_24 : i32
    %c8_i32_25 = arith.constant 8 : i32
    %56 = arith.cmpi slt, %54, %c8_i32_25 : i32
    %57 = arith.andi %55, %56 : i1
    %c0_26 = arith.constant 0 : index
    %c0_27 = arith.constant 0 : index
    %58 = vector.load %arg6[%c0_26, %c0_27] : memref<128x384xf32, #tpu.memory_space<vmem>>, vector<128x384xf32>
    %cst_28 = arith.constant dense<0.000000e+00> : vector<8x384xf32>
    %59 = tpu.matmul %18, %58, %cst_28 {dimension_numbers = #tpu.dot_dimension_numbers<[1], [0], [0], [1], [0, 0, 1, 1], [], []>} : vector<8x128xf32>, vector<128x384xf32>, vector<8x384xf32> -> vector<8x384xf32>
    %60 = arith.addf %59, %17 : vector<8x384xf32>
    %c0_29 = arith.constant 0 : index
    %c0_30 = arith.constant 0 : index
    %61 = vector.load %arg7[%c0_29, %c0_30] : memref<128x384xf32, #tpu.memory_space<vmem>>, vector<128x384xf32>
    %cst_31 = arith.constant dense<0.000000e+00> : vector<8x384xf32>
    %62 = tpu.matmul %18, %61, %cst_31 {dimension_numbers = #tpu.dot_dimension_numbers<[1], [0], [0], [1], [0, 0, 1, 1], [], []>} : vector<8x128xf32>, vector<128x384xf32>, vector<8x384xf32> -> vector<8x384xf32>
    %63 = arith.addf %62, %14 : vector<8x384xf32>
    %64 = vector.extract_strided_slice %60 {offsets = [0, 0], sizes = [8, 128], strides = [1, 1]} : vector<8x384xf32> to vector<8x128xf32>
    %65 = vector.extract_strided_slice %63 {offsets = [0, 0], sizes = [8, 128], strides = [1, 1]} : vector<8x384xf32> to vector<8x128xf32>
    %66 = arith.addf %64, %65 : vector<8x128xf32>
    %67 = arith.negf %66 : vector<8x128xf32>
    %68 = math.exp %67 : vector<8x128xf32>
    %cst_32 = arith.constant 1.000000e+00 : f32
    %69 = vector.broadcast %cst_32 : f32 to vector<8x128xf32>
    %70 = arith.addf %69, %68 : vector<8x128xf32>
    %71 = arith.divf %69, %70 : vector<8x128xf32>
    %72 = vector.extract_strided_slice %60 {offsets = [0, 128], sizes = [8, 128], strides = [1, 1]} : vector<8x384xf32> to vector<8x128xf32>
    %73 = vector.extract_strided_slice %63 {offsets = [0, 128], sizes = [8, 128], strides = [1, 1]} : vector<8x384xf32> to vector<8x128xf32>
    %74 = arith.addf %72, %73 : vector<8x128xf32>
    %75 = arith.negf %74 : vector<8x128xf32>
    %76 = math.exp %75 : vector<8x128xf32>
    %cst_33 = arith.constant 1.000000e+00 : f32
    %77 = vector.broadcast %cst_33 : f32 to vector<8x128xf32>
    %78 = arith.addf %77, %76 : vector<8x128xf32>
    %79 = arith.divf %77, %78 : vector<8x128xf32>
    %80 = vector.extract_strided_slice %60 {offsets = [0, 256], sizes = [8, 128], strides = [1, 1]} : vector<8x384xf32> to vector<8x128xf32>
    %81 = vector.extract_strided_slice %63 {offsets = [0, 256], sizes = [8, 128], strides = [1, 1]} : vector<8x384xf32> to vector<8x128xf32>
    %82 = arith.mulf %71, %81 : vector<8x128xf32>
    %83 = arith.addf %80, %82 : vector<8x128xf32>
    %84 = math.tanh %83 : vector<8x128xf32>
    %85 = arith.subf %18, %84 : vector<8x128xf32>
    %86 = arith.mulf %79, %85 : vector<8x128xf32>
    %87 = arith.addf %84, %86 : vector<8x128xf32>
    %88 = arith.select %57, %87, %18 : vector<8x128xf32>
    %c1_i32_34 = arith.constant 1 : i32
    %c0_i32_35 = arith.constant 0 : i32
    %89 = arith.subi %c1_i32_34, %c0_i32_35 : i32
    %c8_i32_36 = arith.constant 8 : i32
    %90 = arith.cmpi slt, %89, %c8_i32_36 : i32
    %c7_i32_37 = arith.constant 7 : i32
    %91 = arith.minsi %89, %c7_i32_37 : i32
    %92 = arith.index_cast %91 : i32 to index
    %c0_38 = arith.constant 0 : index
    %c0_39 = arith.constant 0 : index
    %93 = vector.load %arg13[%92, %c0_38, %c0_39] : memref<8x8x384xf32, #tpu.memory_space<vmem>>, vector<1x8x384xf32>
    %94 = vector.shape_cast %93 : vector<1x8x384xf32> to vector<8x384xf32>
    %c0_40 = arith.constant 0 : index
    %c0_41 = arith.constant 0 : index
    %95 = vector.load %arg3[%c0_40, %c0_41] : memref<128x384xf32, #tpu.memory_space<vmem>>, vector<128x384xf32>
    %cst_42 = arith.constant dense<0.000000e+00> : vector<8x384xf32>
    %96 = tpu.matmul %52, %95, %cst_42 {dimension_numbers = #tpu.dot_dimension_numbers<[1], [0], [0], [1], [0, 0, 1, 1], [], []>} : vector<8x128xf32>, vector<128x384xf32>, vector<8x384xf32> -> vector<8x384xf32>
    %97 = arith.addf %96, %11 : vector<8x384xf32>
    %98 = vector.extract_strided_slice %94 {offsets = [0, 0], sizes = [8, 128], strides = [1, 1]} : vector<8x384xf32> to vector<8x128xf32>
    %99 = vector.extract_strided_slice %97 {offsets = [0, 0], sizes = [8, 128], strides = [1, 1]} : vector<8x384xf32> to vector<8x128xf32>
    %100 = arith.addf %98, %99 : vector<8x128xf32>
    %101 = arith.negf %100 : vector<8x128xf32>
    %102 = math.exp %101 : vector<8x128xf32>
    %cst_43 = arith.constant 1.000000e+00 : f32
    %103 = vector.broadcast %cst_43 : f32 to vector<8x128xf32>
    %104 = arith.addf %103, %102 : vector<8x128xf32>
    %105 = arith.divf %103, %104 : vector<8x128xf32>
    %106 = vector.extract_strided_slice %94 {offsets = [0, 128], sizes = [8, 128], strides = [1, 1]} : vector<8x384xf32> to vector<8x128xf32>
    %107 = vector.extract_strided_slice %97 {offsets = [0, 128], sizes = [8, 128], strides = [1, 1]} : vector<8x384xf32> to vector<8x128xf32>
    %108 = arith.addf %106, %107 : vector<8x128xf32>
    %109 = arith.negf %108 : vector<8x128xf32>
    %110 = math.exp %109 : vector<8x128xf32>
    %cst_44 = arith.constant 1.000000e+00 : f32
    %111 = vector.broadcast %cst_44 : f32 to vector<8x128xf32>
    %112 = arith.addf %111, %110 : vector<8x128xf32>
    %113 = arith.divf %111, %112 : vector<8x128xf32>
    %114 = vector.extract_strided_slice %94 {offsets = [0, 256], sizes = [8, 128], strides = [1, 1]} : vector<8x384xf32> to vector<8x128xf32>
    %115 = vector.extract_strided_slice %97 {offsets = [0, 256], sizes = [8, 128], strides = [1, 1]} : vector<8x384xf32> to vector<8x128xf32>
    %116 = arith.mulf %105, %115 : vector<8x128xf32>
    %117 = arith.addf %114, %116 : vector<8x128xf32>
    %118 = math.tanh %117 : vector<8x128xf32>
    %119 = arith.subf %52, %118 : vector<8x128xf32>
    %120 = arith.mulf %113, %119 : vector<8x128xf32>
    %121 = arith.addf %118, %120 : vector<8x128xf32>
    %122 = arith.select %90, %121, %52 : vector<8x128xf32>
    %123 = arith.select %90, %121, %53 : vector<8x128xf32>
    %c1_i32_45 = arith.constant 1 : i32
    %124 = arith.subi %c1_i32_34, %c1_i32_45 : i32
    %c0_i32_46 = arith.constant 0 : i32
    %125 = arith.cmpi sge, %124, %c0_i32_46 : i32
    %c8_i32_47 = arith.constant 8 : i32
    %126 = arith.cmpi slt, %124, %c8_i32_47 : i32
    %127 = arith.andi %125, %126 : i1
    %c0_48 = arith.constant 0 : index
    %c0_49 = arith.constant 0 : index
    %128 = vector.load %arg6[%c0_48, %c0_49] : memref<128x384xf32, #tpu.memory_space<vmem>>, vector<128x384xf32>
    %cst_50 = arith.constant dense<0.000000e+00> : vector<8x384xf32>
    %129 = tpu.matmul %53, %128, %cst_50 {dimension_numbers = #tpu.dot_dimension_numbers<[1], [0], [0], [1], [0, 0, 1, 1], [], []>} : vector<8x128xf32>, vector<128x384xf32>, vector<8x384xf32> -> vector<8x384xf32>
    %130 = arith.addf %129, %17 : vector<8x384xf32>
    %c0_51 = arith.constant 0 : index
    %c0_52 = arith.constant 0 : index
    %131 = vector.load %arg7[%c0_51, %c0_52] : memref<128x384xf32, #tpu.memory_space<vmem>>, vector<128x384xf32>
    %cst_53 = arith.constant dense<0.000000e+00> : vector<8x384xf32>
    %132 = tpu.matmul %88, %131, %cst_53 {dimension_numbers = #tpu.dot_dimension_numbers<[1], [0], [0], [1], [0, 0, 1, 1], [], []>} : vector<8x128xf32>, vector<128x384xf32>, vector<8x384xf32> -> vector<8x384xf32>
    %133 = arith.addf %132, %14 : vector<8x384xf32>
    %134 = vector.extract_strided_slice %130 {offsets = [0, 0], sizes = [8, 128], strides = [1, 1]} : vector<8x384xf32> to vector<8x128xf32>
    %135 = vector.extract_strided_slice %133 {offsets = [0, 0], sizes = [8, 128], strides = [1, 1]} : vector<8x384xf32> to vector<8x128xf32>
    %136 = arith.addf %134, %135 : vector<8x128xf32>
    %137 = arith.negf %136 : vector<8x128xf32>
    %138 = math.exp %137 : vector<8x128xf32>
    %cst_54 = arith.constant 1.000000e+00 : f32
    %139 = vector.broadcast %cst_54 : f32 to vector<8x128xf32>
    %140 = arith.addf %139, %138 : vector<8x128xf32>
    %141 = arith.divf %139, %140 : vector<8x128xf32>
    %142 = vector.extract_strided_slice %130 {offsets = [0, 128], sizes = [8, 128], strides = [1, 1]} : vector<8x384xf32> to vector<8x128xf32>
    %143 = vector.extract_strided_slice %133 {offsets = [0, 128], sizes = [8, 128], strides = [1, 1]} : vector<8x384xf32> to vector<8x128xf32>
    %144 = arith.addf %142, %143 : vector<8x128xf32>
    %145 = arith.negf %144 : vector<8x128xf32>
    %146 = math.exp %145 : vector<8x128xf32>
    %cst_55 = arith.constant 1.000000e+00 : f32
    %147 = vector.broadcast %cst_55 : f32 to vector<8x128xf32>
    %148 = arith.addf %147, %146 : vector<8x128xf32>
    %149 = arith.divf %147, %148 : vector<8x128xf32>
    %150 = vector.extract_strided_slice %130 {offsets = [0, 256], sizes = [8, 128], strides = [1, 1]} : vector<8x384xf32> to vector<8x128xf32>
    %151 = vector.extract_strided_slice %133 {offsets = [0, 256], sizes = [8, 128], strides = [1, 1]} : vector<8x384xf32> to vector<8x128xf32>
    %152 = arith.mulf %141, %151 : vector<8x128xf32>
    %153 = arith.addf %150, %152 : vector<8x128xf32>
    %154 = math.tanh %153 : vector<8x128xf32>
    %155 = arith.subf %88, %154 : vector<8x128xf32>
    %156 = arith.mulf %149, %155 : vector<8x128xf32>
    %157 = arith.addf %154, %156 : vector<8x128xf32>
    %158 = arith.select %127, %157, %88 : vector<8x128xf32>
    %c2_i32 = arith.constant 2 : i32
    %c0_i32_56 = arith.constant 0 : i32
    %159 = arith.subi %c2_i32, %c0_i32_56 : i32
    %c8_i32_57 = arith.constant 8 : i32
    %160 = arith.cmpi slt, %159, %c8_i32_57 : i32
    %c7_i32_58 = arith.constant 7 : i32
    %161 = arith.minsi %159, %c7_i32_58 : i32
    %162 = arith.index_cast %161 : i32 to index
    %c0_59 = arith.constant 0 : index
    %c0_60 = arith.constant 0 : index
    %163 = vector.load %arg13[%162, %c0_59, %c0_60] : memref<8x8x384xf32, #tpu.memory_space<vmem>>, vector<1x8x384xf32>
    %164 = vector.shape_cast %163 : vector<1x8x384xf32> to vector<8x384xf32>
    %c0_61 = arith.constant 0 : index
    %c0_62 = arith.constant 0 : index
    %165 = vector.load %arg3[%c0_61, %c0_62] : memref<128x384xf32, #tpu.memory_space<vmem>>, vector<128x384xf32>
    %cst_63 = arith.constant dense<0.000000e+00> : vector<8x384xf32>
    %166 = tpu.matmul %122, %165, %cst_63 {dimension_numbers = #tpu.dot_dimension_numbers<[1], [0], [0], [1], [0, 0, 1, 1], [], []>} : vector<8x128xf32>, vector<128x384xf32>, vector<8x384xf32> -> vector<8x384xf32>
    %167 = arith.addf %166, %11 : vector<8x384xf32>
    %168 = vector.extract_strided_slice %164 {offsets = [0, 0], sizes = [8, 128], strides = [1, 1]} : vector<8x384xf32> to vector<8x128xf32>
    %169 = vector.extract_strided_slice %167 {offsets = [0, 0], sizes = [8, 128], strides = [1, 1]} : vector<8x384xf32> to vector<8x128xf32>
    %170 = arith.addf %168, %169 : vector<8x128xf32>
    %171 = arith.negf %170 : vector<8x128xf32>
    %172 = math.exp %171 : vector<8x128xf32>
    %cst_64 = arith.constant 1.000000e+00 : f32
    %173 = vector.broadcast %cst_64 : f32 to vector<8x128xf32>
    %174 = arith.addf %173, %172 : vector<8x128xf32>
    %175 = arith.divf %173, %174 : vector<8x128xf32>
    %176 = vector.extract_strided_slice %164 {offsets = [0, 128], sizes = [8, 128], strides = [1, 1]} : vector<8x384xf32> to vector<8x128xf32>
    %177 = vector.extract_strided_slice %167 {offsets = [0, 128], sizes = [8, 128], strides = [1, 1]} : vector<8x384xf32> to vector<8x128xf32>
    %178 = arith.addf %176, %177 : vector<8x128xf32>
    %179 = arith.negf %178 : vector<8x128xf32>
    %180 = math.exp %179 : vector<8x128xf32>
    %cst_65 = arith.constant 1.000000e+00 : f32
    %181 = vector.broadcast %cst_65 : f32 to vector<8x128xf32>
    %182 = arith.addf %181, %180 : vector<8x128xf32>
    %183 = arith.divf %181, %182 : vector<8x128xf32>
    %184 = vector.extract_strided_slice %164 {offsets = [0, 256], sizes = [8, 128], strides = [1, 1]} : vector<8x384xf32> to vector<8x128xf32>
    %185 = vector.extract_strided_slice %167 {offsets = [0, 256], sizes = [8, 128], strides = [1, 1]} : vector<8x384xf32> to vector<8x128xf32>
    %186 = arith.mulf %175, %185 : vector<8x128xf32>
    %187 = arith.addf %184, %186 : vector<8x128xf32>
    %188 = math.tanh %187 : vector<8x128xf32>
    %189 = arith.subf %122, %188 : vector<8x128xf32>
    %190 = arith.mulf %183, %189 : vector<8x128xf32>
    %191 = arith.addf %188, %190 : vector<8x128xf32>
    %192 = arith.select %160, %191, %122 : vector<8x128xf32>
    %193 = arith.select %160, %191, %123 : vector<8x128xf32>
    %c1_i32_66 = arith.constant 1 : i32
    %194 = arith.subi %c2_i32, %c1_i32_66 : i32
    %c0_i32_67 = arith.constant 0 : i32
    %195 = arith.cmpi sge, %194, %c0_i32_67 : i32
    %c8_i32_68 = arith.constant 8 : i32
    %196 = arith.cmpi slt, %194, %c8_i32_68 : i32
    %197 = arith.andi %195, %196 : i1
    %c0_69 = arith.constant 0 : index
    %c0_70 = arith.constant 0 : index
    %198 = vector.load %arg6[%c0_69, %c0_70] : memref<128x384xf32, #tpu.memory_space<vmem>>, vector<128x384xf32>
    %cst_71 = arith.constant dense<0.000000e+00> : vector<8x384xf32>
    %199 = tpu.matmul %123, %198, %cst_71 {dimension_numbers = #tpu.dot_dimension_numbers<[1], [0], [0], [1], [0, 0, 1, 1], [], []>} : vector<8x128xf32>, vector<128x384xf32>, vector<8x384xf32> -> vector<8x384xf32>
    %200 = arith.addf %199, %17 : vector<8x384xf32>
    %c0_72 = arith.constant 0 : index
    %c0_73 = arith.constant 0 : index
    %201 = vector.load %arg7[%c0_72, %c0_73] : memref<128x384xf32, #tpu.memory_space<vmem>>, vector<128x384xf32>
    %cst_74 = arith.constant dense<0.000000e+00> : vector<8x384xf32>
    %202 = tpu.matmul %158, %201, %cst_74 {dimension_numbers = #tpu.dot_dimension_numbers<[1], [0], [0], [1], [0, 0, 1, 1], [], []>} : vector<8x128xf32>, vector<128x384xf32>, vector<8x384xf32> -> vector<8x384xf32>
    %203 = arith.addf %202, %14 : vector<8x384xf32>
    %204 = vector.extract_strided_slice %200 {offsets = [0, 0], sizes = [8, 128], strides = [1, 1]} : vector<8x384xf32> to vector<8x128xf32>
    %205 = vector.extract_strided_slice %203 {offsets = [0, 0], sizes = [8, 128], strides = [1, 1]} : vector<8x384xf32> to vector<8x128xf32>
    %206 = arith.addf %204, %205 : vector<8x128xf32>
    %207 = arith.negf %206 : vector<8x128xf32>
    %208 = math.exp %207 : vector<8x128xf32>
    %cst_75 = arith.constant 1.000000e+00 : f32
    %209 = vector.broadcast %cst_75 : f32 to vector<8x128xf32>
    %210 = arith.addf %209, %208 : vector<8x128xf32>
    %211 = arith.divf %209, %210 : vector<8x128xf32>
    %212 = vector.extract_strided_slice %200 {offsets = [0, 128], sizes = [8, 128], strides = [1, 1]} : vector<8x384xf32> to vector<8x128xf32>
    %213 = vector.extract_strided_slice %203 {offsets = [0, 128], sizes = [8, 128], strides = [1, 1]} : vector<8x384xf32> to vector<8x128xf32>
    %214 = arith.addf %212, %213 : vector<8x128xf32>
    %215 = arith.negf %214 : vector<8x128xf32>
    %216 = math.exp %215 : vector<8x128xf32>
    %cst_76 = arith.constant 1.000000e+00 : f32
    %217 = vector.broadcast %cst_76 : f32 to vector<8x128xf32>
    %218 = arith.addf %217, %216 : vector<8x128xf32>
    %219 = arith.divf %217, %218 : vector<8x128xf32>
    %220 = vector.extract_strided_slice %200 {offsets = [0, 256], sizes = [8, 128], strides = [1, 1]} : vector<8x384xf32> to vector<8x128xf32>
    %221 = vector.extract_strided_slice %203 {offsets = [0, 256], sizes = [8, 128], strides = [1, 1]} : vector<8x384xf32> to vector<8x128xf32>
    %222 = arith.mulf %211, %221 : vector<8x128xf32>
    %223 = arith.addf %220, %222 : vector<8x128xf32>
    %224 = math.tanh %223 : vector<8x128xf32>
    %225 = arith.subf %158, %224 : vector<8x128xf32>
    %226 = arith.mulf %219, %225 : vector<8x128xf32>
    %227 = arith.addf %224, %226 : vector<8x128xf32>
    %228 = arith.select %197, %227, %158 : vector<8x128xf32>
    %c3_i32 = arith.constant 3 : i32
    %c0_i32_77 = arith.constant 0 : i32
    %229 = arith.subi %c3_i32, %c0_i32_77 : i32
    %c8_i32_78 = arith.constant 8 : i32
    %230 = arith.cmpi slt, %229, %c8_i32_78 : i32
    %c7_i32_79 = arith.constant 7 : i32
    %231 = arith.minsi %229, %c7_i32_79 : i32
    %232 = arith.index_cast %231 : i32 to index
    %c0_80 = arith.constant 0 : index
    %c0_81 = arith.constant 0 : index
    %233 = vector.load %arg13[%232, %c0_80, %c0_81] : memref<8x8x384xf32, #tpu.memory_space<vmem>>, vector<1x8x384xf32>
    %234 = vector.shape_cast %233 : vector<1x8x384xf32> to vector<8x384xf32>
    %c0_82 = arith.constant 0 : index
    %c0_83 = arith.constant 0 : index
    %235 = vector.load %arg3[%c0_82, %c0_83] : memref<128x384xf32, #tpu.memory_space<vmem>>, vector<128x384xf32>
    %cst_84 = arith.constant dense<0.000000e+00> : vector<8x384xf32>
    %236 = tpu.matmul %192, %235, %cst_84 {dimension_numbers = #tpu.dot_dimension_numbers<[1], [0], [0], [1], [0, 0, 1, 1], [], []>} : vector<8x128xf32>, vector<128x384xf32>, vector<8x384xf32> -> vector<8x384xf32>
    %237 = arith.addf %236, %11 : vector<8x384xf32>
    %238 = vector.extract_strided_slice %234 {offsets = [0, 0], sizes = [8, 128], strides = [1, 1]} : vector<8x384xf32> to vector<8x128xf32>
    %239 = vector.extract_strided_slice %237 {offsets = [0, 0], sizes = [8, 128], strides = [1, 1]} : vector<8x384xf32> to vector<8x128xf32>
    %240 = arith.addf %238, %239 : vector<8x128xf32>
    %241 = arith.negf %240 : vector<8x128xf32>
    %242 = math.exp %241 : vector<8x128xf32>
    %cst_85 = arith.constant 1.000000e+00 : f32
    %243 = vector.broadcast %cst_85 : f32 to vector<8x128xf32>
    %244 = arith.addf %243, %242 : vector<8x128xf32>
    %245 = arith.divf %243, %244 : vector<8x128xf32>
    %246 = vector.extract_strided_slice %234 {offsets = [0, 128], sizes = [8, 128], strides = [1, 1]} : vector<8x384xf32> to vector<8x128xf32>
    %247 = vector.extract_strided_slice %237 {offsets = [0, 128], sizes = [8, 128], strides = [1, 1]} : vector<8x384xf32> to vector<8x128xf32>
    %248 = arith.addf %246, %247 : vector<8x128xf32>
    %249 = arith.negf %248 : vector<8x128xf32>
    %250 = math.exp %249 : vector<8x128xf32>
    %cst_86 = arith.constant 1.000000e+00 : f32
    %251 = vector.broadcast %cst_86 : f32 to vector<8x128xf32>
    %252 = arith.addf %251, %250 : vector<8x128xf32>
    %253 = arith.divf %251, %252 : vector<8x128xf32>
    %254 = vector.extract_strided_slice %234 {offsets = [0, 256], sizes = [8, 128], strides = [1, 1]} : vector<8x384xf32> to vector<8x128xf32>
    %255 = vector.extract_strided_slice %237 {offsets = [0, 256], sizes = [8, 128], strides = [1, 1]} : vector<8x384xf32> to vector<8x128xf32>
    %256 = arith.mulf %245, %255 : vector<8x128xf32>
    %257 = arith.addf %254, %256 : vector<8x128xf32>
    %258 = math.tanh %257 : vector<8x128xf32>
    %259 = arith.subf %192, %258 : vector<8x128xf32>
    %260 = arith.mulf %253, %259 : vector<8x128xf32>
    %261 = arith.addf %258, %260 : vector<8x128xf32>
    %262 = arith.select %230, %261, %192 : vector<8x128xf32>
    %263 = arith.select %230, %261, %193 : vector<8x128xf32>
    %c1_i32_87 = arith.constant 1 : i32
    %264 = arith.subi %c3_i32, %c1_i32_87 : i32
    %c0_i32_88 = arith.constant 0 : i32
    %265 = arith.cmpi sge, %264, %c0_i32_88 : i32
    %c8_i32_89 = arith.constant 8 : i32
    %266 = arith.cmpi slt, %264, %c8_i32_89 : i32
    %267 = arith.andi %265, %266 : i1
    %c0_90 = arith.constant 0 : index
    %c0_91 = arith.constant 0 : index
    %268 = vector.load %arg6[%c0_90, %c0_91] : memref<128x384xf32, #tpu.memory_space<vmem>>, vector<128x384xf32>
    %cst_92 = arith.constant dense<0.000000e+00> : vector<8x384xf32>
    %269 = tpu.matmul %193, %268, %cst_92 {dimension_numbers = #tpu.dot_dimension_numbers<[1], [0], [0], [1], [0, 0, 1, 1], [], []>} : vector<8x128xf32>, vector<128x384xf32>, vector<8x384xf32> -> vector<8x384xf32>
    %270 = arith.addf %269, %17 : vector<8x384xf32>
    %c0_93 = arith.constant 0 : index
    %c0_94 = arith.constant 0 : index
    %271 = vector.load %arg7[%c0_93, %c0_94] : memref<128x384xf32, #tpu.memory_space<vmem>>, vector<128x384xf32>
    %cst_95 = arith.constant dense<0.000000e+00> : vector<8x384xf32>
    %272 = tpu.matmul %228, %271, %cst_95 {dimension_numbers = #tpu.dot_dimension_numbers<[1], [0], [0], [1], [0, 0, 1, 1], [], []>} : vector<8x128xf32>, vector<128x384xf32>, vector<8x384xf32> -> vector<8x384xf32>
    %273 = arith.addf %272, %14 : vector<8x384xf32>
    %274 = vector.extract_strided_slice %270 {offsets = [0, 0], sizes = [8, 128], strides = [1, 1]} : vector<8x384xf32> to vector<8x128xf32>
    %275 = vector.extract_strided_slice %273 {offsets = [0, 0], sizes = [8, 128], strides = [1, 1]} : vector<8x384xf32> to vector<8x128xf32>
    %276 = arith.addf %274, %275 : vector<8x128xf32>
    %277 = arith.negf %276 : vector<8x128xf32>
    %278 = math.exp %277 : vector<8x128xf32>
    %cst_96 = arith.constant 1.000000e+00 : f32
    %279 = vector.broadcast %cst_96 : f32 to vector<8x128xf32>
    %280 = arith.addf %279, %278 : vector<8x128xf32>
    %281 = arith.divf %279, %280 : vector<8x128xf32>
    %282 = vector.extract_strided_slice %270 {offsets = [0, 128], sizes = [8, 128], strides = [1, 1]} : vector<8x384xf32> to vector<8x128xf32>
    %283 = vector.extract_strided_slice %273 {offsets = [0, 128], sizes = [8, 128], strides = [1, 1]} : vector<8x384xf32> to vector<8x128xf32>
    %284 = arith.addf %282, %283 : vector<8x128xf32>
    %285 = arith.negf %284 : vector<8x128xf32>
    %286 = math.exp %285 : vector<8x128xf32>
    %cst_97 = arith.constant 1.000000e+00 : f32
    %287 = vector.broadcast %cst_97 : f32 to vector<8x128xf32>
    %288 = arith.addf %287, %286 : vector<8x128xf32>
    %289 = arith.divf %287, %288 : vector<8x128xf32>
    %290 = vector.extract_strided_slice %270 {offsets = [0, 256], sizes = [8, 128], strides = [1, 1]} : vector<8x384xf32> to vector<8x128xf32>
    %291 = vector.extract_strided_slice %273 {offsets = [0, 256], sizes = [8, 128], strides = [1, 1]} : vector<8x384xf32> to vector<8x128xf32>
    %292 = arith.mulf %281, %291 : vector<8x128xf32>
    %293 = arith.addf %290, %292 : vector<8x128xf32>
    %294 = math.tanh %293 : vector<8x128xf32>
    %295 = arith.subf %228, %294 : vector<8x128xf32>
    %296 = arith.mulf %289, %295 : vector<8x128xf32>
    %297 = arith.addf %294, %296 : vector<8x128xf32>
    %298 = arith.select %267, %297, %228 : vector<8x128xf32>
    %c4_i32 = arith.constant 4 : i32
    %c0_i32_98 = arith.constant 0 : i32
    %299 = arith.subi %c4_i32, %c0_i32_98 : i32
    %c8_i32_99 = arith.constant 8 : i32
    %300 = arith.cmpi slt, %299, %c8_i32_99 : i32
    %c7_i32_100 = arith.constant 7 : i32
    %301 = arith.minsi %299, %c7_i32_100 : i32
    %302 = arith.index_cast %301 : i32 to index
    %c0_101 = arith.constant 0 : index
    %c0_102 = arith.constant 0 : index
    %303 = vector.load %arg13[%302, %c0_101, %c0_102] : memref<8x8x384xf32, #tpu.memory_space<vmem>>, vector<1x8x384xf32>
    %304 = vector.shape_cast %303 : vector<1x8x384xf32> to vector<8x384xf32>
    %c0_103 = arith.constant 0 : index
    %c0_104 = arith.constant 0 : index
    %305 = vector.load %arg3[%c0_103, %c0_104] : memref<128x384xf32, #tpu.memory_space<vmem>>, vector<128x384xf32>
    %cst_105 = arith.constant dense<0.000000e+00> : vector<8x384xf32>
    %306 = tpu.matmul %262, %305, %cst_105 {dimension_numbers = #tpu.dot_dimension_numbers<[1], [0], [0], [1], [0, 0, 1, 1], [], []>} : vector<8x128xf32>, vector<128x384xf32>, vector<8x384xf32> -> vector<8x384xf32>
    %307 = arith.addf %306, %11 : vector<8x384xf32>
    %308 = vector.extract_strided_slice %304 {offsets = [0, 0], sizes = [8, 128], strides = [1, 1]} : vector<8x384xf32> to vector<8x128xf32>
    %309 = vector.extract_strided_slice %307 {offsets = [0, 0], sizes = [8, 128], strides = [1, 1]} : vector<8x384xf32> to vector<8x128xf32>
    %310 = arith.addf %308, %309 : vector<8x128xf32>
    %311 = arith.negf %310 : vector<8x128xf32>
    %312 = math.exp %311 : vector<8x128xf32>
    %cst_106 = arith.constant 1.000000e+00 : f32
    %313 = vector.broadcast %cst_106 : f32 to vector<8x128xf32>
    %314 = arith.addf %313, %312 : vector<8x128xf32>
    %315 = arith.divf %313, %314 : vector<8x128xf32>
    %316 = vector.extract_strided_slice %304 {offsets = [0, 128], sizes = [8, 128], strides = [1, 1]} : vector<8x384xf32> to vector<8x128xf32>
    %317 = vector.extract_strided_slice %307 {offsets = [0, 128], sizes = [8, 128], strides = [1, 1]} : vector<8x384xf32> to vector<8x128xf32>
    %318 = arith.addf %316, %317 : vector<8x128xf32>
    %319 = arith.negf %318 : vector<8x128xf32>
    %320 = math.exp %319 : vector<8x128xf32>
    %cst_107 = arith.constant 1.000000e+00 : f32
    %321 = vector.broadcast %cst_107 : f32 to vector<8x128xf32>
    %322 = arith.addf %321, %320 : vector<8x128xf32>
    %323 = arith.divf %321, %322 : vector<8x128xf32>
    %324 = vector.extract_strided_slice %304 {offsets = [0, 256], sizes = [8, 128], strides = [1, 1]} : vector<8x384xf32> to vector<8x128xf32>
    %325 = vector.extract_strided_slice %307 {offsets = [0, 256], sizes = [8, 128], strides = [1, 1]} : vector<8x384xf32> to vector<8x128xf32>
    %326 = arith.mulf %315, %325 : vector<8x128xf32>
    %327 = arith.addf %324, %326 : vector<8x128xf32>
    %328 = math.tanh %327 : vector<8x128xf32>
    %329 = arith.subf %262, %328 : vector<8x128xf32>
    %330 = arith.mulf %323, %329 : vector<8x128xf32>
    %331 = arith.addf %328, %330 : vector<8x128xf32>
    %332 = arith.select %300, %331, %262 : vector<8x128xf32>
    %333 = arith.select %300, %331, %263 : vector<8x128xf32>
    %c1_i32_108 = arith.constant 1 : i32
    %334 = arith.subi %c4_i32, %c1_i32_108 : i32
    %c0_i32_109 = arith.constant 0 : i32
    %335 = arith.cmpi sge, %334, %c0_i32_109 : i32
    %c8_i32_110 = arith.constant 8 : i32
    %336 = arith.cmpi slt, %334, %c8_i32_110 : i32
    %337 = arith.andi %335, %336 : i1
    %c0_111 = arith.constant 0 : index
    %c0_112 = arith.constant 0 : index
    %338 = vector.load %arg6[%c0_111, %c0_112] : memref<128x384xf32, #tpu.memory_space<vmem>>, vector<128x384xf32>
    %cst_113 = arith.constant dense<0.000000e+00> : vector<8x384xf32>
    %339 = tpu.matmul %263, %338, %cst_113 {dimension_numbers = #tpu.dot_dimension_numbers<[1], [0], [0], [1], [0, 0, 1, 1], [], []>} : vector<8x128xf32>, vector<128x384xf32>, vector<8x384xf32> -> vector<8x384xf32>
    %340 = arith.addf %339, %17 : vector<8x384xf32>
    %c0_114 = arith.constant 0 : index
    %c0_115 = arith.constant 0 : index
    %341 = vector.load %arg7[%c0_114, %c0_115] : memref<128x384xf32, #tpu.memory_space<vmem>>, vector<128x384xf32>
    %cst_116 = arith.constant dense<0.000000e+00> : vector<8x384xf32>
    %342 = tpu.matmul %298, %341, %cst_116 {dimension_numbers = #tpu.dot_dimension_numbers<[1], [0], [0], [1], [0, 0, 1, 1], [], []>} : vector<8x128xf32>, vector<128x384xf32>, vector<8x384xf32> -> vector<8x384xf32>
    %343 = arith.addf %342, %14 : vector<8x384xf32>
    %344 = vector.extract_strided_slice %340 {offsets = [0, 0], sizes = [8, 128], strides = [1, 1]} : vector<8x384xf32> to vector<8x128xf32>
    %345 = vector.extract_strided_slice %343 {offsets = [0, 0], sizes = [8, 128], strides = [1, 1]} : vector<8x384xf32> to vector<8x128xf32>
    %346 = arith.addf %344, %345 : vector<8x128xf32>
    %347 = arith.negf %346 : vector<8x128xf32>
    %348 = math.exp %347 : vector<8x128xf32>
    %cst_117 = arith.constant 1.000000e+00 : f32
    %349 = vector.broadcast %cst_117 : f32 to vector<8x128xf32>
    %350 = arith.addf %349, %348 : vector<8x128xf32>
    %351 = arith.divf %349, %350 : vector<8x128xf32>
    %352 = vector.extract_strided_slice %340 {offsets = [0, 128], sizes = [8, 128], strides = [1, 1]} : vector<8x384xf32> to vector<8x128xf32>
    %353 = vector.extract_strided_slice %343 {offsets = [0, 128], sizes = [8, 128], strides = [1, 1]} : vector<8x384xf32> to vector<8x128xf32>
    %354 = arith.addf %352, %353 : vector<8x128xf32>
    %355 = arith.negf %354 : vector<8x128xf32>
    %356 = math.exp %355 : vector<8x128xf32>
    %cst_118 = arith.constant 1.000000e+00 : f32
    %357 = vector.broadcast %cst_118 : f32 to vector<8x128xf32>
    %358 = arith.addf %357, %356 : vector<8x128xf32>
    %359 = arith.divf %357, %358 : vector<8x128xf32>
    %360 = vector.extract_strided_slice %340 {offsets = [0, 256], sizes = [8, 128], strides = [1, 1]} : vector<8x384xf32> to vector<8x128xf32>
    %361 = vector.extract_strided_slice %343 {offsets = [0, 256], sizes = [8, 128], strides = [1, 1]} : vector<8x384xf32> to vector<8x128xf32>
    %362 = arith.mulf %351, %361 : vector<8x128xf32>
    %363 = arith.addf %360, %362 : vector<8x128xf32>
    %364 = math.tanh %363 : vector<8x128xf32>
    %365 = arith.subf %298, %364 : vector<8x128xf32>
    %366 = arith.mulf %359, %365 : vector<8x128xf32>
    %367 = arith.addf %364, %366 : vector<8x128xf32>
    %368 = arith.select %337, %367, %298 : vector<8x128xf32>
    %c5_i32 = arith.constant 5 : i32
    %c0_i32_119 = arith.constant 0 : i32
    %369 = arith.subi %c5_i32, %c0_i32_119 : i32
    %c8_i32_120 = arith.constant 8 : i32
    %370 = arith.cmpi slt, %369, %c8_i32_120 : i32
    %c7_i32_121 = arith.constant 7 : i32
    %371 = arith.minsi %369, %c7_i32_121 : i32
    %372 = arith.index_cast %371 : i32 to index
    %c0_122 = arith.constant 0 : index
    %c0_123 = arith.constant 0 : index
    %373 = vector.load %arg13[%372, %c0_122, %c0_123] : memref<8x8x384xf32, #tpu.memory_space<vmem>>, vector<1x8x384xf32>
    %374 = vector.shape_cast %373 : vector<1x8x384xf32> to vector<8x384xf32>
    %c0_124 = arith.constant 0 : index
    %c0_125 = arith.constant 0 : index
    %375 = vector.load %arg3[%c0_124, %c0_125] : memref<128x384xf32, #tpu.memory_space<vmem>>, vector<128x384xf32>
    %cst_126 = arith.constant dense<0.000000e+00> : vector<8x384xf32>
    %376 = tpu.matmul %332, %375, %cst_126 {dimension_numbers = #tpu.dot_dimension_numbers<[1], [0], [0], [1], [0, 0, 1, 1], [], []>} : vector<8x128xf32>, vector<128x384xf32>, vector<8x384xf32> -> vector<8x384xf32>
    %377 = arith.addf %376, %11 : vector<8x384xf32>
    %378 = vector.extract_strided_slice %374 {offsets = [0, 0], sizes = [8, 128], strides = [1, 1]} : vector<8x384xf32> to vector<8x128xf32>
    %379 = vector.extract_strided_slice %377 {offsets = [0, 0], sizes = [8, 128], strides = [1, 1]} : vector<8x384xf32> to vector<8x128xf32>
    %380 = arith.addf %378, %379 : vector<8x128xf32>
    %381 = arith.negf %380 : vector<8x128xf32>
    %382 = math.exp %381 : vector<8x128xf32>
    %cst_127 = arith.constant 1.000000e+00 : f32
    %383 = vector.broadcast %cst_127 : f32 to vector<8x128xf32>
    %384 = arith.addf %383, %382 : vector<8x128xf32>
    %385 = arith.divf %383, %384 : vector<8x128xf32>
    %386 = vector.extract_strided_slice %374 {offsets = [0, 128], sizes = [8, 128], strides = [1, 1]} : vector<8x384xf32> to vector<8x128xf32>
    %387 = vector.extract_strided_slice %377 {offsets = [0, 128], sizes = [8, 128], strides = [1, 1]} : vector<8x384xf32> to vector<8x128xf32>
    %388 = arith.addf %386, %387 : vector<8x128xf32>
    %389 = arith.negf %388 : vector<8x128xf32>
    %390 = math.exp %389 : vector<8x128xf32>
    %cst_128 = arith.constant 1.000000e+00 : f32
    %391 = vector.broadcast %cst_128 : f32 to vector<8x128xf32>
    %392 = arith.addf %391, %390 : vector<8x128xf32>
    %393 = arith.divf %391, %392 : vector<8x128xf32>
    %394 = vector.extract_strided_slice %374 {offsets = [0, 256], sizes = [8, 128], strides = [1, 1]} : vector<8x384xf32> to vector<8x128xf32>
    %395 = vector.extract_strided_slice %377 {offsets = [0, 256], sizes = [8, 128], strides = [1, 1]} : vector<8x384xf32> to vector<8x128xf32>
    %396 = arith.mulf %385, %395 : vector<8x128xf32>
    %397 = arith.addf %394, %396 : vector<8x128xf32>
    %398 = math.tanh %397 : vector<8x128xf32>
    %399 = arith.subf %332, %398 : vector<8x128xf32>
    %400 = arith.mulf %393, %399 : vector<8x128xf32>
    %401 = arith.addf %398, %400 : vector<8x128xf32>
    %402 = arith.select %370, %401, %332 : vector<8x128xf32>
    %403 = arith.select %370, %401, %333 : vector<8x128xf32>
    %c1_i32_129 = arith.constant 1 : i32
    %404 = arith.subi %c5_i32, %c1_i32_129 : i32
    %c0_i32_130 = arith.constant 0 : i32
    %405 = arith.cmpi sge, %404, %c0_i32_130 : i32
    %c8_i32_131 = arith.constant 8 : i32
    %406 = arith.cmpi slt, %404, %c8_i32_131 : i32
    %407 = arith.andi %405, %406 : i1
    %c0_132 = arith.constant 0 : index
    %c0_133 = arith.constant 0 : index
    %408 = vector.load %arg6[%c0_132, %c0_133] : memref<128x384xf32, #tpu.memory_space<vmem>>, vector<128x384xf32>
    %cst_134 = arith.constant dense<0.000000e+00> : vector<8x384xf32>
    %409 = tpu.matmul %333, %408, %cst_134 {dimension_numbers = #tpu.dot_dimension_numbers<[1], [0], [0], [1], [0, 0, 1, 1], [], []>} : vector<8x128xf32>, vector<128x384xf32>, vector<8x384xf32> -> vector<8x384xf32>
    %410 = arith.addf %409, %17 : vector<8x384xf32>
    %c0_135 = arith.constant 0 : index
    %c0_136 = arith.constant 0 : index
    %411 = vector.load %arg7[%c0_135, %c0_136] : memref<128x384xf32, #tpu.memory_space<vmem>>, vector<128x384xf32>
    %cst_137 = arith.constant dense<0.000000e+00> : vector<8x384xf32>
    %412 = tpu.matmul %368, %411, %cst_137 {dimension_numbers = #tpu.dot_dimension_numbers<[1], [0], [0], [1], [0, 0, 1, 1], [], []>} : vector<8x128xf32>, vector<128x384xf32>, vector<8x384xf32> -> vector<8x384xf32>
    %413 = arith.addf %412, %14 : vector<8x384xf32>
    %414 = vector.extract_strided_slice %410 {offsets = [0, 0], sizes = [8, 128], strides = [1, 1]} : vector<8x384xf32> to vector<8x128xf32>
    %415 = vector.extract_strided_slice %413 {offsets = [0, 0], sizes = [8, 128], strides = [1, 1]} : vector<8x384xf32> to vector<8x128xf32>
    %416 = arith.addf %414, %415 : vector<8x128xf32>
    %417 = arith.negf %416 : vector<8x128xf32>
    %418 = math.exp %417 : vector<8x128xf32>
    %cst_138 = arith.constant 1.000000e+00 : f32
    %419 = vector.broadcast %cst_138 : f32 to vector<8x128xf32>
    %420 = arith.addf %419, %418 : vector<8x128xf32>
    %421 = arith.divf %419, %420 : vector<8x128xf32>
    %422 = vector.extract_strided_slice %410 {offsets = [0, 128], sizes = [8, 128], strides = [1, 1]} : vector<8x384xf32> to vector<8x128xf32>
    %423 = vector.extract_strided_slice %413 {offsets = [0, 128], sizes = [8, 128], strides = [1, 1]} : vector<8x384xf32> to vector<8x128xf32>
    %424 = arith.addf %422, %423 : vector<8x128xf32>
    %425 = arith.negf %424 : vector<8x128xf32>
    %426 = math.exp %425 : vector<8x128xf32>
    %cst_139 = arith.constant 1.000000e+00 : f32
    %427 = vector.broadcast %cst_139 : f32 to vector<8x128xf32>
    %428 = arith.addf %427, %426 : vector<8x128xf32>
    %429 = arith.divf %427, %428 : vector<8x128xf32>
    %430 = vector.extract_strided_slice %410 {offsets = [0, 256], sizes = [8, 128], strides = [1, 1]} : vector<8x384xf32> to vector<8x128xf32>
    %431 = vector.extract_strided_slice %413 {offsets = [0, 256], sizes = [8, 128], strides = [1, 1]} : vector<8x384xf32> to vector<8x128xf32>
    %432 = arith.mulf %421, %431 : vector<8x128xf32>
    %433 = arith.addf %430, %432 : vector<8x128xf32>
    %434 = math.tanh %433 : vector<8x128xf32>
    %435 = arith.subf %368, %434 : vector<8x128xf32>
    %436 = arith.mulf %429, %435 : vector<8x128xf32>
    %437 = arith.addf %434, %436 : vector<8x128xf32>
    %438 = arith.select %407, %437, %368 : vector<8x128xf32>
    %c6_i32 = arith.constant 6 : i32
    %c0_i32_140 = arith.constant 0 : i32
    %439 = arith.subi %c6_i32, %c0_i32_140 : i32
    %c8_i32_141 = arith.constant 8 : i32
    %440 = arith.cmpi slt, %439, %c8_i32_141 : i32
    %c7_i32_142 = arith.constant 7 : i32
    %441 = arith.minsi %439, %c7_i32_142 : i32
    %442 = arith.index_cast %441 : i32 to index
    %c0_143 = arith.constant 0 : index
    %c0_144 = arith.constant 0 : index
    %443 = vector.load %arg13[%442, %c0_143, %c0_144] : memref<8x8x384xf32, #tpu.memory_space<vmem>>, vector<1x8x384xf32>
    %444 = vector.shape_cast %443 : vector<1x8x384xf32> to vector<8x384xf32>
    %c0_145 = arith.constant 0 : index
    %c0_146 = arith.constant 0 : index
    %445 = vector.load %arg3[%c0_145, %c0_146] : memref<128x384xf32, #tpu.memory_space<vmem>>, vector<128x384xf32>
    %cst_147 = arith.constant dense<0.000000e+00> : vector<8x384xf32>
    %446 = tpu.matmul %402, %445, %cst_147 {dimension_numbers = #tpu.dot_dimension_numbers<[1], [0], [0], [1], [0, 0, 1, 1], [], []>} : vector<8x128xf32>, vector<128x384xf32>, vector<8x384xf32> -> vector<8x384xf32>
    %447 = arith.addf %446, %11 : vector<8x384xf32>
    %448 = vector.extract_strided_slice %444 {offsets = [0, 0], sizes = [8, 128], strides = [1, 1]} : vector<8x384xf32> to vector<8x128xf32>
    %449 = vector.extract_strided_slice %447 {offsets = [0, 0], sizes = [8, 128], strides = [1, 1]} : vector<8x384xf32> to vector<8x128xf32>
    %450 = arith.addf %448, %449 : vector<8x128xf32>
    %451 = arith.negf %450 : vector<8x128xf32>
    %452 = math.exp %451 : vector<8x128xf32>
    %cst_148 = arith.constant 1.000000e+00 : f32
    %453 = vector.broadcast %cst_148 : f32 to vector<8x128xf32>
    %454 = arith.addf %453, %452 : vector<8x128xf32>
    %455 = arith.divf %453, %454 : vector<8x128xf32>
    %456 = vector.extract_strided_slice %444 {offsets = [0, 128], sizes = [8, 128], strides = [1, 1]} : vector<8x384xf32> to vector<8x128xf32>
    %457 = vector.extract_strided_slice %447 {offsets = [0, 128], sizes = [8, 128], strides = [1, 1]} : vector<8x384xf32> to vector<8x128xf32>
    %458 = arith.addf %456, %457 : vector<8x128xf32>
    %459 = arith.negf %458 : vector<8x128xf32>
    %460 = math.exp %459 : vector<8x128xf32>
    %cst_149 = arith.constant 1.000000e+00 : f32
    %461 = vector.broadcast %cst_149 : f32 to vector<8x128xf32>
    %462 = arith.addf %461, %460 : vector<8x128xf32>
    %463 = arith.divf %461, %462 : vector<8x128xf32>
    %464 = vector.extract_strided_slice %444 {offsets = [0, 256], sizes = [8, 128], strides = [1, 1]} : vector<8x384xf32> to vector<8x128xf32>
    %465 = vector.extract_strided_slice %447 {offsets = [0, 256], sizes = [8, 128], strides = [1, 1]} : vector<8x384xf32> to vector<8x128xf32>
    %466 = arith.mulf %455, %465 : vector<8x128xf32>
    %467 = arith.addf %464, %466 : vector<8x128xf32>
    %468 = math.tanh %467 : vector<8x128xf32>
    %469 = arith.subf %402, %468 : vector<8x128xf32>
    %470 = arith.mulf %463, %469 : vector<8x128xf32>
    %471 = arith.addf %468, %470 : vector<8x128xf32>
    %472 = arith.select %440, %471, %402 : vector<8x128xf32>
    %473 = arith.select %440, %471, %403 : vector<8x128xf32>
    %c1_i32_150 = arith.constant 1 : i32
    %474 = arith.subi %c6_i32, %c1_i32_150 : i32
    %c0_i32_151 = arith.constant 0 : i32
    %475 = arith.cmpi sge, %474, %c0_i32_151 : i32
    %c8_i32_152 = arith.constant 8 : i32
    %476 = arith.cmpi slt, %474, %c8_i32_152 : i32
    %477 = arith.andi %475, %476 : i1
    %c0_153 = arith.constant 0 : index
    %c0_154 = arith.constant 0 : index
    %478 = vector.load %arg6[%c0_153, %c0_154] : memref<128x384xf32, #tpu.memory_space<vmem>>, vector<128x384xf32>
    %cst_155 = arith.constant dense<0.000000e+00> : vector<8x384xf32>
    %479 = tpu.matmul %403, %478, %cst_155 {dimension_numbers = #tpu.dot_dimension_numbers<[1], [0], [0], [1], [0, 0, 1, 1], [], []>} : vector<8x128xf32>, vector<128x384xf32>, vector<8x384xf32> -> vector<8x384xf32>
    %480 = arith.addf %479, %17 : vector<8x384xf32>
    %c0_156 = arith.constant 0 : index
    %c0_157 = arith.constant 0 : index
    %481 = vector.load %arg7[%c0_156, %c0_157] : memref<128x384xf32, #tpu.memory_space<vmem>>, vector<128x384xf32>
    %cst_158 = arith.constant dense<0.000000e+00> : vector<8x384xf32>
    %482 = tpu.matmul %438, %481, %cst_158 {dimension_numbers = #tpu.dot_dimension_numbers<[1], [0], [0], [1], [0, 0, 1, 1], [], []>} : vector<8x128xf32>, vector<128x384xf32>, vector<8x384xf32> -> vector<8x384xf32>
    %483 = arith.addf %482, %14 : vector<8x384xf32>
    %484 = vector.extract_strided_slice %480 {offsets = [0, 0], sizes = [8, 128], strides = [1, 1]} : vector<8x384xf32> to vector<8x128xf32>
    %485 = vector.extract_strided_slice %483 {offsets = [0, 0], sizes = [8, 128], strides = [1, 1]} : vector<8x384xf32> to vector<8x128xf32>
    %486 = arith.addf %484, %485 : vector<8x128xf32>
    %487 = arith.negf %486 : vector<8x128xf32>
    %488 = math.exp %487 : vector<8x128xf32>
    %cst_159 = arith.constant 1.000000e+00 : f32
    %489 = vector.broadcast %cst_159 : f32 to vector<8x128xf32>
    %490 = arith.addf %489, %488 : vector<8x128xf32>
    %491 = arith.divf %489, %490 : vector<8x128xf32>
    %492 = vector.extract_strided_slice %480 {offsets = [0, 128], sizes = [8, 128], strides = [1, 1]} : vector<8x384xf32> to vector<8x128xf32>
    %493 = vector.extract_strided_slice %483 {offsets = [0, 128], sizes = [8, 128], strides = [1, 1]} : vector<8x384xf32> to vector<8x128xf32>
    %494 = arith.addf %492, %493 : vector<8x128xf32>
    %495 = arith.negf %494 : vector<8x128xf32>
    %496 = math.exp %495 : vector<8x128xf32>
    %cst_160 = arith.constant 1.000000e+00 : f32
    %497 = vector.broadcast %cst_160 : f32 to vector<8x128xf32>
    %498 = arith.addf %497, %496 : vector<8x128xf32>
    %499 = arith.divf %497, %498 : vector<8x128xf32>
    %500 = vector.extract_strided_slice %480 {offsets = [0, 256], sizes = [8, 128], strides = [1, 1]} : vector<8x384xf32> to vector<8x128xf32>
    %501 = vector.extract_strided_slice %483 {offsets = [0, 256], sizes = [8, 128], strides = [1, 1]} : vector<8x384xf32> to vector<8x128xf32>
    %502 = arith.mulf %491, %501 : vector<8x128xf32>
    %503 = arith.addf %500, %502 : vector<8x128xf32>
    %504 = math.tanh %503 : vector<8x128xf32>
    %505 = arith.subf %438, %504 : vector<8x128xf32>
    %506 = arith.mulf %499, %505 : vector<8x128xf32>
    %507 = arith.addf %504, %506 : vector<8x128xf32>
    %508 = arith.select %477, %507, %438 : vector<8x128xf32>
    %c7_i32_161 = arith.constant 7 : i32
    %c0_i32_162 = arith.constant 0 : i32
    %509 = arith.subi %c7_i32_161, %c0_i32_162 : i32
    %c8_i32_163 = arith.constant 8 : i32
    %510 = arith.cmpi slt, %509, %c8_i32_163 : i32
    %c7_i32_164 = arith.constant 7 : i32
    %511 = arith.minsi %509, %c7_i32_164 : i32
    %512 = arith.index_cast %511 : i32 to index
    %c0_165 = arith.constant 0 : index
    %c0_166 = arith.constant 0 : index
    %513 = vector.load %arg13[%512, %c0_165, %c0_166] : memref<8x8x384xf32, #tpu.memory_space<vmem>>, vector<1x8x384xf32>
    %514 = vector.shape_cast %513 : vector<1x8x384xf32> to vector<8x384xf32>
    %c0_167 = arith.constant 0 : index
    %c0_168 = arith.constant 0 : index
    %515 = vector.load %arg3[%c0_167, %c0_168] : memref<128x384xf32, #tpu.memory_space<vmem>>, vector<128x384xf32>
    %cst_169 = arith.constant dense<0.000000e+00> : vector<8x384xf32>
    %516 = tpu.matmul %472, %515, %cst_169 {dimension_numbers = #tpu.dot_dimension_numbers<[1], [0], [0], [1], [0, 0, 1, 1], [], []>} : vector<8x128xf32>, vector<128x384xf32>, vector<8x384xf32> -> vector<8x384xf32>
    %517 = arith.addf %516, %11 : vector<8x384xf32>
    %518 = vector.extract_strided_slice %514 {offsets = [0, 0], sizes = [8, 128], strides = [1, 1]} : vector<8x384xf32> to vector<8x128xf32>
    %519 = vector.extract_strided_slice %517 {offsets = [0, 0], sizes = [8, 128], strides = [1, 1]} : vector<8x384xf32> to vector<8x128xf32>
    %520 = arith.addf %518, %519 : vector<8x128xf32>
    %521 = arith.negf %520 : vector<8x128xf32>
    %522 = math.exp %521 : vector<8x128xf32>
    %cst_170 = arith.constant 1.000000e+00 : f32
    %523 = vector.broadcast %cst_170 : f32 to vector<8x128xf32>
    %524 = arith.addf %523, %522 : vector<8x128xf32>
    %525 = arith.divf %523, %524 : vector<8x128xf32>
    %526 = vector.extract_strided_slice %514 {offsets = [0, 128], sizes = [8, 128], strides = [1, 1]} : vector<8x384xf32> to vector<8x128xf32>
    %527 = vector.extract_strided_slice %517 {offsets = [0, 128], sizes = [8, 128], strides = [1, 1]} : vector<8x384xf32> to vector<8x128xf32>
    %528 = arith.addf %526, %527 : vector<8x128xf32>
    %529 = arith.negf %528 : vector<8x128xf32>
    %530 = math.exp %529 : vector<8x128xf32>
    %cst_171 = arith.constant 1.000000e+00 : f32
    %531 = vector.broadcast %cst_171 : f32 to vector<8x128xf32>
    %532 = arith.addf %531, %530 : vector<8x128xf32>
    %533 = arith.divf %531, %532 : vector<8x128xf32>
    %534 = vector.extract_strided_slice %514 {offsets = [0, 256], sizes = [8, 128], strides = [1, 1]} : vector<8x384xf32> to vector<8x128xf32>
    %535 = vector.extract_strided_slice %517 {offsets = [0, 256], sizes = [8, 128], strides = [1, 1]} : vector<8x384xf32> to vector<8x128xf32>
    %536 = arith.mulf %525, %535 : vector<8x128xf32>
    %537 = arith.addf %534, %536 : vector<8x128xf32>
    %538 = math.tanh %537 : vector<8x128xf32>
    %539 = arith.subf %472, %538 : vector<8x128xf32>
    %540 = arith.mulf %533, %539 : vector<8x128xf32>
    %541 = arith.addf %538, %540 : vector<8x128xf32>
    %542 = arith.select %510, %541, %472 : vector<8x128xf32>
    %543 = arith.select %510, %541, %473 : vector<8x128xf32>
    %c1_i32_172 = arith.constant 1 : i32
    %544 = arith.subi %c7_i32_161, %c1_i32_172 : i32
    %c0_i32_173 = arith.constant 0 : i32
    %545 = arith.cmpi sge, %544, %c0_i32_173 : i32
    %c8_i32_174 = arith.constant 8 : i32
    %546 = arith.cmpi slt, %544, %c8_i32_174 : i32
    %547 = arith.andi %545, %546 : i1
    %c0_175 = arith.constant 0 : index
    %c0_176 = arith.constant 0 : index
    %548 = vector.load %arg6[%c0_175, %c0_176] : memref<128x384xf32, #tpu.memory_space<vmem>>, vector<128x384xf32>
    %cst_177 = arith.constant dense<0.000000e+00> : vector<8x384xf32>
    %549 = tpu.matmul %473, %548, %cst_177 {dimension_numbers = #tpu.dot_dimension_numbers<[1], [0], [0], [1], [0, 0, 1, 1], [], []>} : vector<8x128xf32>, vector<128x384xf32>, vector<8x384xf32> -> vector<8x384xf32>
    %550 = arith.addf %549, %17 : vector<8x384xf32>
    %c0_178 = arith.constant 0 : index
    %c0_179 = arith.constant 0 : index
    %551 = vector.load %arg7[%c0_178, %c0_179] : memref<128x384xf32, #tpu.memory_space<vmem>>, vector<128x384xf32>
    %cst_180 = arith.constant dense<0.000000e+00> : vector<8x384xf32>
    %552 = tpu.matmul %508, %551, %cst_180 {dimension_numbers = #tpu.dot_dimension_numbers<[1], [0], [0], [1], [0, 0, 1, 1], [], []>} : vector<8x128xf32>, vector<128x384xf32>, vector<8x384xf32> -> vector<8x384xf32>
    %553 = arith.addf %552, %14 : vector<8x384xf32>
    %554 = vector.extract_strided_slice %550 {offsets = [0, 0], sizes = [8, 128], strides = [1, 1]} : vector<8x384xf32> to vector<8x128xf32>
    %555 = vector.extract_strided_slice %553 {offsets = [0, 0], sizes = [8, 128], strides = [1, 1]} : vector<8x384xf32> to vector<8x128xf32>
    %556 = arith.addf %554, %555 : vector<8x128xf32>
    %557 = arith.negf %556 : vector<8x128xf32>
    %558 = math.exp %557 : vector<8x128xf32>
    %cst_181 = arith.constant 1.000000e+00 : f32
    %559 = vector.broadcast %cst_181 : f32 to vector<8x128xf32>
    %560 = arith.addf %559, %558 : vector<8x128xf32>
    %561 = arith.divf %559, %560 : vector<8x128xf32>
    %562 = vector.extract_strided_slice %550 {offsets = [0, 128], sizes = [8, 128], strides = [1, 1]} : vector<8x384xf32> to vector<8x128xf32>
    %563 = vector.extract_strided_slice %553 {offsets = [0, 128], sizes = [8, 128], strides = [1, 1]} : vector<8x384xf32> to vector<8x128xf32>
    %564 = arith.addf %562, %563 : vector<8x128xf32>
    %565 = arith.negf %564 : vector<8x128xf32>
    %566 = math.exp %565 : vector<8x128xf32>
    %cst_182 = arith.constant 1.000000e+00 : f32
    %567 = vector.broadcast %cst_182 : f32 to vector<8x128xf32>
    %568 = arith.addf %567, %566 : vector<8x128xf32>
    %569 = arith.divf %567, %568 : vector<8x128xf32>
    %570 = vector.extract_strided_slice %550 {offsets = [0, 256], sizes = [8, 128], strides = [1, 1]} : vector<8x384xf32> to vector<8x128xf32>
    %571 = vector.extract_strided_slice %553 {offsets = [0, 256], sizes = [8, 128], strides = [1, 1]} : vector<8x384xf32> to vector<8x128xf32>
    %572 = arith.mulf %561, %571 : vector<8x128xf32>
    %573 = arith.addf %570, %572 : vector<8x128xf32>
    %574 = math.tanh %573 : vector<8x128xf32>
    %575 = arith.subf %508, %574 : vector<8x128xf32>
    %576 = arith.mulf %569, %575 : vector<8x128xf32>
    %577 = arith.addf %574, %576 : vector<8x128xf32>
    %578 = arith.select %547, %577, %508 : vector<8x128xf32>
    %c8_i32_183 = arith.constant 8 : i32
    %c0_i32_184 = arith.constant 0 : i32
    %579 = arith.subi %c8_i32_183, %c0_i32_184 : i32
    %c8_i32_185 = arith.constant 8 : i32
    %580 = arith.cmpi slt, %579, %c8_i32_185 : i32
    %c7_i32_186 = arith.constant 7 : i32
    %581 = arith.minsi %579, %c7_i32_186 : i32
    %582 = arith.index_cast %581 : i32 to index
    %c0_187 = arith.constant 0 : index
    %c0_188 = arith.constant 0 : index
    %583 = vector.load %arg13[%582, %c0_187, %c0_188] : memref<8x8x384xf32, #tpu.memory_space<vmem>>, vector<1x8x384xf32>
    %584 = vector.shape_cast %583 : vector<1x8x384xf32> to vector<8x384xf32>
    %c0_189 = arith.constant 0 : index
    %c0_190 = arith.constant 0 : index
    %585 = vector.load %arg3[%c0_189, %c0_190] : memref<128x384xf32, #tpu.memory_space<vmem>>, vector<128x384xf32>
    %cst_191 = arith.constant dense<0.000000e+00> : vector<8x384xf32>
    %586 = tpu.matmul %542, %585, %cst_191 {dimension_numbers = #tpu.dot_dimension_numbers<[1], [0], [0], [1], [0, 0, 1, 1], [], []>} : vector<8x128xf32>, vector<128x384xf32>, vector<8x384xf32> -> vector<8x384xf32>
    %587 = arith.addf %586, %11 : vector<8x384xf32>
    %588 = vector.extract_strided_slice %584 {offsets = [0, 0], sizes = [8, 128], strides = [1, 1]} : vector<8x384xf32> to vector<8x128xf32>
    %589 = vector.extract_strided_slice %587 {offsets = [0, 0], sizes = [8, 128], strides = [1, 1]} : vector<8x384xf32> to vector<8x128xf32>
    %590 = arith.addf %588, %589 : vector<8x128xf32>
    %591 = arith.negf %590 : vector<8x128xf32>
    %592 = math.exp %591 : vector<8x128xf32>
    %cst_192 = arith.constant 1.000000e+00 : f32
    %593 = vector.broadcast %cst_192 : f32 to vector<8x128xf32>
    %594 = arith.addf %593, %592 : vector<8x128xf32>
    %595 = arith.divf %593, %594 : vector<8x128xf32>
    %596 = vector.extract_strided_slice %584 {offsets = [0, 128], sizes = [8, 128], strides = [1, 1]} : vector<8x384xf32> to vector<8x128xf32>
    %597 = vector.extract_strided_slice %587 {offsets = [0, 128], sizes = [8, 128], strides = [1, 1]} : vector<8x384xf32> to vector<8x128xf32>
    %598 = arith.addf %596, %597 : vector<8x128xf32>
    %599 = arith.negf %598 : vector<8x128xf32>
    %600 = math.exp %599 : vector<8x128xf32>
    %cst_193 = arith.constant 1.000000e+00 : f32
    %601 = vector.broadcast %cst_193 : f32 to vector<8x128xf32>
    %602 = arith.addf %601, %600 : vector<8x128xf32>
    %603 = arith.divf %601, %602 : vector<8x128xf32>
    %604 = vector.extract_strided_slice %584 {offsets = [0, 256], sizes = [8, 128], strides = [1, 1]} : vector<8x384xf32> to vector<8x128xf32>
    %605 = vector.extract_strided_slice %587 {offsets = [0, 256], sizes = [8, 128], strides = [1, 1]} : vector<8x384xf32> to vector<8x128xf32>
    %606 = arith.mulf %595, %605 : vector<8x128xf32>
    %607 = arith.addf %604, %606 : vector<8x128xf32>
    %608 = math.tanh %607 : vector<8x128xf32>
    %609 = arith.subf %542, %608 : vector<8x128xf32>
    %610 = arith.mulf %603, %609 : vector<8x128xf32>
    %611 = arith.addf %608, %610 : vector<8x128xf32>
    %612 = arith.select %580, %611, %542 : vector<8x128xf32>
    %613 = arith.select %580, %611, %543 : vector<8x128xf32>
    %c1_i32_194 = arith.constant 1 : i32
    %614 = arith.subi %c8_i32_183, %c1_i32_194 : i32
    %c0_i32_195 = arith.constant 0 : i32
    %615 = arith.cmpi sge, %614, %c0_i32_195 : i32
    %c8_i32_196 = arith.constant 8 : i32
    %616 = arith.cmpi slt, %614, %c8_i32_196 : i32
    %617 = arith.andi %615, %616 : i1
    %c0_197 = arith.constant 0 : index
    %c0_198 = arith.constant 0 : index
    %618 = vector.load %arg6[%c0_197, %c0_198] : memref<128x384xf32, #tpu.memory_space<vmem>>, vector<128x384xf32>
    %cst_199 = arith.constant dense<0.000000e+00> : vector<8x384xf32>
    %619 = tpu.matmul %543, %618, %cst_199 {dimension_numbers = #tpu.dot_dimension_numbers<[1], [0], [0], [1], [0, 0, 1, 1], [], []>} : vector<8x128xf32>, vector<128x384xf32>, vector<8x384xf32> -> vector<8x384xf32>
    %620 = arith.addf %619, %17 : vector<8x384xf32>
    %c0_200 = arith.constant 0 : index
    %c0_201 = arith.constant 0 : index
    %621 = vector.load %arg7[%c0_200, %c0_201] : memref<128x384xf32, #tpu.memory_space<vmem>>, vector<128x384xf32>
    %cst_202 = arith.constant dense<0.000000e+00> : vector<8x384xf32>
    %622 = tpu.matmul %578, %621, %cst_202 {dimension_numbers = #tpu.dot_dimension_numbers<[1], [0], [0], [1], [0, 0, 1, 1], [], []>} : vector<8x128xf32>, vector<128x384xf32>, vector<8x384xf32> -> vector<8x384xf32>
    %623 = arith.addf %622, %14 : vector<8x384xf32>
    %624 = vector.extract_strided_slice %620 {offsets = [0, 0], sizes = [8, 128], strides = [1, 1]} : vector<8x384xf32> to vector<8x128xf32>
    %625 = vector.extract_strided_slice %623 {offsets = [0, 0], sizes = [8, 128], strides = [1, 1]} : vector<8x384xf32> to vector<8x128xf32>
    %626 = arith.addf %624, %625 : vector<8x128xf32>
    %627 = arith.negf %626 : vector<8x128xf32>
    %628 = math.exp %627 : vector<8x128xf32>
    %cst_203 = arith.constant 1.000000e+00 : f32
    %629 = vector.broadcast %cst_203 : f32 to vector<8x128xf32>
    %630 = arith.addf %629, %628 : vector<8x128xf32>
    %631 = arith.divf %629, %630 : vector<8x128xf32>
    %632 = vector.extract_strided_slice %620 {offsets = [0, 128], sizes = [8, 128], strides = [1, 1]} : vector<8x384xf32> to vector<8x128xf32>
    %633 = vector.extract_strided_slice %623 {offsets = [0, 128], sizes = [8, 128], strides = [1, 1]} : vector<8x384xf32> to vector<8x128xf32>
    %634 = arith.addf %632, %633 : vector<8x128xf32>
    %635 = arith.negf %634 : vector<8x128xf32>
    %636 = math.exp %635 : vector<8x128xf32>
    %cst_204 = arith.constant 1.000000e+00 : f32
    %637 = vector.broadcast %cst_204 : f32 to vector<8x128xf32>
    %638 = arith.addf %637, %636 : vector<8x128xf32>
    %639 = arith.divf %637, %638 : vector<8x128xf32>
    %640 = vector.extract_strided_slice %620 {offsets = [0, 256], sizes = [8, 128], strides = [1, 1]} : vector<8x384xf32> to vector<8x128xf32>
    %641 = vector.extract_strided_slice %623 {offsets = [0, 256], sizes = [8, 128], strides = [1, 1]} : vector<8x384xf32> to vector<8x128xf32>
    %642 = arith.mulf %631, %641 : vector<8x128xf32>
    %643 = arith.addf %640, %642 : vector<8x128xf32>
    %644 = math.tanh %643 : vector<8x128xf32>
    %645 = arith.subf %578, %644 : vector<8x128xf32>
    %646 = arith.mulf %639, %645 : vector<8x128xf32>
    %647 = arith.addf %644, %646 : vector<8x128xf32>
    %648 = arith.select %617, %647, %578 : vector<8x128xf32>
    %c9_i32 = arith.constant 9 : i32
    %c0_205 = arith.constant 0 : index
    %c0_206 = arith.constant 0 : index
    %649 = vector.load %arg10[%c0_205, %c0_206] : memref<128x128xf32, #tpu.memory_space<vmem>>, vector<128x128xf32>
    %cst_207 = arith.constant dense<0.000000e+00> : vector<8x128xf32>
    %650 = tpu.matmul %648, %649, %cst_207 {dimension_numbers = #tpu.dot_dimension_numbers<[1], [0], [0], [1], [0, 0, 1, 1], [], []>} : vector<8x128xf32>, vector<128x128xf32>, vector<8x128xf32> -> vector<8x128xf32>
    %c0_208 = arith.constant 0 : index
    %c0_209 = arith.constant 0 : index
    %651 = vector.load %arg11[%c0_208, %c0_209] : memref<1x128xf32, #tpu.memory_space<vmem>>, vector<1x128xf32>
    %652 = vector.broadcast %651 : vector<1x128xf32> to vector<8x128xf32>
    %653 = arith.addf %650, %652 : vector<8x128xf32>
    %c0_210 = arith.constant 0 : index
    %c0_211 = arith.constant 0 : index
    %654 = vector.load %arg12[%c0_210, %c0_211] : memref<8x128xf32, #tpu.memory_space<vmem>>, vector<8x128xf32>
    tpu.vector_store %arg12[%c0_210, %c0_211], %653 {strides = array<i32>} : memref<8x128xf32, #tpu.memory_space<vmem>>, vector<8x128xf32>,
    return
  }
  func.func @transform_0(%arg0: i32) -> (i32, i32, i32) {
    %c0_i32 = arith.constant 0 : i32
    %c0_i32_0 = arith.constant 0 : i32
    %c0_i32_1 = arith.constant 0 : i32
    return %c0_i32, %arg0, %c0_i32_0 : i32, i32, i32
  }
  func.func @transform_1(%arg0: i32) -> (i32, i32) {
    %c0_i32 = arith.constant 0 : i32
    %c0_i32_0 = arith.constant 0 : i32
    %c0_i32_1 = arith.constant 0 : i32
    return %c0_i32, %c0_i32_0 : i32, i32
  }
  func.func @transform_2(%arg0: i32) -> (i32, i32) {
    %c0_i32 = arith.constant 0 : i32
    %c0_i32_0 = arith.constant 0 : i32
    %c0_i32_1 = arith.constant 0 : i32
    return %c0_i32, %c0_i32_0 : i32, i32
  }
  func.func @transform_3(%arg0: i32) -> (i32, i32) {
    %c0_i32 = arith.constant 0 : i32
    %c0_i32_0 = arith.constant 0 : i32
    %c0_i32_1 = arith.constant 0 : i32
    return %c0_i32, %c0_i32_0 : i32, i32
  }
  func.func @transform_4(%arg0: i32) -> (i32, i32) {
    %c0_i32 = arith.constant 0 : i32
    %c0_i32_0 = arith.constant 0 : i32
    %c0_i32_1 = arith.constant 0 : i32
    return %c0_i32, %c0_i32_0 : i32, i32
  }
  func.func @transform_5(%arg0: i32) -> (i32, i32) {
    %c0_i32 = arith.constant 0 : i32
    %c0_i32_0 = arith.constant 0 : i32
    %c0_i32_1 = arith.constant 0 : i32
    return %c0_i32, %c0_i32_0 : i32, i32
  }
  func.func @transform_6(%arg0: i32) -> (i32, i32) {
    %c0_i32 = arith.constant 0 : i32
    %c0_i32_0 = arith.constant 0 : i32
    %c0_i32_1 = arith.constant 0 : i32
    return %c0_i32, %c0_i32_0 : i32, i32
  }
  func.func @transform_7(%arg0: i32) -> (i32, i32) {
    %c0_i32 = arith.constant 0 : i32
    %c0_i32_0 = arith.constant 0 : i32
    %c0_i32_1 = arith.constant 0 : i32
    return %c0_i32, %c0_i32_0 : i32, i32
  }
  func.func @transform_8(%arg0: i32) -> (i32, i32) {
    %c0_i32 = arith.constant 0 : i32
    %c0_i32_0 = arith.constant 0 : i32
    %c0_i32_1 = arith.constant 0 : i32
    return %c0_i32, %c0_i32_0 : i32, i32
  }
  func.func @transform_9(%arg0: i32) -> (i32, i32) {
    %c0_i32 = arith.constant 0 : i32
    %c0_i32_0 = arith.constant 0 : i32
    %c0_i32_1 = arith.constant 0 : i32
    return %c0_i32, %c0_i32_0 : i32, i32
  }
  func.func @transform_10(%arg0: i32) -> (i32, i32) {
    %c0_i32 = arith.constant 0 : i32
    %c0_i32_0 = arith.constant 0 : i32
    %c0_i32_1 = arith.constant 0 : i32
    return %c0_i32, %c0_i32_0 : i32, i32
  }
  func.func @transform_11(%arg0: i32) -> (i32, i32) {
    %c0_i32 = arith.constant 0 : i32
    %c0_i32_0 = arith.constant 0 : i32
    return %arg0, %c0_i32 : i32, i32
  }
}

</mosaic_0001>

<bundles_post_ra>
// kernel: grunet_forward.1
= control target key start
LH: loop header
LB: loop body
LE: loop exit
PB: predicated region body
PF: predicated region fallthrough
CT: control target
= control target key end

     0   :  { %16 = vsyncpa [#allocation4], 0  ;;  %s9768_s0 = inlined_call_operand.vmem [shape: f32[8,8,128], index: 0, kind: input, shape index: {}]   ;;  %s9769_s1 = inlined_call_operand.hbm [shape: f32[128,384], index: 1, kind: input, shape index: {}]   ;;  %s9770_s2 = inlined_call_operand.hbm [shape: f32[128,384], index: 2, kind: input, shape index: {}]   ;;  %s9771_s3 = inlined_call_operand.vmem [shape: f32[1,384], index: 3, kind: input, shape index: {}]   ;;  %s9772_s4 = inlined_call_operand.vmem [shape: f32[1,384], index: 4, kind: input, shape index: {}]   ;;  %s9773_s5 = inlined_call_operand.hbm [shape: f32[128,384], index: 5, kind: input, shape index: {}]   ;;  %s9774_s6 = inlined_call_operand.hbm [shape: f32[128,384], index: 6, kind: input, shape index: {}]   ;;  %s9775_s7 = inlined_call_operand.vmem [shape: f32[1,384], index: 7, kind: input, shape index: {}]   ;;  %s9776_s8 = inlined_call_operand.vmem [shape: f32[1,384], index: 8, kind: input, shape index: {}]   ;;  %s9777_s9 = inlined_call_operand.hbm [shape: f32[128,128], index: 9, kind: input, shape index: {}]   ;;  %s9778_s10 = inlined_call_operand.vmem [shape: f32[1,128], index: 10, kind: input, shape index: {}]   ;;  %s9779_s11 = inlined_call_operand.vmem [shape: f32[8,128], index: 11, kind: output, shape index: {}]  }
   0x1   :  { %17 = vsyncpa [#allocation6], 0 }
   0x2   :  { %18 = vsyncpa [#allocation9], 0  ;;  %s6562_s17 = smov [#allocation5]   ;;  %s6563_s19 = smov [#allocation8]  }
   0x3   :  { %s38_s18 = sshll.u32 %s6562_s17, 4  ;;  %s66_s20 = sshll.u32 %s6563_s19, 4  ;;  %s39_s18 = int_to_ptr.vmem [resolvable:$true] %s38_s18  ;;  %s67_s20 = int_to_ptr.vmem [resolvable:$true] %s66_s20 }
   0x4   :  { %s6464_s21 = scalar_lea.vmem %s39_s18, 6144  ;;  %p6469_p1 = scmp.lt.s32.totalorder %s39_s18, %s39_s18 }
   0x5   :  { %p6465_p0 = scmp.ne.s32.totalorder %s39_s18, %s6464_s21  ;;  %p6470_p2 = scmp.lt.s32.totalorder %s6464_s21, %s6464_s21 }
   0x7   :  { %p6471_p3 = por %p6470_p2, %p6469_p1 }
   0x9   :  { %p6472_p4 = pnand %p6471_p3, %p6465_p0 }
   0xb   :  { %6475 = shalt.err (!%p6472_p4)
}
   0xc   :  { %s6564_s22 = smov 384   ;;  %s6565_s23 = smov 24  }
   0xd   :  { %44 = dma.hbm_to_vmem [thread:$0]  %s9770_s2, 6144, %s39_s18, [#allocation6], %s6564_s22, %s6564_s22, %s6565_s23  }
   0xe   :  { %s6484_s26 = scalar_lea.vmem %s67_s20, 6144  ;;  %p6489_p6 = scmp.lt.s32.totalorder %s67_s20, %s67_s20 }
   0xf   :  { %p6485_p5 = scmp.ne.s32.totalorder %s67_s20, %s6484_s26  ;;  %p6490_p7 = scmp.lt.s32.totalorder %s6484_s26, %s6484_s26 }
  0x11   :  { %p6491_p8 = por %p6490_p7, %p6489_p6 }
  0x13   :  { %p6492_p9 = pnand %p6491_p8, %p6485_p5 }
  0x15   :  { %6495 = shalt.err (!%p6492_p9)
}
  0x16   :  { %72 = dma.hbm_to_vmem [thread:$0]  %s9774_s6, 6144, %s67_s20, [#allocation9], %s6564_s22, %s6564_s22, %s6565_s23  }
  0x17   :  { %s6566_s29 = smov [#allocation3]   ;;  %s6567_s12 = smov [#allocation7]  }
  0x18   :  { %s26_s30 = sshll.u32 %s6566_s29, 4  ;;  %s54_s13 = sshll.u32 %s6567_s12, 4  ;;  %s27_s30 = int_to_ptr.vmem [resolvable:$true] %s26_s30  ;;  %s55_s13 = int_to_ptr.vmem [resolvable:$true] %s54_s13 }
  0x19   :  { %s6504_s2 = scalar_lea.vmem %s27_s30, 6144  ;;  %p6509_p11 = scmp.lt.s32.totalorder %s27_s30, %s27_s30 }
  0x1a   :  { %p6505_p10 = scmp.ne.s32.totalorder %s27_s30, %s6504_s2  ;;  %p6510_p12 = scmp.lt.s32.totalorder %s6504_s2, %s6504_s2 }
  0x1c   :  { %p6511_p13 = por %p6510_p12, %p6509_p11 }
  0x1e   :  { %p6512_p0 = pnand %p6511_p13, %p6505_p10 }
  0x20   :  { %6515 = shalt.err (!%p6512_p0)
}
  0x21   :  { %32 = dma.hbm_to_vmem [thread:$0]  %s9769_s1, 6144, %s27_s30, [#allocation4], %s6564_s22, %s6564_s22, %s6565_s23  }
  0x22   :  { %s6524_s6 = scalar_lea.vmem %s55_s13, 6144  ;;  %p6529_p2 = scmp.lt.s32.totalorder %s55_s13, %s55_s13 }
  0x23   :  { %p6525_p1 = scmp.ne.s32.totalorder %s55_s13, %s6524_s6  ;;  %p6530_p3 = scmp.lt.s32.totalorder %s6524_s6, %s6524_s6 }
  0x25   :  { %p6531_p4 = por %p6530_p3, %p6529_p2 }
  0x27   :  { %p6532_p5 = pnand %p6531_p4, %p6525_p1 }
  0x29   :  { %6535 = shalt.err (!%p6532_p5)
}
  0x2a   :  { %60 = dma.hbm_to_vmem [thread:$0]  %s9773_s5, 6144, %s55_s13, [#allocation6], %s6564_s22, %s6564_s22, %s6565_s23  }
  0x2b   :  { %s6568_s18 = smov [#allocation10]  }
  0x2c   :  { %s82_s19 = sshll.u32 %s6568_s18, 4  ;;  %s83_s19 = int_to_ptr.vmem [resolvable:$true] %s82_s19 }
  0x2d   :  { %s6544_s20 = scalar_lea.vmem %s83_s19, 2048  ;;  %p6549_p7 = scmp.lt.s32.totalorder %s83_s19, %s83_s19 }
  0x2e   :  { %p6545_p6 = scmp.ne.s32.totalorder %s83_s19, %s6544_s20  ;;  %p6550_p8 = scmp.lt.s32.totalorder %s6544_s20, %s6544_s20 }
  0x30   :  { %p6551_p9 = por %p6550_p8, %p6549_p7 }
  0x32   :  { %p6552_p10 = pnand %p6551_p9, %p6545_p6 }
  0x34   :  { %6555 = shalt.err (!%p6552_p10)
}
  0x35   :  { %s6569_s1 = smov 128   ;;  %s6570_s21 = smov 8  }
  0x36   :  { %88 = dma.hbm_to_vmem [thread:$0]  %s9777_s9, 2048, %s83_s19, [#allocation9], %s6569_s1, %s6569_s1, %s6570_s21  }
  0x37   :  { %6556 = dma.done.wait [#allocation4], 6144  }
  0x38   :  { %6557 = vsyncadd [#allocation4], 4294961152 }
  0x39   :  { %6558 = dma.done.wait [#allocation6], 12288  }
  0x3a   :  { %6559 = vsyncadd [#allocation6], 4294955008 }
  0x3b   :  { %6560 = dma.done.wait [#allocation9], 8192  }
  0x3c   :  { %6561 = vsyncadd [#allocation9], 4294959104  ;;  %v9867_v0 = vmov 0.0   ;;  %v160_v1 = vld [vmem:[#allocation3 + $0x170] sm:$0xff]  ;;  %v159_v2 = vld [vmem:[#allocation3 + $0x168] sm:$0xff]  ;;  %vm6572_vm0 = vmmov 0  }
  0x3d   :  { %243 = vmatprep.mubr.f32.mxu0 %v9867_v0  ;;  %v157_v3 = vld [vmem:[#allocation3 + $0x158] sm:$0xff]  ;;  %179 = vmatprep.subr.mxu0 %v160_v1  ;;  %v156_v4 = vld [vmem:[#allocation3 + $0x150] sm:$0xff]  ;;  %v154_v5 = vld [vmem:[#allocation3 + $0x140] sm:$0xff] }
  0x3e   :  { %180 = vmatpush1.msra.mxu0 %v159_v2  ;;  %v153_v6 = vld [vmem:[#allocation3 + $0x138] sm:$0xff]  ;;  %v151_v7 = vld [vmem:[#allocation3 + $0x128] sm:$0xff]  ;;  %v150_v8 = vld [vmem:[#allocation3 + $0x120] sm:$0xff] }
  0x3f   :  { %181 = vmatprep.subr.mxu0 %v157_v3  ;;  %v148_v9 = vld [vmem:[#allocation3 + $0x110] sm:$0xff]  ;;  %v147_v10 = vld [vmem:[#allocation3 + $0x108] sm:$0xff]  ;;  %v145_v11 = vld [vmem:[#allocation3 + $0xf8] sm:$0xff] }
  0x40   :  { %182 = vmatpush1.msra.mxu0 %v156_v4  ;;  %v144_v12 = vld [vmem:[#allocation3 + $0xf0] sm:$0xff]  ;;  %v142_v13 = vld [vmem:[#allocation3 + $0xe0] sm:$0xff]  ;;  %v141_v15 = vld [vmem:[#allocation3 + $0xd8] sm:$0xff] }
  0x41   :  { %183 = vmatprep.subr.mxu0 %v154_v5  ;;  %v6664_v14 = vld [vmem:[%s9768_s0] sm:$0xff]  ;;  %v161_v16 = vld [vmem:[#allocation3 + $0x178] sm:$0xff]  ;;  %v139_v17 = vld [vmem:[#allocation3 + $0xc8] sm:$0xff] }
  0x42   :  { %184 = vmatpush1.msra.mxu0 %v153_v6  ;;  %4966 = vmatprep.mubr.f32.mxu1 %v6664_v14  ;;  %v158_v18 = vld [vmem:[#allocation3 + $0x160] sm:$0xff]  ;;  %v155_v20 = vld [vmem:[#allocation3 + $0x148] sm:$0xff]  ;;  %v136_v21 = vld [vmem:[#allocation3 + $0xb0] sm:$0xff] }
  0x43   :  { %185 = vmatprep.subr.mxu0 %v151_v7  ;;  %4934 = vmatprep.subr.mxu1 %v161_v16  ;;  %v138_v19 = vld [vmem:[#allocation3 + $0xc0] sm:$0xff]  ;;  %v135_v22 = vld [vmem:[#allocation3 + $0xa8] sm:$0xff]  ;;  %v152_v23 = vld [vmem:[#allocation3 + $0x130] sm:$0xff] }
  0x44   :  { %186 = vmatpush1.msra.mxu0 %v150_v8  ;;  %4935 = vmatpush3.msra.mxu1 %v161_v16  ;;  %v133_v24 = vld [vmem:[#allocation3 + $0x98] sm:$0xff]  ;;  %v132_v25 = vld [vmem:[#allocation3 + $0x90] sm:$0xff]  ;;  %v130_v27 = vld [vmem:[#allocation3 + $0x80] sm:$0xff] }
  0x45   :  { %187 = vmatprep.subr.mxu0 %v148_v9  ;;  %4936 = vmatprep.subr.mxu1 %v158_v18  ;;  %v149_v26 = vld [vmem:[#allocation3 + $0x118] sm:$0xff]  ;;  %v146_v29 = vld [vmem:[#allocation3 + $0x100] sm:$0xff]  ;;  %v127_v30 = vld [vmem:[#allocation3 + $0x68] sm:$0xff] }
  0x46   :  { %188 = vmatpush1.msra.mxu0 %v147_v10  ;;  %4937 = vmatpush3.msra.mxu1 %v158_v18  ;;  %v129_v28 = vld [vmem:[#allocation3 + $0x78] sm:$0xff]  ;;  %v126_v31 = vld [vmem:[#allocation3 + $0x60] sm:$0xff]  ;;  %v143_v32 = vld [vmem:[#allocation3 + $0xe8] sm:$0xff] }
  0x47   :  { %189 = vmatprep.subr.mxu0 %v145_v11  ;;  %4938 = vmatprep.subr.mxu1 %v155_v20  ;;  %v124_v33 = vld [vmem:[#allocation3 + $0x50] sm:$0xff]  ;;  %v123_v34 = vld [vmem:[#allocation3 + $0x48] sm:$0xff]  ;;  %v121_v36 = vld [vmem:[#allocation3 + $0x38] sm:$0xff] }
  0x48   :  { %190 = vmatpush1.msra.mxu0 %v144_v12  ;;  %4939 = vmatpush3.msra.mxu1 %v155_v20  ;;  %v140_v35 = vld [vmem:[#allocation3 + $0xd0] sm:$0xff]  ;;  %v137_v38 = vld [vmem:[#allocation3 + $0xb8] sm:$0xff]  ;;  %v118_v39 = vld [vmem:[#allocation3 + $0x20] sm:$0xff] }
  0x49   :  { %191 = vmatprep.subr.mxu0 %v142_v13  ;;  %4940 = vmatprep.subr.mxu1 %v152_v23  ;;  %v120_v37 = vld [vmem:[#allocation3 + $0x30] sm:$0xff]  ;;  %v117_v40 = vld [vmem:[#allocation3 + $0x18] sm:$0xff]  ;;  %v134_v41 = vld [vmem:[#allocation3 + $0xa0] sm:$0xff] }
  0x4a   :  { %192 = vmatpush1.msra.mxu0 %v141_v15  ;;  %4941 = vmatpush3.msra.mxu1 %v152_v23  ;;  %v115_v42 = vld [vmem:[#allocation3 + $0x8] sm:$0xff]  ;;  %v114_v43 = vld [vmem:[#allocation3] sm:$0xff]  ;;  %v6667_v45 = vld [vmem:[#allocation5 + $0x170] sm:$0xff] }
  0x4b   :  { %193 = vmatprep.subr.mxu0 %v139_v17  ;;  %4942 = vmatprep.subr.mxu1 %v149_v26  ;;  %v131_v44 = vld [vmem:[#allocation3 + $0x88] sm:$0xff]  ;;  %v6671_v47 = vld [vmem:[#allocation5 + $0x158] sm:$0xff]  ;;  %v6675_v48 = vld [vmem:[#allocation5 + $0x150] sm:$0xff] }
  0x4c   :  { %194 = vmatpush1.msra.mxu0 %v138_v19  ;;  %4943 = vmatpush3.msra.mxu1 %v149_v26  ;;  %v6669_v46 = vld [vmem:[#allocation5 + $0x168] sm:$0xff]  ;;  %v128_v49 = vld [vmem:[#allocation3 + $0x70] sm:$0xff]  ;;  %v6684_v51 = vld [vmem:[#allocation5 + $0x140] sm:$0xff] }
  0x4d   :  { %195 = vmatprep.subr.mxu0 %v136_v21  ;;  %4944 = vmatprep.subr.mxu1 %v146_v29  ;;  %v6682_v50 = vld [vmem:[%s9768_s0 + $0x8] sm:$0xff]  ;;  %v6687_v52 = vld [vmem:[#allocation5 + $0x138] sm:$0xff]  ;;  %v6694_v54 = vld [vmem:[#allocation5 + $0x120] sm:$0xff] }
  0x4e   :  { %196 = vmatpush1.msra.mxu0 %v135_v22  ;;  %4945 = vmatpush3.msra.mxu1 %v146_v29  ;;  %v6690_v53 = vld [vmem:[#allocation5 + $0x128] sm:$0xff]  ;;  %v125_v55 = vld [vmem:[#allocation3 + $0x58] sm:$0xff]  ;;  %v6701_v56 = vld [vmem:[%s9768_s0 + $0x10] sm:$0xff] }
  0x4f   :  { %197 = vmatprep.subr.mxu0 %v133_v24  ;;  %4946 = vmatprep.subr.mxu1 %v143_v32  ;;  %v6703_v57 = vld [vmem:[#allocation5 + $0x110] sm:$0xff]  ;;  %v6706_v58 = vld [vmem:[#allocation5 + $0x108] sm:$0xff]  ;;  %v6709_v59 = vld [vmem:[#allocation5 + $0xf8] sm:$0xff] }
  0x50   :  { %198 = vmatpush1.msra.mxu0 %v132_v25  ;;  %4947 = vmatpush3.msra.mxu1 %v143_v32  ;;  %v6713_v60 = vld [vmem:[#allocation5 + $0xf0] sm:$0xff]  ;;  %v122_v61 = vld [vmem:[#allocation3 + $0x40] sm:$0xff]  ;;  %v6720_v62 = vld [vmem:[%s9768_s0 + $0x18] sm:$0xff] }
  0x51   :  { %199 = vmatprep.subr.mxu0 %v130_v27  ;;  %4948 = vmatprep.subr.mxu1 %v140_v35  ;;  %v6722_v63 = vld [vmem:[#allocation5 + $0xe0] sm:$0xff]  ;;  %v6725_v1 = vld [vmem:[#allocation5 + $0xd8] sm:$0xff]  ;;  %v6728_v2 = vld [vmem:[#allocation5 + $0xc8] sm:$0xff] }
  0x52   :  { %200 = vmatpush1.msra.mxu0 %v129_v28  ;;  %4949 = vmatpush3.msra.mxu1 %v140_v35  ;;  %v6732_v3 = vld [vmem:[#allocation5 + $0xc0] sm:$0xff]  ;;  %v119_v4 = vld [vmem:[#allocation3 + $0x28] sm:$0xff]  ;;  %v6741_v6 = vld [vmem:[#allocation5 + $0xb0] sm:$0xff] }
  0x53   :  { %201 = vmatprep.subr.mxu0 %v127_v30  ;;  %4950 = vmatprep.subr.mxu1 %v137_v38  ;;  %v6739_v5 = vld [vmem:[%s9768_s0 + $0x20] sm:$0xff]  ;;  %v6744_v7 = vld [vmem:[#allocation5 + $0xa8] sm:$0xff]  ;;  %v6747_v8 = vld [vmem:[#allocation5 + $0x98] sm:$0xff] }
  0x54   :  { %202 = vmatpush1.msra.mxu0 %v126_v31  ;;  %4951 = vmatpush3.msra.mxu1 %v137_v38  ;;  %v6751_v9 = vld [vmem:[#allocation5 + $0x90] sm:$0xff]  ;;  %v111_v11 = vld [vmem:[%s9768_s0 + $0x28] sm:$0xff]  ;;  %v6758_v12 = vld [vmem:[#allocation5 + $0x80] sm:$0xff] }
  0x55   :  { %203 = vmatprep.subr.mxu0 %v124_v33  ;;  %4952 = vmatprep.subr.mxu1 %v134_v41  ;;  %v116_v10 = vld [vmem:[#allocation3 + $0x10] sm:$0xff]  ;;  %v6761_v13 = vld [vmem:[#allocation5 + $0x78] sm:$0xff]  ;;  %v6767_v15 = vld [vmem:[#allocation5 + $0x60] sm:$0xff] }
  0x56   :  { %204 = vmatpush1.msra.mxu0 %v123_v34  ;;  %4953 = vmatpush3.msra.mxu1 %v134_v41  ;;  %v112_v16 = vld [vmem:[%s9768_s0 + $0x30] sm:$0xff]  ;;  %v6777_v18 = vld [vmem:[#allocation5 + $0x48] sm:$0xff]  ;;  %v6780_v19 = vld [vmem:[#allocation5 + $0x38] sm:$0xff] }
  0x57   :  { %205 = vmatprep.subr.mxu0 %v121_v36  ;;  %4954 = vmatprep.subr.mxu1 %v131_v44  ;;  %v6774_v17 = vld [vmem:[#allocation5 + $0x50] sm:$0xff]  ;;  %v6786_v21 = vld [vmem:[#allocation5 + $0x178] sm:$0xff]  ;;  %v6793_v23 = vld [vmem:[#allocation5 + $0x20] sm:$0xff] }
  0x58   :  { %206 = vmatpush1.msra.mxu0 %v120_v37  ;;  %4955 = vmatpush3.msra.mxu1 %v131_v44  ;;  %v6784_v20 = vld [vmem:[#allocation5 + $0x30] sm:$0xff]  ;;  %v113_v22 = vld [vmem:[%s9768_s0 + $0x38] sm:$0xff]  ;;  %v6800_v25 = vld [vmem:[#allocation5 + $0x8] sm:$0xff] }
  0x59   :  { %207 = vmatprep.subr.mxu0 %v118_v39  ;;  %4956 = vmatprep.subr.mxu1 %v128_v49  ;;  %v6796_v24 = vld [vmem:[#allocation5 + $0x18] sm:$0xff]  ;;  %v6804_v26 = vld [vmem:[#allocation5] sm:$0xff]  ;;  %v6812_v28 = vld [vmem:[#allocation5 + $0x148] sm:$0xff] }
  0x5a   :  { %208 = vmatpush1.msra.mxu0 %v117_v40  ;;  %4957 = vmatpush3.msra.mxu1 %v128_v49  ;;  %v6806_v27 = vld [vmem:[#allocation5 + $0x160] sm:$0xff]  ;;  %v6818_v29 = vld [vmem:[#allocation5 + $0x130] sm:$0xff]  ;;  %v6823_v30 = vld [vmem:[#allocation5 + $0x118] sm:$0xff] }
  0x5b   :  { %209 = vmatprep.subr.mxu0 %v115_v42  ;;  %4958 = vmatprep.subr.mxu1 %v125_v55  ;;  %v6829_v31 = vld [vmem:[#allocation5 + $0x100] sm:$0xff]  ;;  %v6835_v32 = vld [vmem:[#allocation5 + $0xe8] sm:$0xff]  ;;  %v6839_v33 = vld [vmem:[#allocation5 + $0xd0] sm:$0xff] }
  0x5c   :  { %210 = vmatpush1.msra.mxu0 %v114_v43  ;;  %4959 = vmatpush3.msra.mxu1 %v125_v55  ;;  %v6845_v34 = vld [vmem:[#allocation5 + $0xb8] sm:$0xff]  ;;  %v6851_v35 = vld [vmem:[#allocation5 + $0xa0] sm:$0xff]  ;;  %v6857_v36 = vld [vmem:[#allocation5 + $0x88] sm:$0xff]  ;;  %v164_v43 = vlaneseq }
  0x5d   :  { %244 = vmatmul.mubr.f32.vlgmr.msra.gmra.mxu0 %v6664_v14  ;;  %523 = vmatprep.subr.mxu0 %v6667_v45  ;;  %v6764_v14 = vld [vmem:[#allocation5 + $0x68] sm:$0xff]  ;;  %v6863_v37 = vld [vmem:[#allocation5 + $0x70] sm:$0xff]  ;;  %v6869_v38 = vld [vmem:[#allocation5 + $0x58] sm:$0xff] }
  0x5e   :  { %524 = vmatpush1.msra.mxu0 %v6669_v46  ;;  %249 = vmatprep.mubr.f32.mxu0 %v9867_v0  ;;  %v6875_v39 = vld [vmem:[#allocation5 + $0x40] sm:$0xff]  ;;  %v6881_v40 = vld [vmem:[#allocation5 + $0x28] sm:$0xff]  ;;  %v6887_v41 = vld [vmem:[#allocation5 + $0x10] sm:$0xff]  ;;  %v165_v44 = vshrl.u32 %v164_v43, 7 }
  0x5f   :  { %525 = vmatprep.subr.mxu0 %v6671_v47  ;;  %4960 = vmatprep.subr.mxu1 %v122_v61  ;;  %v6945_v42 = vld [vmem:[#allocation7 + $0x170] sm:$0xff] }
  0x60   :  { %526 = vmatpush1.msra.mxu0 %v6675_v48  ;;  %4961 = vmatpush3.msra.mxu1 %v122_v61 }
  0x61   :  { %250 = vmatmul.mubr.f32.gmra.mxu0 %v6682_v50  ;;  %527 = vmatprep.subr.mxu0 %v6684_v51 }
  0x62   :  { %528 = vmatpush1.msra.mxu0 %v6687_v52  ;;  %255 = vmatprep.mubr.f32.mxu0 %v9867_v0 }
  0x63   :  { %529 = vmatprep.subr.mxu0 %v6690_v53  ;;  %4962 = vmatprep.subr.mxu1 %v119_v4 }
  0x64   :  { %530 = vmatpush1.msra.mxu0 %v6694_v54  ;;  %4963 = vmatpush3.msra.mxu1 %v119_v4 }
  0x65   :  { %256 = vmatmul.mubr.f32.gmra.mxu0 %v6701_v56  ;;  %531 = vmatprep.subr.mxu0 %v6703_v57 }
  0x66   :  { %532 = vmatpush1.msra.mxu0 %v6706_v58  ;;  %261 = vmatprep.mubr.f32.mxu0 %v9867_v0 }
  0x67   :  { %533 = vmatprep.subr.mxu0 %v6709_v59  ;;  %4964 = vmatprep.subr.mxu1 %v116_v10 }
  0x68   :  { %534 = vmatpush1.msra.mxu0 %v6713_v60  ;;  %4965 = vmatpush3.msra.mxu1 %v116_v10 }
  0x69   :  { %262 = vmatmul.mubr.f32.gmra.mxu0 %v6720_v62  ;;  %535 = vmatprep.subr.mxu0 %v6722_v63 }
  0x6a   :  { %536 = vmatpush1.msra.mxu0 %v6725_v1  ;;  %267 = vmatprep.mubr.f32.mxu0 %v9867_v0 }
  0x6b   :  { %537 = vmatprep.subr.mxu0 %v6728_v2  ;;  %4978 = vmatprep.subr.mxu1 %v9867_v0 }
  0x6c   :  { %538 = vmatpush1.msra.mxu0 %v6732_v3  ;;  %4967 = vmatmul.mubr.f32.vlgmr.msra.gmra.mxu1 %v6682_v50 }
  0x6d   :  { %268 = vmatmul.mubr.f32.gmra.mxu0 %v6739_v5  ;;  %539 = vmatprep.subr.mxu0 %v6741_v6 }
  0x6e   :  { %540 = vmatpush1.msra.mxu0 %v6744_v7  ;;  %273 = vmatprep.mubr.f32.mxu0 %v9867_v0 }
  0x6f   :  { %541 = vmatprep.subr.mxu0 %v6747_v8  ;;  %4979 = vmatpush3.msra.mxu1 %v6786_v21 }
  0x70   :  { %542 = vmatpush1.msra.mxu0 %v6751_v9  ;;  %4980 = vmatprep.subr.mxu1 %v9867_v0 }
  0x71   :  { %274 = vmatmul.mubr.f32.gmra.mxu0 %v111_v11  ;;  %543 = vmatprep.subr.mxu0 %v6758_v12 }
  0x72   :  { %544 = vmatpush1.msra.mxu0 %v6761_v13  ;;  %279 = vmatprep.mubr.f32.mxu0 %v9867_v0 }
  0x73   :  { %545 = vmatprep.subr.mxu0 %v6764_v14  ;;  %4981 = vmatpush3.msra.mxu1 %v6806_v27 }
  0x74   :  { %546 = vmatpush1.msra.mxu0 %v6767_v15  ;;  %4982 = vmatprep.subr.mxu1 %v9867_v0 }
  0x75   :  { %280 = vmatmul.mubr.f32.gmra.mxu0 %v112_v16  ;;  %547 = vmatprep.subr.mxu0 %v6774_v17 }
  0x76   :  { %548 = vmatpush1.msra.mxu0 %v6777_v18  ;;  %285 = vmatprep.mubr.f32.mxu0 %v9867_v0 }
  0x77   :  { %549 = vmatprep.subr.mxu0 %v6780_v19  ;;  %4983 = vmatpush3.msra.mxu1 %v6812_v28 }
  0x78   :  { %550 = vmatpush1.msra.mxu0 %v6784_v20  ;;  %4969 = vmatprep.mubr.f32.mxu1 %v6701_v56 }
  0x79   :  { %286 = vmatmul.mubr.f32.gmra.mxu0 %v113_v22  ;;  %551 = vmatprep.subr.mxu0 %v6793_v23 }
  0x7a   :  { %552 = vmatpush1.msra.mxu0 %v6796_v24  ;;  %587 = vmatprep.mubr.f32.mxu0 %v9867_v0 }
  0x7b   :  { %553 = vmatprep.subr.mxu0 %v6800_v25  ;;  %4984 = vmatprep.subr.mxu1 %v9867_v0 }
  0x7c   :  { %554 = vmatpush1.msra.mxu0 %v6804_v26  ;;  %4970 = vmatmul.mubr.f32.gmra.mxu1 %v6720_v62 }
  0x7d   :  { %588 = vmatmul.mubr.f32.vlgmr.msra.gmra.mxu0 %v9867_v0  ;;  %4985 = vmatpush3.msra.mxu1 %v6818_v29 }
  0x7e   :  { %4972 = vmatprep.mubr.f32.mxu1 %v6739_v5  ;;  %4986 = vmatprep.subr.mxu1 %v9867_v0  ;;  %v6973_v5 = vsub.s32 2, %v165_v44 }
  0x7f   :  { %688 = vmatprep.subr.mxu0 %v6667_v45  ;;  %4987 = vmatpush3.msra.mxu1 %v6823_v30  ;;  %v6948_v45 = vsub.s32 0, %v165_v44 }
  0x80   :  { %689 = vmatpush1.msra.mxu0 %v6669_v46  ;;  %4988 = vmatprep.subr.mxu1 %v9867_v0  ;;  %v162_v46 = vld [vmem:[%s9771_s3] sm:$0x7]  ;;  %10112 = vst [vmem:[#allocation20_spill] sm:$0xff] %v6973_v5 }
  0x81   :  { %4973 = vmatmul.mubr.f32.gmra.mxu1 %v111_v11  ;;  %690 = vmatprep.subr.mxu0 %v6671_v47  ;;  %v167_v50 = vrot.slane %v162_v46, %v6948_v45  ;;  %v175_v10 = vrot.slane %v162_v46, %v6973_v5 }
  0x82   :  { %4989 = vmatpush3.msra.mxu1 %v6829_v31  ;;  %4975 = vmatprep.mubr.f32.mxu1 %v112_v16 }
  0x83   :  { %4990 = vmatprep.subr.mxu1 %v9867_v0  ;;  %691 = vmatpush1.msra.mxu0 %v6675_v48  ;;  %v6953_v48 = vsub.s32 1, %v165_v44 }
  0x84   :  { %4991 = vmatpush3.msra.mxu1 %v6835_v32  ;;  %692 = vmatprep.subr.mxu0 %v6684_v51 }
  0x85   :  { %4992 = vmatprep.subr.mxu1 %v9867_v0  ;;  %4976 = vmatmul.mubr.f32.gmra.mxu1 %v113_v22 }
  0x86   :  { %4993 = vmatpush3.msra.mxu1 %v6839_v33  ;;  %5010 = vmatprep.mubr.msk.f32.mxu1 %vm6572_vm0, %v9867_v0 }
  0x87   :  { %4994 = vmatprep.subr.mxu1 %v9867_v0  ;;  %693 = vmatpush1.msra.mxu0 %v6687_v52  ;;  %v171_v52 = vrot.slane %v162_v46, %v6953_v48 }
  0x88   :  { %4995 = vmatpush3.msra.mxu1 %v6845_v34  ;;  %694 = vmatprep.subr.mxu0 %v6690_v53 }
  0x89   :  { %4996 = vmatprep.subr.mxu1 %v9867_v0  ;;  %695 = vmatpush1.msra.mxu0 %v6694_v54 }
  0x8a   :  { %4997 = vmatpush3.msra.mxu1 %v6851_v35  ;;  %696 = vmatprep.subr.mxu0 %v6703_v57 }
  0x8b   :  { %4998 = vmatprep.subr.mxu1 %v9867_v0  ;;  %697 = vmatpush1.msra.mxu0 %v6706_v58 }
  0x8c   :  { %4999 = vmatpush3.msra.mxu1 %v6857_v36  ;;  %698 = vmatprep.subr.mxu0 %v6709_v59 }
  0x8d   :  { %5000 = vmatprep.subr.mxu1 %v9867_v0  ;;  %699 = vmatpush1.msra.mxu0 %v6713_v60 }
  0x8e   :  { %5001 = vmatpush3.msra.mxu1 %v6863_v37  ;;  %700 = vmatprep.subr.mxu0 %v6722_v63 }
  0x8f   :  { %5002 = vmatprep.subr.mxu1 %v9867_v0  ;;  %701 = vmatpush1.msra.mxu0 %v6725_v1 }
  0x90   :  { %5003 = vmatpush3.msra.mxu1 %v6869_v38  ;;  %702 = vmatprep.subr.mxu0 %v6728_v2 }
  0x91   :  { %5004 = vmatprep.subr.mxu1 %v9867_v0  ;;  %703 = vmatpush1.msra.mxu0 %v6732_v3 }
  0x92   :  { %5005 = vmatpush3.msra.mxu1 %v6875_v39  ;;  %704 = vmatprep.subr.mxu0 %v6741_v6 }
  0x93   :  { %5006 = vmatprep.subr.mxu1 %v9867_v0  ;;  %705 = vmatpush1.msra.mxu0 %v6744_v7 }
  0x94   :  { %5007 = vmatpush3.msra.mxu1 %v6881_v40  ;;  %706 = vmatprep.subr.mxu0 %v6747_v8 }
  0x95   :  { %5008 = vmatprep.subr.mxu1 %v9867_v0  ;;  %707 = vmatpush1.msra.mxu0 %v6751_v9 }
  0x96   :  { %5009 = vmatpush3.msra.mxu1 %v6887_v41  ;;  %708 = vmatprep.subr.mxu0 %v6758_v12 }
  0x97   :  { %5011 = vmatmul.mubr.f32.vlgmr.msra.gmra.mxu1 %v9867_v0  ;;  %5013 = vmatprep.subr.mxu1 %v9867_v0 }
  0x98   :  { %5014 = vmatpush3.msra.mxu1 %v6786_v21  ;;  %709 = vmatpush1.msra.mxu0 %v6761_v13 }
  0x99   :  { %5015 = vmatprep.subr.mxu1 %v9867_v0  ;;  %710 = vmatprep.subr.mxu0 %v6764_v14  ;;  %v421_v14 = vld [vmem:[%s9772_s4] sm:$0x7] }
  0x9a   :  { %5016 = vmatpush3.msra.mxu1 %v6806_v27  ;;  %711 = vmatpush1.msra.mxu0 %v6767_v15 }
  0x9b   :  { %5017 = vmatprep.subr.mxu1 %v9867_v0  ;;  %712 = vmatprep.subr.mxu0 %v6774_v17 }
  0x9c   :  { %5018 = vmatpush3.msra.mxu1 %v6812_v28  ;;  %713 = vmatpush1.msra.mxu0 %v6777_v18 }
  0x9d   :  { %5019 = vmatprep.subr.mxu1 %v9867_v0  ;;  %714 = vmatprep.subr.mxu0 %v6780_v19 }
  0x9e   :  { %5020 = vmatpush3.msra.mxu1 %v6818_v29  ;;  %715 = vmatpush1.msra.mxu0 %v6784_v20  ;;  %v6992_v20 = vrot.slane %v421_v14, %v6948_v45 }
  0x9f   :  { %5021 = vmatprep.subr.mxu1 %v9867_v0  ;;  %716 = vmatprep.subr.mxu0 %v6793_v23 }
  0xa0   :  { %5022 = vmatpush3.msra.mxu1 %v6823_v30  ;;  %717 = vmatpush1.msra.mxu0 %v6796_v24  ;;  %10118 = vst [vmem:[#allocation26_spill] sm:$0xff] %v6992_v20 }
  0xa1   :  { %5023 = vmatprep.subr.mxu1 %v9867_v0  ;;  %718 = vmatprep.subr.mxu0 %v6800_v25 }
  0xa2   :  { %5024 = vmatpush3.msra.mxu1 %v6829_v31  ;;  %719 = vmatpush1.msra.mxu0 %v6804_v26 }
  0xa3   :  { %5025 = vmatprep.subr.mxu1 %v9867_v0  ;;  %752 = vmatprep.mubr.f32.mxu0 %v9867_v0 }
  0xa4   :  { %5026 = vmatpush3.msra.mxu1 %v6835_v32  ;;  %5045 = vmatprep.mubr.msk.f32.mxu1 %vm6572_vm0, %v9867_v0 }
  0xa5   :  { %5027 = vmatprep.subr.mxu1 %v9867_v0  ;;  %897 = vmatprep.subr.mxu0 %v6945_v42 }
  0xa6   :  { %5028 = vmatpush3.msra.mxu1 %v6839_v33 }
  0xa7   :  { %5029 = vmatprep.subr.mxu1 %v9867_v0 }
  0xa8   :  { %5030 = vmatpush3.msra.mxu1 %v6845_v34 }
  0xa9   :  { %5031 = vmatprep.subr.mxu1 %v9867_v0 }
  0xaa   :  { %5032 = vmatpush3.msra.mxu1 %v6851_v35 }
  0xab   :  { %5033 = vmatprep.subr.mxu1 %v9867_v0 }
  0xac   :  { %5034 = vmatpush3.msra.mxu1 %v6857_v36 }
  0xad   :  { %5035 = vmatprep.subr.mxu1 %v9867_v0 }
  0xae   :  { %5036 = vmatpush3.msra.mxu1 %v6863_v37 }
  0xaf   :  { %5037 = vmatprep.subr.mxu1 %v9867_v0 }
  0xb0   :  { %5038 = vmatpush3.msra.mxu1 %v6869_v38 }
  0xb1   :  { %5039 = vmatprep.subr.mxu1 %v9867_v0 }
  0xb2   :  { %5040 = vmatpush3.msra.mxu1 %v6875_v39 }
  0xb3   :  { %5041 = vmatprep.subr.mxu1 %v9867_v0 }
  0xb4   :  { %5042 = vmatpush3.msra.mxu1 %v6881_v40 }
  0xb5   :  { %5043 = vmatprep.subr.mxu1 %v9867_v0 }
  0xb6   :  { %5044 = vmatpush3.msra.mxu1 %v6887_v41 }
  0xb7   :  { %5048 = vmatprep.subr.mxu1 %v9867_v0 }
 0x11d   :  { %v245_v47 = vpop.f32.mrf.mxu0 }
 0x11e   :  { %v246_v43 = vadd.f32 %v245_v47, %v167_v50 }
 0x11f   :  { %v247_v49 = vpop.f32.mrf.mxu0 }
 0x121   :  { %v251_v51 = vpop.f32.mrf.mxu0 }
 0x122   :  { %v6957_v53 = vadd.f32 %v251_v51, %v167_v50 }
 0x123   :  { %v253_v54 = vpop.f32.mrf.mxu0 }
 0x124   :  { %v6959_v55 = vadd.f32 %v253_v54, %v171_v52 }
 0x125   :  { %v257_v56 = vpop.f32.mrf.mxu0 }
 0x126   :  { %v6961_v57 = vadd.f32 %v257_v56, %v167_v50 }
 0x127   :  { %v259_v58 = vpop.f32.mrf.mxu0 }
 0x128   :  { %10106 = vst [vmem:[#allocation14_spill] sm:$0xff] %v6961_v57  ;;  %v6963_v59 = vadd.f32 %v259_v58, %v171_v52  ;;  %v7129_v57 = vld [vmem:[#allocation7 + $0x70] sm:$0xff] }
 0x129   :  { %v263_v60 = vpop.f32.mrf.mxu0  ;;  %10135 = vst [vmem:[#allocation43_spill] sm:$0xff] %v7129_v57 }
 0x12a   :  { %10107 = vst [vmem:[#allocation15_spill] sm:$0xff] %v6963_v59  ;;  %v6965_v61 = vadd.f32 %v263_v60, %v167_v50  ;;  %v7127_v59 = vld [vmem:[#allocation7 + $0x60] sm:$0xff] }
 0x12b   :  { %v265_v62 = vpop.f32.mrf.mxu0  ;;  %10134 = vst [vmem:[#allocation42_spill] sm:$0xff] %v7127_v59 }
 0x12c   :  { %10108 = vst [vmem:[#allocation16_spill] sm:$0xff] %v6965_v61  ;;  %v6967_v63 = vadd.f32 %v265_v62, %v171_v52  ;;  %v4968_v15 = vpop.f32.mrf.mxu1  ;;  %v7002_v62 = vrot.slane %v421_v14, %v6953_v48  ;;  %v7119_v61 = vld [vmem:[#allocation7 + $0x88] sm:$0xff] }
 0x12d   :  { %v269_v1 = vpop.f32.mrf.mxu0  ;;  %v6987_v17 = vadd.f32 %v4968_v15, %v175_v10  ;;  %v248_v15 = vadd.f32 %v247_v49, %v171_v52  ;;  %10132 = vst [vmem:[#allocation40_spill] sm:$0xff] %v7119_v61 }
 0x12e   :  { %10109 = vst [vmem:[#allocation17_spill] sm:$0xff] %v6967_v63  ;;  %v6969_v2 = vadd.f32 %v269_v1, %v167_v50  ;;  %v358_v25 = vpop.f32.mrf.mxu1  ;;  %10122 = vst [vmem:[#allocation30_spill] sm:$0xff] %v7002_v62  ;;  %v7117_v63 = vld [vmem:[#allocation7 + $0x78] sm:$0xff] }
 0x12f   :  { %v271_v3 = vpop.f32.mrf.mxu0  ;;  %10131 = vst [vmem:[#allocation39_spill] sm:$0xff] %v7117_v63 }
 0x130   :  { %10110 = vst [vmem:[#allocation18_spill] sm:$0xff] %v6969_v2  ;;  %v6971_v4 = vadd.f32 %v271_v3, %v171_v52  ;;  %v7109_v2 = vld [vmem:[#allocation7 + $0xa0] sm:$0xff] }
 0x131   :  { %v275_v6 = vpop.f32.mrf.mxu0  ;;  %10129 = vst [vmem:[#allocation37_spill] sm:$0xff] %v7109_v2 }
 0x132   :  { %10111 = vst [vmem:[#allocation19_spill] sm:$0xff] %v6971_v4  ;;  %v6975_v7 = vadd.f32 %v275_v6, %v167_v50  ;;  %v7107_v4 = vld [vmem:[#allocation7 + $0x90] sm:$0xff] }
 0x133   :  { %v277_v8 = vpop.f32.mrf.mxu0  ;;  %10128 = vst [vmem:[#allocation36_spill] sm:$0xff] %v7107_v4 }
 0x134   :  { %10113 = vst [vmem:[#allocation21_spill] sm:$0xff] %v6975_v7  ;;  %v6977_v9 = vadd.f32 %v277_v8, %v171_v52  ;;  %v7099_v7 = vld [vmem:[#allocation7 + $0xb8] sm:$0xff] }
 0x135   :  { %v281_v11 = vpop.f32.mrf.mxu0 }
 0x136   :  { %10114 = vst [vmem:[#allocation22_spill] sm:$0xff] %v6977_v9  ;;  %v6980_v12 = vadd.f32 %v281_v11, %v167_v50  ;;  %v7097_v9 = vld [vmem:[#allocation7 + $0xa8] sm:$0xff] }
 0x137   :  { %v283_v13 = vpop.f32.mrf.mxu0 }
 0x138   :  { %10115 = vst [vmem:[#allocation23_spill] sm:$0xff] %v6980_v12  ;;  %v6985_v16 = vadd.f32 %v283_v13, %v171_v52  ;;  %v7089_v12 = vld [vmem:[#allocation7 + $0xd0] sm:$0xff] }
 0x139   :  { %v287_v18 = vpop.f32.mrf.mxu0 }
 0x13a   :  { %10116 = vst [vmem:[#allocation24_spill] sm:$0xff] %v6985_v16  ;;  %v6989_v19 = vadd.f32 %v287_v18, %v167_v50  ;;  %v7087_v16 = vld [vmem:[#allocation7 + $0xc0] sm:$0xff] }
 0x13b   :  { %v289_v22 = vpop.f32.mrf.mxu0 }
 0x13c   :  { %10117 = vst [vmem:[#allocation25_spill] sm:$0xff] %v6989_v19  ;;  %v6994_v23 = vadd.f32 %v289_v22, %v171_v52  ;;  %v4971_v46 = vpop.f32.mrf.mxu1  ;;  %v7079_v19 = vld [vmem:[#allocation7 + $0xe8] sm:$0xff] }
 0x13d   :  { %v589_v24 = vpop.f32.mrf.mxu0  ;;  %v6997_v54 = vadd.f32 %v4971_v46, %v175_v10 }
 0x13e   :  { %10119 = vst [vmem:[#allocation27_spill] sm:$0xff] %v6994_v23  ;;  %v590_v44 = vadd.f32 %v589_v24, %v6992_v20  ;;  %v368_v56 = vpop.f32.mrf.mxu1  ;;  %v7077_v23 = vld [vmem:[#allocation7 + $0xd8] sm:$0xff] }
 0x13f   :  { %10120 = vst [vmem:[#allocation28_spill] sm:$0xff] %v6997_v54  ;;  %v6999_v60 = vadd.f32 %v368_v56, %v175_v10  ;;  %v591_v3 = vpop.f32.mrf.mxu0  ;;  %v7014_v56 = vrot.slane %v421_v14, %v6973_v5  ;;  %v7021_v14 = vld [vmem:[#allocation7 + $0x178] sm:$0xff]  ;;  %v7113_v54 = vld [vmem:[#allocation7 + $0x80] sm:$0xff]  ;;  %v7133_v5 = vld [vmem:[#allocation7 + $0x50] sm:$0xff] }
 0x140   :  { %v664_v51 = vadd.f32 %v590_v44, %v246_v43  ;;  %v592_v50 = vadd.f32 %v591_v3, %v7002_v62  ;;  %10130 = vst [vmem:[#allocation38_spill] sm:$0xff] %v7113_v54  ;;  %10136 = vst [vmem:[#allocation44_spill] sm:$0xff] %v7133_v5 }
 0x141   :  { %10121 = vst [vmem:[#allocation29_spill] sm:$0xff] %v6999_v60  ;;  %v4974_v1 = vpop.f32.mrf.mxu1  ;;  %10127 = vst [vmem:[#allocation35_spill] sm:$0xff] %v7014_v56  ;;  %v7123_v60 = vld [vmem:[#allocation7 + $0x68] sm:$0xff] }
 0x142   :  { %v4452_v58 = vmul.f32 -1.442695, %v664_v51  ;;  %v7004_v6 = vadd.f32 %v4974_v1, %v175_v10  ;;  %v671_v24 = vadd.f32 %v592_v50, %v248_v15  ;;  %10133 = vst [vmem:[#allocation41_spill] sm:$0xff] %v7123_v60 }
 0x143   :  { %v378_v8 = vpop.f32.mrf.mxu1 }
 0x144   :  { %5864 = vpow2.f32 %v4452_v58  ;;  %10123 = vst [vmem:[#allocation31_spill] sm:$0xff] %v7004_v6  ;;  %v7006_v47 = vadd.f32 %v378_v8, %v175_v10  ;;  %v4453_v43 = vmul.f32 -1.442695, %v671_v24  ;;  %v7093_v6 = vld [vmem:[#allocation7 + $0xb0] sm:$0xff] }
 0x145   :  { %v4977_v11 = vpop.f32.mrf.mxu1 }
 0x146   :  { %10124 = vst [vmem:[#allocation32_spill] sm:$0xff] %v7006_v47  ;;  %v7009_v13 = vadd.f32 %v4977_v11, %v175_v10  ;;  %5866 = vpow2.f32 %v4453_v43  ;;  %v359_v11 = vadd.f32 %v358_v25, %v175_v10  ;;  %v7029_v25 = vld [vmem:[#allocation7 + $0x160] sm:$0xff]  ;;  %v7103_v47 = vld [vmem:[#allocation7 + $0x98] sm:$0xff] }
 0x147   :  { %v388_v18 = vpop.f32.mrf.mxu1 }
 0x148   :  { %10125 = vst [vmem:[#allocation33_spill] sm:$0xff] %v7009_v13  ;;  %v7011_v22 = vadd.f32 %v388_v18, %v175_v10  ;;  %v7027_v10 = vld [vmem:[#allocation7 + $0x150] sm:$0xff]  ;;  %v7073_v13 = vld [vmem:[#allocation7 + $0xe0] sm:$0xff] }
 0x14a   :  { %10126 = vst [vmem:[#allocation34_spill] sm:$0xff] %v7011_v22  ;;  %v7083_v22 = vld [vmem:[#allocation7 + $0xc8] sm:$0xff] }
 0x151   :  { %v5865_v44 = vpop.eup %5864 }
 0x152   :  { %v668_v46 = vadd.f32 1.0, %v5865_v44 }
 0x153   :  { %v5867_v3 = vpop.eup %5866 }
 0x154   :  { %5868 = vrcp.f32 %v668_v46  ;;  %v675_v52 = vadd.f32 1.0, %v5867_v3  ;;  %v7019_v46 = vld [vmem:[#allocation7 + $0x168] sm:$0xff] }
 0x155   :  { %v7039_v3 = vld [vmem:[#allocation7 + $0x148] sm:$0xff] }
 0x157   :  { %v660_v51 = vpop.f32.mrf.mxu1 }
 0x158   :  { %v661_v1 = vadd.f32 %v660_v51, %v7014_v56  ;;  %v7033_v51 = vld [vmem:[#allocation7 + $0x140] sm:$0xff] }
 0x159   :  { %v5012_v58 = vpop.f32.mrf.mxu1 }
 0x15a   :  { %v7023_v58 = vld [vmem:[#allocation7 + $0x158] sm:$0xff] }
 0x161   :  { %v5869_v8 = vpop.eup %5868 }
 0x162   :  { %v678_v49 = vmul.f32 %v5869_v8, %v661_v1  ;;  %v7037_v1 = vld [vmem:[#allocation7 + $0x138] sm:$0xff]  ;;  %v7043_v8 = vld [vmem:[#allocation7 + $0x128] sm:$0xff] }
 0x164   :  { %v679_v18 = vadd.f32 %v678_v49, %v359_v11  ;;  %v7047_v11 = vld [vmem:[#allocation7 + $0x120] sm:$0xff]  ;;  %v7049_v49 = vld [vmem:[#allocation7 + $0x130] sm:$0xff] }
 0x166   :  { %5870 = vtanh.f32 %v679_v18  ;;  %v7057_v18 = vld [vmem:[#allocation7 + $0x108] sm:$0xff] }
 0x167   :  { %5872 = vrcp.f32 %v675_v52  ;;  %v7053_v52 = vld [vmem:[#allocation7 + $0x110] sm:$0xff] }
 0x173   :  { %v5871_v50 = vpop.eup %5870 }
 0x174   :  { %v681_v15 = vsub.f32 0.0, %v5871_v50  ;;  %v5873_v24 = vpop.eup %5872 }
 0x176   :  { %v682_v43 = vmul.f32 %v5873_v24, %v681_v15  ;;  %v7063_v15 = vld [vmem:[#allocation7 + $0xf8] sm:$0xff]  ;;  %v7067_v24 = vld [vmem:[#allocation7 + $0xf0] sm:$0xff] }
 0x178   :  { %v7017_v44 = vadd.f32 %v5871_v50, %v682_v43  ;;  %v7059_v50 = vld [vmem:[#allocation7 + $0x118] sm:$0xff]  ;;  %v7069_v43 = vld [vmem:[#allocation7 + $0x100] sm:$0xff] }
 0x17a   :  { %753 = vmatmul.mubr.f32.vlgmr.msra.gmra.mxu0 %v7017_v44  ;;  %5046 = vmatmul.mubr.f32.vlgmr.msra.gmra.mxu1 %v7017_v44 }
 0x17b   :  { %898 = vmatpush1.msra.mxu0 %v7019_v46  ;;  %5049 = vmatpush3.msra.mxu1 %v7021_v14 }
 0x17c   :  { %899 = vmatprep.subr.mxu0 %v7023_v58  ;;  %5050 = vmatprep.subr.mxu1 %v9867_v0 }
 0x17d   :  { %900 = vmatpush1.msra.mxu0 %v7027_v10  ;;  %5051 = vmatpush3.msra.mxu1 %v7029_v25 }
 0x17e   :  { %901 = vmatprep.subr.mxu0 %v7033_v51  ;;  %5052 = vmatprep.subr.mxu1 %v9867_v0 }
 0x17f   :  { %902 = vmatpush1.msra.mxu0 %v7037_v1  ;;  %5053 = vmatpush3.msra.mxu1 %v7039_v3 }
 0x180   :  { %903 = vmatprep.subr.mxu0 %v7043_v8  ;;  %5054 = vmatprep.subr.mxu1 %v9867_v0 }
 0x181   :  { %904 = vmatpush1.msra.mxu0 %v7047_v11  ;;  %5055 = vmatpush3.msra.mxu1 %v7049_v49 }
 0x182   :  { %905 = vmatprep.subr.mxu0 %v7053_v52  ;;  %5056 = vmatprep.subr.mxu1 %v9867_v0 }
 0x183   :  { %906 = vmatpush1.msra.mxu0 %v7057_v18  ;;  %5057 = vmatpush3.msra.mxu1 %v7059_v50 }
 0x184   :  { %907 = vmatprep.subr.mxu0 %v7063_v15  ;;  %5058 = vmatprep.subr.mxu1 %v9867_v0 }
 0x185   :  { %908 = vmatpush1.msra.mxu0 %v7067_v24  ;;  %5059 = vmatpush3.msra.mxu1 %v7069_v43 }
 0x186   :  { %909 = vmatprep.subr.mxu0 %v7073_v13  ;;  %5060 = vmatprep.subr.mxu1 %v9867_v0 }
 0x187   :  { %910 = vmatpush1.msra.mxu0 %v7077_v23  ;;  %5061 = vmatpush3.msra.mxu1 %v7079_v19 }
 0x188   :  { %911 = vmatprep.subr.mxu0 %v7083_v22  ;;  %5062 = vmatprep.subr.mxu1 %v9867_v0 }
 0x189   :  { %912 = vmatpush1.msra.mxu0 %v7087_v16  ;;  %5063 = vmatpush3.msra.mxu1 %v7089_v12 }
 0x18a   :  { %913 = vmatprep.subr.mxu0 %v7093_v6  ;;  %5064 = vmatprep.subr.mxu1 %v9867_v0 }
 0x18b   :  { %914 = vmatpush1.msra.mxu0 %v7097_v9  ;;  %5065 = vmatpush3.msra.mxu1 %v7099_v7 }
 0x18c   :  { %915 = vmatprep.subr.mxu0 %v7103_v47  ;;  %5066 = vmatprep.subr.mxu1 %v9867_v0 }
 0x18d   :  { %916 = vmatpush1.msra.mxu0 %v7107_v4  ;;  %5067 = vmatpush3.msra.mxu1 %v7109_v2  ;;  %v7137_v2 = vld [vmem:[#allocation7 + $0x48] sm:$0xff]  ;;  %v7139_v4 = vld [vmem:[#allocation7 + $0x58] sm:$0xff] }
 0x18e   :  { %917 = vmatprep.subr.mxu0 %v7113_v54  ;;  %5068 = vmatprep.subr.mxu1 %v9867_v0  ;;  %10137 = vst [vmem:[#allocation45_spill] sm:$0xff] %v7137_v2  ;;  %10138 = vst [vmem:[#allocation46_spill] sm:$0xff] %v7139_v4  ;;  %v7143_v54 = vld [vmem:[#allocation7 + $0x38] sm:$0xff] }
 0x18f   :  { %918 = vmatpush1.msra.mxu0 %v7117_v63  ;;  %5069 = vmatpush3.msra.mxu1 %v7119_v61  ;;  %10139 = vst [vmem:[#allocation47_spill] sm:$0xff] %v7143_v54  ;;  %v7147_v61 = vld [vmem:[#allocation7 + $0x30] sm:$0xff]  ;;  %v7149_v63 = vld [vmem:[#allocation7 + $0x40] sm:$0xff] }
 0x190   :  { %919 = vmatprep.subr.mxu0 %v7123_v60  ;;  %5070 = vmatprep.subr.mxu1 %v9867_v0  ;;  %10140 = vst [vmem:[#allocation48_spill] sm:$0xff] %v7147_v61  ;;  %10141 = vst [vmem:[#allocation49_spill] sm:$0xff] %v7149_v63  ;;  %v7153_v60 = vld [vmem:[#allocation7 + $0x20] sm:$0xff] }
 0x191   :  { %920 = vmatpush1.msra.mxu0 %v7127_v59  ;;  %5071 = vmatpush3.msra.mxu1 %v7129_v57  ;;  %10142 = vst [vmem:[#allocation50_spill] sm:$0xff] %v7153_v60  ;;  %v7157_v57 = vld [vmem:[#allocation7 + $0x18] sm:$0xff]  ;;  %v7159_v59 = vld [vmem:[#allocation7 + $0x28] sm:$0xff] }
 0x192   :  { %921 = vmatprep.subr.mxu0 %v7133_v5  ;;  %5072 = vmatprep.subr.mxu1 %v9867_v0  ;;  %10143 = vst [vmem:[#allocation51_spill] sm:$0xff] %v7157_v57  ;;  %10144 = vst [vmem:[#allocation52_spill] sm:$0xff] %v7159_v59  ;;  %v7163_v5 = vld [vmem:[#allocation7 + $0x8] sm:$0xff] }
 0x193   :  { %922 = vmatpush1.msra.mxu0 %v7137_v2  ;;  %5073 = vmatpush3.msra.mxu1 %v7139_v4  ;;  %10145 = vst [vmem:[#allocation53_spill] sm:$0xff] %v7163_v5  ;;  %v7167_v4 = vld [vmem:[#allocation7] sm:$0xff]  ;;  %v7208_v2 = vld [vmem:[#allocation8 + $0x148] sm:$0xff] }
 0x194   :  { %923 = vmatprep.subr.mxu0 %v7143_v54  ;;  %5074 = vmatprep.subr.mxu1 %v9867_v0  ;;  %10146 = vst [vmem:[#allocation54_spill] sm:$0xff] %v7167_v4  ;;  %v7171_v54 = vld [vmem:[#allocation7 + $0x10] sm:$0xff]  ;;  %10157 = vst [vmem:[#allocation65_spill] sm:$0xff] %v7208_v2 }
 0x195   :  { %924 = vmatpush1.msra.mxu0 %v7147_v61  ;;  %5075 = vmatpush3.msra.mxu1 %v7149_v63  ;;  %10147 = vst [vmem:[#allocation55_spill] sm:$0xff] %v7171_v54  ;;  %v7177_v63 = vld [vmem:[#allocation8 + $0x170] sm:$0xff]  ;;  %v7201_v61 = vld [vmem:[#allocation8 + $0x138] sm:$0xff] }
 0x196   :  { %925 = vmatprep.subr.mxu0 %v7153_v60  ;;  %5076 = vmatprep.subr.mxu1 %v9867_v0  ;;  %10148 = vst [vmem:[#allocation56_spill] sm:$0xff] %v7177_v63  ;;  %v7198_v60 = vld [vmem:[#allocation8 + $0x160] sm:$0xff]  ;;  %10155 = vst [vmem:[#allocation63_spill] sm:$0xff] %v7201_v61 }
 0x197   :  { %926 = vmatpush1.msra.mxu0 %v7157_v57  ;;  %5077 = vmatpush3.msra.mxu1 %v7159_v59  ;;  %v7182_v57 = vld [vmem:[#allocation8 + $0x168] sm:$0xff]  ;;  %v7188_v59 = vld [vmem:[#allocation8 + $0x178] sm:$0xff]  ;;  %10154 = vst [vmem:[#allocation62_spill] sm:$0xff] %v7198_v60 }
 0x198   :  { %927 = vmatprep.subr.mxu0 %v7163_v5  ;;  %5078 = vmatprep.subr.mxu1 %v9867_v0  ;;  %10149 = vst [vmem:[#allocation57_spill] sm:$0xff] %v7182_v57  ;;  %v7186_v5 = vld [vmem:[#allocation8 + $0x158] sm:$0xff]  ;;  %10151 = vst [vmem:[#allocation59_spill] sm:$0xff] %v7188_v59 }
 0x199   :  { %928 = vmatpush1.msra.mxu0 %v7167_v4  ;;  %961 = vmatprep.mubr.f32.mxu0 %v9867_v0  ;;  %10150 = vst [vmem:[#allocation58_spill] sm:$0xff] %v7186_v5  ;;  %v7191_v4 = vld [vmem:[#allocation8 + $0x150] sm:$0xff] }
 0x19a   :  { %5079 = vmatpush3.msra.mxu1 %v7171_v54  ;;  %5080 = vmatprep.mubr.msk.f32.mxu1 %vm6572_vm0, %v9867_v0  ;;  %10152 = vst [vmem:[#allocation60_spill] sm:$0xff] %v7191_v4  ;;  %v7195_v54 = vld [vmem:[#allocation8 + $0x140] sm:$0xff] }
 0x19b   :  { %962 = vmatmul.mubr.f32.vlgmr.msra.gmra.mxu0 %v7017_v44  ;;  %5081 = vmatmul.mubr.f32.vlgmr.msra.gmra.mxu1 %v7017_v44  ;;  %10153 = vst [vmem:[#allocation61_spill] sm:$0xff] %v7195_v54 }
 0x19c   :  { %1086 = vmatprep.subr.mxu0 %v7177_v63  ;;  %1150 = vmatprep.mubr.f32.mxu0 %v9867_v0  ;;  %v7205_v63 = vld [vmem:[#allocation8 + $0x128] sm:$0xff] }
 0x19d   :  { %1087 = vmatpush1.msra.mxu0 %v7182_v57  ;;  %5083 = vmatprep.subr.mxu1 %v9867_v0  ;;  %10156 = vst [vmem:[#allocation64_spill] sm:$0xff] %v7205_v63  ;;  %v7211_v57 = vld [vmem:[#allocation8 + $0x120] sm:$0xff] }
 0x19e   :  { %1088 = vmatprep.subr.mxu0 %v7186_v5  ;;  %5084 = vmatpush3.msra.mxu1 %v7188_v59  ;;  %10158 = vst [vmem:[#allocation66_spill] sm:$0xff] %v7211_v57  ;;  %v7215_v5 = vld [vmem:[#allocation8 + $0x110] sm:$0xff] }
 0x19f   :  { %1089 = vmatpush1.msra.mxu0 %v7191_v4  ;;  %5085 = vmatprep.subr.mxu1 %v9867_v0  ;;  %10159 = vst [vmem:[#allocation67_spill] sm:$0xff] %v7215_v5  ;;  %v7218_v59 = vld [vmem:[#allocation8 + $0x130] sm:$0xff]  ;;  %v7221_v4 = vld [vmem:[#allocation8 + $0x108] sm:$0xff] }
 0x1a0   :  { %1090 = vmatprep.subr.mxu0 %v7195_v54  ;;  %5086 = vmatpush3.msra.mxu1 %v7198_v60  ;;  %10160 = vst [vmem:[#allocation68_spill] sm:$0xff] %v7218_v59  ;;  %10161 = vst [vmem:[#allocation69_spill] sm:$0xff] %v7221_v4  ;;  %v7225_v54 = vld [vmem:[#allocation8 + $0xf8] sm:$0xff] }
 0x1a1   :  { %1091 = vmatpush1.msra.mxu0 %v7201_v61  ;;  %5087 = vmatprep.subr.mxu1 %v9867_v0  ;;  %10162 = vst [vmem:[#allocation70_spill] sm:$0xff] %v7225_v54  ;;  %v7228_v60 = vld [vmem:[#allocation8 + $0x118] sm:$0xff]  ;;  %v7231_v61 = vld [vmem:[#allocation8 + $0xf0] sm:$0xff] }
 0x1a2   :  { %1092 = vmatprep.subr.mxu0 %v7205_v63  ;;  %5088 = vmatpush3.msra.mxu1 %v7208_v2  ;;  %10163 = vst [vmem:[#allocation71_spill] sm:$0xff] %v7228_v60  ;;  %10164 = vst [vmem:[#allocation72_spill] sm:$0xff] %v7231_v61  ;;  %v7235_v63 = vld [vmem:[#allocation8 + $0xe0] sm:$0xff] }
 0x1a3   :  { %1093 = vmatpush1.msra.mxu0 %v7211_v57  ;;  %5089 = vmatprep.subr.mxu1 %v9867_v0  ;;  %10165 = vst [vmem:[#allocation73_spill] sm:$0xff] %v7235_v63  ;;  %v7238_v2 = vld [vmem:[#allocation8 + $0x100] sm:$0xff]  ;;  %v7241_v57 = vld [vmem:[#allocation8 + $0xd8] sm:$0xff] }
 0x1a4   :  { %1094 = vmatprep.subr.mxu0 %v7215_v5  ;;  %5090 = vmatpush3.msra.mxu1 %v7218_v59  ;;  %10166 = vst [vmem:[#allocation74_spill] sm:$0xff] %v7238_v2  ;;  %10167 = vst [vmem:[#allocation75_spill] sm:$0xff] %v7241_v57  ;;  %v7245_v5 = vld [vmem:[#allocation8 + $0xc8] sm:$0xff] }
 0x1a5   :  { %1095 = vmatpush1.msra.mxu0 %v7221_v4  ;;  %5091 = vmatprep.subr.mxu1 %v9867_v0  ;;  %10168 = vst [vmem:[#allocation76_spill] sm:$0xff] %v7245_v5  ;;  %v7248_v59 = vld [vmem:[#allocation8 + $0xe8] sm:$0xff]  ;;  %v7251_v4 = vld [vmem:[#allocation8 + $0xc0] sm:$0xff] }
 0x1a6   :  { %1096 = vmatprep.subr.mxu0 %v7225_v54  ;;  %5092 = vmatpush3.msra.mxu1 %v7228_v60  ;;  %10169 = vst [vmem:[#allocation77_spill] sm:$0xff] %v7248_v59  ;;  %10170 = vst [vmem:[#allocation78_spill] sm:$0xff] %v7251_v4  ;;  %v7255_v54 = vld [vmem:[#allocation8 + $0xb0] sm:$0xff] }
 0x1a7   :  { %1097 = vmatpush1.msra.mxu0 %v7231_v61  ;;  %5093 = vmatprep.subr.mxu1 %v9867_v0  ;;  %10171 = vst [vmem:[#allocation79_spill] sm:$0xff] %v7255_v54  ;;  %v7258_v60 = vld [vmem:[#allocation8 + $0xd0] sm:$0xff]  ;;  %v7261_v61 = vld [vmem:[#allocation8 + $0xa8] sm:$0xff] }
 0x1a8   :  { %1098 = vmatprep.subr.mxu0 %v7235_v63  ;;  %5094 = vmatpush3.msra.mxu1 %v7238_v2  ;;  %10172 = vst [vmem:[#allocation80_spill] sm:$0xff] %v7258_v60  ;;  %10173 = vst [vmem:[#allocation81_spill] sm:$0xff] %v7261_v61  ;;  %v7265_v63 = vld [vmem:[#allocation8 + $0x98] sm:$0xff] }
 0x1a9   :  { %1099 = vmatpush1.msra.mxu0 %v7241_v57  ;;  %5095 = vmatprep.subr.mxu1 %v9867_v0  ;;  %10174 = vst [vmem:[#allocation82_spill] sm:$0xff] %v7265_v63  ;;  %v7268_v2 = vld [vmem:[#allocation8 + $0xb8] sm:$0xff]  ;;  %v7271_v57 = vld [vmem:[#allocation8 + $0x90] sm:$0xff] }
 0x1aa   :  { %1100 = vmatprep.subr.mxu0 %v7245_v5  ;;  %5096 = vmatpush3.msra.mxu1 %v7248_v59  ;;  %10175 = vst [vmem:[#allocation83_spill] sm:$0xff] %v7268_v2  ;;  %10176 = vst [vmem:[#allocation84_spill] sm:$0xff] %v7271_v57  ;;  %v7275_v5 = vld [vmem:[#allocation8 + $0x80] sm:$0xff] }
 0x1ab   :  { %1101 = vmatpush1.msra.mxu0 %v7251_v4  ;;  %5097 = vmatprep.subr.mxu1 %v9867_v0  ;;  %10177 = vst [vmem:[#allocation85_spill] sm:$0xff] %v7275_v5  ;;  %v7278_v59 = vld [vmem:[#allocation8 + $0xa0] sm:$0xff]  ;;  %v7281_v4 = vld [vmem:[#allocation8 + $0x78] sm:$0xff] }
 0x1ac   :  { %1102 = vmatprep.subr.mxu0 %v7255_v54  ;;  %5098 = vmatpush3.msra.mxu1 %v7258_v60  ;;  %10178 = vst [vmem:[#allocation86_spill] sm:$0xff] %v7278_v59  ;;  %10179 = vst [vmem:[#allocation87_spill] sm:$0xff] %v7281_v4  ;;  %v7285_v54 = vld [vmem:[#allocation8 + $0x68] sm:$0xff] }
 0x1ad   :  { %1103 = vmatpush1.msra.mxu0 %v7261_v61  ;;  %5099 = vmatprep.subr.mxu1 %v9867_v0  ;;  %10180 = vst [vmem:[#allocation88_spill] sm:$0xff] %v7285_v54  ;;  %v7288_v60 = vld [vmem:[#allocation8 + $0x88] sm:$0xff]  ;;  %v7291_v61 = vld [vmem:[#allocation8 + $0x60] sm:$0xff] }
 0x1ae   :  { %1104 = vmatprep.subr.mxu0 %v7265_v63  ;;  %5100 = vmatpush3.msra.mxu1 %v7268_v2  ;;  %10181 = vst [vmem:[#allocation89_spill] sm:$0xff] %v7288_v60  ;;  %10182 = vst [vmem:[#allocation90_spill] sm:$0xff] %v7291_v61  ;;  %v7295_v63 = vld [vmem:[#allocation8 + $0x50] sm:$0xff] }
 0x1af   :  { %1105 = vmatpush1.msra.mxu0 %v7271_v57  ;;  %5101 = vmatprep.subr.mxu1 %v9867_v0  ;;  %10183 = vst [vmem:[#allocation91_spill] sm:$0xff] %v7295_v63  ;;  %v7298_v2 = vld [vmem:[#allocation8 + $0x70] sm:$0xff]  ;;  %v7301_v57 = vld [vmem:[#allocation8 + $0x48] sm:$0xff] }
 0x1b0   :  { %1106 = vmatprep.subr.mxu0 %v7275_v5  ;;  %5102 = vmatpush3.msra.mxu1 %v7278_v59  ;;  %10184 = vst [vmem:[#allocation92_spill] sm:$0xff] %v7298_v2  ;;  %10185 = vst [vmem:[#allocation93_spill] sm:$0xff] %v7301_v57  ;;  %v7305_v5 = vld [vmem:[#allocation8 + $0x38] sm:$0xff] }
 0x1b1   :  { %1107 = vmatpush1.msra.mxu0 %v7281_v4  ;;  %5103 = vmatprep.subr.mxu1 %v9867_v0  ;;  %10186 = vst [vmem:[#allocation94_spill] sm:$0xff] %v7305_v5  ;;  %v7308_v59 = vld [vmem:[#allocation8 + $0x58] sm:$0xff]  ;;  %v7311_v4 = vld [vmem:[#allocation8 + $0x30] sm:$0xff] }
 0x1b2   :  { %1108 = vmatprep.subr.mxu0 %v7285_v54  ;;  %5104 = vmatpush3.msra.mxu1 %v7288_v60  ;;  %v7315_v54 = vld [vmem:[#allocation8 + $0x20] sm:$0xff] }
 0x1b3   :  { %1109 = vmatpush1.msra.mxu0 %v7291_v61  ;;  %5105 = vmatprep.subr.mxu1 %v9867_v0  ;;  %v7318_v60 = vld [vmem:[#allocation8 + $0x40] sm:$0xff]  ;;  %v7321_v61 = vld [vmem:[#allocation8 + $0x18] sm:$0xff] }
 0x1b4   :  { %1110 = vmatprep.subr.mxu0 %v7295_v63  ;;  %5106 = vmatpush3.msra.mxu1 %v7298_v2  ;;  %10187 = vst [vmem:[#allocation95_spill] sm:$0xff] %v7321_v61  ;;  %v7325_v63 = vld [vmem:[#allocation8 + $0x8] sm:$0xff] }
 0x1b5   :  { %1111 = vmatpush1.msra.mxu0 %v7301_v57  ;;  %5107 = vmatprep.subr.mxu1 %v9867_v0  ;;  %10188 = vst [vmem:[#allocation96_spill] sm:$0xff] %v7325_v63  ;;  %v7328_v2 = vld [vmem:[#allocation8 + $0x28] sm:$0xff]  ;;  %v7331_v57 = vld [vmem:[#allocation8] sm:$0xff] }
 0x1b6   :  { %1112 = vmatprep.subr.mxu0 %v7305_v5  ;;  %5108 = vmatpush3.msra.mxu1 %v7308_v59  ;;  %10189 = vst [vmem:[#allocation97_spill] sm:$0xff] %v7331_v57  ;;  %v7336_v5 = vld [vmem:[#allocation8 + $0x10] sm:$0xff] }
 0x1b7   :  { %1113 = vmatpush1.msra.mxu0 %v7311_v4  ;;  %5109 = vmatprep.subr.mxu1 %v9867_v0  ;;  %10190 = vst [vmem:[#allocation98_spill] sm:$0xff] %v7336_v5 }
 0x1b8   :  { %1114 = vmatprep.subr.mxu0 %v7315_v54  ;;  %5110 = vmatpush3.msra.mxu1 %v7318_v60 }
 0x1b9   :  { %1115 = vmatpush1.msra.mxu0 %v7321_v61  ;;  %5111 = vmatprep.subr.mxu1 %v9867_v0  ;;  %v7346_v61 = vld [vmem:[#allocation5 + $0x170] sm:$0xff] }
 0x1ba   :  { %1116 = vmatprep.subr.mxu0 %v7325_v63  ;;  %5112 = vmatpush3.msra.mxu1 %v7328_v2  ;;  %10191 = vst [vmem:[#allocation99_spill] sm:$0xff] %v7346_v61  ;;  %v7351_v63 = vld [vmem:[#allocation5 + $0x168] sm:$0xff] }
 0x1bb   :  { %1117 = vmatpush1.msra.mxu0 %v7331_v57  ;;  %5113 = vmatprep.subr.mxu1 %v9867_v0  ;;  %10192 = vst [vmem:[#allocation100_spill] sm:$0xff] %v7351_v63  ;;  %v7355_v57 = vld [vmem:[#allocation5 + $0x158] sm:$0xff] }
 0x1bc   :  { %1151 = vmatmul.mubr.f32.vlgmr.msra.gmra.mxu0 %v9867_v0  ;;  %5114 = vmatpush3.msra.mxu1 %v7336_v5  ;;  %v7359_v5 = vld [vmem:[#allocation5 + $0x150] sm:$0xff] }
 0x1bd   :  { %5115 = vmatprep.mubr.msk.f32.mxu1 %vm6572_vm0, %v9867_v0  ;;  %1251 = vmatprep.subr.mxu0 %v7346_v61  ;;  %10193 = vst [vmem:[#allocation101_spill] sm:$0xff] %v7359_v5  ;;  %v7363_v61 = vld [vmem:[#allocation5 + $0x140] sm:$0xff] }
 0x1be   :  { %5116 = vmatmul.mubr.f32.vlgmr.msra.gmra.mxu1 %v9867_v0  ;;  %5118 = vmatprep.subr.mxu1 %v9867_v0 }
 0x1bf   :  { %1252 = vmatpush1.msra.mxu0 %v7351_v63  ;;  %5119 = vmatpush3.msra.mxu1 %v6786_v21  ;;  %v7367_v63 = vld [vmem:[#allocation5 + $0x138] sm:$0xff]  ;;  %v7371_v21 = vld [vmem:[#allocation5 + $0x128] sm:$0xff] }
 0x1c0   :  { %1253 = vmatprep.subr.mxu0 %v7355_v57  ;;  %5120 = vmatprep.subr.mxu1 %v9867_v0  ;;  %10194 = vst [vmem:[#allocation102_spill] sm:$0xff] %v7367_v63 }
 0x1c1   :  { %1254 = vmatpush1.msra.mxu0 %v7359_v5  ;;  %5121 = vmatpush3.msra.mxu1 %v6806_v27  ;;  %v7375_v5 = vld [vmem:[#allocation5 + $0x120] sm:$0xff]  ;;  %v7379_v27 = vld [vmem:[#allocation5 + $0x110] sm:$0xff] }
 0x1c2   :  { %1255 = vmatprep.subr.mxu0 %v7363_v61  ;;  %5122 = vmatprep.subr.mxu1 %v9867_v0  ;;  %10195 = vst [vmem:[#allocation103_spill] sm:$0xff] %v7375_v5 }
 0x1c3   :  { %1256 = vmatpush1.msra.mxu0 %v7367_v63  ;;  %5123 = vmatpush3.msra.mxu1 %v6812_v28  ;;  %v7383_v63 = vld [vmem:[#allocation5 + $0x108] sm:$0xff]  ;;  %v7387_v28 = vld [vmem:[#allocation5 + $0xf8] sm:$0xff] }
 0x1c4   :  { %1257 = vmatprep.subr.mxu0 %v7371_v21  ;;  %5124 = vmatprep.subr.mxu1 %v9867_v0  ;;  %10196 = vst [vmem:[#allocation104_spill] sm:$0xff] %v7383_v63 }
 0x1c5   :  { %1258 = vmatpush1.msra.mxu0 %v7375_v5  ;;  %5125 = vmatpush3.msra.mxu1 %v6818_v29  ;;  %v7391_v5 = vld [vmem:[#allocation5 + $0xf0] sm:$0xff]  ;;  %v7395_v29 = vld [vmem:[#allocation5 + $0xe0] sm:$0xff] }
 0x1c6   :  { %1259 = vmatprep.subr.mxu0 %v7379_v27  ;;  %5126 = vmatprep.subr.mxu1 %v9867_v0  ;;  %10197 = vst [vmem:[#allocation105_spill] sm:$0xff] %v7391_v5 }
 0x1c7   :  { %1260 = vmatpush1.msra.mxu0 %v7383_v63  ;;  %5127 = vmatpush3.msra.mxu1 %v6823_v30  ;;  %v7399_v63 = vld [vmem:[#allocation5 + $0xd8] sm:$0xff]  ;;  %v7403_v30 = vld [vmem:[#allocation5 + $0xc8] sm:$0xff] }
 0x1c8   :  { %1261 = vmatprep.subr.mxu0 %v7387_v28  ;;  %5128 = vmatprep.subr.mxu1 %v9867_v0  ;;  %10198 = vst [vmem:[#allocation106_spill] sm:$0xff] %v7399_v63 }
 0x1c9   :  { %1262 = vmatpush1.msra.mxu0 %v7391_v5  ;;  %5129 = vmatpush3.msra.mxu1 %v6829_v31  ;;  %v7407_v5 = vld [vmem:[#allocation5 + $0xc0] sm:$0xff]  ;;  %v7411_v31 = vld [vmem:[#allocation5 + $0xb0] sm:$0xff] }
 0x1ca   :  { %1263 = vmatprep.subr.mxu0 %v7395_v29  ;;  %5130 = vmatprep.subr.mxu1 %v9867_v0  ;;  %10199 = vst [vmem:[#allocation107_spill] sm:$0xff] %v7407_v5 }
 0x1cb   :  { %1264 = vmatpush1.msra.mxu0 %v7399_v63  ;;  %5131 = vmatpush3.msra.mxu1 %v6835_v32  ;;  %v7415_v63 = vld [vmem:[#allocation5 + $0xa8] sm:$0xff]  ;;  %v7419_v32 = vld [vmem:[#allocation5 + $0x98] sm:$0xff] }
 0x1cc   :  { %1265 = vmatprep.subr.mxu0 %v7403_v30  ;;  %5132 = vmatprep.subr.mxu1 %v9867_v0  ;;  %10200 = vst [vmem:[#allocation108_spill] sm:$0xff] %v7415_v63 }
 0x1cd   :  { %1266 = vmatpush1.msra.mxu0 %v7407_v5  ;;  %5133 = vmatpush3.msra.mxu1 %v6839_v33  ;;  %v7423_v5 = vld [vmem:[#allocation5 + $0x90] sm:$0xff]  ;;  %v7427_v33 = vld [vmem:[#allocation5 + $0x80] sm:$0xff] }
 0x1ce   :  { %1267 = vmatprep.subr.mxu0 %v7411_v31  ;;  %5134 = vmatprep.subr.mxu1 %v9867_v0  ;;  %10201 = vst [vmem:[#allocation109_spill] sm:$0xff] %v7423_v5  ;;  %10202 = vst [vmem:[#allocation110_spill] sm:$0xff] %v7427_v33 }
 0x1cf   :  { %1268 = vmatpush1.msra.mxu0 %v7415_v63  ;;  %5135 = vmatpush3.msra.mxu1 %v6845_v34  ;;  %v7431_v63 = vld [vmem:[#allocation5 + $0x78] sm:$0xff]  ;;  %v7435_v34 = vld [vmem:[#allocation5 + $0x68] sm:$0xff] }
 0x1d0   :  { %1269 = vmatprep.subr.mxu0 %v7419_v32  ;;  %5136 = vmatprep.subr.mxu1 %v9867_v0  ;;  %10203 = vst [vmem:[#allocation111_spill] sm:$0xff] %v7431_v63  ;;  %10204 = vst [vmem:[#allocation112_spill] sm:$0xff] %v7435_v34 }
 0x1d1   :  { %1270 = vmatpush1.msra.mxu0 %v7423_v5  ;;  %5137 = vmatpush3.msra.mxu1 %v6851_v35  ;;  %v7439_v5 = vld [vmem:[#allocation5 + $0x60] sm:$0xff]  ;;  %v7443_v35 = vld [vmem:[#allocation5 + $0x50] sm:$0xff] }
 0x1d2   :  { %1271 = vmatprep.subr.mxu0 %v7427_v33  ;;  %5138 = vmatprep.subr.mxu1 %v9867_v0  ;;  %10205 = vst [vmem:[#allocation113_spill] sm:$0xff] %v7439_v5  ;;  %10206 = vst [vmem:[#allocation114_spill] sm:$0xff] %v7443_v35 }
 0x1d3   :  { %1272 = vmatpush1.msra.mxu0 %v7431_v63  ;;  %5139 = vmatpush3.msra.mxu1 %v6857_v36  ;;  %v7447_v63 = vld [vmem:[#allocation5 + $0x48] sm:$0xff]  ;;  %v7451_v36 = vld [vmem:[#allocation5 + $0x38] sm:$0xff] }
 0x1d4   :  { %1273 = vmatprep.subr.mxu0 %v7435_v34  ;;  %5140 = vmatprep.subr.mxu1 %v9867_v0  ;;  %10207 = vst [vmem:[#allocation115_spill] sm:$0xff] %v7447_v63  ;;  %10208 = vst [vmem:[#allocation116_spill] sm:$0xff] %v7451_v36 }
 0x1d5   :  { %1274 = vmatpush1.msra.mxu0 %v7439_v5  ;;  %5141 = vmatpush3.msra.mxu1 %v6863_v37  ;;  %v7455_v5 = vld [vmem:[#allocation5 + $0x30] sm:$0xff]  ;;  %v7459_v37 = vld [vmem:[#allocation5 + $0x20] sm:$0xff] }
 0x1d6   :  { %1275 = vmatprep.subr.mxu0 %v7443_v35  ;;  %5142 = vmatprep.subr.mxu1 %v9867_v0  ;;  %10209 = vst [vmem:[#allocation117_spill] sm:$0xff] %v7455_v5  ;;  %10210 = vst [vmem:[#allocation118_spill] sm:$0xff] %v7459_v37 }
 0x1d7   :  { %1276 = vmatpush1.msra.mxu0 %v7447_v63  ;;  %5143 = vmatpush3.msra.mxu1 %v6869_v38  ;;  %v7463_v63 = vld [vmem:[#allocation5 + $0x18] sm:$0xff]  ;;  %v7467_v38 = vld [vmem:[#allocation5 + $0x8] sm:$0xff] }
 0x1d8   :  { %1277 = vmatprep.subr.mxu0 %v7451_v36  ;;  %5144 = vmatprep.subr.mxu1 %v9867_v0  ;;  %10211 = vst [vmem:[#allocation119_spill] sm:$0xff] %v7463_v63  ;;  %10212 = vst [vmem:[#allocation120_spill] sm:$0xff] %v7467_v38 }
 0x1d9   :  { %1278 = vmatpush1.msra.mxu0 %v7455_v5  ;;  %5145 = vmatpush3.msra.mxu1 %v6875_v39 }
 0x1da   :  { %1279 = vmatprep.subr.mxu0 %v7459_v37  ;;  %5146 = vmatprep.subr.mxu1 %v9867_v0 }
 0x1db   :  { %1280 = vmatpush1.msra.mxu0 %v7463_v63  ;;  %5147 = vmatpush3.msra.mxu1 %v6881_v40 }
 0x1dc   :  { %1281 = vmatprep.subr.mxu0 %v7467_v38  ;;  %5148 = vmatprep.subr.mxu1 %v9867_v0 }
 0x1dd   :  { %1282 = vmatpush1.msra.mxu0 %v6804_v26  ;;  %5149 = vmatpush3.msra.mxu1 %v6887_v41 }
 0x1de   :  { %1315 = vmatprep.mubr.f32.mxu0 %v9867_v0  ;;  %5150 = vmatprep.mubr.msk.f32.mxu1 %vm6572_vm0, %v9867_v0 }
 0x1df   :  { %1412 = vmatprep.subr.mxu0 %v6945_v42  ;;  %5153 = vmatprep.subr.mxu1 %v9867_v0 }
 0x23a   :  { %v754_v39 = vpop.f32.mrf.mxu0  ;;  %v825_v40 = vpop.f32.mrf.mxu1 }
 0x23b   :  { %v755_v63 = vadd.f32 %v754_v39, %v6992_v20  ;;  %v826_v39 = vadd.f32 %v825_v40, %v7014_v56 }
 0x23c   :  { %v5047_v38 = vpop.f32.mrf.mxu1  ;;  %v756_v26 = vpop.f32.mrf.mxu0 }
 0x23d   :  { %v829_v37 = vadd.f32 %v755_v63, %v6957_v53  ;;  %v757_v41 = vadd.f32 %v756_v26, %v7002_v62 }
 0x23f   :  { %v4454_v5 = vmul.f32 -1.442695, %v829_v37  ;;  %v836_v36 = vadd.f32 %v757_v41, %v6959_v55  ;;  %v10231_v41 = vld [vmem:[#allocation49_spill] sm:$0xff] }
 0x241   :  { %5874 = vpow2.f32 %v4454_v5  ;;  %v4455_v35 = vmul.f32 -1.442695, %v836_v36 }
 0x243   :  { %5876 = vpow2.f32 %v4455_v35 }
 0x24e   :  { %v5875_v34 = vpop.eup %5874 }
 0x24f   :  { %v833_v33 = vadd.f32 1.0, %v5875_v34 }
 0x250   :  { %v5877_v0 = vpop.eup %5876 }
 0x251   :  { %5878 = vrcp.f32 %v833_v33  ;;  %v840_v5 = vadd.f32 1.0, %v5877_v0  ;;  %v7492_v33 = vld [vmem:[%s9775_s7] sm:$0x7] }
 0x252   :  { %v7505_v0 = vrot.slane %v7492_v33, %v6948_v45 }
 0x254   :  { %10213 = vst [vmem:[#allocation121_spill] sm:$0xff] %v7505_v0 }
 0x25b   :  { %v7482_v42 = vpop.f32.mrf.mxu1  ;;  %v963_v40 = vpop.f32.mrf.mxu0 }
 0x25d   :  { %v5082_v38 = vpop.f32.mrf.mxu1  ;;  %v965_v26 = vpop.f32.mrf.mxu0 }
 0x25e   :  { %v5879_v20 = vpop.eup %5878  ;;  %v10233_v38 = vld [vmem:[#allocation51_spill] sm:$0xff] }
 0x25f   :  { %v843_v53 = vmul.f32 %v5879_v20, %v826_v39  ;;  %v10214_v20 = vmov 0.0   ;;  %v10232_v39 = vld [vmem:[#allocation50_spill] sm:$0xff] }
 0x261   :  { %v844_v63 = vadd.f32 %v843_v53, %v6987_v17  ;;  %v7497_v17 = vld [vmem:[%s9776_s8] sm:$0x7]  ;;  %v10234_v53 = vld [vmem:[#allocation52_spill] sm:$0xff] }
 0x263   :  { %5880 = vtanh.f32 %v844_v63  ;;  %v10235_v63 = vld [vmem:[#allocation53_spill] sm:$0xff] }
 0x264   :  { %5882 = vrcp.f32 %v840_v5  ;;  %v10236_v5 = vld [vmem:[#allocation54_spill] sm:$0xff] }
 0x270   :  { %v5881_v37 = vpop.eup %5880 }
 0x271   :  { %v846_v55 = vsub.f32 %v7017_v44, %v5881_v37  ;;  %v5883_v36 = vpop.eup %5882  ;;  %v7511_v44 = vrot.slane %v7497_v17, %v6948_v45 }
 0x273   :  { %v847_v34 = vmul.f32 %v5883_v36, %v846_v55  ;;  %10215 = vst [vmem:[#allocation122_spill] sm:$0xff] %v7511_v44  ;;  %v10238_v55 = vld [vmem:[#allocation56_spill] sm:$0xff] }
 0x274   :  { %v10239_v36 = vld [vmem:[#allocation20_spill] sm:$0xff] }
 0x275   :  { %v7487_v35 = vadd.f32 %v5881_v37, %v847_v34  ;;  %v10237_v37 = vld [vmem:[#allocation55_spill] sm:$0xff]  ;;  %v7594_v34 = vrot.slane %v7497_v17, %v10239_v36 }
 0x277   :  { %1316 = vmatmul.mubr.f32.vlgmr.msra.gmra.mxu0 %v7487_v35  ;;  %5151 = vmatmul.mubr.f32.vlgmr.msra.gmra.mxu1 %v7487_v35 }
 0x278   :  { %1413 = vmatpush1.msra.mxu0 %v7019_v46  ;;  %5154 = vmatpush3.msra.mxu1 %v7021_v14  ;;  %v964_v14 = vadd.f32 %v963_v40, %v7505_v0  ;;  %v10241_v40 = vld [vmem:[#allocation57_spill] sm:$0xff] }
 0x279   :  { %1414 = vmatprep.subr.mxu0 %v7023_v58  ;;  %5155 = vmatprep.subr.mxu1 %v10214_v20 }
 0x27a   :  { %1415 = vmatpush1.msra.mxu0 %v7027_v10  ;;  %5156 = vmatpush3.msra.mxu1 %v7029_v25 }
 0x27b   :  { %1416 = vmatprep.subr.mxu0 %v7033_v51  ;;  %5157 = vmatprep.subr.mxu1 %v10214_v20 }
 0x27c   :  { %v1152_v46 = vpop.f32.mrf.mxu0  ;;  %1417 = vmatpush1.msra.mxu0 %v7037_v1  ;;  %5158 = vmatpush3.msra.mxu1 %v7039_v3  ;;  %v7535_v1 = vrot.slane %v7497_v17, %v6953_v48 }
 0x27d   :  { %v1153_v58 = vadd.f32 %v1152_v46, %v7511_v44  ;;  %1418 = vmatprep.subr.mxu0 %v7043_v8  ;;  %5159 = vmatprep.subr.mxu1 %v10214_v20  ;;  %v7543_v8 = vrot.slane %v7492_v33, %v6953_v48  ;;  %v10243_v46 = vld [vmem:[#allocation58_spill] sm:$0xff] }
 0x27e   :  { %1419 = vmatpush1.msra.mxu0 %v7047_v11  ;;  %5160 = vmatpush3.msra.mxu1 %v7049_v49  ;;  %v7525_v45 = vpop.f32.mrf.mxu1  ;;  %10216 = vst [vmem:[#allocation123_spill] sm:$0xff] %v7535_v1  ;;  %v1154_v3 = vpop.f32.mrf.mxu0  ;;  %v10226_v49 = vld [vmem:[#allocation44_spill] sm:$0xff] }
 0x27f   :  { %v1227_v10 = vadd.f32 %v1153_v58, %v964_v14  ;;  %1420 = vmatprep.subr.mxu0 %v7053_v52  ;;  %5161 = vmatprep.subr.mxu1 %v10214_v20  ;;  %10217 = vst [vmem:[#allocation124_spill] sm:$0xff] %v7543_v8  ;;  %v1155_v11 = vadd.f32 %v1154_v3, %v7535_v1  ;;  %v10244_v14 = vld [vmem:[#allocation60_spill] sm:$0xff]  ;;  %v10245_v58 = vld [vmem:[#allocation62_spill] sm:$0xff]  ;;  %v10249_v3 = vld [vmem:[#allocation65_spill] sm:$0xff] }
 0x280   :  { %1421 = vmatpush1.msra.mxu0 %v7057_v18  ;;  %5162 = vmatpush3.msra.mxu1 %v7059_v50  ;;  %v5117_v25 = vpop.f32.mrf.mxu1  ;;  %v966_v48 = vadd.f32 %v965_v26, %v7543_v8  ;;  %v10227_v18 = vld [vmem:[#allocation45_spill] sm:$0xff]  ;;  %v10228_v50 = vld [vmem:[#allocation46_spill] sm:$0xff]  ;;  %v10242_v26 = vld [vmem:[#allocation59_spill] sm:$0xff]  ;;  %v1224_v17 = vadd.f32 %v7525_v45, %v7594_v34 }
 0x281   :  { %v4456_v51 = vmul.f32 -1.442695, %v1227_v10  ;;  %1422 = vmatprep.subr.mxu0 %v7063_v15  ;;  %5163 = vmatprep.subr.mxu1 %v10214_v20  ;;  %v7604_v10 = vrot.slane %v7492_v33, %v10239_v36  ;;  %v10247_v25 = vld [vmem:[#allocation61_spill] sm:$0xff]  ;;  %v10252_v33 = vld [vmem:[#allocation68_spill] sm:$0xff] }
 0x282   :  { %1423 = vmatpush1.msra.mxu0 %v7067_v24  ;;  %5164 = vmatpush3.msra.mxu1 %v7069_v43  ;;  %v10229_v24 = vld [vmem:[#allocation47_spill] sm:$0xff]  ;;  %v10230_v43 = vld [vmem:[#allocation48_spill] sm:$0xff] }
 0x283   :  { %5884 = vpow2.f32 %v4456_v51  ;;  %1424 = vmatprep.subr.mxu0 %v7073_v13  ;;  %5165 = vmatprep.subr.mxu1 %v10214_v20  ;;  %v10222_v13 = vld [vmem:[#allocation40_spill] sm:$0xff]  ;;  %v10248_v51 = vld [vmem:[#allocation63_spill] sm:$0xff]  ;;  %v1035_v45 = vadd.f32 %v7482_v42, %v7604_v10  ;;  %v10259_v42 = vld [vmem:[#allocation73_spill] sm:$0xff] }
 0x284   :  { %1425 = vmatpush1.msra.mxu0 %v7077_v23  ;;  %5166 = vmatpush3.msra.mxu1 %v7079_v19  ;;  %v1234_v19 = vadd.f32 %v1155_v11, %v966_v48  ;;  %v10218_v23 = vld [vmem:[#allocation36_spill] sm:$0xff] }
 0x285   :  { %1426 = vmatprep.subr.mxu0 %v7083_v22  ;;  %5167 = vmatprep.subr.mxu1 %v10214_v20  ;;  %v10225_v22 = vld [vmem:[#allocation43_spill] sm:$0xff]  ;;  %10240 = vst [vmem:[#allocation36_spill] sm:$0xff] %v7594_v34  ;;  %v10250_v48 = vld [vmem:[#allocation64_spill] sm:$0xff] }
 0x286   :  { %1427 = vmatpush1.msra.mxu0 %v7087_v16  ;;  %5168 = vmatpush3.msra.mxu1 %v7089_v12  ;;  %v10219_v16 = vld [vmem:[#allocation37_spill] sm:$0xff]  ;;  %v10220_v12 = vld [vmem:[#allocation38_spill] sm:$0xff]  ;;  %v10274_v36 = vld [vmem:[#allocation88_spill] sm:$0xff] }
 0x287   :  { %1428 = vmatprep.subr.mxu0 %v7093_v6  ;;  %5169 = vmatprep.subr.mxu1 %v10214_v20  ;;  %v10221_v6 = vld [vmem:[#allocation39_spill] sm:$0xff]  ;;  %10246 = vst [vmem:[#allocation37_spill] sm:$0xff] %v7604_v10 }
 0x288   :  { %1429 = vmatpush1.msra.mxu0 %v7097_v9  ;;  %5170 = vmatpush3.msra.mxu1 %v7099_v7  ;;  %v10223_v9 = vld [vmem:[#allocation41_spill] sm:$0xff]  ;;  %v4457_v7 = vmul.f32 -1.442695, %v1234_v19 }
 0x289   :  { %1430 = vmatprep.subr.mxu0 %v7103_v47  ;;  %5171 = vmatprep.subr.mxu1 %v10214_v20  ;;  %v10224_v47 = vld [vmem:[#allocation42_spill] sm:$0xff] }
 0x28a   :  { %1431 = vmatpush1.msra.mxu0 %v10218_v23  ;;  %5172 = vmatpush3.msra.mxu1 %v10219_v16  ;;  %5886 = vpow2.f32 %v4457_v7  ;;  %v10251_v23 = vld [vmem:[#allocation66_spill] sm:$0xff] }
 0x28b   :  { %1432 = vmatprep.subr.mxu0 %v10220_v12  ;;  %5173 = vmatprep.subr.mxu1 %v10214_v20  ;;  %v10253_v12 = vld [vmem:[#allocation67_spill] sm:$0xff] }
 0x28c   :  { %1433 = vmatpush1.msra.mxu0 %v10221_v6  ;;  %5174 = vmatpush3.msra.mxu1 %v10222_v13  ;;  %v10254_v6 = vld [vmem:[#allocation69_spill] sm:$0xff]  ;;  %v10255_v13 = vld [vmem:[#allocation71_spill] sm:$0xff] }
 0x28d   :  { %1434 = vmatprep.subr.mxu0 %v10223_v9  ;;  %5175 = vmatprep.subr.mxu1 %v10214_v20 }
 0x28e   :  { %1435 = vmatpush1.msra.mxu0 %v10224_v47  ;;  %5176 = vmatpush3.msra.mxu1 %v10225_v22  ;;  %v10256_v47 = vld [vmem:[#allocation70_spill] sm:$0xff]  ;;  %v10257_v22 = vld [vmem:[#allocation72_spill] sm:$0xff] }
 0x28f   :  { %1436 = vmatprep.subr.mxu0 %v10226_v49  ;;  %5177 = vmatprep.subr.mxu1 %v10214_v20  ;;  %v10258_v49 = vld [vmem:[#allocation74_spill] sm:$0xff] }
 0x290   :  { %v5885_v52 = vpop.eup %5884  ;;  %1437 = vmatpush1.msra.mxu0 %v10227_v18  ;;  %5178 = vmatpush3.msra.mxu1 %v10228_v50  ;;  %v10261_v18 = vld [vmem:[#allocation77_spill] sm:$0xff]  ;;  %v10262_v50 = vld [vmem:[#allocation76_spill] sm:$0xff] }
 0x291   :  { %v1231_v15 = vadd.f32 1.0, %v5885_v52  ;;  %1438 = vmatprep.subr.mxu0 %v10229_v24  ;;  %5179 = vmatprep.subr.mxu1 %v10214_v20  ;;  %v10260_v52 = vld [vmem:[#allocation75_spill] sm:$0xff]  ;;  %v10264_v24 = vld [vmem:[#allocation80_spill] sm:$0xff] }
 0x292   :  { %1439 = vmatpush1.msra.mxu0 %v10230_v43  ;;  %5180 = vmatpush3.msra.mxu1 %v10231_v41  ;;  %v10265_v43 = vld [vmem:[#allocation79_spill] sm:$0xff]  ;;  %v10266_v41 = vld [vmem:[#allocation81_spill] sm:$0xff] }
 0x293   :  { %5888 = vrcp.f32 %v1231_v15  ;;  %1440 = vmatprep.subr.mxu0 %v10232_v39  ;;  %5181 = vmatprep.subr.mxu1 %v10214_v20  ;;  %v10263_v15 = vld [vmem:[#allocation78_spill] sm:$0xff]  ;;  %v10267_v39 = vld [vmem:[#allocation83_spill] sm:$0xff] }
 0x294   :  { %1441 = vmatpush1.msra.mxu0 %v10233_v38  ;;  %5182 = vmatpush3.msra.mxu1 %v10234_v53  ;;  %v10268_v38 = vld [vmem:[#allocation82_spill] sm:$0xff]  ;;  %v10269_v53 = vld [vmem:[#allocation84_spill] sm:$0xff] }
 0x295   :  { %1442 = vmatprep.subr.mxu0 %v10235_v63  ;;  %5183 = vmatprep.subr.mxu1 %v10214_v20  ;;  %v10270_v63 = vld [vmem:[#allocation86_spill] sm:$0xff] }
 0x296   :  { %1443 = vmatpush1.msra.mxu0 %v10236_v5  ;;  %1476 = vmatprep.mubr.f32.mxu0 %v10214_v20  ;;  %v10271_v5 = vld [vmem:[#allocation85_spill] sm:$0xff] }
 0x297   :  { %5184 = vmatpush3.msra.mxu1 %v10237_v37  ;;  %5185 = vmatprep.mubr.msk.f32.mxu1 %vm6572_vm0, %v10214_v20  ;;  %v5887_v11 = vpop.eup %5886  ;;  %v10272_v37 = vld [vmem:[#allocation87_spill] sm:$0xff] }
 0x298   :  { %1477 = vmatmul.mubr.f32.vlgmr.msra.gmra.mxu0 %v7487_v35  ;;  %5186 = vmatmul.mubr.f32.vlgmr.msra.gmra.mxu1 %v7487_v35  ;;  %v1238_v9 = vadd.f32 1.0, %v5887_v11  ;;  %v10280_v11 = vld [vmem:[#allocation95_spill] sm:$0xff] }
 0x299   :  { %1553 = vmatprep.subr.mxu0 %v10238_v55  ;;  %5188 = vmatprep.subr.mxu1 %v10214_v20  ;;  %v10273_v55 = vld [vmem:[#allocation89_spill] sm:$0xff] }
 0x29a   :  { %1554 = vmatpush1.msra.mxu0 %v10241_v40  ;;  %5189 = vmatpush3.msra.mxu1 %v10242_v26  ;;  %v10275_v40 = vld [vmem:[#allocation90_spill] sm:$0xff]  ;;  %v10276_v26 = vld [vmem:[#allocation92_spill] sm:$0xff] }
 0x29b   :  { %1555 = vmatprep.subr.mxu0 %v10243_v46  ;;  %5190 = vmatprep.subr.mxu1 %v10214_v20  ;;  %v10277_v46 = vld [vmem:[#allocation91_spill] sm:$0xff] }
 0x29c   :  { %1556 = vmatpush1.msra.mxu0 %v10244_v14  ;;  %5191 = vmatpush3.msra.mxu1 %v10245_v58  ;;  %v10278_v58 = vld [vmem:[#allocation93_spill] sm:$0xff] }
 0x29d   :  { %1557 = vmatprep.subr.mxu0 %v10247_v25  ;;  %5192 = vmatprep.subr.mxu1 %v10214_v20 }
 0x29e   :  { %1558 = vmatpush1.msra.mxu0 %v10248_v51  ;;  %5193 = vmatpush3.msra.mxu1 %v10249_v3 }
 0x29f   :  { %1559 = vmatprep.subr.mxu0 %v10250_v48  ;;  %5194 = vmatprep.subr.mxu1 %v10214_v20 }
 0x2a0   :  { %v5889_v19 = vpop.eup %5888  ;;  %1560 = vmatpush1.msra.mxu0 %v10251_v23  ;;  %5195 = vmatpush3.msra.mxu1 %v10252_v33  ;;  %v10286_v23 = vld [vmem:[#allocation101_spill] sm:$0xff]  ;;  %v7682_v33 = vld [vmem:[#allocation5 + $0x160] sm:$0xff] }
 0x2a1   :  { %v1241_v16 = vmul.f32 %v5889_v19, %v1224_v17  ;;  %1561 = vmatprep.subr.mxu0 %v10253_v12  ;;  %5196 = vmatprep.subr.mxu1 %v10214_v20  ;;  %v10279_v17 = vld [vmem:[#allocation94_spill] sm:$0xff]  ;;  %v10282_v19 = vld [vmem:[#allocation97_spill] sm:$0xff]  ;;  %v7694_v12 = vld [vmem:[#allocation5 + $0x130] sm:$0xff] }
 0x2a2   :  { %1562 = vmatpush1.msra.mxu0 %v10254_v6  ;;  %5197 = vmatpush3.msra.mxu1 %v10255_v13  ;;  %v7700_v6 = vld [vmem:[#allocation5 + $0x118] sm:$0xff]  ;;  %v7706_v13 = vld [vmem:[#allocation5 + $0x100] sm:$0xff] }
 0x2a3   :  { %v1242_v7 = vadd.f32 %v1241_v16, %v1035_v45  ;;  %1563 = vmatprep.subr.mxu0 %v10256_v47  ;;  %5198 = vmatprep.subr.mxu1 %v10214_v20  ;;  %v10287_v45 = vld [vmem:[#allocation102_spill] sm:$0xff]  ;;  %v7688_v16 = vld [vmem:[#allocation5 + $0x148] sm:$0xff]  ;;  %v7724_v47 = vld [vmem:[#allocation5 + $0xb8] sm:$0xff] }
 0x2a4   :  { %1564 = vmatpush1.msra.mxu0 %v10257_v22  ;;  %5199 = vmatpush3.msra.mxu1 %v10258_v49  ;;  %v7730_v22 = vld [vmem:[#allocation5 + $0xa0] sm:$0xff] }
 0x2a5   :  { %5890 = vtanh.f32 %v1242_v7  ;;  %1565 = vmatprep.subr.mxu0 %v10259_v42  ;;  %5200 = vmatprep.subr.mxu1 %v10214_v20  ;;  %v7718_v7 = vld [vmem:[#allocation5 + $0xd0] sm:$0xff]  ;;  %v10295_v49 = vld [vmem:[#allocation110_spill] sm:$0xff]  ;;  %v7736_v42 = vld [vmem:[#allocation5 + $0x88] sm:$0xff] }
 0x2a6   :  { %1566 = vmatpush1.msra.mxu0 %v10260_v52  ;;  %5201 = vmatpush3.msra.mxu1 %v10261_v18  ;;  %5892 = vrcp.f32 %v1238_v9  ;;  %v7712_v9 = vld [vmem:[#allocation5 + $0xe8] sm:$0xff]  ;;  %v10297_v52 = vld [vmem:[#allocation112_spill] sm:$0xff] }
 0x2a7   :  { %1567 = vmatprep.subr.mxu0 %v10262_v50  ;;  %5202 = vmatprep.subr.mxu1 %v10214_v20  ;;  %v7742_v18 = vld [vmem:[#allocation5 + $0x70] sm:$0xff]  ;;  %v10299_v50 = vld [vmem:[#allocation114_spill] sm:$0xff] }
 0x2a8   :  { %1568 = vmatpush1.msra.mxu0 %v10263_v15  ;;  %5203 = vmatpush3.msra.mxu1 %v10264_v24  ;;  %v10300_v15 = vld [vmem:[#allocation115_spill] sm:$0xff]  ;;  %v7748_v24 = vld [vmem:[#allocation5 + $0x58] sm:$0xff] }
 0x2a9   :  { %1569 = vmatprep.subr.mxu0 %v10265_v43  ;;  %5204 = vmatprep.subr.mxu1 %v10214_v20  ;;  %v10301_v43 = vld [vmem:[#allocation116_spill] sm:$0xff] }
 0x2aa   :  { %1570 = vmatpush1.msra.mxu0 %v10266_v41  ;;  %5205 = vmatpush3.msra.mxu1 %v10267_v39  ;;  %v10302_v41 = vld [vmem:[#allocation117_spill] sm:$0xff]  ;;  %v7754_v39 = vld [vmem:[#allocation5 + $0x40] sm:$0xff] }
 0x2ab   :  { %1571 = vmatprep.subr.mxu0 %v10268_v38  ;;  %5206 = vmatprep.subr.mxu1 %v10214_v20  ;;  %v10303_v38 = vld [vmem:[#allocation118_spill] sm:$0xff] }
 0x2ac   :  { %1572 = vmatpush1.msra.mxu0 %v10269_v53  ;;  %5207 = vmatpush3.msra.mxu1 %v10270_v63  ;;  %v10304_v53 = vld [vmem:[#allocation119_spill] sm:$0xff] }
 0x2ad   :  { %1573 = vmatprep.subr.mxu0 %v10271_v5  ;;  %5208 = vmatprep.subr.mxu1 %v10214_v20  ;;  %v7760_v63 = vld [vmem:[#allocation5 + $0x28] sm:$0xff]  ;;  %v10305_v5 = vld [vmem:[#allocation120_spill] sm:$0xff] }
 0x2ae   :  { %1574 = vmatpush1.msra.mxu0 %v10272_v37  ;;  %5209 = vmatpush3.msra.mxu1 %v10273_v55  ;;  %v7765_v37 = vld [vmem:[#allocation5] sm:$0xff]  ;;  %v7768_v55 = vld [vmem:[#allocation5 + $0x10] sm:$0xff] }
 0x2af   :  { %1575 = vmatprep.subr.mxu0 %v10274_v36  ;;  %5210 = vmatprep.subr.mxu1 %v10214_v20  ;;  %v7774_v36 = vld [vmem:[#allocation7 + $0x170] sm:$0xff] }
 0x2b0   :  { %1576 = vmatpush1.msra.mxu0 %v10275_v40  ;;  %5211 = vmatpush3.msra.mxu1 %v10276_v26 }
 0x2b1   :  { %1577 = vmatprep.subr.mxu0 %v10277_v46  ;;  %5212 = vmatprep.subr.mxu1 %v10214_v20  ;;  %v10306_v46 = vld [vmem:[#allocation26_spill] sm:$0xff] }
 0x2b2   :  { %v5891_v14 = vpop.eup %5890  ;;  %1578 = vmatpush1.msra.mxu0 %v10278_v58  ;;  %5213 = vmatpush3.msra.mxu1 %v7308_v59  ;;  %v10281_v59 = vld [vmem:[#allocation96_spill] sm:$0xff] }
 0x2b3   :  { %1579 = vmatprep.subr.mxu0 %v10279_v17  ;;  %5214 = vmatprep.subr.mxu1 %v10214_v20  ;;  %v1244_v25 = vsub.f32 0.0, %v5891_v14  ;;  %v5893_v51 = vpop.eup %5892  ;;  %v10307_v17 = vld [vmem:[#allocation14_spill] sm:$0xff] }
 0x2b4   :  { %1580 = vmatpush1.msra.mxu0 %v7311_v4  ;;  %5215 = vmatpush3.msra.mxu1 %v7318_v60  ;;  %v10283_v4 = vld [vmem:[#allocation98_spill] sm:$0xff]  ;;  %v7676_v60 = vld [vmem:[#allocation5 + $0x178] sm:$0xff] }
 0x2b5   :  { %1581 = vmatprep.subr.mxu0 %v7315_v54  ;;  %5216 = vmatprep.subr.mxu1 %v10214_v20  ;;  %v1245_v3 = vmul.f32 %v5893_v51, %v1244_v25  ;;  %v10285_v54 = vld [vmem:[#allocation100_spill] sm:$0xff] }
 0x2b6   :  { %1582 = vmatpush1.msra.mxu0 %v10280_v11  ;;  %5217 = vmatpush3.msra.mxu1 %v7328_v2  ;;  %v10284_v2 = vld [vmem:[#allocation99_spill] sm:$0xff] }
 0x2b7   :  { %1583 = vmatprep.subr.mxu0 %v10281_v59  ;;  %5218 = vmatprep.subr.mxu1 %v10214_v20  ;;  %v7664_v48 = vadd.f32 %v5891_v14, %v1245_v3  ;;  %v10308_v59 = vld [vmem:[#allocation15_spill] sm:$0xff] }
 0x2b8   :  { %1584 = vmatpush1.msra.mxu0 %v10282_v19  ;;  %1617 = vmatprep.mubr.f32.mxu0 %v10214_v20 }
 0x2b9   :  { %5219 = vmatpush3.msra.mxu1 %v10283_v4  ;;  %5220 = vmatprep.mubr.msk.f32.mxu1 %vm6572_vm0, %v10214_v20 }
 0x2ba   :  { %1618 = vmatmul.mubr.f32.vlgmr.msra.gmra.mxu0 %v7664_v48  ;;  %5221 = vmatmul.mubr.f32.vlgmr.msra.gmra.mxu1 %v7664_v48 }
 0x2bb   :  { %1718 = vmatprep.subr.mxu0 %v10284_v2  ;;  %5223 = vmatprep.subr.mxu1 %v10214_v20 }
 0x2bc   :  { %1719 = vmatpush1.msra.mxu0 %v10285_v54  ;;  %5224 = vmatpush3.msra.mxu1 %v7676_v60 }
 0x2bd   :  { %1720 = vmatprep.subr.mxu0 %v7355_v57  ;;  %5225 = vmatprep.subr.mxu1 %v10214_v20  ;;  %v10288_v57 = vld [vmem:[#allocation103_spill] sm:$0xff] }
 0x2be   :  { %1721 = vmatpush1.msra.mxu0 %v10286_v23  ;;  %5226 = vmatpush3.msra.mxu1 %v7682_v33 }
 0x2bf   :  { %1722 = vmatprep.subr.mxu0 %v7363_v61  ;;  %5227 = vmatprep.subr.mxu1 %v10214_v20  ;;  %v10289_v61 = vld [vmem:[#allocation104_spill] sm:$0xff] }
 0x2c0   :  { %1723 = vmatpush1.msra.mxu0 %v10287_v45  ;;  %5228 = vmatpush3.msra.mxu1 %v7688_v16 }
 0x2c1   :  { %1724 = vmatprep.subr.mxu0 %v7371_v21  ;;  %5229 = vmatprep.subr.mxu1 %v10214_v20  ;;  %v10290_v21 = vld [vmem:[#allocation105_spill] sm:$0xff] }
 0x2c2   :  { %1725 = vmatpush1.msra.mxu0 %v10288_v57  ;;  %5230 = vmatpush3.msra.mxu1 %v7694_v12 }
 0x2c3   :  { %1726 = vmatprep.subr.mxu0 %v7379_v27  ;;  %5231 = vmatprep.subr.mxu1 %v10214_v20  ;;  %v10291_v27 = vld [vmem:[#allocation106_spill] sm:$0xff] }
 0x2c4   :  { %1727 = vmatpush1.msra.mxu0 %v10289_v61  ;;  %5232 = vmatpush3.msra.mxu1 %v7700_v6 }
 0x2c5   :  { %1728 = vmatprep.subr.mxu0 %v7387_v28  ;;  %5233 = vmatprep.subr.mxu1 %v10214_v20  ;;  %v10292_v28 = vld [vmem:[#allocation107_spill] sm:$0xff] }
 0x2c6   :  { %1729 = vmatpush1.msra.mxu0 %v10290_v21  ;;  %5234 = vmatpush3.msra.mxu1 %v7706_v13 }
 0x2c7   :  { %1730 = vmatprep.subr.mxu0 %v7395_v29  ;;  %5235 = vmatprep.subr.mxu1 %v10214_v20  ;;  %v10293_v29 = vld [vmem:[#allocation108_spill] sm:$0xff] }
 0x2c8   :  { %1731 = vmatpush1.msra.mxu0 %v10291_v27  ;;  %5236 = vmatpush3.msra.mxu1 %v7712_v9 }
 0x2c9   :  { %1732 = vmatprep.subr.mxu0 %v7403_v30  ;;  %5237 = vmatprep.subr.mxu1 %v10214_v20  ;;  %v10294_v30 = vld [vmem:[#allocation109_spill] sm:$0xff] }
 0x2ca   :  { %1733 = vmatpush1.msra.mxu0 %v10292_v28  ;;  %5238 = vmatpush3.msra.mxu1 %v7718_v7  ;;  %v10309_v28 = vld [vmem:[#allocation29_spill] sm:$0xff] }
 0x2cb   :  { %1734 = vmatprep.subr.mxu0 %v7411_v31  ;;  %5239 = vmatprep.subr.mxu1 %v10214_v20  ;;  %v10296_v31 = vld [vmem:[#allocation111_spill] sm:$0xff] }
 0x2cc   :  { %1735 = vmatpush1.msra.mxu0 %v10293_v29  ;;  %5240 = vmatpush3.msra.mxu1 %v7724_v47 }
 0x2cd   :  { %1736 = vmatprep.subr.mxu0 %v7419_v32  ;;  %5241 = vmatprep.subr.mxu1 %v10214_v20  ;;  %v10298_v32 = vld [vmem:[#allocation113_spill] sm:$0xff] }
 0x2ce   :  { %1737 = vmatpush1.msra.mxu0 %v10294_v30  ;;  %5242 = vmatpush3.msra.mxu1 %v7730_v22 }
 0x2cf   :  { %1738 = vmatprep.subr.mxu0 %v10295_v49  ;;  %5243 = vmatprep.subr.mxu1 %v10214_v20 }
 0x2d0   :  { %1739 = vmatpush1.msra.mxu0 %v10296_v31  ;;  %5244 = vmatpush3.msra.mxu1 %v7736_v42 }
 0x2d1   :  { %1740 = vmatprep.subr.mxu0 %v10297_v52  ;;  %5245 = vmatprep.subr.mxu1 %v10214_v20 }
 0x2d2   :  { %1741 = vmatpush1.msra.mxu0 %v10298_v32  ;;  %5246 = vmatpush3.msra.mxu1 %v7742_v18 }
 0x2d3   :  { %1742 = vmatprep.subr.mxu0 %v10299_v50  ;;  %5247 = vmatprep.subr.mxu1 %v10214_v20 }
 0x2d4   :  { %1743 = vmatpush1.msra.mxu0 %v10300_v15  ;;  %5248 = vmatpush3.msra.mxu1 %v7748_v24 }
 0x2d5   :  { %1744 = vmatprep.subr.mxu0 %v10301_v43  ;;  %5249 = vmatprep.subr.mxu1 %v10214_v20  ;;  %v7791_v43 = vld [vmem:[#allocation7 + $0x168] sm:$0xff] }
 0x2d6   :  { %1745 = vmatpush1.msra.mxu0 %v10302_v41  ;;  %5250 = vmatpush3.msra.mxu1 %v7754_v39  ;;  %v7794_v41 = vld [vmem:[#allocation7 + $0x178] sm:$0xff] }
 0x2d7   :  { %1746 = vmatprep.subr.mxu0 %v10303_v38  ;;  %5251 = vmatprep.subr.mxu1 %v10214_v20  ;;  %v7797_v38 = vld [vmem:[#allocation7 + $0x158] sm:$0xff] }
 0x2d8   :  { %1747 = vmatpush1.msra.mxu0 %v10304_v53  ;;  %5252 = vmatpush3.msra.mxu1 %v7760_v63  ;;  %v7804_v53 = vld [vmem:[#allocation7 + $0x160] sm:$0xff] }
 0x2d9   :  { %1748 = vmatprep.subr.mxu0 %v10305_v5  ;;  %5253 = vmatprep.subr.mxu1 %v10214_v20 }
 0x2da   :  { %1749 = vmatpush1.msra.mxu0 %v7765_v37  ;;  %5254 = vmatpush3.msra.mxu1 %v7768_v55 }
 0x2db   :  { %1782 = vmatprep.mubr.f32.mxu0 %v10214_v20  ;;  %5255 = vmatprep.mubr.msk.f32.mxu1 %vm6572_vm0, %v10214_v20 }
 0x2dc   :  { %1879 = vmatprep.subr.mxu0 %v7774_v36  ;;  %5258 = vmatprep.subr.mxu1 %v10214_v20 }
 0x337   :  { %v1317_v40 = vpop.f32.mrf.mxu0  ;;  %v1388_v26 = vpop.f32.mrf.mxu1 }
 0x338   :  { %v1318_v14 = vadd.f32 %v1317_v40, %v10306_v46  ;;  %v1389_v57 = vadd.f32 %v1388_v26, %v7014_v56  ;;  %v7807_v40 = vld [vmem:[#allocation7 + $0x140] sm:$0xff]  ;;  %v7811_v26 = vld [vmem:[#allocation7 + $0x138] sm:$0xff] }
 0x339   :  { %v5152_v58 = vpop.f32.mrf.mxu1  ;;  %v1319_v3 = vpop.f32.mrf.mxu0 }
 0x33a   :  { %v1392_v25 = vadd.f32 %v1318_v14, %v10307_v17  ;;  %v1320_v11 = vadd.f32 %v1319_v3, %v7002_v62  ;;  %v7814_v14 = vld [vmem:[#allocation7 + $0x148] sm:$0xff] }
 0x33c   :  { %v4458_v51 = vmul.f32 -1.442695, %v1392_v25  ;;  %v1399_v19 = vadd.f32 %v1320_v11, %v10308_v59  ;;  %v7819_v25 = vld [vmem:[#allocation7 + $0x128] sm:$0xff]  ;;  %v7825_v11 = vld [vmem:[#allocation7 + $0x120] sm:$0xff]  ;;  %v7828_v59 = vld [vmem:[#allocation7 + $0x130] sm:$0xff] }
 0x33e   :  { %5894 = vpow2.f32 %v4458_v51  ;;  %v4459_v4 = vmul.f32 -1.442695, %v1399_v19 }
 0x340   :  { %5896 = vpow2.f32 %v4459_v4  ;;  %v7831_v4 = vld [vmem:[#allocation7 + $0x110] sm:$0xff] }
 0x34b   :  { %v5895_v2 = vpop.eup %5894 }
 0x34c   :  { %v1396_v54 = vadd.f32 1.0, %v5895_v2 }
 0x34d   :  { %v5897_v45 = vpop.eup %5896 }
 0x34e   :  { %5898 = vrcp.f32 %v1396_v54  ;;  %v1403_v30 = vadd.f32 1.0, %v5897_v45  ;;  %v7835_v54 = vld [vmem:[#allocation7 + $0x108] sm:$0xff]  ;;  %v7838_v45 = vld [vmem:[#allocation7 + $0x118] sm:$0xff] }
 0x358   :  { %v7782_v23 = vpop.f32.mrf.mxu1  ;;  %v1478_v15 = vpop.f32.mrf.mxu0 }
 0x359   :  { %v1479_v51 = vadd.f32 %v1478_v15, %v7505_v0 }
 0x35a   :  { %v5187_v61 = vpop.f32.mrf.mxu1  ;;  %v1480_v5 = vpop.f32.mrf.mxu0 }
 0x35b   :  { %v5899_v21 = vpop.eup %5898 }
 0x35c   :  { %v1406_v27 = vmul.f32 %v5899_v21, %v1389_v57  ;;  %v7841_v57 = vld [vmem:[#allocation7 + $0xf8] sm:$0xff]  ;;  %v7845_v21 = vld [vmem:[#allocation7 + $0xf0] sm:$0xff] }
 0x35e   :  { %v1407_v29 = vadd.f32 %v1406_v27, %v10309_v28  ;;  %v7848_v27 = vld [vmem:[#allocation7 + $0x100] sm:$0xff] }
 0x35f   :  { %v7851_v28 = vld [vmem:[#allocation7 + $0xe0] sm:$0xff] }
 0x360   :  { %5900 = vtanh.f32 %v1407_v29 }
 0x361   :  { %5902 = vrcp.f32 %v1403_v30  ;;  %v7855_v30 = vld [vmem:[#allocation7 + $0xd8] sm:$0xff] }
 0x36d   :  { %v5901_v49 = vpop.eup %5900 }
 0x36e   :  { %v1409_v31 = vsub.f32 %v7487_v35, %v5901_v49  ;;  %v5903_v52 = vpop.eup %5902  ;;  %v7801_v35 = vld [vmem:[#allocation7 + $0x150] sm:$0xff] }
 0x370   :  { %v1410_v32 = vmul.f32 %v5903_v52, %v1409_v31  ;;  %v7861_v31 = vld [vmem:[#allocation7 + $0xc8] sm:$0xff]  ;;  %v7865_v52 = vld [vmem:[#allocation7 + $0xc0] sm:$0xff] }
 0x372   :  { %v7787_v50 = vadd.f32 %v5901_v49, %v1410_v32  ;;  %v7858_v49 = vld [vmem:[#allocation7 + $0xe8] sm:$0xff]  ;;  %v7868_v32 = vld [vmem:[#allocation7 + $0xd0] sm:$0xff] }
 0x374   :  { %1783 = vmatmul.mubr.f32.vlgmr.msra.gmra.mxu0 %v7787_v50  ;;  %5256 = vmatmul.mubr.f32.vlgmr.msra.gmra.mxu1 %v7787_v50 }
 0x375   :  { %1880 = vmatpush1.msra.mxu0 %v7791_v43  ;;  %5259 = vmatpush3.msra.mxu1 %v7794_v41 }
 0x376   :  { %1881 = vmatprep.subr.mxu0 %v7797_v38  ;;  %5260 = vmatprep.subr.mxu1 %v10214_v20 }
 0x377   :  { %1882 = vmatpush1.msra.mxu0 %v7801_v35  ;;  %5261 = vmatpush3.msra.mxu1 %v7804_v53 }
 0x378   :  { %1883 = vmatprep.subr.mxu0 %v7807_v40  ;;  %5262 = vmatprep.subr.mxu1 %v10214_v20 }
 0x379   :  { %1884 = vmatpush1.msra.mxu0 %v7811_v26  ;;  %5263 = vmatpush3.msra.mxu1 %v7814_v14 }
 0x37a   :  { %v1619_v58 = vpop.f32.mrf.mxu0  ;;  %v7817_v17 = vpop.f32.mrf.mxu1  ;;  %1885 = vmatprep.subr.mxu0 %v7819_v25  ;;  %5264 = vmatprep.subr.mxu1 %v10214_v20 }
 0x37b   :  { %v1620_v3 = vadd.f32 %v1619_v58, %v7511_v44  ;;  %1886 = vmatpush1.msra.mxu0 %v7825_v11  ;;  %5265 = vmatpush3.msra.mxu1 %v7828_v59  ;;  %v7872_v58 = vld [vmem:[#allocation7 + $0xb0] sm:$0xff] }
 0x37c   :  { %v5222_v19 = vpop.f32.mrf.mxu1  ;;  %1887 = vmatprep.subr.mxu0 %v7831_v4  ;;  %5266 = vmatprep.subr.mxu1 %v10214_v20  ;;  %v1621_v29 = vpop.f32.mrf.mxu0  ;;  %10310 = vst [vmem:[#allocation38_spill] sm:$0xff] %v7872_v58 }
 0x37d   :  { %v1694_v2 = vadd.f32 %v1620_v3, %v1479_v51  ;;  %1888 = vmatpush1.msra.mxu0 %v7835_v54  ;;  %5267 = vmatpush3.msra.mxu1 %v7838_v45  ;;  %v1622_v15 = vadd.f32 %v1621_v29, %v7535_v1  ;;  %v7876_v51 = vld [vmem:[#allocation7 + $0xa8] sm:$0xff]  ;;  %v7879_v3 = vld [vmem:[#allocation7 + $0xb8] sm:$0xff]  ;;  %v1481_v19 = vadd.f32 %v1480_v5, %v7543_v8  ;;  %v7890_v29 = vld [vmem:[#allocation7 + $0xa0] sm:$0xff] }
 0x37e   :  { %1889 = vmatprep.subr.mxu0 %v7841_v57  ;;  %5268 = vmatprep.subr.mxu1 %v10214_v20  ;;  %10311 = vst [vmem:[#allocation39_spill] sm:$0xff] %v7876_v51  ;;  %10314 = vst [vmem:[#allocation42_spill] sm:$0xff] %v7890_v29  ;;  %v7897_v5 = vld [vmem:[#allocation7 + $0x78] sm:$0xff]  ;;  %v8016_v8 = vld [vmem:[#allocation8 + $0xf0] sm:$0xff] }
 0x37f   :  { %v4460_v61 = vmul.f32 -1.442695, %v1694_v2  ;;  %1890 = vmatpush1.msra.mxu0 %v7845_v21  ;;  %5269 = vmatpush3.msra.mxu1 %v7848_v27  ;;  %v7883_v2 = vld [vmem:[#allocation7 + $0x98] sm:$0xff]  ;;  %10316 = vst [vmem:[#allocation44_spill] sm:$0xff] %v7897_v5  ;;  %10346 = vst [vmem:[#allocation74_spill] sm:$0xff] %v8016_v8 }
 0x380   :  { %1891 = vmatprep.subr.mxu0 %v7851_v28  ;;  %5270 = vmatprep.subr.mxu1 %v10214_v20  ;;  %10312 = vst [vmem:[#allocation40_spill] sm:$0xff] %v7883_v2 }
 0x381   :  { %5904 = vpow2.f32 %v4460_v61  ;;  %1892 = vmatpush1.msra.mxu0 %v7855_v30  ;;  %5271 = vmatpush3.msra.mxu1 %v7858_v49  ;;  %v7887_v61 = vld [vmem:[#allocation7 + $0x90] sm:$0xff] }
 0x382   :  { %1893 = vmatprep.subr.mxu0 %v7861_v31  ;;  %5272 = vmatprep.subr.mxu1 %v10214_v20  ;;  %10313 = vst [vmem:[#allocation41_spill] sm:$0xff] %v7887_v61 }
 0x383   :  { %1894 = vmatpush1.msra.mxu0 %v7865_v52  ;;  %5273 = vmatpush3.msra.mxu1 %v7868_v32 }
 0x384   :  { %1895 = vmatprep.subr.mxu0 %v7872_v58  ;;  %5274 = vmatprep.subr.mxu1 %v10214_v20  ;;  %v7893_v58 = vld [vmem:[#allocation7 + $0x80] sm:$0xff] }
 0x385   :  { %1896 = vmatpush1.msra.mxu0 %v7876_v51  ;;  %5275 = vmatpush3.msra.mxu1 %v7879_v3  ;;  %v1701_v51 = vadd.f32 %v1622_v15, %v1481_v19  ;;  %10315 = vst [vmem:[#allocation43_spill] sm:$0xff] %v7893_v58  ;;  %v7907_v15 = vld [vmem:[#allocation7 + $0x60] sm:$0xff]  ;;  %v7910_v19 = vld [vmem:[#allocation7 + $0x70] sm:$0xff] }
 0x386   :  { %1897 = vmatprep.subr.mxu0 %v7883_v2  ;;  %5276 = vmatprep.subr.mxu1 %v10214_v20  ;;  %v7900_v2 = vld [vmem:[#allocation7 + $0x88] sm:$0xff]  ;;  %10319 = vst [vmem:[#allocation47_spill] sm:$0xff] %v7907_v15  ;;  %10320 = vst [vmem:[#allocation48_spill] sm:$0xff] %v7910_v19 }
 0x387   :  { %1898 = vmatpush1.msra.mxu0 %v7887_v61  ;;  %5277 = vmatpush3.msra.mxu1 %v7890_v29  ;;  %10317 = vst [vmem:[#allocation45_spill] sm:$0xff] %v7900_v2  ;;  %v7903_v61 = vld [vmem:[#allocation7 + $0x68] sm:$0xff]  ;;  %v7923_v29 = vld [vmem:[#allocation7 + $0x38] sm:$0xff] }
 0x388   :  { %1899 = vmatprep.subr.mxu0 %v7893_v58  ;;  %5278 = vmatprep.subr.mxu1 %v10214_v20  ;;  %10318 = vst [vmem:[#allocation46_spill] sm:$0xff] %v7903_v61  ;;  %v4461_v58 = vmul.f32 -1.442695, %v1701_v51  ;;  %10324 = vst [vmem:[#allocation52_spill] sm:$0xff] %v7923_v29 }
 0x389   :  { %1900 = vmatpush1.msra.mxu0 %v7897_v5  ;;  %5279 = vmatpush3.msra.mxu1 %v7900_v2  ;;  %v7913_v5 = vld [vmem:[#allocation7 + $0x50] sm:$0xff]  ;;  %v7917_v2 = vld [vmem:[#allocation7 + $0x48] sm:$0xff] }
 0x38a   :  { %1901 = vmatprep.subr.mxu0 %v7903_v61  ;;  %5280 = vmatprep.subr.mxu1 %v10214_v20  ;;  %10321 = vst [vmem:[#allocation49_spill] sm:$0xff] %v7913_v5  ;;  %10322 = vst [vmem:[#allocation50_spill] sm:$0xff] %v7917_v2  ;;  %v7920_v61 = vld [vmem:[#allocation7 + $0x58] sm:$0xff]  ;;  %5906 = vpow2.f32 %v4461_v58  ;;  %v7947_v58 = vld [vmem:[#allocation7] sm:$0xff] }
 0x38b   :  { %1902 = vmatpush1.msra.mxu0 %v7907_v15  ;;  %5281 = vmatpush3.msra.mxu1 %v7910_v19  ;;  %10323 = vst [vmem:[#allocation51_spill] sm:$0xff] %v7920_v61  ;;  %v7927_v19 = vld [vmem:[#allocation7 + $0x30] sm:$0xff]  ;;  %10331 = vst [vmem:[#allocation59_spill] sm:$0xff] %v7947_v58 }
 0x38c   :  { %1903 = vmatprep.subr.mxu0 %v7913_v5  ;;  %5282 = vmatprep.subr.mxu1 %v10214_v20  ;;  %10325 = vst [vmem:[#allocation53_spill] sm:$0xff] %v7927_v19  ;;  %v7930_v5 = vld [vmem:[#allocation7 + $0x40] sm:$0xff] }
 0x38d   :  { %1904 = vmatpush1.msra.mxu0 %v7917_v2  ;;  %5283 = vmatpush3.msra.mxu1 %v7920_v61  ;;  %10326 = vst [vmem:[#allocation54_spill] sm:$0xff] %v7930_v5  ;;  %v7933_v2 = vld [vmem:[#allocation7 + $0x20] sm:$0xff] }
 0x38e   :  { %v5905_v15 = vpop.eup %5904  ;;  %1905 = vmatprep.subr.mxu0 %v7923_v29  ;;  %5284 = vmatprep.subr.mxu1 %v10214_v20  ;;  %10327 = vst [vmem:[#allocation55_spill] sm:$0xff] %v7933_v2  ;;  %v7937_v29 = vld [vmem:[#allocation7 + $0x18] sm:$0xff] }
 0x38f   :  { %v1698_v51 = vadd.f32 1.0, %v5905_v15  ;;  %1906 = vmatpush1.msra.mxu0 %v7927_v19  ;;  %5285 = vmatpush3.msra.mxu1 %v7930_v5  ;;  %10328 = vst [vmem:[#allocation56_spill] sm:$0xff] %v7937_v29  ;;  %v7940_v15 = vld [vmem:[#allocation7 + $0x28] sm:$0xff]  ;;  %v7997_v5 = vld [vmem:[#allocation8 + $0x130] sm:$0xff] }
 0x390   :  { %1907 = vmatprep.subr.mxu0 %v7933_v2  ;;  %5286 = vmatprep.subr.mxu1 %v10214_v20  ;;  %10329 = vst [vmem:[#allocation20_spill] sm:$0xff] %v7940_v15  ;;  %v7943_v19 = vld [vmem:[#allocation7 + $0x8] sm:$0xff]  ;;  %v7978_v2 = vld [vmem:[#allocation8 + $0x140] sm:$0xff]  ;;  %10344 = vst [vmem:[#allocation70_spill] sm:$0xff] %v7997_v5 }
 0x391   :  { %5908 = vrcp.f32 %v1698_v51  ;;  %1908 = vmatpush1.msra.mxu0 %v7937_v29  ;;  %5287 = vmatpush3.msra.mxu1 %v7940_v15  ;;  %10330 = vst [vmem:[#allocation57_spill] sm:$0xff] %v7943_v19  ;;  %v7951_v51 = vld [vmem:[#allocation7 + $0x10] sm:$0xff]  ;;  %v7965_v15 = vld [vmem:[#allocation8 + $0x178] sm:$0xff]  ;;  %10339 = vst [vmem:[#allocation66_spill] sm:$0xff] %v7978_v2 }
 0x392   :  { %1909 = vmatprep.subr.mxu0 %v7943_v19  ;;  %5288 = vmatprep.subr.mxu1 %v10214_v20  ;;  %10332 = vst [vmem:[#allocation58_spill] sm:$0xff] %v7951_v51  ;;  %v7958_v19 = vld [vmem:[#allocation8 + $0x170] sm:$0xff]  ;;  %10335 = vst [vmem:[#allocation61_spill] sm:$0xff] %v7965_v15 }
 0x393   :  { %1910 = vmatpush1.msra.mxu0 %v7947_v58  ;;  %1943 = vmatprep.mubr.f32.mxu0 %v10214_v20  ;;  %10333 = vst [vmem:[#allocation60_spill] sm:$0xff] %v7958_v19  ;;  %v7962_v58 = vld [vmem:[#allocation8 + $0x168] sm:$0xff]  ;;  %v7972_v29 = vld [vmem:[#allocation8 + $0x150] sm:$0xff] }
 0x394   :  { %5289 = vmatpush3.msra.mxu1 %v7951_v51  ;;  %5290 = vmatprep.mubr.msk.f32.mxu1 %vm6572_vm0, %v10214_v20  ;;  %10334 = vst [vmem:[#allocation62_spill] sm:$0xff] %v7962_v58  ;;  %v7968_v51 = vld [vmem:[#allocation8 + $0x158] sm:$0xff]  ;;  %10337 = vst [vmem:[#allocation65_spill] sm:$0xff] %v7972_v29 }
 0x395   :  { %1944 = vmatmul.mubr.f32.vlgmr.msra.gmra.mxu0 %v7787_v50  ;;  %5291 = vmatmul.mubr.f32.vlgmr.msra.gmra.mxu1 %v7787_v50  ;;  %10336 = vst [vmem:[#allocation63_spill] sm:$0xff] %v7968_v51 }
 0x396   :  { %2020 = vmatprep.subr.mxu0 %v7958_v19  ;;  %5293 = vmatprep.subr.mxu1 %v10214_v20  ;;  %v7975_v19 = vld [vmem:[#allocation8 + $0x160] sm:$0xff] }
 0x397   :  { %2021 = vmatpush1.msra.mxu0 %v7962_v58  ;;  %5294 = vmatpush3.msra.mxu1 %v7965_v15  ;;  %10338 = vst [vmem:[#allocation64_spill] sm:$0xff] %v7975_v19  ;;  %v7982_v15 = vld [vmem:[#allocation8 + $0x138] sm:$0xff]  ;;  %v7988_v58 = vld [vmem:[#allocation8 + $0x128] sm:$0xff] }
 0x398   :  { %2022 = vmatprep.subr.mxu0 %v7968_v51  ;;  %5295 = vmatprep.subr.mxu1 %v10214_v20  ;;  %10340 = vst [vmem:[#allocation68_spill] sm:$0xff] %v7982_v15  ;;  %v7985_v51 = vld [vmem:[#allocation8 + $0x148] sm:$0xff]  ;;  %10342 = vst [vmem:[#allocation69_spill] sm:$0xff] %v7988_v58 }
 0x399   :  { %2023 = vmatpush1.msra.mxu0 %v7972_v29  ;;  %5296 = vmatpush3.msra.mxu1 %v7975_v19  ;;  %10341 = vst [vmem:[#allocation67_spill] sm:$0xff] %v7985_v51  ;;  %v5907_v19 = vpop.eup %5906  ;;  %v7994_v29 = vld [vmem:[#allocation8 + $0x120] sm:$0xff] }
 0x39a   :  { %2024 = vmatprep.subr.mxu0 %v7978_v2  ;;  %5297 = vmatprep.subr.mxu1 %v10214_v20  ;;  %v1691_v2 = vadd.f32 %v7817_v17, %v7594_v34  ;;  %10343 = vst [vmem:[#allocation71_spill] sm:$0xff] %v7994_v29  ;;  %v8006_v17 = vld [vmem:[#allocation8 + $0x108] sm:$0xff]  ;;  %v1705_v34 = vadd.f32 1.0, %v5907_v19 }
 0x39b   :  { %2025 = vmatpush1.msra.mxu0 %v7982_v15  ;;  %5298 = vmatpush3.msra.mxu1 %v7985_v51  ;;  %v8000_v51 = vld [vmem:[#allocation8 + $0x110] sm:$0xff]  ;;  %v8032_v19 = vld [vmem:[#allocation8 + $0xc8] sm:$0xff] }
 0x39c   :  { %2026 = vmatprep.subr.mxu0 %v7988_v58  ;;  %5299 = vmatprep.subr.mxu1 %v10214_v20  ;;  %10345 = vst [vmem:[#allocation72_spill] sm:$0xff] %v8000_v51  ;;  %v1550_v58 = vadd.f32 %v7782_v23, %v7604_v10  ;;  %v8019_v23 = vld [vmem:[#allocation8 + $0x100] sm:$0xff]  ;;  %10351 = vst [vmem:[#allocation78_spill] sm:$0xff] %v8032_v19 }
 0x39d   :  { %2027 = vmatpush1.msra.mxu0 %v7994_v29  ;;  %5300 = vmatpush3.msra.mxu1 %v7997_v5  ;;  %v8009_v29 = vld [vmem:[#allocation8 + $0x118] sm:$0xff]  ;;  %10347 = vst [vmem:[#allocation73_spill] sm:$0xff] %v8019_v23 }
 0x39e   :  { %v5909_v15 = vpop.eup %5908  ;;  %2028 = vmatprep.subr.mxu0 %v8000_v51  ;;  %5301 = vmatprep.subr.mxu1 %v10214_v20  ;;  %v8012_v5 = vld [vmem:[#allocation8 + $0xf8] sm:$0xff] }
 0x39f   :  { %v1708_v61 = vmul.f32 %v5909_v15, %v1691_v2  ;;  %2029 = vmatpush1.msra.mxu0 %v8006_v17  ;;  %5302 = vmatpush3.msra.mxu1 %v8009_v29  ;;  %v8022_v2 = vld [vmem:[#allocation8 + $0xe0] sm:$0xff]  ;;  %v8026_v15 = vld [vmem:[#allocation8 + $0xd8] sm:$0xff] }
 0x3a0   :  { %2030 = vmatprep.subr.mxu0 %v8012_v5  ;;  %5303 = vmatprep.subr.mxu1 %v10214_v20  ;;  %10348 = vst [vmem:[#allocation75_spill] sm:$0xff] %v8022_v2  ;;  %10349 = vst [vmem:[#allocation77_spill] sm:$0xff] %v8026_v15 }
 0x3a1   :  { %v1709_v51 = vadd.f32 %v1708_v61, %v1550_v58  ;;  %2031 = vmatpush1.msra.mxu0 %v8016_v8  ;;  %5304 = vmatpush3.msra.mxu1 %v8019_v23  ;;  %v8029_v61 = vld [vmem:[#allocation8 + $0xe8] sm:$0xff]  ;;  %v8036_v58 = vld [vmem:[#allocation8 + $0xc0] sm:$0xff] }
 0x3a2   :  { %2032 = vmatprep.subr.mxu0 %v8022_v2  ;;  %5305 = vmatprep.subr.mxu1 %v10214_v20  ;;  %10350 = vst [vmem:[#allocation76_spill] sm:$0xff] %v8029_v61  ;;  %10352 = vst [vmem:[#allocation80_spill] sm:$0xff] %v8036_v58  ;;  %v8103_v23 = vld [vmem:[#allocation8 + $0x20] sm:$0xff]  ;;  %v8113_v8 = vld [vmem:[#allocation8 + $0x8] sm:$0xff] }
 0x3a3   :  { %5910 = vtanh.f32 %v1709_v51  ;;  %2033 = vmatpush1.msra.mxu0 %v8026_v15  ;;  %5306 = vmatpush3.msra.mxu1 %v8029_v61  ;;  %v8039_v51 = vld [vmem:[#allocation8 + $0xd0] sm:$0xff]  ;;  %v8046_v61 = vld [vmem:[#allocation8 + $0xa8] sm:$0xff]  ;;  %10371 = vst [vmem:[#allocation98_spill] sm:$0xff] %v8103_v23 }
 0x3a4   :  { %2034 = vmatprep.subr.mxu0 %v8032_v19  ;;  %5307 = vmatprep.subr.mxu1 %v10214_v20  ;;  %5912 = vrcp.f32 %v1705_v34  ;;  %10353 = vst [vmem:[#allocation79_spill] sm:$0xff] %v8039_v51  ;;  %v8042_v15 = vld [vmem:[#allocation8 + $0xb0] sm:$0xff]  ;;  %10355 = vst [vmem:[#allocation83_spill] sm:$0xff] %v8046_v61  ;;  %v8049_v19 = vld [vmem:[#allocation8 + $0xb8] sm:$0xff] }
 0x3a5   :  { %2035 = vmatpush1.msra.mxu0 %v8036_v58  ;;  %5308 = vmatpush3.msra.mxu1 %v8039_v51  ;;  %10354 = vst [vmem:[#allocation81_spill] sm:$0xff] %v8042_v15  ;;  %10356 = vst [vmem:[#allocation82_spill] sm:$0xff] %v8049_v19  ;;  %v8052_v34 = vld [vmem:[#allocation8 + $0x98] sm:$0xff]  ;;  %v8056_v51 = vld [vmem:[#allocation8 + $0x90] sm:$0xff] }
 0x3a6   :  { %2036 = vmatprep.subr.mxu0 %v8042_v15  ;;  %5309 = vmatprep.subr.mxu1 %v10214_v20  ;;  %10357 = vst [vmem:[#allocation84_spill] sm:$0xff] %v8052_v34  ;;  %10358 = vst [vmem:[#allocation86_spill] sm:$0xff] %v8056_v51  ;;  %v8059_v15 = vld [vmem:[#allocation8 + $0xa0] sm:$0xff] }
 0x3a7   :  { %2037 = vmatpush1.msra.mxu0 %v8046_v61  ;;  %5310 = vmatpush3.msra.mxu1 %v8049_v19  ;;  %10359 = vst [vmem:[#allocation85_spill] sm:$0xff] %v8059_v15  ;;  %v8062_v58 = vld [vmem:[#allocation8 + $0x80] sm:$0xff]  ;;  %v8066_v19 = vld [vmem:[#allocation8 + $0x78] sm:$0xff]  ;;  %v8072_v61 = vld [vmem:[#allocation8 + $0x68] sm:$0xff] }
 0x3a8   :  { %2038 = vmatprep.subr.mxu0 %v8052_v34  ;;  %5311 = vmatprep.subr.mxu1 %v10214_v20  ;;  %10360 = vst [vmem:[#allocation87_spill] sm:$0xff] %v8062_v58  ;;  %10361 = vst [vmem:[#allocation89_spill] sm:$0xff] %v8066_v19  ;;  %v8069_v34 = vld [vmem:[#allocation8 + $0x88] sm:$0xff] }
 0x3a9   :  { %2039 = vmatpush1.msra.mxu0 %v8056_v51  ;;  %5312 = vmatpush3.msra.mxu1 %v8059_v15  ;;  %10362 = vst [vmem:[#allocation88_spill] sm:$0xff] %v8069_v34  ;;  %10363 = vst [vmem:[#allocation90_spill] sm:$0xff] %v8072_v61  ;;  %v8076_v15 = vld [vmem:[#allocation8 + $0x60] sm:$0xff]  ;;  %v8082_v51 = vld [vmem:[#allocation8 + $0x50] sm:$0xff] }
 0x3aa   :  { %2040 = vmatprep.subr.mxu0 %v8062_v58  ;;  %5313 = vmatprep.subr.mxu1 %v10214_v20  ;;  %10364 = vst [vmem:[#allocation92_spill] sm:$0xff] %v8076_v15  ;;  %v8079_v58 = vld [vmem:[#allocation8 + $0x70] sm:$0xff]  ;;  %10366 = vst [vmem:[#allocation93_spill] sm:$0xff] %v8082_v51 }
 0x3ab   :  { %2041 = vmatpush1.msra.mxu0 %v8066_v19  ;;  %5314 = vmatpush3.msra.mxu1 %v8069_v34  ;;  %10365 = vst [vmem:[#allocation91_spill] sm:$0xff] %v8079_v58  ;;  %v8086_v34 = vld [vmem:[#allocation8 + $0x48] sm:$0xff] }
 0x3ac   :  { %2042 = vmatprep.subr.mxu0 %v8072_v61  ;;  %5315 = vmatprep.subr.mxu1 %v10214_v20  ;;  %10367 = vst [vmem:[#allocation94_spill] sm:$0xff] %v8086_v34  ;;  %v8089_v61 = vld [vmem:[#allocation8 + $0x58] sm:$0xff] }
 0x3ad   :  { %2043 = vmatpush1.msra.mxu0 %v8076_v15  ;;  %5316 = vmatpush3.msra.mxu1 %v8079_v58  ;;  %10368 = vst [vmem:[#allocation95_spill] sm:$0xff] %v8089_v61  ;;  %v8092_v15 = vld [vmem:[#allocation8 + $0x38] sm:$0xff]  ;;  %v8096_v58 = vld [vmem:[#allocation8 + $0x30] sm:$0xff] }
 0x3ae   :  { %2044 = vmatprep.subr.mxu0 %v8082_v51  ;;  %5317 = vmatprep.subr.mxu1 %v10214_v20  ;;  %10369 = vst [vmem:[#allocation96_spill] sm:$0xff] %v8092_v15  ;;  %10370 = vst [vmem:[#allocation97_spill] sm:$0xff] %v8096_v58  ;;  %v8099_v51 = vld [vmem:[#allocation8 + $0x40] sm:$0xff] }
 0x3af   :  { %2045 = vmatpush1.msra.mxu0 %v8086_v34  ;;  %5318 = vmatpush3.msra.mxu1 %v8089_v61  ;;  %v8110_v61 = vld [vmem:[#allocation8 + $0x28] sm:$0xff] }
 0x3b0   :  { %v5911_v19 = vpop.eup %5910  ;;  %2046 = vmatprep.subr.mxu0 %v8092_v15  ;;  %5319 = vmatprep.subr.mxu1 %v10214_v20  ;;  %v8107_v15 = vld [vmem:[#allocation8 + $0x18] sm:$0xff] }
 0x3b1   :  { %2047 = vmatpush1.msra.mxu0 %v8096_v58  ;;  %5320 = vmatpush3.msra.mxu1 %v8099_v51  ;;  %v1711_v34 = vsub.f32 %v7664_v48, %v5911_v19  ;;  %v5913_v2 = vpop.eup %5912  ;;  %10372 = vst [vmem:[#allocation99_spill] sm:$0xff] %v8107_v15  ;;  %v8117_v48 = vld [vmem:[#allocation8] sm:$0xff] }
 0x3b2   :  { %2048 = vmatprep.subr.mxu0 %v8103_v23  ;;  %5321 = vmatprep.subr.mxu1 %v10214_v20 }
 0x3b3   :  { %2049 = vmatpush1.msra.mxu0 %v8107_v15  ;;  %5322 = vmatpush3.msra.mxu1 %v8110_v61  ;;  %v1712_v58 = vmul.f32 %v5913_v2, %v1711_v34  ;;  %v8123_v15 = vld [vmem:[#allocation8 + $0x10] sm:$0xff]  ;;  %v8134_v34 = vld [vmem:[#allocation5 + $0x168] sm:$0xff] }
 0x3b4   :  { %2050 = vmatprep.subr.mxu0 %v8113_v8  ;;  %5323 = vmatprep.subr.mxu1 %v10214_v20  ;;  %v8130_v2 = vld [vmem:[#allocation5 + $0x170] sm:$0xff]  ;;  %10374 = vst [vmem:[#allocation101_spill] sm:$0xff] %v8134_v34 }
 0x3b5   :  { %2051 = vmatpush1.msra.mxu0 %v8117_v48  ;;  %2084 = vmatprep.mubr.f32.mxu0 %v10214_v20  ;;  %v8121_v23 = vadd.f32 %v5911_v19, %v1712_v58  ;;  %10373 = vst [vmem:[#allocation100_spill] sm:$0xff] %v8130_v2  ;;  %v8138_v19 = vld [vmem:[#allocation5 + $0x158] sm:$0xff]  ;;  %v8142_v58 = vld [vmem:[#allocation5 + $0x150] sm:$0xff] }
 0x3b6   :  { %5324 = vmatpush3.msra.mxu1 %v8123_v15  ;;  %5325 = vmatprep.mubr.msk.f32.mxu1 %vm6572_vm0, %v10214_v20  ;;  %10375 = vst [vmem:[#allocation102_spill] sm:$0xff] %v8142_v58 }
 0x3b7   :  { %2085 = vmatmul.mubr.f32.vlgmr.msra.gmra.mxu0 %v8121_v23  ;;  %5326 = vmatmul.mubr.f32.vlgmr.msra.gmra.mxu1 %v8121_v23 }
 0x3b8   :  { %2185 = vmatprep.subr.mxu0 %v8130_v2  ;;  %5328 = vmatprep.subr.mxu1 %v10214_v20  ;;  %v8146_v2 = vld [vmem:[#allocation5 + $0x140] sm:$0xff] }
 0x3b9   :  { %2186 = vmatpush1.msra.mxu0 %v8134_v34  ;;  %5329 = vmatpush3.msra.mxu1 %v7676_v60  ;;  %v8150_v34 = vld [vmem:[#allocation5 + $0x138] sm:$0xff]  ;;  %v8154_v60 = vld [vmem:[#allocation5 + $0x128] sm:$0xff] }
 0x3ba   :  { %2187 = vmatprep.subr.mxu0 %v8138_v19  ;;  %5330 = vmatprep.subr.mxu1 %v10214_v20  ;;  %10376 = vst [vmem:[#allocation103_spill] sm:$0xff] %v8150_v34 }
 0x3bb   :  { %2188 = vmatpush1.msra.mxu0 %v8142_v58  ;;  %5331 = vmatpush3.msra.mxu1 %v7682_v33  ;;  %v8158_v58 = vld [vmem:[#allocation5 + $0x120] sm:$0xff]  ;;  %v8162_v33 = vld [vmem:[#allocation5 + $0x110] sm:$0xff] }
 0x3bc   :  { %2189 = vmatprep.subr.mxu0 %v8146_v2  ;;  %5332 = vmatprep.subr.mxu1 %v10214_v20  ;;  %10377 = vst [vmem:[#allocation104_spill] sm:$0xff] %v8158_v58 }
 0x3bd   :  { %2190 = vmatpush1.msra.mxu0 %v8150_v34  ;;  %5333 = vmatpush3.msra.mxu1 %v7688_v16  ;;  %v8166_v34 = vld [vmem:[#allocation5 + $0x108] sm:$0xff]  ;;  %v8170_v16 = vld [vmem:[#allocation5 + $0xf8] sm:$0xff] }
 0x3be   :  { %2191 = vmatprep.subr.mxu0 %v8154_v60  ;;  %5334 = vmatprep.subr.mxu1 %v10214_v20  ;;  %10378 = vst [vmem:[#allocation105_spill] sm:$0xff] %v8166_v34 }
 0x3bf   :  { %2192 = vmatpush1.msra.mxu0 %v8158_v58  ;;  %5335 = vmatpush3.msra.mxu1 %v7694_v12  ;;  %v8174_v58 = vld [vmem:[#allocation5 + $0xf0] sm:$0xff]  ;;  %v8178_v12 = vld [vmem:[#allocation5 + $0xe0] sm:$0xff] }
 0x3c0   :  { %2193 = vmatprep.subr.mxu0 %v8162_v33  ;;  %5336 = vmatprep.subr.mxu1 %v10214_v20  ;;  %10379 = vst [vmem:[#allocation106_spill] sm:$0xff] %v8174_v58 }
 0x3c1   :  { %2194 = vmatpush1.msra.mxu0 %v8166_v34  ;;  %5337 = vmatpush3.msra.mxu1 %v7700_v6  ;;  %v8182_v34 = vld [vmem:[#allocation5 + $0xd8] sm:$0xff]  ;;  %v8186_v6 = vld [vmem:[#allocation5 + $0xc8] sm:$0xff] }
 0x3c2   :  { %2195 = vmatprep.subr.mxu0 %v8170_v16  ;;  %5338 = vmatprep.subr.mxu1 %v10214_v20  ;;  %10380 = vst [vmem:[#allocation107_spill] sm:$0xff] %v8182_v34  ;;  %10381 = vst [vmem:[#allocation108_spill] sm:$0xff] %v8186_v6 }
 0x3c3   :  { %2196 = vmatpush1.msra.mxu0 %v8174_v58  ;;  %5339 = vmatpush3.msra.mxu1 %v7706_v13  ;;  %v8190_v58 = vld [vmem:[#allocation5 + $0xc0] sm:$0xff]  ;;  %v8194_v13 = vld [vmem:[#allocation5 + $0xb0] sm:$0xff] }
 0x3c4   :  { %2197 = vmatprep.subr.mxu0 %v8178_v12  ;;  %5340 = vmatprep.subr.mxu1 %v10214_v20  ;;  %10382 = vst [vmem:[#allocation109_spill] sm:$0xff] %v8190_v58  ;;  %10383 = vst [vmem:[#allocation110_spill] sm:$0xff] %v8194_v13 }
 0x3c5   :  { %2198 = vmatpush1.msra.mxu0 %v8182_v34  ;;  %5341 = vmatpush3.msra.mxu1 %v7712_v9  ;;  %v8198_v34 = vld [vmem:[#allocation5 + $0xa8] sm:$0xff]  ;;  %v8202_v9 = vld [vmem:[#allocation5 + $0x98] sm:$0xff] }
 0x3c6   :  { %2199 = vmatprep.subr.mxu0 %v8186_v6  ;;  %5342 = vmatprep.subr.mxu1 %v10214_v20  ;;  %10384 = vst [vmem:[#allocation111_spill] sm:$0xff] %v8198_v34  ;;  %10385 = vst [vmem:[#allocation112_spill] sm:$0xff] %v8202_v9 }
 0x3c7   :  { %2200 = vmatpush1.msra.mxu0 %v8190_v58  ;;  %5343 = vmatpush3.msra.mxu1 %v7718_v7  ;;  %v8206_v58 = vld [vmem:[#allocation5 + $0x90] sm:$0xff]  ;;  %v8210_v7 = vld [vmem:[#allocation5 + $0x80] sm:$0xff] }
 0x3c8   :  { %2201 = vmatprep.subr.mxu0 %v8194_v13  ;;  %5344 = vmatprep.subr.mxu1 %v10214_v20  ;;  %10386 = vst [vmem:[#allocation113_spill] sm:$0xff] %v8206_v58  ;;  %10387 = vst [vmem:[#allocation114_spill] sm:$0xff] %v8210_v7 }
 0x3c9   :  { %2202 = vmatpush1.msra.mxu0 %v8198_v34  ;;  %5345 = vmatpush3.msra.mxu1 %v7724_v47  ;;  %v8214_v34 = vld [vmem:[#allocation5 + $0x78] sm:$0xff]  ;;  %v8218_v47 = vld [vmem:[#allocation5 + $0x68] sm:$0xff] }
 0x3ca   :  { %2203 = vmatprep.subr.mxu0 %v8202_v9  ;;  %5346 = vmatprep.subr.mxu1 %v10214_v20  ;;  %10388 = vst [vmem:[#allocation115_spill] sm:$0xff] %v8214_v34  ;;  %10389 = vst [vmem:[#allocation116_spill] sm:$0xff] %v8218_v47 }
 0x3cb   :  { %2204 = vmatpush1.msra.mxu0 %v8206_v58  ;;  %5347 = vmatpush3.msra.mxu1 %v7730_v22  ;;  %v8222_v58 = vld [vmem:[#allocation5 + $0x60] sm:$0xff]  ;;  %v8226_v22 = vld [vmem:[#allocation5 + $0x50] sm:$0xff] }
 0x3cc   :  { %2205 = vmatprep.subr.mxu0 %v8210_v7  ;;  %5348 = vmatprep.subr.mxu1 %v10214_v20  ;;  %10390 = vst [vmem:[#allocation117_spill] sm:$0xff] %v8222_v58  ;;  %10391 = vst [vmem:[#allocation118_spill] sm:$0xff] %v8226_v22 }
 0x3cd   :  { %2206 = vmatpush1.msra.mxu0 %v8214_v34  ;;  %5349 = vmatpush3.msra.mxu1 %v7736_v42  ;;  %v8230_v34 = vld [vmem:[#allocation5 + $0x48] sm:$0xff]  ;;  %v8234_v42 = vld [vmem:[#allocation5 + $0x38] sm:$0xff] }
 0x3ce   :  { %2207 = vmatprep.subr.mxu0 %v8218_v47  ;;  %5350 = vmatprep.subr.mxu1 %v10214_v20  ;;  %10392 = vst [vmem:[#allocation119_spill] sm:$0xff] %v8230_v34  ;;  %10393 = vst [vmem:[#allocation120_spill] sm:$0xff] %v8234_v42 }
 0x3cf   :  { %2208 = vmatpush1.msra.mxu0 %v8222_v58  ;;  %5351 = vmatpush3.msra.mxu1 %v7742_v18  ;;  %v8238_v58 = vld [vmem:[#allocation5 + $0x30] sm:$0xff]  ;;  %v8242_v18 = vld [vmem:[#allocation5 + $0x20] sm:$0xff] }
 0x3d0   :  { %2209 = vmatprep.subr.mxu0 %v8226_v22  ;;  %5352 = vmatprep.subr.mxu1 %v10214_v20  ;;  %10394 = vst [vmem:[#allocation14_spill] sm:$0xff] %v8238_v58  ;;  %10395 = vst [vmem:[#allocation15_spill] sm:$0xff] %v8242_v18  ;;  %v10399_v22 = vld [vmem:[#allocation17_spill] sm:$0xff] }
 0x3d1   :  { %2210 = vmatpush1.msra.mxu0 %v8230_v34  ;;  %5353 = vmatpush3.msra.mxu1 %v7748_v24  ;;  %v8246_v34 = vld [vmem:[#allocation5 + $0x18] sm:$0xff]  ;;  %v8250_v24 = vld [vmem:[#allocation5 + $0x8] sm:$0xff] }
 0x3d2   :  { %2211 = vmatprep.subr.mxu0 %v8234_v42  ;;  %5354 = vmatprep.subr.mxu1 %v10214_v20  ;;  %10396 = vst [vmem:[#allocation29_spill] sm:$0xff] %v8246_v34  ;;  %10397 = vst [vmem:[#allocation125_spill] sm:$0xff] %v8250_v24 }
 0x3d3   :  { %2212 = vmatpush1.msra.mxu0 %v8238_v58  ;;  %5355 = vmatpush3.msra.mxu1 %v7754_v39 }
 0x3d4   :  { %2213 = vmatprep.subr.mxu0 %v8242_v18  ;;  %5356 = vmatprep.subr.mxu1 %v10214_v20  ;;  %v10398_v18 = vld [vmem:[#allocation16_spill] sm:$0xff] }
 0x3d5   :  { %2214 = vmatpush1.msra.mxu0 %v8246_v34  ;;  %5357 = vmatpush3.msra.mxu1 %v7760_v63 }
 0x3d6   :  { %2215 = vmatprep.subr.mxu0 %v8250_v24  ;;  %5358 = vmatprep.subr.mxu1 %v10214_v20 }
 0x3d7   :  { %2216 = vmatpush1.msra.mxu0 %v7765_v37  ;;  %5359 = vmatpush3.msra.mxu1 %v7768_v55 }
 0x3d8   :  { %2249 = vmatprep.mubr.f32.mxu0 %v10214_v20  ;;  %5360 = vmatprep.mubr.msk.f32.mxu1 %vm6572_vm0, %v10214_v20 }
 0x3d9   :  { %2346 = vmatprep.subr.mxu0 %v7774_v36  ;;  %5363 = vmatprep.subr.mxu1 %v10214_v20 }
 0x434   :  { %v1784_v39 = vpop.f32.mrf.mxu0  ;;  %v1855_v63 = vpop.f32.mrf.mxu1 }
 0x435   :  { %v1785_v34 = vadd.f32 %v1784_v39, %v10306_v46  ;;  %v1856_v39 = vadd.f32 %v1855_v63, %v7014_v56  ;;  %v10415_v63 = vld [vmem:[#allocation51_spill] sm:$0xff] }
 0x436   :  { %v5257_v24 = vpop.f32.mrf.mxu1  ;;  %v1786_v37 = vpop.f32.mrf.mxu0 }
 0x437   :  { %v1859_v58 = vadd.f32 %v1785_v34, %v10398_v18  ;;  %v1787_v55 = vadd.f32 %v1786_v37, %v7002_v62 }
 0x439   :  { %v4462_v42 = vmul.f32 -1.442695, %v1859_v58  ;;  %v1866_v47 = vadd.f32 %v1787_v55, %v10399_v22  ;;  %v10400_v58 = vld [vmem:[#allocation28_spill] sm:$0xff] }
 0x43b   :  { %5914 = vpow2.f32 %v4462_v42  ;;  %v4463_v7 = vmul.f32 -1.442695, %v1866_v47 }
 0x43d   :  { %5916 = vpow2.f32 %v4463_v7 }
 0x448   :  { %v5915_v9 = vpop.eup %5914 }
 0x449   :  { %v1863_v13 = vadd.f32 1.0, %v5915_v9 }
 0x44a   :  { %v5917_v6 = vpop.eup %5916 }
 0x44b   :  { %5918 = vrcp.f32 %v1863_v13  ;;  %v1870_v18 = vadd.f32 1.0, %v5917_v6  ;;  %v10414_v6 = vld [vmem:[#allocation50_spill] sm:$0xff] }
 0x455   :  { %v8265_v36 = vpop.f32.mrf.mxu1  ;;  %v1945_v13 = vpop.f32.mrf.mxu0 }
 0x457   :  { %v5292_v24 = vpop.f32.mrf.mxu1 }
 0x458   :  { %v5919_v46 = vpop.eup %5918 }
 0x459   :  { %v1873_v34 = vmul.f32 %v5919_v46, %v1856_v39  ;;  %v1947_v46 = vpop.f32.mrf.mxu0  ;;  %v10416_v39 = vld [vmem:[#allocation52_spill] sm:$0xff] }
 0x45b   :  { %v1874_v42 = vadd.f32 %v1873_v34, %v10400_v58  ;;  %v10417_v34 = vld [vmem:[#allocation53_spill] sm:$0xff]  ;;  %v10418_v58 = vld [vmem:[#allocation54_spill] sm:$0xff] }
 0x45d   :  { %5920 = vtanh.f32 %v1874_v42  ;;  %v10419_v42 = vld [vmem:[#allocation55_spill] sm:$0xff] }
 0x45e   :  { %5922 = vrcp.f32 %v1870_v18  ;;  %v10420_v18 = vld [vmem:[#allocation56_spill] sm:$0xff] }
 0x46a   :  { %v5921_v37 = vpop.eup %5920 }
 0x46b   :  { %v1876_v47 = vsub.f32 %v7787_v50, %v5921_v37  ;;  %v5923_v22 = vpop.eup %5922 }
 0x46d   :  { %v1877_v9 = vmul.f32 %v5923_v22, %v1876_v47  ;;  %v10422_v47 = vld [vmem:[#allocation57_spill] sm:$0xff]  ;;  %v10423_v22 = vld [vmem:[#allocation59_spill] sm:$0xff] }
 0x46f   :  { %v8270_v7 = vadd.f32 %v5921_v37, %v1877_v9  ;;  %v10421_v37 = vld [vmem:[#allocation20_spill] sm:$0xff]  ;;  %v10424_v9 = vld [vmem:[#allocation58_spill] sm:$0xff] }
 0x471   :  { %2250 = vmatmul.mubr.f32.vlgmr.msra.gmra.mxu0 %v8270_v7  ;;  %5361 = vmatmul.mubr.f32.vlgmr.msra.gmra.mxu1 %v8270_v7 }
 0x472   :  { %2347 = vmatpush1.msra.mxu0 %v7791_v43  ;;  %5364 = vmatpush3.msra.mxu1 %v7794_v41  ;;  %v1946_v41 = vadd.f32 %v1945_v13, %v7505_v0  ;;  %v10425_v13 = vld [vmem:[#allocation60_spill] sm:$0xff] }
 0x473   :  { %2348 = vmatprep.subr.mxu0 %v7797_v38  ;;  %5365 = vmatprep.subr.mxu1 %v10214_v20 }
 0x474   :  { %2349 = vmatpush1.msra.mxu0 %v7801_v35  ;;  %5366 = vmatpush3.msra.mxu1 %v7804_v53 }
 0x475   :  { %2350 = vmatprep.subr.mxu0 %v7807_v40  ;;  %5367 = vmatprep.subr.mxu1 %v10214_v20 }
 0x476   :  { %2351 = vmatpush1.msra.mxu0 %v7811_v26  ;;  %5368 = vmatpush3.msra.mxu1 %v7814_v14 }
 0x477   :  { %v2086_v50 = vpop.f32.mrf.mxu0  ;;  %v8284_v43 = vpop.f32.mrf.mxu1  ;;  %2352 = vmatprep.subr.mxu0 %v7819_v25  ;;  %5369 = vmatprep.subr.mxu1 %v10214_v20  ;;  %v10401_v25 = vld [vmem:[#allocation38_spill] sm:$0xff] }
 0x478   :  { %v2087_v38 = vadd.f32 %v2086_v50, %v7511_v44  ;;  %2353 = vmatpush1.msra.mxu0 %v7825_v11  ;;  %5370 = vmatpush3.msra.mxu1 %v7828_v59  ;;  %v10402_v11 = vld [vmem:[#allocation39_spill] sm:$0xff]  ;;  %v10403_v59 = vld [vmem:[#allocation124_spill] sm:$0xff]  ;;  %v10427_v50 = vld [vmem:[#allocation61_spill] sm:$0xff] }
 0x479   :  { %v5327_v35 = vpop.f32.mrf.mxu1  ;;  %2354 = vmatprep.subr.mxu0 %v7831_v4  ;;  %5371 = vmatprep.subr.mxu1 %v10214_v20  ;;  %v2088_v26 = vpop.f32.mrf.mxu0  ;;  %v1948_v4 = vadd.f32 %v1947_v46, %v10403_v59  ;;  %v10426_v46 = vld [vmem:[#allocation62_spill] sm:$0xff] }
 0x47a   :  { %v2161_v53 = vadd.f32 %v2087_v38, %v1946_v41  ;;  %2355 = vmatpush1.msra.mxu0 %v7835_v54  ;;  %5372 = vmatpush3.msra.mxu1 %v7838_v45  ;;  %v2089_v14 = vadd.f32 %v2088_v26, %v7535_v1  ;;  %v10404_v54 = vld [vmem:[#allocation40_spill] sm:$0xff]  ;;  %v10405_v45 = vld [vmem:[#allocation41_spill] sm:$0xff]  ;;  %v10428_v41 = vld [vmem:[#allocation63_spill] sm:$0xff] }
 0x47b   :  { %2356 = vmatprep.subr.mxu0 %v7841_v57  ;;  %5373 = vmatprep.subr.mxu1 %v10214_v20  ;;  %v10406_v57 = vld [vmem:[#allocation42_spill] sm:$0xff]  ;;  %v10429_v38 = vld [vmem:[#allocation65_spill] sm:$0xff]  ;;  %v10430_v35 = vld [vmem:[#allocation64_spill] sm:$0xff] }
 0x47c   :  { %v4464_v40 = vmul.f32 -1.442695, %v2161_v53  ;;  %2357 = vmatpush1.msra.mxu0 %v7845_v21  ;;  %5374 = vmatpush3.msra.mxu1 %v7848_v27  ;;  %v2168_v21 = vadd.f32 %v2089_v14, %v1948_v4  ;;  %v10407_v27 = vld [vmem:[#allocation43_spill] sm:$0xff]  ;;  %v10431_v53 = vld [vmem:[#allocation66_spill] sm:$0xff]  ;;  %v10434_v14 = vld [vmem:[#allocation69_spill] sm:$0xff] }
 0x47d   :  { %2358 = vmatprep.subr.mxu0 %v7851_v28  ;;  %5375 = vmatprep.subr.mxu1 %v10214_v20  ;;  %v10408_v28 = vld [vmem:[#allocation44_spill] sm:$0xff]  ;;  %v10433_v26 = vld [vmem:[#allocation67_spill] sm:$0xff] }
 0x47e   :  { %5924 = vpow2.f32 %v4464_v40  ;;  %2359 = vmatpush1.msra.mxu0 %v7855_v30  ;;  %5376 = vmatpush3.msra.mxu1 %v7858_v49  ;;  %v10409_v30 = vld [vmem:[#allocation45_spill] sm:$0xff]  ;;  %v10410_v49 = vld [vmem:[#allocation46_spill] sm:$0xff]  ;;  %v10432_v40 = vld [vmem:[#allocation68_spill] sm:$0xff] }
 0x47f   :  { %2360 = vmatprep.subr.mxu0 %v7861_v31  ;;  %5377 = vmatprep.subr.mxu1 %v10214_v20  ;;  %v10411_v31 = vld [vmem:[#allocation47_spill] sm:$0xff] }
 0x480   :  { %2361 = vmatpush1.msra.mxu0 %v7865_v52  ;;  %5378 = vmatpush3.msra.mxu1 %v7868_v32  ;;  %v10412_v52 = vld [vmem:[#allocation48_spill] sm:$0xff]  ;;  %v4465_v32 = vmul.f32 -1.442695, %v2168_v21 }
 0x481   :  { %2362 = vmatprep.subr.mxu0 %v10401_v25  ;;  %5379 = vmatprep.subr.mxu1 %v10214_v20  ;;  %v10438_v21 = vld [vmem:[#allocation72_spill] sm:$0xff] }
 0x482   :  { %2363 = vmatpush1.msra.mxu0 %v10402_v11  ;;  %5380 = vmatpush3.msra.mxu1 %v7879_v3  ;;  %v10413_v3 = vld [vmem:[#allocation49_spill] sm:$0xff]  ;;  %5926 = vpow2.f32 %v4465_v32  ;;  %v10435_v11 = vld [vmem:[#allocation36_spill] sm:$0xff]  ;;  %v10446_v32 = vld [vmem:[#allocation79_spill] sm:$0xff] }
 0x483   :  { %2364 = vmatprep.subr.mxu0 %v10404_v54  ;;  %5381 = vmatprep.subr.mxu1 %v10214_v20  ;;  %v2158_v4 = vadd.f32 %v8284_v43, %v10435_v11  ;;  %v10436_v54 = vld [vmem:[#allocation71_spill] sm:$0xff] }
 0x484   :  { %2365 = vmatpush1.msra.mxu0 %v10405_v45  ;;  %5382 = vmatpush3.msra.mxu1 %v10406_v57  ;;  %v10437_v45 = vld [vmem:[#allocation70_spill] sm:$0xff] }
 0x485   :  { %2366 = vmatprep.subr.mxu0 %v10407_v27  ;;  %5383 = vmatprep.subr.mxu1 %v10214_v20  ;;  %v2017_v27 = vadd.f32 %v8265_v36, %v7604_v10  ;;  %v10442_v36 = vld [vmem:[#allocation77_spill] sm:$0xff] }
 0x486   :  { %2367 = vmatpush1.msra.mxu0 %v10408_v28  ;;  %5384 = vmatpush3.msra.mxu1 %v10409_v30 }
 0x487   :  { %2368 = vmatprep.subr.mxu0 %v10410_v49  ;;  %5385 = vmatprep.subr.mxu1 %v10214_v20  ;;  %v10439_v49 = vld [vmem:[#allocation74_spill] sm:$0xff] }
 0x488   :  { %2369 = vmatpush1.msra.mxu0 %v10411_v31  ;;  %5386 = vmatpush3.msra.mxu1 %v10412_v52  ;;  %v10440_v31 = vld [vmem:[#allocation73_spill] sm:$0xff]  ;;  %v10441_v52 = vld [vmem:[#allocation75_spill] sm:$0xff] }
 0x489   :  { %2370 = vmatprep.subr.mxu0 %v10413_v3  ;;  %5387 = vmatprep.subr.mxu1 %v10214_v20  ;;  %v10447_v3 = vld [vmem:[#allocation81_spill] sm:$0xff] }
 0x48a   :  { %2371 = vmatpush1.msra.mxu0 %v10414_v6  ;;  %5388 = vmatpush3.msra.mxu1 %v10415_v63  ;;  %v10448_v6 = vld [vmem:[#allocation83_spill] sm:$0xff]  ;;  %v10449_v63 = vld [vmem:[#allocation82_spill] sm:$0xff] }
 0x48b   :  { %v5925_v55 = vpop.eup %5924  ;;  %2372 = vmatprep.subr.mxu0 %v10416_v39  ;;  %5389 = vmatprep.subr.mxu1 %v10214_v20  ;;  %v10451_v39 = vld [vmem:[#allocation86_spill] sm:$0xff] }
 0x48c   :  { %v2165_v24 = vadd.f32 1.0, %v5925_v55  ;;  %2373 = vmatpush1.msra.mxu0 %v10417_v34  ;;  %5390 = vmatpush3.msra.mxu1 %v10418_v58  ;;  %v10450_v55 = vld [vmem:[#allocation84_spill] sm:$0xff]  ;;  %v10453_v34 = vld [vmem:[#allocation87_spill] sm:$0xff]  ;;  %v10454_v58 = vld [vmem:[#allocation89_spill] sm:$0xff] }
 0x48d   :  { %2374 = vmatprep.subr.mxu0 %v10419_v42  ;;  %5391 = vmatprep.subr.mxu1 %v10214_v20  ;;  %v10455_v42 = vld [vmem:[#allocation88_spill] sm:$0xff] }
 0x48e   :  { %5928 = vrcp.f32 %v2165_v24  ;;  %2375 = vmatpush1.msra.mxu0 %v10420_v18  ;;  %5392 = vmatpush3.msra.mxu1 %v10421_v37  ;;  %v10452_v24 = vld [vmem:[#allocation85_spill] sm:$0xff]  ;;  %v10456_v18 = vld [vmem:[#allocation90_spill] sm:$0xff]  ;;  %v10457_v37 = vld [vmem:[#allocation92_spill] sm:$0xff] }
 0x48f   :  { %2376 = vmatprep.subr.mxu0 %v10422_v47  ;;  %5393 = vmatprep.subr.mxu1 %v10214_v20  ;;  %v5927_v25 = vpop.eup %5926  ;;  %v10458_v47 = vld [vmem:[#allocation91_spill] sm:$0xff] }
 0x490   :  { %2377 = vmatpush1.msra.mxu0 %v10423_v22  ;;  %2410 = vmatprep.mubr.f32.mxu0 %v10214_v20  ;;  %v2172_v30 = vadd.f32 1.0, %v5927_v25  ;;  %v10459_v22 = vld [vmem:[#allocation93_spill] sm:$0xff]  ;;  %v8438_v25 = vld [vmem:[#allocation5 + $0x148] sm:$0xff] }
 0x491   :  { %5394 = vmatpush3.msra.mxu1 %v10424_v9  ;;  %5395 = vmatprep.mubr.msk.f32.mxu1 %vm6572_vm0, %v10214_v20  ;;  %v10460_v9 = vld [vmem:[#allocation94_spill] sm:$0xff] }
 0x492   :  { %2411 = vmatmul.mubr.f32.vlgmr.msra.gmra.mxu0 %v8270_v7  ;;  %5396 = vmatmul.mubr.f32.vlgmr.msra.gmra.mxu1 %v8270_v7 }
 0x493   :  { %2487 = vmatprep.subr.mxu0 %v10425_v13  ;;  %5398 = vmatprep.subr.mxu1 %v10214_v20  ;;  %v10461_v13 = vld [vmem:[#allocation95_spill] sm:$0xff] }
 0x494   :  { %2488 = vmatpush1.msra.mxu0 %v10426_v46  ;;  %5399 = vmatpush3.msra.mxu1 %v10427_v50  ;;  %v10462_v50 = vld [vmem:[#allocation96_spill] sm:$0xff] }
 0x495   :  { %2489 = vmatprep.subr.mxu0 %v10428_v41  ;;  %5400 = vmatprep.subr.mxu1 %v10214_v20  ;;  %v10463_v41 = vld [vmem:[#allocation97_spill] sm:$0xff] }
 0x496   :  { %2490 = vmatpush1.msra.mxu0 %v10429_v38  ;;  %5401 = vmatpush3.msra.mxu1 %v10430_v35 }
 0x497   :  { %2491 = vmatprep.subr.mxu0 %v10431_v53  ;;  %5402 = vmatprep.subr.mxu1 %v10214_v20  ;;  %v10464_v53 = vld [vmem:[#allocation98_spill] sm:$0xff] }
 0x498   :  { %2492 = vmatpush1.msra.mxu0 %v10432_v40  ;;  %5403 = vmatpush3.msra.mxu1 %v10433_v26  ;;  %v10465_v40 = vld [vmem:[#allocation99_spill] sm:$0xff] }
 0x499   :  { %2493 = vmatprep.subr.mxu0 %v10434_v14  ;;  %5404 = vmatprep.subr.mxu1 %v10214_v20  ;;  %v10469_v14 = vld [vmem:[#allocation103_spill] sm:$0xff] }
 0x49a   :  { %2494 = vmatpush1.msra.mxu0 %v10436_v54  ;;  %5405 = vmatpush3.msra.mxu1 %v10437_v45  ;;  %v8450_v54 = vld [vmem:[#allocation5 + $0x118] sm:$0xff]  ;;  %v8456_v45 = vld [vmem:[#allocation5 + $0x100] sm:$0xff] }
 0x49b   :  { %v5929_v57 = vpop.eup %5928  ;;  %2495 = vmatprep.subr.mxu0 %v10438_v21  ;;  %5406 = vmatprep.subr.mxu1 %v10214_v20  ;;  %v10474_v21 = vld [vmem:[#allocation108_spill] sm:$0xff] }
 0x49c   :  { %v2175_v28 = vmul.f32 %v5929_v57, %v2158_v4  ;;  %2496 = vmatpush1.msra.mxu0 %v8006_v17  ;;  %5407 = vmatpush3.msra.mxu1 %v8009_v29  ;;  %v10443_v17 = vld [vmem:[#allocation76_spill] sm:$0xff]  ;;  %v10444_v29 = vld [vmem:[#allocation78_spill] sm:$0xff]  ;;  %v8462_v57 = vld [vmem:[#allocation5 + $0xe8] sm:$0xff] }
 0x49d   :  { %2497 = vmatprep.subr.mxu0 %v8012_v5  ;;  %5408 = vmatprep.subr.mxu1 %v10214_v20  ;;  %v10445_v5 = vld [vmem:[#allocation80_spill] sm:$0xff] }
 0x49e   :  { %v2176_v43 = vadd.f32 %v2175_v28, %v2017_v27  ;;  %2498 = vmatpush1.msra.mxu0 %v10439_v49  ;;  %5409 = vmatpush3.msra.mxu1 %v10440_v31  ;;  %v8444_v4 = vld [vmem:[#allocation5 + $0x130] sm:$0xff]  ;;  %v10476_v28 = vld [vmem:[#allocation110_spill] sm:$0xff]  ;;  %v10479_v49 = vld [vmem:[#allocation113_spill] sm:$0xff] }
 0x49f   :  { %2499 = vmatprep.subr.mxu0 %v10441_v52  ;;  %5410 = vmatprep.subr.mxu1 %v10214_v20  ;;  %v8468_v27 = vld [vmem:[#allocation5 + $0xd0] sm:$0xff]  ;;  %v8480_v31 = vld [vmem:[#allocation5 + $0xa0] sm:$0xff] }
 0x4a0   :  { %5930 = vtanh.f32 %v2176_v43  ;;  %2500 = vmatpush1.msra.mxu0 %v10442_v36  ;;  %5411 = vmatpush3.msra.mxu1 %v10443_v17  ;;  %v8474_v43 = vld [vmem:[#allocation5 + $0xb8] sm:$0xff]  ;;  %v10480_v52 = vld [vmem:[#allocation114_spill] sm:$0xff]  ;;  %v10481_v36 = vld [vmem:[#allocation115_spill] sm:$0xff] }
 0x4a1   :  { %2501 = vmatprep.subr.mxu0 %v10444_v29  ;;  %5412 = vmatprep.subr.mxu1 %v10214_v20  ;;  %5932 = vrcp.f32 %v2172_v30  ;;  %v10478_v30 = vld [vmem:[#allocation112_spill] sm:$0xff]  ;;  %v8486_v17 = vld [vmem:[#allocation5 + $0x88] sm:$0xff] }
 0x4a2   :  { %2502 = vmatpush1.msra.mxu0 %v10445_v5  ;;  %5413 = vmatpush3.msra.mxu1 %v10446_v32  ;;  %v10482_v29 = vld [vmem:[#allocation116_spill] sm:$0xff]  ;;  %v10483_v5 = vld [vmem:[#allocation117_spill] sm:$0xff] }
 0x4a3   :  { %2503 = vmatprep.subr.mxu0 %v10447_v3  ;;  %5414 = vmatprep.subr.mxu1 %v10214_v20  ;;  %v8492_v32 = vld [vmem:[#allocation5 + $0x70] sm:$0xff]  ;;  %v10484_v3 = vld [vmem:[#allocation118_spill] sm:$0xff] }
 0x4a4   :  { %2504 = vmatpush1.msra.mxu0 %v10448_v6  ;;  %5415 = vmatpush3.msra.mxu1 %v10449_v63  ;;  %v10485_v6 = vld [vmem:[#allocation119_spill] sm:$0xff]  ;;  %v8498_v63 = vld [vmem:[#allocation5 + $0x58] sm:$0xff] }
 0x4a5   :  { %2505 = vmatprep.subr.mxu0 %v10450_v55  ;;  %5416 = vmatprep.subr.mxu1 %v10214_v20  ;;  %v10486_v55 = vld [vmem:[#allocation120_spill] sm:$0xff] }
 0x4a6   :  { %2506 = vmatpush1.msra.mxu0 %v10451_v39  ;;  %5417 = vmatpush3.msra.mxu1 %v10452_v24  ;;  %v10487_v39 = vld [vmem:[#allocation14_spill] sm:$0xff] }
 0x4a7   :  { %2507 = vmatprep.subr.mxu0 %v10453_v34  ;;  %5418 = vmatprep.subr.mxu1 %v10214_v20  ;;  %v8504_v24 = vld [vmem:[#allocation5 + $0x40] sm:$0xff]  ;;  %v10488_v34 = vld [vmem:[#allocation15_spill] sm:$0xff] }
 0x4a8   :  { %2508 = vmatpush1.msra.mxu0 %v10454_v58  ;;  %5419 = vmatpush3.msra.mxu1 %v10455_v42  ;;  %v10489_v58 = vld [vmem:[#allocation29_spill] sm:$0xff]  ;;  %v8510_v42 = vld [vmem:[#allocation5 + $0x28] sm:$0xff] }
 0x4a9   :  { %2509 = vmatprep.subr.mxu0 %v10456_v18  ;;  %5420 = vmatprep.subr.mxu1 %v10214_v20  ;;  %v10490_v18 = vld [vmem:[#allocation125_spill] sm:$0xff] }
 0x4aa   :  { %2510 = vmatpush1.msra.mxu0 %v10457_v37  ;;  %5421 = vmatpush3.msra.mxu1 %v10458_v47  ;;  %v8515_v37 = vld [vmem:[#allocation5] sm:$0xff]  ;;  %v8518_v47 = vld [vmem:[#allocation5 + $0x10] sm:$0xff] }
 0x4ab   :  { %2511 = vmatprep.subr.mxu0 %v10459_v22  ;;  %5422 = vmatprep.subr.mxu1 %v10214_v20  ;;  %v8524_v22 = vld [vmem:[#allocation7 + $0x170] sm:$0xff] }
 0x4ac   :  { %2512 = vmatpush1.msra.mxu0 %v10460_v9  ;;  %5423 = vmatpush3.msra.mxu1 %v10461_v13 }
 0x4ad   :  { %v5931_v46 = vpop.eup %5930  ;;  %2513 = vmatprep.subr.mxu0 %v10462_v50  ;;  %5424 = vmatprep.subr.mxu1 %v10214_v20 }
 0x4ae   :  { %2514 = vmatpush1.msra.mxu0 %v10463_v41  ;;  %5425 = vmatpush3.msra.mxu1 %v8099_v51  ;;  %v2178_v38 = vsub.f32 %v8121_v23, %v5931_v46  ;;  %v5933_v35 = vpop.eup %5932  ;;  %v10466_v23 = vld [vmem:[#allocation100_spill] sm:$0xff] }
 0x4af   :  { %2515 = vmatprep.subr.mxu0 %v10464_v53  ;;  %5426 = vmatprep.subr.mxu1 %v10214_v20 }
 0x4b0   :  { %2516 = vmatpush1.msra.mxu0 %v10465_v40  ;;  %5427 = vmatpush3.msra.mxu1 %v8110_v61  ;;  %v2179_v26 = vmul.f32 %v5933_v35, %v2178_v38  ;;  %v8426_v61 = vld [vmem:[#allocation5 + $0x178] sm:$0xff]  ;;  %v10492_v38 = vld [vmem:[#allocation18_spill] sm:$0xff] }
 0x4b1   :  { %2517 = vmatprep.subr.mxu0 %v8113_v8  ;;  %5428 = vmatprep.subr.mxu1 %v10214_v20  ;;  %v10467_v8 = vld [vmem:[#allocation101_spill] sm:$0xff] }
 0x4b2   :  { %2518 = vmatpush1.msra.mxu0 %v8117_v48  ;;  %2551 = vmatprep.mubr.f32.mxu0 %v10214_v20  ;;  %v8416_v51 = vadd.f32 %v5931_v46, %v2179_v26  ;;  %v8432_v48 = vld [vmem:[#allocation5 + $0x160] sm:$0xff] }
 0x4b3   :  { %5429 = vmatpush3.msra.mxu1 %v8123_v15  ;;  %5430 = vmatprep.mubr.msk.f32.mxu1 %vm6572_vm0, %v10214_v20  ;;  %v10468_v15 = vld [vmem:[#allocation102_spill] sm:$0xff] }
 0x4b4   :  { %2552 = vmatmul.mubr.f32.vlgmr.msra.gmra.mxu0 %v8416_v51  ;;  %5431 = vmatmul.mubr.f32.vlgmr.msra.gmra.mxu1 %v8416_v51  ;;  %v10491_v46 = vld [vmem:[#allocation26_spill] sm:$0xff] }
 0x4b5   :  { %2652 = vmatprep.subr.mxu0 %v10466_v23  ;;  %5433 = vmatprep.subr.mxu1 %v10214_v20  ;;  %v10493_v23 = vld [vmem:[#allocation19_spill] sm:$0xff] }
 0x4b6   :  { %2653 = vmatpush1.msra.mxu0 %v10467_v8  ;;  %5434 = vmatpush3.msra.mxu1 %v8426_v61 }
 0x4b7   :  { %2654 = vmatprep.subr.mxu0 %v8138_v19  ;;  %5435 = vmatprep.subr.mxu1 %v10214_v20  ;;  %v10470_v19 = vld [vmem:[#allocation104_spill] sm:$0xff] }
 0x4b8   :  { %2655 = vmatpush1.msra.mxu0 %v10468_v15  ;;  %5436 = vmatpush3.msra.mxu1 %v8432_v48 }
 0x4b9   :  { %2656 = vmatprep.subr.mxu0 %v8146_v2  ;;  %5437 = vmatprep.subr.mxu1 %v10214_v20  ;;  %v10471_v2 = vld [vmem:[#allocation105_spill] sm:$0xff] }
 0x4ba   :  { %2657 = vmatpush1.msra.mxu0 %v10469_v14  ;;  %5438 = vmatpush3.msra.mxu1 %v8438_v25 }
 0x4bb   :  { %2658 = vmatprep.subr.mxu0 %v8154_v60  ;;  %5439 = vmatprep.subr.mxu1 %v10214_v20  ;;  %v10472_v60 = vld [vmem:[#allocation106_spill] sm:$0xff] }
 0x4bc   :  { %2659 = vmatpush1.msra.mxu0 %v10470_v19  ;;  %5440 = vmatpush3.msra.mxu1 %v8444_v4 }
 0x4bd   :  { %2660 = vmatprep.subr.mxu0 %v8162_v33  ;;  %5441 = vmatprep.subr.mxu1 %v10214_v20  ;;  %v10473_v33 = vld [vmem:[#allocation107_spill] sm:$0xff] }
 0x4be   :  { %2661 = vmatpush1.msra.mxu0 %v10471_v2  ;;  %5442 = vmatpush3.msra.mxu1 %v8450_v54 }
 0x4bf   :  { %2662 = vmatprep.subr.mxu0 %v8170_v16  ;;  %5443 = vmatprep.subr.mxu1 %v10214_v20  ;;  %v10475_v16 = vld [vmem:[#allocation109_spill] sm:$0xff] }
 0x4c0   :  { %2663 = vmatpush1.msra.mxu0 %v10472_v60  ;;  %5444 = vmatpush3.msra.mxu1 %v8456_v45 }
 0x4c1   :  { %2664 = vmatprep.subr.mxu0 %v8178_v12  ;;  %5445 = vmatprep.subr.mxu1 %v10214_v20  ;;  %v10477_v12 = vld [vmem:[#allocation111_spill] sm:$0xff] }
 0x4c2   :  { %2665 = vmatpush1.msra.mxu0 %v10473_v33  ;;  %5446 = vmatpush3.msra.mxu1 %v8462_v57 }
 0x4c3   :  { %2666 = vmatprep.subr.mxu0 %v10474_v21  ;;  %5447 = vmatprep.subr.mxu1 %v10214_v20 }
 0x4c4   :  { %2667 = vmatpush1.msra.mxu0 %v10475_v16  ;;  %5448 = vmatpush3.msra.mxu1 %v8468_v27 }
 0x4c5   :  { %2668 = vmatprep.subr.mxu0 %v10476_v28  ;;  %5449 = vmatprep.subr.mxu1 %v10214_v20 }
 0x4c6   :  { %2669 = vmatpush1.msra.mxu0 %v10477_v12  ;;  %5450 = vmatpush3.msra.mxu1 %v8474_v43  ;;  %v10494_v12 = vld [vmem:[#allocation32_spill] sm:$0xff] }
 0x4c7   :  { %2670 = vmatprep.subr.mxu0 %v10478_v30  ;;  %5451 = vmatprep.subr.mxu1 %v10214_v20 }
 0x4c8   :  { %2671 = vmatpush1.msra.mxu0 %v10479_v49  ;;  %5452 = vmatpush3.msra.mxu1 %v8480_v31 }
 0x4c9   :  { %2672 = vmatprep.subr.mxu0 %v10480_v52  ;;  %5453 = vmatprep.subr.mxu1 %v10214_v20 }
 0x4ca   :  { %2673 = vmatpush1.msra.mxu0 %v10481_v36  ;;  %5454 = vmatpush3.msra.mxu1 %v8486_v17 }
 0x4cb   :  { %2674 = vmatprep.subr.mxu0 %v10482_v29  ;;  %5455 = vmatprep.subr.mxu1 %v10214_v20 }
 0x4cc   :  { %2675 = vmatpush1.msra.mxu0 %v10483_v5  ;;  %5456 = vmatpush3.msra.mxu1 %v8492_v32 }
 0x4cd   :  { %2676 = vmatprep.subr.mxu0 %v10484_v3  ;;  %5457 = vmatprep.subr.mxu1 %v10214_v20 }
 0x4ce   :  { %2677 = vmatpush1.msra.mxu0 %v10485_v6  ;;  %5458 = vmatpush3.msra.mxu1 %v8498_v63 }
 0x4cf   :  { %2678 = vmatprep.subr.mxu0 %v10486_v55  ;;  %5459 = vmatprep.subr.mxu1 %v10214_v20  ;;  %v8541_v55 = vld [vmem:[#allocation7 + $0x168] sm:$0xff] }
 0x4d0   :  { %2679 = vmatpush1.msra.mxu0 %v10487_v39  ;;  %5460 = vmatpush3.msra.mxu1 %v8504_v24  ;;  %v8544_v39 = vld [vmem:[#allocation7 + $0x178] sm:$0xff] }
 0x4d1   :  { %2680 = vmatprep.subr.mxu0 %v10488_v34  ;;  %5461 = vmatprep.subr.mxu1 %v10214_v20  ;;  %v8547_v34 = vld [vmem:[#allocation7 + $0x158] sm:$0xff] }
 0x4d2   :  { %2681 = vmatpush1.msra.mxu0 %v10489_v58  ;;  %5462 = vmatpush3.msra.mxu1 %v8510_v42  ;;  %v8554_v58 = vld [vmem:[#allocation7 + $0x160] sm:$0xff] }
 0x4d3   :  { %2682 = vmatprep.subr.mxu0 %v10490_v18  ;;  %5463 = vmatprep.subr.mxu1 %v10214_v20 }
 0x4d4   :  { %2683 = vmatpush1.msra.mxu0 %v8515_v37  ;;  %5464 = vmatpush3.msra.mxu1 %v8518_v47 }
 0x4d5   :  { %2716 = vmatprep.mubr.f32.mxu0 %v10214_v20  ;;  %5465 = vmatprep.mubr.msk.f32.mxu1 %vm6572_vm0, %v10214_v20 }
 0x4d6   :  { %2813 = vmatprep.subr.mxu0 %v8524_v22  ;;  %5468 = vmatprep.subr.mxu1 %v10214_v20 }
 0x531   :  { %v2251_v9 = vpop.f32.mrf.mxu0  ;;  %v2322_v13 = vpop.f32.mrf.mxu1 }
 0x532   :  { %v2252_v50 = vadd.f32 %v2251_v9, %v10491_v46  ;;  %v2323_v33 = vadd.f32 %v2322_v13, %v7014_v56  ;;  %v8557_v9 = vld [vmem:[#allocation7 + $0x140] sm:$0xff]  ;;  %v8561_v13 = vld [vmem:[#allocation7 + $0x138] sm:$0xff] }
 0x533   :  { %v5362_v41 = vpop.f32.mrf.mxu1  ;;  %v2253_v40 = vpop.f32.mrf.mxu0 }
 0x534   :  { %v2326_v35 = vadd.f32 %v2252_v50, %v10492_v38  ;;  %v2254_v26 = vadd.f32 %v2253_v40, %v7002_v62  ;;  %v8564_v50 = vld [vmem:[#allocation7 + $0x148] sm:$0xff] }
 0x536   :  { %v4466_v53 = vmul.f32 -1.442695, %v2326_v35  ;;  %v2333_v8 = vadd.f32 %v2254_v26, %v10493_v23  ;;  %v8569_v35 = vld [vmem:[#allocation7 + $0x128] sm:$0xff]  ;;  %v8575_v26 = vld [vmem:[#allocation7 + $0x120] sm:$0xff]  ;;  %v8578_v23 = vld [vmem:[#allocation7 + $0x130] sm:$0xff] }
 0x538   :  { %5934 = vpow2.f32 %v4466_v53  ;;  %v4467_v15 = vmul.f32 -1.442695, %v2333_v8 }
 0x53a   :  { %5936 = vpow2.f32 %v4467_v15  ;;  %v8581_v15 = vld [vmem:[#allocation7 + $0x110] sm:$0xff] }
 0x545   :  { %v5935_v14 = vpop.eup %5934 }
 0x546   :  { %v2330_v19 = vadd.f32 1.0, %v5935_v14 }
 0x547   :  { %v5937_v60 = vpop.eup %5936 }
 0x548   :  { %5938 = vrcp.f32 %v2330_v19  ;;  %v2337_v49 = vadd.f32 1.0, %v5937_v60  ;;  %v8585_v19 = vld [vmem:[#allocation7 + $0x108] sm:$0xff]  ;;  %v8588_v60 = vld [vmem:[#allocation7 + $0x118] sm:$0xff] }
 0x552   :  { %v8532_v2 = vpop.f32.mrf.mxu1  ;;  %v2412_v6 = vpop.f32.mrf.mxu0 }
 0x553   :  { %v2413_v53 = vadd.f32 %v2412_v6, %v7505_v0 }
 0x554   :  { %v5397_v21 = vpop.f32.mrf.mxu1  ;;  %v2414_v18 = vpop.f32.mrf.mxu0 }
 0x555   :  { %v5939_v16 = vpop.eup %5938 }
 0x556   :  { %v2340_v28 = vmul.f32 %v5939_v16, %v2323_v33  ;;  %v8591_v33 = vld [vmem:[#allocation7 + $0xf8] sm:$0xff]  ;;  %v8595_v16 = vld [vmem:[#allocation7 + $0xf0] sm:$0xff] }
 0x558   :  { %v2341_v30 = vadd.f32 %v2340_v28, %v10494_v12  ;;  %v8598_v28 = vld [vmem:[#allocation7 + $0x100] sm:$0xff] }
 0x559   :  { %v8601_v12 = vld [vmem:[#allocation7 + $0xe0] sm:$0xff] }
 0x55a   :  { %5940 = vtanh.f32 %v2341_v30 }
 0x55b   :  { %5942 = vrcp.f32 %v2337_v49  ;;  %v8605_v49 = vld [vmem:[#allocation7 + $0xd8] sm:$0xff] }
 0x567   :  { %v5941_v52 = vpop.eup %5940 }
 0x568   :  { %v2343_v36 = vsub.f32 %v8270_v7, %v5941_v52  ;;  %v5943_v29 = vpop.eup %5942  ;;  %v8551_v7 = vld [vmem:[#allocation7 + $0x150] sm:$0xff] }
 0x56a   :  { %v2344_v5 = vmul.f32 %v5943_v29, %v2343_v36  ;;  %v8611_v36 = vld [vmem:[#allocation7 + $0xc8] sm:$0xff]  ;;  %v8615_v29 = vld [vmem:[#allocation7 + $0xc0] sm:$0xff] }
 0x56c   :  { %v8537_v3 = vadd.f32 %v5941_v52, %v2344_v5  ;;  %v8608_v52 = vld [vmem:[#allocation7 + $0xe8] sm:$0xff]  ;;  %v8618_v5 = vld [vmem:[#allocation7 + $0xd0] sm:$0xff] }
 0x56e   :  { %2717 = vmatmul.mubr.f32.vlgmr.msra.gmra.mxu0 %v8537_v3  ;;  %5466 = vmatmul.mubr.f32.vlgmr.msra.gmra.mxu1 %v8537_v3 }
 0x56f   :  { %2814 = vmatpush1.msra.mxu0 %v8541_v55  ;;  %5469 = vmatpush3.msra.mxu1 %v8544_v39 }
 0x570   :  { %2815 = vmatprep.subr.mxu0 %v8547_v34  ;;  %5470 = vmatprep.subr.mxu1 %v10214_v20 }
 0x571   :  { %2816 = vmatpush1.msra.mxu0 %v8551_v7  ;;  %5471 = vmatpush3.msra.mxu1 %v8554_v58 }
 0x572   :  { %2817 = vmatprep.subr.mxu0 %v8557_v9  ;;  %5472 = vmatprep.subr.mxu1 %v10214_v20 }
 0x573   :  { %2818 = vmatpush1.msra.mxu0 %v8561_v13  ;;  %5473 = vmatpush3.msra.mxu1 %v8564_v50 }
 0x574   :  { %v2553_v41 = vpop.f32.mrf.mxu0  ;;  %v8567_v38 = vpop.f32.mrf.mxu1  ;;  %2819 = vmatprep.subr.mxu0 %v8569_v35  ;;  %5474 = vmatprep.subr.mxu1 %v10214_v20 }
 0x575   :  { %v2554_v40 = vadd.f32 %v2553_v41, %v7511_v44  ;;  %2820 = vmatpush1.msra.mxu0 %v8575_v26  ;;  %5475 = vmatpush3.msra.mxu1 %v8578_v23  ;;  %v8622_v41 = vld [vmem:[#allocation7 + $0xb0] sm:$0xff] }
 0x576   :  { %v5432_v8 = vpop.f32.mrf.mxu1  ;;  %2821 = vmatprep.subr.mxu0 %v8581_v15  ;;  %5476 = vmatprep.subr.mxu1 %v10214_v20  ;;  %v2555_v30 = vpop.f32.mrf.mxu0  ;;  %10495 = vst [vmem:[#allocation16_spill] sm:$0xff] %v8622_v41 }
 0x577   :  { %v2628_v14 = vadd.f32 %v2554_v40, %v2413_v53  ;;  %2822 = vmatpush1.msra.mxu0 %v8585_v19  ;;  %5477 = vmatpush3.msra.mxu1 %v8588_v60  ;;  %v2556_v6 = vadd.f32 %v2555_v30, %v7535_v1  ;;  %v8626_v53 = vld [vmem:[#allocation7 + $0xa8] sm:$0xff]  ;;  %v8629_v40 = vld [vmem:[#allocation7 + $0xb8] sm:$0xff]  ;;  %v2415_v8 = vadd.f32 %v2414_v18, %v10403_v59  ;;  %v8640_v30 = vld [vmem:[#allocation7 + $0xa0] sm:$0xff] }
 0x578   :  { %2823 = vmatprep.subr.mxu0 %v8591_v33  ;;  %5478 = vmatprep.subr.mxu1 %v10214_v20  ;;  %10496 = vst [vmem:[#allocation17_spill] sm:$0xff] %v8626_v53  ;;  %10499 = vst [vmem:[#allocation39_spill] sm:$0xff] %v8640_v30  ;;  %v8647_v18 = vld [vmem:[#allocation7 + $0x78] sm:$0xff]  ;;  %v8766_v59 = vld [vmem:[#allocation8 + $0xf0] sm:$0xff] }
 0x579   :  { %v4468_v21 = vmul.f32 -1.442695, %v2628_v14  ;;  %2824 = vmatpush1.msra.mxu0 %v8595_v16  ;;  %5479 = vmatpush3.msra.mxu1 %v8598_v28  ;;  %v8633_v14 = vld [vmem:[#allocation7 + $0x98] sm:$0xff]  ;;  %10501 = vst [vmem:[#allocation41_spill] sm:$0xff] %v8647_v18  ;;  %10531 = vst [vmem:[#allocation71_spill] sm:$0xff] %v8766_v59 }
 0x57a   :  { %2825 = vmatprep.subr.mxu0 %v8601_v12  ;;  %5480 = vmatprep.subr.mxu1 %v10214_v20  ;;  %10497 = vst [vmem:[#allocation28_spill] sm:$0xff] %v8633_v14 }
 0x57b   :  { %5944 = vpow2.f32 %v4468_v21  ;;  %2826 = vmatpush1.msra.mxu0 %v8605_v49  ;;  %5481 = vmatpush3.msra.mxu1 %v8608_v52  ;;  %v8637_v21 = vld [vmem:[#allocation7 + $0x90] sm:$0xff] }
 0x57c   :  { %2827 = vmatprep.subr.mxu0 %v8611_v36  ;;  %5482 = vmatprep.subr.mxu1 %v10214_v20  ;;  %10498 = vst [vmem:[#allocation38_spill] sm:$0xff] %v8637_v21 }
 0x57d   :  { %2828 = vmatpush1.msra.mxu0 %v8615_v29  ;;  %5483 = vmatpush3.msra.mxu1 %v8618_v5 }
 0x57e   :  { %2829 = vmatprep.subr.mxu0 %v8622_v41  ;;  %5484 = vmatprep.subr.mxu1 %v10214_v20  ;;  %v8643_v41 = vld [vmem:[#allocation7 + $0x80] sm:$0xff] }
 0x57f   :  { %2830 = vmatpush1.msra.mxu0 %v8626_v53  ;;  %5485 = vmatpush3.msra.mxu1 %v8629_v40  ;;  %v2635_v53 = vadd.f32 %v2556_v6, %v2415_v8  ;;  %10500 = vst [vmem:[#allocation40_spill] sm:$0xff] %v8643_v41  ;;  %v8657_v6 = vld [vmem:[#allocation7 + $0x60] sm:$0xff]  ;;  %v8660_v8 = vld [vmem:[#allocation7 + $0x70] sm:$0xff] }
 0x580   :  { %2831 = vmatprep.subr.mxu0 %v8633_v14  ;;  %5486 = vmatprep.subr.mxu1 %v10214_v20  ;;  %v8650_v14 = vld [vmem:[#allocation7 + $0x88] sm:$0xff]  ;;  %10504 = vst [vmem:[#allocation44_spill] sm:$0xff] %v8657_v6  ;;  %10505 = vst [vmem:[#allocation45_spill] sm:$0xff] %v8660_v8 }
 0x581   :  { %2832 = vmatpush1.msra.mxu0 %v8637_v21  ;;  %5487 = vmatpush3.msra.mxu1 %v8640_v30  ;;  %10502 = vst [vmem:[#allocation42_spill] sm:$0xff] %v8650_v14  ;;  %v8653_v21 = vld [vmem:[#allocation7 + $0x68] sm:$0xff]  ;;  %v8673_v30 = vld [vmem:[#allocation7 + $0x38] sm:$0xff] }
 0x582   :  { %2833 = vmatprep.subr.mxu0 %v8643_v41  ;;  %5488 = vmatprep.subr.mxu1 %v10214_v20  ;;  %10503 = vst [vmem:[#allocation43_spill] sm:$0xff] %v8653_v21  ;;  %v4469_v41 = vmul.f32 -1.442695, %v2635_v53  ;;  %10509 = vst [vmem:[#allocation49_spill] sm:$0xff] %v8673_v30 }
 0x583   :  { %2834 = vmatpush1.msra.mxu0 %v8647_v18  ;;  %5489 = vmatpush3.msra.mxu1 %v8650_v14  ;;  %v8663_v18 = vld [vmem:[#allocation7 + $0x50] sm:$0xff]  ;;  %v8667_v14 = vld [vmem:[#allocation7 + $0x48] sm:$0xff] }
 0x584   :  { %2835 = vmatprep.subr.mxu0 %v8653_v21  ;;  %5490 = vmatprep.subr.mxu1 %v10214_v20  ;;  %10506 = vst [vmem:[#allocation46_spill] sm:$0xff] %v8663_v18  ;;  %10507 = vst [vmem:[#allocation47_spill] sm:$0xff] %v8667_v14  ;;  %v8670_v21 = vld [vmem:[#allocation7 + $0x58] sm:$0xff]  ;;  %5946 = vpow2.f32 %v4469_v41  ;;  %v8697_v41 = vld [vmem:[#allocation7] sm:$0xff] }
 0x585   :  { %2836 = vmatpush1.msra.mxu0 %v8657_v6  ;;  %5491 = vmatpush3.msra.mxu1 %v8660_v8  ;;  %10508 = vst [vmem:[#allocation48_spill] sm:$0xff] %v8670_v21  ;;  %v8677_v8 = vld [vmem:[#allocation7 + $0x30] sm:$0xff]  ;;  %10516 = vst [vmem:[#allocation56_spill] sm:$0xff] %v8697_v41 }
 0x586   :  { %2837 = vmatprep.subr.mxu0 %v8663_v18  ;;  %5492 = vmatprep.subr.mxu1 %v10214_v20  ;;  %10510 = vst [vmem:[#allocation50_spill] sm:$0xff] %v8677_v8  ;;  %v8680_v18 = vld [vmem:[#allocation7 + $0x40] sm:$0xff] }
 0x587   :  { %2838 = vmatpush1.msra.mxu0 %v8667_v14  ;;  %5493 = vmatpush3.msra.mxu1 %v8670_v21  ;;  %10511 = vst [vmem:[#allocation51_spill] sm:$0xff] %v8680_v18  ;;  %v8683_v14 = vld [vmem:[#allocation7 + $0x20] sm:$0xff] }
 0x588   :  { %v5945_v6 = vpop.eup %5944  ;;  %2839 = vmatprep.subr.mxu0 %v8673_v30  ;;  %5494 = vmatprep.subr.mxu1 %v10214_v20  ;;  %10512 = vst [vmem:[#allocation52_spill] sm:$0xff] %v8683_v14  ;;  %v8687_v30 = vld [vmem:[#allocation7 + $0x18] sm:$0xff] }
 0x589   :  { %v2632_v53 = vadd.f32 1.0, %v5945_v6  ;;  %2840 = vmatpush1.msra.mxu0 %v8677_v8  ;;  %5495 = vmatpush3.msra.mxu1 %v8680_v18  ;;  %10513 = vst [vmem:[#allocation53_spill] sm:$0xff] %v8687_v30  ;;  %v8690_v6 = vld [vmem:[#allocation7 + $0x28] sm:$0xff]  ;;  %v8747_v18 = vld [vmem:[#allocation8 + $0x130] sm:$0xff] }
 0x58a   :  { %2841 = vmatprep.subr.mxu0 %v8683_v14  ;;  %5496 = vmatprep.subr.mxu1 %v10214_v20  ;;  %10514 = vst [vmem:[#allocation54_spill] sm:$0xff] %v8690_v6  ;;  %v8693_v8 = vld [vmem:[#allocation7 + $0x8] sm:$0xff]  ;;  %v8728_v14 = vld [vmem:[#allocation8 + $0x140] sm:$0xff]  ;;  %10529 = vst [vmem:[#allocation67_spill] sm:$0xff] %v8747_v18 }
 0x58b   :  { %5948 = vrcp.f32 %v2632_v53  ;;  %2842 = vmatpush1.msra.mxu0 %v8687_v30  ;;  %5497 = vmatpush3.msra.mxu1 %v8690_v6  ;;  %10515 = vst [vmem:[#allocation55_spill] sm:$0xff] %v8693_v8  ;;  %v8701_v53 = vld [vmem:[#allocation7 + $0x10] sm:$0xff]  ;;  %v8715_v6 = vld [vmem:[#allocation8 + $0x178] sm:$0xff]  ;;  %10524 = vst [vmem:[#allocation63_spill] sm:$0xff] %v8728_v14 }
 0x58c   :  { %2843 = vmatprep.subr.mxu0 %v8693_v8  ;;  %5498 = vmatprep.subr.mxu1 %v10214_v20  ;;  %10517 = vst [vmem:[#allocation20_spill] sm:$0xff] %v8701_v53  ;;  %v8708_v8 = vld [vmem:[#allocation8 + $0x170] sm:$0xff]  ;;  %10520 = vst [vmem:[#allocation58_spill] sm:$0xff] %v8715_v6 }
 0x58d   :  { %2844 = vmatpush1.msra.mxu0 %v8697_v41  ;;  %2877 = vmatprep.mubr.f32.mxu0 %v10214_v20  ;;  %10518 = vst [vmem:[#allocation57_spill] sm:$0xff] %v8708_v8  ;;  %v8712_v41 = vld [vmem:[#allocation8 + $0x168] sm:$0xff]  ;;  %v8722_v30 = vld [vmem:[#allocation8 + $0x150] sm:$0xff] }
 0x58e   :  { %5499 = vmatpush3.msra.mxu1 %v8701_v53  ;;  %5500 = vmatprep.mubr.msk.f32.mxu1 %vm6572_vm0, %v10214_v20  ;;  %10519 = vst [vmem:[#allocation59_spill] sm:$0xff] %v8712_v41  ;;  %v8718_v53 = vld [vmem:[#allocation8 + $0x158] sm:$0xff]  ;;  %10522 = vst [vmem:[#allocation62_spill] sm:$0xff] %v8722_v30 }
 0x58f   :  { %2878 = vmatmul.mubr.f32.vlgmr.msra.gmra.mxu0 %v8537_v3  ;;  %5501 = vmatmul.mubr.f32.vlgmr.msra.gmra.mxu1 %v8537_v3  ;;  %10521 = vst [vmem:[#allocation60_spill] sm:$0xff] %v8718_v53 }
 0x590   :  { %2954 = vmatprep.subr.mxu0 %v8708_v8  ;;  %5503 = vmatprep.subr.mxu1 %v10214_v20  ;;  %v8725_v8 = vld [vmem:[#allocation8 + $0x160] sm:$0xff] }
 0x591   :  { %2955 = vmatpush1.msra.mxu0 %v8712_v41  ;;  %5504 = vmatpush3.msra.mxu1 %v8715_v6  ;;  %10523 = vst [vmem:[#allocation61_spill] sm:$0xff] %v8725_v8  ;;  %v8732_v6 = vld [vmem:[#allocation8 + $0x138] sm:$0xff]  ;;  %v8738_v41 = vld [vmem:[#allocation8 + $0x128] sm:$0xff] }
 0x592   :  { %2956 = vmatprep.subr.mxu0 %v8718_v53  ;;  %5505 = vmatprep.subr.mxu1 %v10214_v20  ;;  %10525 = vst [vmem:[#allocation65_spill] sm:$0xff] %v8732_v6  ;;  %v8735_v53 = vld [vmem:[#allocation8 + $0x148] sm:$0xff]  ;;  %10527 = vst [vmem:[#allocation66_spill] sm:$0xff] %v8738_v41 }
 0x593   :  { %2957 = vmatpush1.msra.mxu0 %v8722_v30  ;;  %5506 = vmatpush3.msra.mxu1 %v8725_v8  ;;  %10526 = vst [vmem:[#allocation64_spill] sm:$0xff] %v8735_v53  ;;  %v5947_v8 = vpop.eup %5946  ;;  %v8744_v30 = vld [vmem:[#allocation8 + $0x120] sm:$0xff] }
 0x594   :  { %2958 = vmatprep.subr.mxu0 %v8728_v14  ;;  %5507 = vmatprep.subr.mxu1 %v10214_v20  ;;  %v2625_v14 = vadd.f32 %v8567_v38, %v10435_v11  ;;  %10528 = vst [vmem:[#allocation68_spill] sm:$0xff] %v8744_v30  ;;  %v8756_v38 = vld [vmem:[#allocation8 + $0x108] sm:$0xff]  ;;  %v2639_v11 = vadd.f32 1.0, %v5947_v8 }
 0x595   :  { %2959 = vmatpush1.msra.mxu0 %v8732_v6  ;;  %5508 = vmatpush3.msra.mxu1 %v8735_v53  ;;  %v8750_v53 = vld [vmem:[#allocation8 + $0x110] sm:$0xff]  ;;  %v8782_v8 = vld [vmem:[#allocation8 + $0xc8] sm:$0xff] }
 0x596   :  { %2960 = vmatprep.subr.mxu0 %v8738_v41  ;;  %5509 = vmatprep.subr.mxu1 %v10214_v20  ;;  %10530 = vst [vmem:[#allocation69_spill] sm:$0xff] %v8750_v53  ;;  %v2484_v41 = vadd.f32 %v8532_v2, %v7604_v10  ;;  %v8769_v2 = vld [vmem:[#allocation8 + $0x100] sm:$0xff]  ;;  %10536 = vst [vmem:[#allocation75_spill] sm:$0xff] %v8782_v8 }
 0x597   :  { %2961 = vmatpush1.msra.mxu0 %v8744_v30  ;;  %5510 = vmatpush3.msra.mxu1 %v8747_v18  ;;  %v8759_v30 = vld [vmem:[#allocation8 + $0x118] sm:$0xff]  ;;  %10532 = vst [vmem:[#allocation70_spill] sm:$0xff] %v8769_v2 }
 0x598   :  { %v5949_v6 = vpop.eup %5948  ;;  %2962 = vmatprep.subr.mxu0 %v8750_v53  ;;  %5511 = vmatprep.subr.mxu1 %v10214_v20  ;;  %v8762_v18 = vld [vmem:[#allocation8 + $0xf8] sm:$0xff] }
 0x599   :  { %v2642_v21 = vmul.f32 %v5949_v6, %v2625_v14  ;;  %2963 = vmatpush1.msra.mxu0 %v8756_v38  ;;  %5512 = vmatpush3.msra.mxu1 %v8759_v30  ;;  %v8772_v14 = vld [vmem:[#allocation8 + $0xe0] sm:$0xff]  ;;  %v8776_v6 = vld [vmem:[#allocation8 + $0xd8] sm:$0xff] }
 0x59a   :  { %2964 = vmatprep.subr.mxu0 %v8762_v18  ;;  %5513 = vmatprep.subr.mxu1 %v10214_v20  ;;  %10533 = vst [vmem:[#allocation72_spill] sm:$0xff] %v8772_v14  ;;  %10534 = vst [vmem:[#allocation74_spill] sm:$0xff] %v8776_v6 }
 0x59b   :  { %v2643_v53 = vadd.f32 %v2642_v21, %v2484_v41  ;;  %2965 = vmatpush1.msra.mxu0 %v8766_v59  ;;  %5514 = vmatpush3.msra.mxu1 %v8769_v2  ;;  %v8779_v21 = vld [vmem:[#allocation8 + $0xe8] sm:$0xff]  ;;  %v8786_v41 = vld [vmem:[#allocation8 + $0xc0] sm:$0xff] }
 0x59c   :  { %2966 = vmatprep.subr.mxu0 %v8772_v14  ;;  %5515 = vmatprep.subr.mxu1 %v10214_v20  ;;  %10535 = vst [vmem:[#allocation73_spill] sm:$0xff] %v8779_v21  ;;  %10537 = vst [vmem:[#allocation77_spill] sm:$0xff] %v8786_v41  ;;  %v8853_v2 = vld [vmem:[#allocation8 + $0x20] sm:$0xff]  ;;  %v8863_v59 = vld [vmem:[#allocation8 + $0x8] sm:$0xff] }
 0x59d   :  { %5950 = vtanh.f32 %v2643_v53  ;;  %2967 = vmatpush1.msra.mxu0 %v8776_v6  ;;  %5516 = vmatpush3.msra.mxu1 %v8779_v21  ;;  %v8789_v53 = vld [vmem:[#allocation8 + $0xd0] sm:$0xff]  ;;  %v8796_v21 = vld [vmem:[#allocation8 + $0xa8] sm:$0xff]  ;;  %10556 = vst [vmem:[#allocation95_spill] sm:$0xff] %v8853_v2 }
 0x59e   :  { %2968 = vmatprep.subr.mxu0 %v8782_v8  ;;  %5517 = vmatprep.subr.mxu1 %v10214_v20  ;;  %5952 = vrcp.f32 %v2639_v11  ;;  %10538 = vst [vmem:[#allocation76_spill] sm:$0xff] %v8789_v53  ;;  %v8792_v6 = vld [vmem:[#allocation8 + $0xb0] sm:$0xff]  ;;  %10540 = vst [vmem:[#allocation80_spill] sm:$0xff] %v8796_v21  ;;  %v8799_v8 = vld [vmem:[#allocation8 + $0xb8] sm:$0xff] }
 0x59f   :  { %2969 = vmatpush1.msra.mxu0 %v8786_v41  ;;  %5518 = vmatpush3.msra.mxu1 %v8789_v53  ;;  %10539 = vst [vmem:[#allocation78_spill] sm:$0xff] %v8792_v6  ;;  %10541 = vst [vmem:[#allocation79_spill] sm:$0xff] %v8799_v8  ;;  %v8802_v11 = vld [vmem:[#allocation8 + $0x98] sm:$0xff]  ;;  %v8806_v53 = vld [vmem:[#allocation8 + $0x90] sm:$0xff] }
 0x5a0   :  { %2970 = vmatprep.subr.mxu0 %v8792_v6  ;;  %5519 = vmatprep.subr.mxu1 %v10214_v20  ;;  %10542 = vst [vmem:[#allocation81_spill] sm:$0xff] %v8802_v11  ;;  %10543 = vst [vmem:[#allocation83_spill] sm:$0xff] %v8806_v53  ;;  %v8809_v6 = vld [vmem:[#allocation8 + $0xa0] sm:$0xff] }
 0x5a1   :  { %2971 = vmatpush1.msra.mxu0 %v8796_v21  ;;  %5520 = vmatpush3.msra.mxu1 %v8799_v8  ;;  %10544 = vst [vmem:[#allocation82_spill] sm:$0xff] %v8809_v6  ;;  %v8812_v41 = vld [vmem:[#allocation8 + $0x80] sm:$0xff]  ;;  %v8816_v8 = vld [vmem:[#allocation8 + $0x78] sm:$0xff]  ;;  %v8822_v21 = vld [vmem:[#allocation8 + $0x68] sm:$0xff] }
 0x5a2   :  { %2972 = vmatprep.subr.mxu0 %v8802_v11  ;;  %5521 = vmatprep.subr.mxu1 %v10214_v20  ;;  %10545 = vst [vmem:[#allocation84_spill] sm:$0xff] %v8812_v41  ;;  %10546 = vst [vmem:[#allocation86_spill] sm:$0xff] %v8816_v8  ;;  %v8819_v11 = vld [vmem:[#allocation8 + $0x88] sm:$0xff] }
 0x5a3   :  { %2973 = vmatpush1.msra.mxu0 %v8806_v53  ;;  %5522 = vmatpush3.msra.mxu1 %v8809_v6  ;;  %10547 = vst [vmem:[#allocation85_spill] sm:$0xff] %v8819_v11  ;;  %10548 = vst [vmem:[#allocation87_spill] sm:$0xff] %v8822_v21  ;;  %v8826_v6 = vld [vmem:[#allocation8 + $0x60] sm:$0xff]  ;;  %v8832_v53 = vld [vmem:[#allocation8 + $0x50] sm:$0xff] }
 0x5a4   :  { %2974 = vmatprep.subr.mxu0 %v8812_v41  ;;  %5523 = vmatprep.subr.mxu1 %v10214_v20  ;;  %10549 = vst [vmem:[#allocation89_spill] sm:$0xff] %v8826_v6  ;;  %v8829_v41 = vld [vmem:[#allocation8 + $0x70] sm:$0xff]  ;;  %10551 = vst [vmem:[#allocation90_spill] sm:$0xff] %v8832_v53 }
 0x5a5   :  { %2975 = vmatpush1.msra.mxu0 %v8816_v8  ;;  %5524 = vmatpush3.msra.mxu1 %v8819_v11  ;;  %10550 = vst [vmem:[#allocation88_spill] sm:$0xff] %v8829_v41  ;;  %v8836_v11 = vld [vmem:[#allocation8 + $0x48] sm:$0xff] }
 0x5a6   :  { %2976 = vmatprep.subr.mxu0 %v8822_v21  ;;  %5525 = vmatprep.subr.mxu1 %v10214_v20  ;;  %10552 = vst [vmem:[#allocation92_spill] sm:$0xff] %v8836_v11  ;;  %v8839_v21 = vld [vmem:[#allocation8 + $0x58] sm:$0xff] }
 0x5a7   :  { %2977 = vmatpush1.msra.mxu0 %v8826_v6  ;;  %5526 = vmatpush3.msra.mxu1 %v8829_v41  ;;  %10553 = vst [vmem:[#allocation91_spill] sm:$0xff] %v8839_v21  ;;  %v8842_v6 = vld [vmem:[#allocation8 + $0x38] sm:$0xff]  ;;  %v8846_v41 = vld [vmem:[#allocation8 + $0x30] sm:$0xff] }
 0x5a8   :  { %2978 = vmatprep.subr.mxu0 %v8832_v53  ;;  %5527 = vmatprep.subr.mxu1 %v10214_v20  ;;  %10554 = vst [vmem:[#allocation93_spill] sm:$0xff] %v8842_v6  ;;  %10555 = vst [vmem:[#allocation94_spill] sm:$0xff] %v8846_v41  ;;  %v8849_v53 = vld [vmem:[#allocation8 + $0x40] sm:$0xff] }
 0x5a9   :  { %2979 = vmatpush1.msra.mxu0 %v8836_v11  ;;  %5528 = vmatpush3.msra.mxu1 %v8839_v21  ;;  %v8860_v21 = vld [vmem:[#allocation8 + $0x28] sm:$0xff] }
 0x5aa   :  { %v5951_v8 = vpop.eup %5950  ;;  %2980 = vmatprep.subr.mxu0 %v8842_v6  ;;  %5529 = vmatprep.subr.mxu1 %v10214_v20  ;;  %v8857_v6 = vld [vmem:[#allocation8 + $0x18] sm:$0xff] }
 0x5ab   :  { %2981 = vmatpush1.msra.mxu0 %v8846_v41  ;;  %5530 = vmatpush3.msra.mxu1 %v8849_v53  ;;  %v2645_v11 = vsub.f32 %v8416_v51, %v5951_v8  ;;  %v5953_v14 = vpop.eup %5952  ;;  %10557 = vst [vmem:[#allocation96_spill] sm:$0xff] %v8857_v6  ;;  %v8867_v51 = vld [vmem:[#allocation8] sm:$0xff] }
 0x5ac   :  { %2982 = vmatprep.subr.mxu0 %v8853_v2  ;;  %5531 = vmatprep.subr.mxu1 %v10214_v20 }
 0x5ad   :  { %2983 = vmatpush1.msra.mxu0 %v8857_v6  ;;  %5532 = vmatpush3.msra.mxu1 %v8860_v21  ;;  %v2646_v41 = vmul.f32 %v5953_v14, %v2645_v11  ;;  %v8873_v6 = vld [vmem:[#allocation8 + $0x10] sm:$0xff]  ;;  %v8884_v11 = vld [vmem:[#allocation5 + $0x168] sm:$0xff] }
 0x5ae   :  { %2984 = vmatprep.subr.mxu0 %v8863_v59  ;;  %5533 = vmatprep.subr.mxu1 %v10214_v20  ;;  %v8880_v14 = vld [vmem:[#allocation5 + $0x170] sm:$0xff]  ;;  %10559 = vst [vmem:[#allocation98_spill] sm:$0xff] %v8884_v11 }
 0x5af   :  { %2985 = vmatpush1.msra.mxu0 %v8867_v51  ;;  %3018 = vmatprep.mubr.f32.mxu0 %v10214_v20  ;;  %v8871_v2 = vadd.f32 %v5951_v8, %v2646_v41  ;;  %10558 = vst [vmem:[#allocation97_spill] sm:$0xff] %v8880_v14  ;;  %v8888_v8 = vld [vmem:[#allocation5 + $0x158] sm:$0xff]  ;;  %v8892_v41 = vld [vmem:[#allocation5 + $0x150] sm:$0xff] }
 0x5b0   :  { %5534 = vmatpush3.msra.mxu1 %v8873_v6  ;;  %5535 = vmatprep.mubr.msk.f32.mxu1 %vm6572_vm0, %v10214_v20  ;;  %10560 = vst [vmem:[#allocation99_spill] sm:$0xff] %v8892_v41 }
 0x5b1   :  { %3019 = vmatmul.mubr.f32.vlgmr.msra.gmra.mxu0 %v8871_v2  ;;  %5536 = vmatmul.mubr.f32.vlgmr.msra.gmra.mxu1 %v8871_v2 }
 0x5b2   :  { %3119 = vmatprep.subr.mxu0 %v8880_v14  ;;  %5538 = vmatprep.subr.mxu1 %v10214_v20  ;;  %v8896_v14 = vld [vmem:[#allocation5 + $0x140] sm:$0xff] }
 0x5b3   :  { %3120 = vmatpush1.msra.mxu0 %v8884_v11  ;;  %5539 = vmatpush3.msra.mxu1 %v8426_v61  ;;  %v8900_v11 = vld [vmem:[#allocation5 + $0x138] sm:$0xff]  ;;  %v8904_v61 = vld [vmem:[#allocation5 + $0x128] sm:$0xff] }
 0x5b4   :  { %3121 = vmatprep.subr.mxu0 %v8888_v8  ;;  %5540 = vmatprep.subr.mxu1 %v10214_v20  ;;  %10561 = vst [vmem:[#allocation100_spill] sm:$0xff] %v8900_v11 }
 0x5b5   :  { %3122 = vmatpush1.msra.mxu0 %v8892_v41  ;;  %5541 = vmatpush3.msra.mxu1 %v8432_v48  ;;  %v8908_v41 = vld [vmem:[#allocation5 + $0x120] sm:$0xff]  ;;  %v8912_v48 = vld [vmem:[#allocation5 + $0x110] sm:$0xff] }
 0x5b6   :  { %3123 = vmatprep.subr.mxu0 %v8896_v14  ;;  %5542 = vmatprep.subr.mxu1 %v10214_v20  ;;  %10562 = vst [vmem:[#allocation101_spill] sm:$0xff] %v8908_v41 }
 0x5b7   :  { %3124 = vmatpush1.msra.mxu0 %v8900_v11  ;;  %5543 = vmatpush3.msra.mxu1 %v8438_v25  ;;  %v8916_v11 = vld [vmem:[#allocation5 + $0x108] sm:$0xff]  ;;  %v8920_v25 = vld [vmem:[#allocation5 + $0xf8] sm:$0xff] }
 0x5b8   :  { %3125 = vmatprep.subr.mxu0 %v8904_v61  ;;  %5544 = vmatprep.subr.mxu1 %v10214_v20  ;;  %10563 = vst [vmem:[#allocation102_spill] sm:$0xff] %v8916_v11 }
 0x5b9   :  { %3126 = vmatpush1.msra.mxu0 %v8908_v41  ;;  %5545 = vmatpush3.msra.mxu1 %v8444_v4  ;;  %v8924_v41 = vld [vmem:[#allocation5 + $0xf0] sm:$0xff]  ;;  %v8928_v4 = vld [vmem:[#allocation5 + $0xe0] sm:$0xff] }
 0x5ba   :  { %3127 = vmatprep.subr.mxu0 %v8912_v48  ;;  %5546 = vmatprep.subr.mxu1 %v10214_v20  ;;  %10564 = vst [vmem:[#allocation103_spill] sm:$0xff] %v8924_v41 }
 0x5bb   :  { %3128 = vmatpush1.msra.mxu0 %v8916_v11  ;;  %5547 = vmatpush3.msra.mxu1 %v8450_v54  ;;  %v8932_v11 = vld [vmem:[#allocation5 + $0xd8] sm:$0xff]  ;;  %v8936_v54 = vld [vmem:[#allocation5 + $0xc8] sm:$0xff] }
 0x5bc   :  { %3129 = vmatprep.subr.mxu0 %v8920_v25  ;;  %5548 = vmatprep.subr.mxu1 %v10214_v20  ;;  %10565 = vst [vmem:[#allocation104_spill] sm:$0xff] %v8932_v11  ;;  %10566 = vst [vmem:[#allocation105_spill] sm:$0xff] %v8936_v54 }
 0x5bd   :  { %3130 = vmatpush1.msra.mxu0 %v8924_v41  ;;  %5549 = vmatpush3.msra.mxu1 %v8456_v45  ;;  %v8940_v41 = vld [vmem:[#allocation5 + $0xc0] sm:$0xff]  ;;  %v8944_v45 = vld [vmem:[#allocation5 + $0xb0] sm:$0xff] }
 0x5be   :  { %3131 = vmatprep.subr.mxu0 %v8928_v4  ;;  %5550 = vmatprep.subr.mxu1 %v10214_v20  ;;  %10567 = vst [vmem:[#allocation106_spill] sm:$0xff] %v8940_v41  ;;  %10568 = vst [vmem:[#allocation107_spill] sm:$0xff] %v8944_v45 }
 0x5bf   :  { %3132 = vmatpush1.msra.mxu0 %v8932_v11  ;;  %5551 = vmatpush3.msra.mxu1 %v8462_v57  ;;  %v8948_v11 = vld [vmem:[#allocation5 + $0xa8] sm:$0xff]  ;;  %v8952_v57 = vld [vmem:[#allocation5 + $0x98] sm:$0xff] }
 0x5c0   :  { %3133 = vmatprep.subr.mxu0 %v8936_v54  ;;  %5552 = vmatprep.subr.mxu1 %v10214_v20  ;;  %10569 = vst [vmem:[#allocation108_spill] sm:$0xff] %v8948_v11  ;;  %10570 = vst [vmem:[#allocation109_spill] sm:$0xff] %v8952_v57 }
 0x5c1   :  { %3134 = vmatpush1.msra.mxu0 %v8940_v41  ;;  %5553 = vmatpush3.msra.mxu1 %v8468_v27  ;;  %v8956_v41 = vld [vmem:[#allocation5 + $0x90] sm:$0xff]  ;;  %v8960_v27 = vld [vmem:[#allocation5 + $0x80] sm:$0xff] }
 0x5c2   :  { %3135 = vmatprep.subr.mxu0 %v8944_v45  ;;  %5554 = vmatprep.subr.mxu1 %v10214_v20  ;;  %10571 = vst [vmem:[#allocation110_spill] sm:$0xff] %v8956_v41  ;;  %10572 = vst [vmem:[#allocation111_spill] sm:$0xff] %v8960_v27 }
 0x5c3   :  { %3136 = vmatpush1.msra.mxu0 %v8948_v11  ;;  %5555 = vmatpush3.msra.mxu1 %v8474_v43  ;;  %v8964_v11 = vld [vmem:[#allocation5 + $0x78] sm:$0xff]  ;;  %v8968_v43 = vld [vmem:[#allocation5 + $0x68] sm:$0xff] }
 0x5c4   :  { %3137 = vmatprep.subr.mxu0 %v8952_v57  ;;  %5556 = vmatprep.subr.mxu1 %v10214_v20  ;;  %10573 = vst [vmem:[#allocation112_spill] sm:$0xff] %v8964_v11  ;;  %10574 = vst [vmem:[#allocation113_spill] sm:$0xff] %v8968_v43 }
 0x5c5   :  { %3138 = vmatpush1.msra.mxu0 %v8956_v41  ;;  %5557 = vmatpush3.msra.mxu1 %v8480_v31  ;;  %v8972_v41 = vld [vmem:[#allocation5 + $0x60] sm:$0xff]  ;;  %v8976_v31 = vld [vmem:[#allocation5 + $0x50] sm:$0xff] }
 0x5c6   :  { %3139 = vmatprep.subr.mxu0 %v8960_v27  ;;  %5558 = vmatprep.subr.mxu1 %v10214_v20  ;;  %10575 = vst [vmem:[#allocation114_spill] sm:$0xff] %v8972_v41  ;;  %10576 = vst [vmem:[#allocation115_spill] sm:$0xff] %v8976_v31 }
 0x5c7   :  { %3140 = vmatpush1.msra.mxu0 %v8964_v11  ;;  %5559 = vmatpush3.msra.mxu1 %v8486_v17  ;;  %v8980_v11 = vld [vmem:[#allocation5 + $0x48] sm:$0xff]  ;;  %v8984_v17 = vld [vmem:[#allocation5 + $0x38] sm:$0xff] }
 0x5c8   :  { %3141 = vmatprep.subr.mxu0 %v8968_v43  ;;  %5560 = vmatprep.subr.mxu1 %v10214_v20  ;;  %10577 = vst [vmem:[#allocation116_spill] sm:$0xff] %v8980_v11  ;;  %10578 = vst [vmem:[#allocation117_spill] sm:$0xff] %v8984_v17 }
 0x5c9   :  { %3142 = vmatpush1.msra.mxu0 %v8972_v41  ;;  %5561 = vmatpush3.msra.mxu1 %v8492_v32  ;;  %v8988_v41 = vld [vmem:[#allocation5 + $0x30] sm:$0xff]  ;;  %v8992_v32 = vld [vmem:[#allocation5 + $0x20] sm:$0xff] }
 0x5ca   :  { %3143 = vmatprep.subr.mxu0 %v8976_v31  ;;  %5562 = vmatprep.subr.mxu1 %v10214_v20  ;;  %10579 = vst [vmem:[#allocation118_spill] sm:$0xff] %v8988_v41  ;;  %10580 = vst [vmem:[#allocation119_spill] sm:$0xff] %v8992_v32  ;;  %v10584_v31 = vld [vmem:[#allocation22_spill] sm:$0xff] }
 0x5cb   :  { %3144 = vmatpush1.msra.mxu0 %v8980_v11  ;;  %5563 = vmatpush3.msra.mxu1 %v8498_v63  ;;  %v8996_v11 = vld [vmem:[#allocation5 + $0x18] sm:$0xff]  ;;  %v9000_v63 = vld [vmem:[#allocation5 + $0x8] sm:$0xff] }
 0x5cc   :  { %3145 = vmatprep.subr.mxu0 %v8984_v17  ;;  %5564 = vmatprep.subr.mxu1 %v10214_v20  ;;  %10581 = vst [vmem:[#allocation120_spill] sm:$0xff] %v8996_v11  ;;  %10582 = vst [vmem:[#allocation14_spill] sm:$0xff] %v9000_v63 }
 0x5cd   :  { %3146 = vmatpush1.msra.mxu0 %v8988_v41  ;;  %5565 = vmatpush3.msra.mxu1 %v8504_v24 }
 0x5ce   :  { %3147 = vmatprep.subr.mxu0 %v8992_v32  ;;  %5566 = vmatprep.subr.mxu1 %v10214_v20  ;;  %v10583_v32 = vld [vmem:[#allocation21_spill] sm:$0xff] }
 0x5cf   :  { %3148 = vmatpush1.msra.mxu0 %v8996_v11  ;;  %5567 = vmatpush3.msra.mxu1 %v8510_v42 }
 0x5d0   :  { %3149 = vmatprep.subr.mxu0 %v9000_v63  ;;  %5568 = vmatprep.subr.mxu1 %v10214_v20 }
 0x5d1   :  { %3150 = vmatpush1.msra.mxu0 %v8515_v37  ;;  %5569 = vmatpush3.msra.mxu1 %v8518_v47 }
 0x5d2   :  { %3183 = vmatprep.mubr.f32.mxu0 %v10214_v20  ;;  %5570 = vmatprep.mubr.msk.f32.mxu1 %vm6572_vm0, %v10214_v20 }
 0x5d3   :  { %3280 = vmatprep.subr.mxu0 %v8524_v22  ;;  %5573 = vmatprep.subr.mxu1 %v10214_v20 }
 0x62e   :  { %v2718_v24 = vpop.f32.mrf.mxu0  ;;  %v2789_v42 = vpop.f32.mrf.mxu1 }
 0x62f   :  { %v2719_v11 = vadd.f32 %v2718_v24, %v10491_v46  ;;  %v2790_v24 = vadd.f32 %v2789_v42, %v7014_v56  ;;  %v10600_v42 = vld [vmem:[#allocation48_spill] sm:$0xff] }
 0x630   :  { %v5467_v63 = vpop.f32.mrf.mxu1  ;;  %v2720_v37 = vpop.f32.mrf.mxu0 }
 0x631   :  { %v2793_v41 = vadd.f32 %v2719_v11, %v10583_v32  ;;  %v2721_v47 = vadd.f32 %v2720_v37, %v7002_v62 }
 0x633   :  { %v4470_v17 = vmul.f32 -1.442695, %v2793_v41  ;;  %v2800_v43 = vadd.f32 %v2721_v47, %v10584_v31  ;;  %v10585_v41 = vld [vmem:[#allocation31_spill] sm:$0xff] }
 0x635   :  { %5954 = vpow2.f32 %v4470_v17  ;;  %v4471_v27 = vmul.f32 -1.442695, %v2800_v43 }
 0x637   :  { %5956 = vpow2.f32 %v4471_v27 }
 0x642   :  { %v5955_v57 = vpop.eup %5954 }
 0x643   :  { %v2797_v45 = vadd.f32 1.0, %v5955_v57 }
 0x644   :  { %v5957_v54 = vpop.eup %5956 }
 0x645   :  { %5958 = vrcp.f32 %v2797_v45  ;;  %v2804_v32 = vadd.f32 1.0, %v5957_v54  ;;  %v10599_v54 = vld [vmem:[#allocation47_spill] sm:$0xff] }
 0x64f   :  { %v9015_v22 = vpop.f32.mrf.mxu1  ;;  %v2879_v45 = vpop.f32.mrf.mxu0 }
 0x651   :  { %v5502_v63 = vpop.f32.mrf.mxu1 }
 0x652   :  { %v5959_v46 = vpop.eup %5958 }
 0x653   :  { %v2807_v11 = vmul.f32 %v5959_v46, %v2790_v24  ;;  %v2881_v46 = vpop.f32.mrf.mxu0  ;;  %v10601_v24 = vld [vmem:[#allocation49_spill] sm:$0xff] }
 0x655   :  { %v2808_v17 = vadd.f32 %v2807_v11, %v10585_v41  ;;  %v10602_v11 = vld [vmem:[#allocation50_spill] sm:$0xff]  ;;  %v10603_v41 = vld [vmem:[#allocation51_spill] sm:$0xff] }
 0x657   :  { %5960 = vtanh.f32 %v2808_v17  ;;  %v10604_v17 = vld [vmem:[#allocation52_spill] sm:$0xff] }
 0x658   :  { %5962 = vrcp.f32 %v2804_v32  ;;  %v10605_v32 = vld [vmem:[#allocation53_spill] sm:$0xff] }
 0x664   :  { %v5961_v37 = vpop.eup %5960 }
 0x665   :  { %v2810_v43 = vsub.f32 %v8537_v3, %v5961_v37  ;;  %v5963_v31 = vpop.eup %5962 }
 0x667   :  { %v2811_v57 = vmul.f32 %v5963_v31, %v2810_v43  ;;  %v10607_v43 = vld [vmem:[#allocation55_spill] sm:$0xff]  ;;  %v10608_v31 = vld [vmem:[#allocation56_spill] sm:$0xff] }
 0x669   :  { %v9020_v27 = vadd.f32 %v5961_v37, %v2811_v57  ;;  %v10606_v37 = vld [vmem:[#allocation54_spill] sm:$0xff]  ;;  %v10609_v57 = vld [vmem:[#allocation20_spill] sm:$0xff] }
 0x66b   :  { %3184 = vmatmul.mubr.f32.vlgmr.msra.gmra.mxu0 %v9020_v27  ;;  %5571 = vmatmul.mubr.f32.vlgmr.msra.gmra.mxu1 %v9020_v27 }
 0x66c   :  { %3281 = vmatpush1.msra.mxu0 %v8541_v55  ;;  %5574 = vmatpush3.msra.mxu1 %v8544_v39  ;;  %v2880_v39 = vadd.f32 %v2879_v45, %v7505_v0  ;;  %v10610_v45 = vld [vmem:[#allocation57_spill] sm:$0xff] }
 0x66d   :  { %3282 = vmatprep.subr.mxu0 %v8547_v34  ;;  %5575 = vmatprep.subr.mxu1 %v10214_v20 }
 0x66e   :  { %3283 = vmatpush1.msra.mxu0 %v8551_v7  ;;  %5576 = vmatpush3.msra.mxu1 %v8554_v58 }
 0x66f   :  { %3284 = vmatprep.subr.mxu0 %v8557_v9  ;;  %5577 = vmatprep.subr.mxu1 %v10214_v20 }
 0x670   :  { %3285 = vmatpush1.msra.mxu0 %v8561_v13  ;;  %5578 = vmatpush3.msra.mxu1 %v8564_v50 }
 0x671   :  { %v3020_v3 = vpop.f32.mrf.mxu0  ;;  %v9034_v55 = vpop.f32.mrf.mxu1  ;;  %3286 = vmatprep.subr.mxu0 %v8569_v35  ;;  %5579 = vmatprep.subr.mxu1 %v10214_v20  ;;  %v10586_v35 = vld [vmem:[#allocation16_spill] sm:$0xff] }
 0x672   :  { %v3021_v34 = vadd.f32 %v3020_v3, %v7511_v44  ;;  %3287 = vmatpush1.msra.mxu0 %v8575_v26  ;;  %5580 = vmatpush3.msra.mxu1 %v8578_v23  ;;  %v10587_v26 = vld [vmem:[#allocation17_spill] sm:$0xff]  ;;  %v10588_v23 = vld [vmem:[#allocation124_spill] sm:$0xff]  ;;  %v10612_v3 = vld [vmem:[#allocation58_spill] sm:$0xff] }
 0x673   :  { %v5537_v7 = vpop.f32.mrf.mxu1  ;;  %3288 = vmatprep.subr.mxu0 %v8581_v15  ;;  %5581 = vmatprep.subr.mxu1 %v10214_v20  ;;  %v3022_v13 = vpop.f32.mrf.mxu0  ;;  %v2882_v15 = vadd.f32 %v2881_v46, %v10588_v23  ;;  %v10611_v46 = vld [vmem:[#allocation59_spill] sm:$0xff] }
 0x674   :  { %v3095_v58 = vadd.f32 %v3021_v34, %v2880_v39  ;;  %3289 = vmatpush1.msra.mxu0 %v8585_v19  ;;  %5582 = vmatpush3.msra.mxu1 %v8588_v60  ;;  %v3023_v50 = vadd.f32 %v3022_v13, %v7535_v1  ;;  %v10589_v19 = vld [vmem:[#allocation28_spill] sm:$0xff]  ;;  %v10590_v60 = vld [vmem:[#allocation38_spill] sm:$0xff]  ;;  %v10615_v7 = vld [vmem:[#allocation61_spill] sm:$0xff] }
 0x675   :  { %3290 = vmatprep.subr.mxu0 %v8591_v33  ;;  %5583 = vmatprep.subr.mxu1 %v10214_v20  ;;  %v10591_v33 = vld [vmem:[#allocation39_spill] sm:$0xff]  ;;  %v10613_v39 = vld [vmem:[#allocation60_spill] sm:$0xff]  ;;  %v10614_v34 = vld [vmem:[#allocation62_spill] sm:$0xff] }
 0x676   :  { %v4472_v9 = vmul.f32 -1.442695, %v3095_v58  ;;  %3291 = vmatpush1.msra.mxu0 %v8595_v16  ;;  %5584 = vmatpush3.msra.mxu1 %v8598_v28  ;;  %v3102_v16 = vadd.f32 %v3023_v50, %v2882_v15  ;;  %v10592_v28 = vld [vmem:[#allocation40_spill] sm:$0xff]  ;;  %v10616_v58 = vld [vmem:[#allocation63_spill] sm:$0xff]  ;;  %v10619_v50 = vld [vmem:[#allocation66_spill] sm:$0xff] }
 0x677   :  { %3292 = vmatprep.subr.mxu0 %v8601_v12  ;;  %5585 = vmatprep.subr.mxu1 %v10214_v20  ;;  %v10593_v12 = vld [vmem:[#allocation41_spill] sm:$0xff]  ;;  %v10618_v13 = vld [vmem:[#allocation64_spill] sm:$0xff] }
 0x678   :  { %5964 = vpow2.f32 %v4472_v9  ;;  %3293 = vmatpush1.msra.mxu0 %v8605_v49  ;;  %5586 = vmatpush3.msra.mxu1 %v8608_v52  ;;  %v10594_v49 = vld [vmem:[#allocation42_spill] sm:$0xff]  ;;  %v10595_v52 = vld [vmem:[#allocation43_spill] sm:$0xff]  ;;  %v10617_v9 = vld [vmem:[#allocation65_spill] sm:$0xff] }
 0x679   :  { %3294 = vmatprep.subr.mxu0 %v8611_v36  ;;  %5587 = vmatprep.subr.mxu1 %v10214_v20  ;;  %v10596_v36 = vld [vmem:[#allocation44_spill] sm:$0xff] }
 0x67a   :  { %3295 = vmatpush1.msra.mxu0 %v8615_v29  ;;  %5588 = vmatpush3.msra.mxu1 %v8618_v5  ;;  %v10597_v29 = vld [vmem:[#allocation45_spill] sm:$0xff]  ;;  %v4473_v5 = vmul.f32 -1.442695, %v3102_v16 }
 0x67b   :  { %3296 = vmatprep.subr.mxu0 %v10586_v35  ;;  %5589 = vmatprep.subr.mxu1 %v10214_v20  ;;  %v10623_v16 = vld [vmem:[#allocation69_spill] sm:$0xff] }
 0x67c   :  { %3297 = vmatpush1.msra.mxu0 %v10587_v26  ;;  %5590 = vmatpush3.msra.mxu1 %v8629_v40  ;;  %v10598_v40 = vld [vmem:[#allocation46_spill] sm:$0xff]  ;;  %5966 = vpow2.f32 %v4473_v5  ;;  %v10620_v26 = vld [vmem:[#allocation36_spill] sm:$0xff] }
 0x67d   :  { %3298 = vmatprep.subr.mxu0 %v10589_v19  ;;  %5591 = vmatprep.subr.mxu1 %v10214_v20  ;;  %v3092_v15 = vadd.f32 %v9034_v55, %v10620_v26  ;;  %v10621_v19 = vld [vmem:[#allocation68_spill] sm:$0xff] }
 0x67e   :  { %3299 = vmatpush1.msra.mxu0 %v10590_v60  ;;  %5592 = vmatpush3.msra.mxu1 %v10591_v33  ;;  %v10622_v60 = vld [vmem:[#allocation67_spill] sm:$0xff]  ;;  %v10631_v5 = vld [vmem:[#allocation76_spill] sm:$0xff] }
 0x67f   :  { %3300 = vmatprep.subr.mxu0 %v10592_v28  ;;  %5593 = vmatprep.subr.mxu1 %v10214_v20  ;;  %v2951_v28 = vadd.f32 %v9015_v22, %v7604_v10  ;;  %v10627_v22 = vld [vmem:[#allocation74_spill] sm:$0xff] }
 0x680   :  { %3301 = vmatpush1.msra.mxu0 %v10593_v12  ;;  %5594 = vmatpush3.msra.mxu1 %v10594_v49 }
 0x681   :  { %3302 = vmatprep.subr.mxu0 %v10595_v52  ;;  %5595 = vmatprep.subr.mxu1 %v10214_v20  ;;  %v10624_v52 = vld [vmem:[#allocation71_spill] sm:$0xff] }
 0x682   :  { %3303 = vmatpush1.msra.mxu0 %v10596_v36  ;;  %5596 = vmatpush3.msra.mxu1 %v10597_v29  ;;  %v10625_v36 = vld [vmem:[#allocation70_spill] sm:$0xff]  ;;  %v10626_v29 = vld [vmem:[#allocation72_spill] sm:$0xff] }
 0x683   :  { %3304 = vmatprep.subr.mxu0 %v10598_v40  ;;  %5597 = vmatprep.subr.mxu1 %v10214_v20  ;;  %v10632_v40 = vld [vmem:[#allocation78_spill] sm:$0xff] }
 0x684   :  { %3305 = vmatpush1.msra.mxu0 %v10599_v54  ;;  %5598 = vmatpush3.msra.mxu1 %v10600_v42  ;;  %v10633_v54 = vld [vmem:[#allocation80_spill] sm:$0xff]  ;;  %v10634_v42 = vld [vmem:[#allocation79_spill] sm:$0xff] }
 0x685   :  { %v5965_v47 = vpop.eup %5964  ;;  %3306 = vmatprep.subr.mxu0 %v10601_v24  ;;  %5599 = vmatprep.subr.mxu1 %v10214_v20  ;;  %v10636_v24 = vld [vmem:[#allocation83_spill] sm:$0xff] }
 0x686   :  { %v3099_v63 = vadd.f32 1.0, %v5965_v47  ;;  %3307 = vmatpush1.msra.mxu0 %v10602_v11  ;;  %5600 = vmatpush3.msra.mxu1 %v10603_v41  ;;  %v10635_v47 = vld [vmem:[#allocation81_spill] sm:$0xff]  ;;  %v10638_v11 = vld [vmem:[#allocation84_spill] sm:$0xff]  ;;  %v10639_v41 = vld [vmem:[#allocation86_spill] sm:$0xff] }
 0x687   :  { %3308 = vmatprep.subr.mxu0 %v10604_v17  ;;  %5601 = vmatprep.subr.mxu1 %v10214_v20  ;;  %v10640_v17 = vld [vmem:[#allocation85_spill] sm:$0xff] }
 0x688   :  { %5968 = vrcp.f32 %v3099_v63  ;;  %3309 = vmatpush1.msra.mxu0 %v10605_v32  ;;  %5602 = vmatpush3.msra.mxu1 %v10606_v37  ;;  %v10637_v63 = vld [vmem:[#allocation82_spill] sm:$0xff]  ;;  %v10641_v32 = vld [vmem:[#allocation87_spill] sm:$0xff]  ;;  %v10642_v37 = vld [vmem:[#allocation89_spill] sm:$0xff] }
 0x689   :  { %3310 = vmatprep.subr.mxu0 %v10607_v43  ;;  %5603 = vmatprep.subr.mxu1 %v10214_v20  ;;  %v5967_v35 = vpop.eup %5966  ;;  %v10643_v43 = vld [vmem:[#allocation88_spill] sm:$0xff] }
 0x68a   :  { %3311 = vmatpush1.msra.mxu0 %v10608_v31  ;;  %3344 = vmatprep.mubr.f32.mxu0 %v10214_v20  ;;  %v3106_v49 = vadd.f32 1.0, %v5967_v35  ;;  %v10644_v31 = vld [vmem:[#allocation90_spill] sm:$0xff]  ;;  %v6345_v35 = vld [vmem:[#allocation5 + $0x148] sm:$0xff] }
 0x68b   :  { %5604 = vmatpush3.msra.mxu1 %v10609_v57  ;;  %5605 = vmatprep.mubr.msk.f32.mxu1 %vm6572_vm0, %v10214_v20  ;;  %v10645_v57 = vld [vmem:[#allocation92_spill] sm:$0xff] }
 0x68c   :  { %3345 = vmatmul.mubr.f32.vlgmr.msra.gmra.mxu0 %v9020_v27  ;;  %5606 = vmatmul.mubr.f32.vlgmr.msra.gmra.mxu1 %v9020_v27 }
 0x68d   :  { %3421 = vmatprep.subr.mxu0 %v10610_v45  ;;  %5608 = vmatprep.subr.mxu1 %v10214_v20  ;;  %v10646_v45 = vld [vmem:[#allocation91_spill] sm:$0xff] }
 0x68e   :  { %3422 = vmatpush1.msra.mxu0 %v10611_v46  ;;  %5609 = vmatpush3.msra.mxu1 %v10612_v3  ;;  %v10647_v3 = vld [vmem:[#allocation93_spill] sm:$0xff] }
 0x68f   :  { %3423 = vmatprep.subr.mxu0 %v10613_v39  ;;  %5610 = vmatprep.subr.mxu1 %v10214_v20  ;;  %v10648_v39 = vld [vmem:[#allocation94_spill] sm:$0xff] }
 0x690   :  { %3424 = vmatpush1.msra.mxu0 %v10614_v34  ;;  %5611 = vmatpush3.msra.mxu1 %v10615_v7 }
 0x691   :  { %3425 = vmatprep.subr.mxu0 %v10616_v58  ;;  %5612 = vmatprep.subr.mxu1 %v10214_v20  ;;  %v10649_v58 = vld [vmem:[#allocation95_spill] sm:$0xff] }
 0x692   :  { %3426 = vmatpush1.msra.mxu0 %v10617_v9  ;;  %5613 = vmatpush3.msra.mxu1 %v10618_v13  ;;  %v10650_v9 = vld [vmem:[#allocation96_spill] sm:$0xff] }
 0x693   :  { %3427 = vmatprep.subr.mxu0 %v10619_v50  ;;  %5614 = vmatprep.subr.mxu1 %v10214_v20  ;;  %v10654_v50 = vld [vmem:[#allocation100_spill] sm:$0xff] }
 0x694   :  { %3428 = vmatpush1.msra.mxu0 %v10621_v19  ;;  %5615 = vmatpush3.msra.mxu1 %v10622_v60  ;;  %v10656_v19 = vld [vmem:[#allocation102_spill] sm:$0xff]  ;;  %v10657_v60 = vld [vmem:[#allocation103_spill] sm:$0xff] }
 0x695   :  { %v5969_v33 = vpop.eup %5968  ;;  %3429 = vmatprep.subr.mxu0 %v10623_v16  ;;  %5616 = vmatprep.subr.mxu1 %v10214_v20  ;;  %v10659_v16 = vld [vmem:[#allocation105_spill] sm:$0xff] }
 0x696   :  { %v3109_v12 = vmul.f32 %v5969_v33, %v3092_v15  ;;  %3430 = vmatpush1.msra.mxu0 %v8756_v38  ;;  %5617 = vmatpush3.msra.mxu1 %v8759_v30  ;;  %v10628_v38 = vld [vmem:[#allocation73_spill] sm:$0xff]  ;;  %v10629_v30 = vld [vmem:[#allocation75_spill] sm:$0xff]  ;;  %v10658_v33 = vld [vmem:[#allocation104_spill] sm:$0xff] }
 0x697   :  { %3431 = vmatprep.subr.mxu0 %v8762_v18  ;;  %5618 = vmatprep.subr.mxu1 %v10214_v20  ;;  %v10630_v18 = vld [vmem:[#allocation77_spill] sm:$0xff] }
 0x698   :  { %v3110_v55 = vadd.f32 %v3109_v12, %v2951_v28  ;;  %3432 = vmatpush1.msra.mxu0 %v10624_v52  ;;  %5619 = vmatpush3.msra.mxu1 %v10625_v36  ;;  %v10655_v15 = vld [vmem:[#allocation101_spill] sm:$0xff]  ;;  %v10660_v28 = vld [vmem:[#allocation106_spill] sm:$0xff]  ;;  %v10661_v12 = vld [vmem:[#allocation107_spill] sm:$0xff] }
 0x699   :  { %3433 = vmatprep.subr.mxu0 %v10626_v29  ;;  %5620 = vmatprep.subr.mxu1 %v10214_v20  ;;  %v10664_v52 = vld [vmem:[#allocation110_spill] sm:$0xff]  ;;  %v10665_v29 = vld [vmem:[#allocation111_spill] sm:$0xff] }
 0x69a   :  { %5970 = vtanh.f32 %v3110_v55  ;;  %3434 = vmatpush1.msra.mxu0 %v10627_v22  ;;  %5621 = vmatpush3.msra.mxu1 %v10628_v38  ;;  %v10662_v55 = vld [vmem:[#allocation108_spill] sm:$0xff]  ;;  %v6352_v36 = vld [vmem:[#allocation5 + $0xa0] sm:$0xff]  ;;  %v6353_v38 = vld [vmem:[#allocation5 + $0x88] sm:$0xff] }
 0x69b   :  { %3435 = vmatprep.subr.mxu0 %v10629_v30  ;;  %5622 = vmatprep.subr.mxu1 %v10214_v20  ;;  %5972 = vrcp.f32 %v3106_v49  ;;  %v10663_v49 = vld [vmem:[#allocation109_spill] sm:$0xff]  ;;  %v10666_v22 = vld [vmem:[#allocation112_spill] sm:$0xff] }
 0x69c   :  { %3436 = vmatpush1.msra.mxu0 %v10630_v18  ;;  %5623 = vmatpush3.msra.mxu1 %v10631_v5  ;;  %v10667_v30 = vld [vmem:[#allocation113_spill] sm:$0xff]  ;;  %v10668_v18 = vld [vmem:[#allocation114_spill] sm:$0xff]  ;;  %v6354_v5 = vld [vmem:[#allocation5 + $0x70] sm:$0xff] }
 0x69d   :  { %3437 = vmatprep.subr.mxu0 %v10632_v40  ;;  %5624 = vmatprep.subr.mxu1 %v10214_v20  ;;  %v10669_v40 = vld [vmem:[#allocation115_spill] sm:$0xff] }
 0x69e   :  { %3438 = vmatpush1.msra.mxu0 %v10633_v54  ;;  %5625 = vmatpush3.msra.mxu1 %v10634_v42  ;;  %v10670_v54 = vld [vmem:[#allocation116_spill] sm:$0xff]  ;;  %v6355_v42 = vld [vmem:[#allocation5 + $0x58] sm:$0xff] }
 0x69f   :  { %3439 = vmatprep.subr.mxu0 %v10635_v47  ;;  %5626 = vmatprep.subr.mxu1 %v10214_v20  ;;  %v10671_v47 = vld [vmem:[#allocation117_spill] sm:$0xff] }
 0x6a0   :  { %3440 = vmatpush1.msra.mxu0 %v10636_v24  ;;  %5627 = vmatpush3.msra.mxu1 %v10637_v63  ;;  %v10672_v24 = vld [vmem:[#allocation118_spill] sm:$0xff] }
 0x6a1   :  { %3441 = vmatprep.subr.mxu0 %v10638_v11  ;;  %5628 = vmatprep.subr.mxu1 %v10214_v20  ;;  %v6356_v63 = vld [vmem:[#allocation5 + $0x40] sm:$0xff]  ;;  %v10673_v11 = vld [vmem:[#allocation119_spill] sm:$0xff] }
 0x6a2   :  { %3442 = vmatpush1.msra.mxu0 %v10639_v41  ;;  %5629 = vmatpush3.msra.mxu1 %v10640_v17  ;;  %v10674_v41 = vld [vmem:[#allocation120_spill] sm:$0xff]  ;;  %v6357_v17 = vld [vmem:[#allocation5 + $0x28] sm:$0xff] }
 0x6a3   :  { %3443 = vmatprep.subr.mxu0 %v10641_v32  ;;  %5630 = vmatprep.subr.mxu1 %v10214_v20  ;;  %v10675_v32 = vld [vmem:[#allocation14_spill] sm:$0xff] }
 0x6a4   :  { %3444 = vmatpush1.msra.mxu0 %v10642_v37  ;;  %5631 = vmatpush3.msra.mxu1 %v10643_v43  ;;  %v6358_v37 = vld [vmem:[#allocation5] sm:$0xff]  ;;  %v6359_v43 = vld [vmem:[#allocation5 + $0x10] sm:$0xff] }
 0x6a5   :  { %3445 = vmatprep.subr.mxu0 %v10644_v31  ;;  %5632 = vmatprep.subr.mxu1 %v10214_v20  ;;  %v9223_v31 = vld [vmem:[#allocation7 + $0x170] sm:$0xff] }
 0x6a6   :  { %3446 = vmatpush1.msra.mxu0 %v10645_v57  ;;  %5633 = vmatpush3.msra.mxu1 %v10646_v45 }
 0x6a7   :  { %v5971_v46 = vpop.eup %5970  ;;  %3447 = vmatprep.subr.mxu0 %v10647_v3  ;;  %5634 = vmatprep.subr.mxu1 %v10214_v20 }
 0x6a8   :  { %3448 = vmatpush1.msra.mxu0 %v10648_v39  ;;  %5635 = vmatpush3.msra.mxu1 %v8849_v53  ;;  %v3112_v34 = vsub.f32 %v8871_v2, %v5971_v46  ;;  %v5973_v7 = vpop.eup %5972  ;;  %v10651_v2 = vld [vmem:[#allocation97_spill] sm:$0xff] }
 0x6a9   :  { %3449 = vmatprep.subr.mxu0 %v10649_v58  ;;  %5636 = vmatprep.subr.mxu1 %v10214_v20 }
 0x6aa   :  { %3450 = vmatpush1.msra.mxu0 %v10650_v9  ;;  %5637 = vmatpush3.msra.mxu1 %v8860_v21  ;;  %v3113_v13 = vmul.f32 %v5973_v7, %v3112_v34  ;;  %v6343_v21 = vld [vmem:[#allocation5 + $0x178] sm:$0xff]  ;;  %v10677_v34 = vld [vmem:[#allocation23_spill] sm:$0xff] }
 0x6ab   :  { %3451 = vmatprep.subr.mxu0 %v8863_v59  ;;  %5638 = vmatprep.subr.mxu1 %v10214_v20  ;;  %v10652_v59 = vld [vmem:[#allocation98_spill] sm:$0xff] }
 0x6ac   :  { %3452 = vmatpush1.msra.mxu0 %v8867_v51  ;;  %3485 = vmatprep.mubr.f32.mxu0 %v10214_v20  ;;  %v9166_v53 = vadd.f32 %v5971_v46, %v3113_v13  ;;  %v6344_v51 = vld [vmem:[#allocation5 + $0x160] sm:$0xff] }
 0x6ad   :  { %5639 = vmatpush3.msra.mxu1 %v8873_v6  ;;  %5640 = vmatprep.mubr.msk.f32.mxu1 %vm6572_vm0, %v10214_v20  ;;  %v10653_v6 = vld [vmem:[#allocation99_spill] sm:$0xff]  ;;  %v10676_v46 = vld [vmem:[#allocation26_spill] sm:$0xff] }
 0x6ae   :  { %3486 = vmatmul.mubr.f32.vlgmr.msra.gmra.mxu0 %v9166_v53  ;;  %5641 = vmatmul.mubr.f32.vlgmr.msra.gmra.mxu1 %v9166_v53 }
 0x6af   :  { %3586 = vmatprep.subr.mxu0 %v10651_v2  ;;  %5643 = vmatprep.subr.mxu1 %v10214_v20  ;;  %v10678_v2 = vld [vmem:[#allocation24_spill] sm:$0xff] }
 0x6b0   :  { %3587 = vmatpush1.msra.mxu0 %v10652_v59  ;;  %5644 = vmatpush3.msra.mxu1 %v6343_v21 }
 0x6b1   :  { %3588 = vmatprep.subr.mxu0 %v8888_v8  ;;  %5645 = vmatprep.subr.mxu1 %v10214_v20  ;;  %v6346_v8 = vld [vmem:[#allocation5 + $0x130] sm:$0xff] }
 0x6b2   :  { %3589 = vmatpush1.msra.mxu0 %v10653_v6  ;;  %5646 = vmatpush3.msra.mxu1 %v6344_v51 }
 0x6b3   :  { %3590 = vmatprep.subr.mxu0 %v8896_v14  ;;  %5647 = vmatprep.subr.mxu1 %v10214_v20  ;;  %v6347_v14 = vld [vmem:[#allocation5 + $0x118] sm:$0xff] }
 0x6b4   :  { %3591 = vmatpush1.msra.mxu0 %v10654_v50  ;;  %5648 = vmatpush3.msra.mxu1 %v6345_v35 }
 0x6b5   :  { %3592 = vmatprep.subr.mxu0 %v8904_v61  ;;  %5649 = vmatprep.subr.mxu1 %v10214_v20  ;;  %v6348_v61 = vld [vmem:[#allocation5 + $0x100] sm:$0xff] }
 0x6b6   :  { %3593 = vmatpush1.msra.mxu0 %v10655_v15  ;;  %5650 = vmatpush3.msra.mxu1 %v6346_v8 }
 0x6b7   :  { %3594 = vmatprep.subr.mxu0 %v8912_v48  ;;  %5651 = vmatprep.subr.mxu1 %v10214_v20  ;;  %v6349_v48 = vld [vmem:[#allocation5 + $0xe8] sm:$0xff] }
 0x6b8   :  { %3595 = vmatpush1.msra.mxu0 %v10656_v19  ;;  %5652 = vmatpush3.msra.mxu1 %v6347_v14 }
 0x6b9   :  { %3596 = vmatprep.subr.mxu0 %v8920_v25  ;;  %5653 = vmatprep.subr.mxu1 %v10214_v20  ;;  %v6350_v25 = vld [vmem:[#allocation5 + $0xd0] sm:$0xff] }
 0x6ba   :  { %3597 = vmatpush1.msra.mxu0 %v10657_v60  ;;  %5654 = vmatpush3.msra.mxu1 %v6348_v61  ;;  %v10679_v60 = vld [vmem:[#allocation34_spill] sm:$0xff] }
 0x6bb   :  { %3598 = vmatprep.subr.mxu0 %v8928_v4  ;;  %5655 = vmatprep.subr.mxu1 %v10214_v20  ;;  %v6351_v4 = vld [vmem:[#allocation5 + $0xb8] sm:$0xff] }
 0x6bc   :  { %3599 = vmatpush1.msra.mxu0 %v10658_v33  ;;  %5656 = vmatpush3.msra.mxu1 %v6349_v48 }
 0x6bd   :  { %3600 = vmatprep.subr.mxu0 %v10659_v16  ;;  %5657 = vmatprep.subr.mxu1 %v10214_v20 }
 0x6be   :  { %3601 = vmatpush1.msra.mxu0 %v10660_v28  ;;  %5658 = vmatpush3.msra.mxu1 %v6350_v25 }
 0x6bf   :  { %3602 = vmatprep.subr.mxu0 %v10661_v12  ;;  %5659 = vmatprep.subr.mxu1 %v10214_v20 }
 0x6c0   :  { %3603 = vmatpush1.msra.mxu0 %v10662_v55  ;;  %5660 = vmatpush3.msra.mxu1 %v6351_v4  ;;  %v9240_v4 = vld [vmem:[#allocation7 + $0x168] sm:$0xff] }
 0x6c1   :  { %3604 = vmatprep.subr.mxu0 %v10663_v49  ;;  %5661 = vmatprep.subr.mxu1 %v10214_v20  ;;  %v9243_v49 = vld [vmem:[#allocation7 + $0x178] sm:$0xff] }
 0x6c2   :  { %3605 = vmatpush1.msra.mxu0 %v10664_v52  ;;  %5662 = vmatpush3.msra.mxu1 %v6352_v36  ;;  %v9246_v52 = vld [vmem:[#allocation7 + $0x158] sm:$0xff]  ;;  %v9253_v36 = vld [vmem:[#allocation7 + $0x160] sm:$0xff] }
 0x6c3   :  { %3606 = vmatprep.subr.mxu0 %v10665_v29  ;;  %5663 = vmatprep.subr.mxu1 %v10214_v20 }
 0x6c4   :  { %3607 = vmatpush1.msra.mxu0 %v10666_v22  ;;  %5664 = vmatpush3.msra.mxu1 %v6353_v38  ;;  %v9256_v22 = vld [vmem:[#allocation7 + $0x140] sm:$0xff]  ;;  %v9260_v38 = vld [vmem:[#allocation7 + $0x138] sm:$0xff] }
 0x6c5   :  { %3608 = vmatprep.subr.mxu0 %v10667_v30  ;;  %5665 = vmatprep.subr.mxu1 %v10214_v20  ;;  %v9263_v30 = vld [vmem:[#allocation7 + $0x148] sm:$0xff] }
 0x6c6   :  { %3609 = vmatpush1.msra.mxu0 %v10668_v18  ;;  %5666 = vmatpush3.msra.mxu1 %v6354_v5 }
 0x6c7   :  { %3610 = vmatprep.subr.mxu0 %v10669_v40  ;;  %5667 = vmatprep.subr.mxu1 %v10214_v20  ;;  %v9268_v40 = vld [vmem:[#allocation7 + $0x128] sm:$0xff] }
 0x6c8   :  { %3611 = vmatpush1.msra.mxu0 %v10670_v54  ;;  %5668 = vmatpush3.msra.mxu1 %v6355_v42 }
 0x6c9   :  { %3612 = vmatprep.subr.mxu0 %v10671_v47  ;;  %5669 = vmatprep.subr.mxu1 %v10214_v20  ;;  %v9274_v47 = vld [vmem:[#allocation7 + $0x120] sm:$0xff] }
 0x6ca   :  { %3613 = vmatpush1.msra.mxu0 %v10672_v24  ;;  %5670 = vmatpush3.msra.mxu1 %v6356_v63  ;;  %v9277_v24 = vld [vmem:[#allocation7 + $0x130] sm:$0xff] }
 0x6cb   :  { %3614 = vmatprep.subr.mxu0 %v10673_v11  ;;  %5671 = vmatprep.subr.mxu1 %v10214_v20  ;;  %v9280_v11 = vld [vmem:[#allocation7 + $0x110] sm:$0xff] }
 0x6cc   :  { %3615 = vmatpush1.msra.mxu0 %v10674_v41  ;;  %5672 = vmatpush3.msra.mxu1 %v6357_v17  ;;  %v9284_v17 = vld [vmem:[#allocation7 + $0x108] sm:$0xff] }
 0x6cd   :  { %3616 = vmatprep.subr.mxu0 %v10675_v32  ;;  %5673 = vmatprep.subr.mxu1 %v10214_v20  ;;  %v9287_v32 = vld [vmem:[#allocation7 + $0x118] sm:$0xff] }
 0x6ce   :  { %3617 = vmatpush1.msra.mxu0 %v6358_v37  ;;  %5674 = vmatpush3.msra.mxu1 %v6359_v43  ;;  %v9290_v37 = vld [vmem:[#allocation7 + $0xf8] sm:$0xff] }
 0x6cf   :  { %3650 = vmatprep.mubr.f32.mxu0 %v10214_v20  ;;  %5675 = vmatprep.mubr.msk.f32.mxu1 %vm6572_vm0, %v10214_v20 }
 0x6d0   :  { %3747 = vmatprep.subr.mxu0 %v9223_v31  ;;  %5678 = vmatprep.subr.mxu1 %v10214_v20 }
 0x72b   :  { %v3185_v57 = vpop.f32.mrf.mxu0  ;;  %v3256_v45 = vpop.f32.mrf.mxu1 }
 0x72c   :  { %v3186_v3 = vadd.f32 %v3185_v57, %v10676_v46  ;;  %v3257_v15 = vadd.f32 %v3256_v45, %v7014_v56  ;;  %v9294_v57 = vld [vmem:[#allocation7 + $0xf0] sm:$0xff]  ;;  %v9297_v45 = vld [vmem:[#allocation7 + $0x100] sm:$0xff] }
 0x72d   :  { %v5572_v39 = vpop.f32.mrf.mxu1  ;;  %v3187_v9 = vpop.f32.mrf.mxu0  ;;  %v9446_v56 = vld [vmem:[#allocation8 + $0x130] sm:$0xff] }
 0x72e   :  { %v3260_v7 = vadd.f32 %v3186_v3, %v10677_v34  ;;  %v3188_v13 = vadd.f32 %v3187_v9, %v7002_v62  ;;  %v9300_v3 = vld [vmem:[#allocation7 + $0xe0] sm:$0xff]  ;;  %v9304_v34 = vld [vmem:[#allocation7 + $0xd8] sm:$0xff]  ;;  %10691 = vst [vmem:[#allocation28_spill] sm:$0xff] %v9446_v56  ;;  %v9465_v46 = vld [vmem:[#allocation8 + $0xf0] sm:$0xff] }
 0x72f   :  { %v9314_v9 = vld [vmem:[#allocation7 + $0xc0] sm:$0xff] }
 0x730   :  { %v4474_v58 = vmul.f32 -1.442695, %v3260_v7  ;;  %v3267_v59 = vadd.f32 %v3188_v13, %v10678_v2  ;;  %v9307_v7 = vld [vmem:[#allocation7 + $0xe8] sm:$0xff]  ;;  %v9317_v13 = vld [vmem:[#allocation7 + $0xd0] sm:$0xff] }
 0x732   :  { %5974 = vpow2.f32 %v4474_v58  ;;  %v4475_v21 = vmul.f32 -1.442695, %v3267_v59  ;;  %v9310_v58 = vld [vmem:[#allocation7 + $0xc8] sm:$0xff]  ;;  %v9321_v59 = vld [vmem:[#allocation7 + $0xb0] sm:$0xff] }
 0x734   :  { %5976 = vpow2.f32 %v4475_v21  ;;  %v9325_v21 = vld [vmem:[#allocation7 + $0xa8] sm:$0xff] }
 0x73f   :  { %v5975_v6 = vpop.eup %5974 }
 0x740   :  { %v3264_v51 = vadd.f32 1.0, %v5975_v6  ;;  %v9328_v6 = vld [vmem:[#allocation7 + $0xb8] sm:$0xff] }
 0x741   :  { %v5977_v35 = vpop.eup %5976 }
 0x742   :  { %5978 = vrcp.f32 %v3264_v51  ;;  %v3271_v33 = vadd.f32 1.0, %v5977_v35  ;;  %v9332_v35 = vld [vmem:[#allocation7 + $0x98] sm:$0xff] }
 0x74c   :  { %v9231_v50 = vpop.f32.mrf.mxu1  ;;  %v3346_v55 = vpop.f32.mrf.mxu0 }
 0x74d   :  { %v3347_v54 = vadd.f32 %v3346_v55, %v7505_v0  ;;  %v9366_v55 = vld [vmem:[#allocation7 + $0x48] sm:$0xff]  ;;  %v9424_v0 = vld [vmem:[#allocation8 + $0x160] sm:$0xff] }
 0x74e   :  { %v5607_v8 = vpop.f32.mrf.mxu1  ;;  %v3348_v29 = vpop.f32.mrf.mxu0  ;;  %10685 = vst [vmem:[#allocation32_spill] sm:$0xff] %v9424_v0 }
 0x74f   :  { %v5979_v19 = vpop.eup %5978  ;;  %v3349_v51 = vadd.f32 %v3348_v29, %v10588_v23  ;;  %v9339_v8 = vld [vmem:[#allocation7 + $0xa0] sm:$0xff]  ;;  %v9369_v29 = vld [vmem:[#allocation7 + $0x58] sm:$0xff] }
 0x750   :  { %v3274_v14 = vmul.f32 %v5979_v19, %v3257_v15  ;;  %v9336_v15 = vld [vmem:[#allocation7 + $0x90] sm:$0xff]  ;;  %v9414_v23 = vld [vmem:[#allocation8 + $0x178] sm:$0xff] }
 0x751   :  { %10682 = vst [vmem:[#allocation125_spill] sm:$0xff] %v9414_v23 }
 0x752   :  { %v3275_v61 = vadd.f32 %v3274_v14, %v10679_v60  ;;  %v9342_v14 = vld [vmem:[#allocation7 + $0x80] sm:$0xff]  ;;  %v9346_v60 = vld [vmem:[#allocation7 + $0x78] sm:$0xff] }
 0x754   :  { %5980 = vtanh.f32 %v3275_v61  ;;  %v9349_v61 = vld [vmem:[#allocation7 + $0x88] sm:$0xff] }
 0x755   :  { %5982 = vrcp.f32 %v3271_v33  ;;  %v9352_v33 = vld [vmem:[#allocation7 + $0x68] sm:$0xff] }
 0x761   :  { %v5981_v48 = vpop.eup %5980 }
 0x762   :  { %v3277_v16 = vsub.f32 %v9020_v27, %v5981_v48  ;;  %v5983_v28 = vpop.eup %5982  ;;  %v9250_v27 = vld [vmem:[#allocation7 + $0x150] sm:$0xff] }
 0x764   :  { %v3278_v25 = vmul.f32 %v5983_v28, %v3277_v16  ;;  %v9359_v16 = vld [vmem:[#allocation7 + $0x70] sm:$0xff] }
 0x766   :  { %v9236_v12 = vadd.f32 %v5981_v48, %v3278_v25  ;;  %v9356_v48 = vld [vmem:[#allocation7 + $0x60] sm:$0xff]  ;;  %v9362_v25 = vld [vmem:[#allocation7 + $0x50] sm:$0xff] }
 0x768   :  { %10680 = vst [vmem:[#allocation15_spill] sm:$0xff] %v9236_v12  ;;  %3651 = vmatmul.mubr.f32.vlgmr.msra.gmra.mxu0 %v9236_v12  ;;  %5676 = vmatmul.mubr.f32.vlgmr.msra.gmra.mxu1 %v9236_v12 }
 0x769   :  { %3748 = vmatpush1.msra.mxu0 %v9240_v4  ;;  %5679 = vmatpush3.msra.mxu1 %v9243_v49 }
 0x76a   :  { %3749 = vmatprep.subr.mxu0 %v9246_v52  ;;  %5680 = vmatprep.subr.mxu1 %v10214_v20 }
 0x76b   :  { %3750 = vmatpush1.msra.mxu0 %v9250_v27  ;;  %5681 = vmatpush3.msra.mxu1 %v9253_v36 }
 0x76c   :  { %3751 = vmatprep.subr.mxu0 %v9256_v22  ;;  %5682 = vmatprep.subr.mxu1 %v10214_v20 }
 0x76d   :  { %3752 = vmatpush1.msra.mxu0 %v9260_v38  ;;  %5683 = vmatpush3.msra.mxu1 %v9263_v30 }
 0x76e   :  { %v3487_v18 = vpop.f32.mrf.mxu0  ;;  %v9266_v5 = vpop.f32.mrf.mxu1  ;;  %3753 = vmatprep.subr.mxu0 %v9268_v40  ;;  %5684 = vmatprep.subr.mxu1 %v10214_v20 }
 0x76f   :  { %v3488_v42 = vadd.f32 %v3487_v18, %v7511_v44  ;;  %3754 = vmatpush1.msra.mxu0 %v9274_v47  ;;  %5685 = vmatpush3.msra.mxu1 %v9277_v24  ;;  %v9421_v44 = vld [vmem:[#allocation8 + $0x150] sm:$0xff] }
 0x770   :  { %v5642_v63 = vpop.f32.mrf.mxu1  ;;  %3755 = vmatprep.subr.mxu0 %v9280_v11  ;;  %5686 = vmatprep.subr.mxu1 %v10214_v20  ;;  %v3489_v39 = vpop.f32.mrf.mxu0  ;;  %10684 = vst [vmem:[#allocation19_spill] sm:$0xff] %v9421_v44 }
 0x771   :  { %v3562_v41 = vadd.f32 %v3488_v42, %v3347_v54  ;;  %3756 = vmatpush1.msra.mxu0 %v9284_v17  ;;  %5687 = vmatpush3.msra.mxu1 %v9287_v32  ;;  %v3490_v2 = vadd.f32 %v3489_v39, %v7535_v1  ;;  %v9372_v54 = vld [vmem:[#allocation7 + $0x38] sm:$0xff]  ;;  %v9376_v63 = vld [vmem:[#allocation7 + $0x30] sm:$0xff] }
 0x772   :  { %3757 = vmatprep.subr.mxu0 %v9290_v37  ;;  %5688 = vmatprep.subr.mxu1 %v10214_v20  ;;  %v9386_v39 = vld [vmem:[#allocation7 + $0x18] sm:$0xff] }
 0x773   :  { %v4476_v43 = vmul.f32 -1.442695, %v3562_v41  ;;  %3758 = vmatpush1.msra.mxu0 %v9294_v57  ;;  %5689 = vmatpush3.msra.mxu1 %v9297_v45  ;;  %v3569_v19 = vadd.f32 %v3490_v2, %v3349_v51  ;;  %v9379_v41 = vld [vmem:[#allocation7 + $0x40] sm:$0xff]  ;;  %v9389_v2 = vld [vmem:[#allocation7 + $0x28] sm:$0xff]  ;;  %v9417_v1 = vld [vmem:[#allocation8 + $0x158] sm:$0xff] }
 0x774   :  { %3759 = vmatprep.subr.mxu0 %v9300_v3  ;;  %5690 = vmatprep.subr.mxu1 %v10214_v20  ;;  %v9392_v51 = vld [vmem:[#allocation7 + $0x8] sm:$0xff]  ;;  %10683 = vst [vmem:[#allocation18_spill] sm:$0xff] %v9417_v1 }
 0x775   :  { %5984 = vpow2.f32 %v4476_v43  ;;  %3760 = vmatpush1.msra.mxu0 %v9304_v34  ;;  %5691 = vmatpush3.msra.mxu1 %v9307_v7  ;;  %v4477_v28 = vmul.f32 -1.442695, %v3569_v19  ;;  %v9382_v43 = vld [vmem:[#allocation7 + $0x20] sm:$0xff] }
 0x776   :  { %3761 = vmatprep.subr.mxu0 %v9310_v58  ;;  %5692 = vmatprep.subr.mxu1 %v10214_v20  ;;  %v9396_v19 = vld [vmem:[#allocation7] sm:$0xff] }
 0x777   :  { %3762 = vmatpush1.msra.mxu0 %v9314_v9  ;;  %5693 = vmatpush3.msra.mxu1 %v9317_v13  ;;  %5986 = vpow2.f32 %v4477_v28  ;;  %v9400_v28 = vld [vmem:[#allocation7 + $0x10] sm:$0xff] }
 0x778   :  { %3763 = vmatprep.subr.mxu0 %v9321_v59  ;;  %5694 = vmatprep.subr.mxu1 %v10214_v20 }
 0x779   :  { %3764 = vmatpush1.msra.mxu0 %v9325_v21  ;;  %5695 = vmatpush3.msra.mxu1 %v9328_v6 }
 0x77a   :  { %3765 = vmatprep.subr.mxu0 %v9332_v35  ;;  %5696 = vmatprep.subr.mxu1 %v10214_v20 }
 0x77b   :  { %3766 = vmatpush1.msra.mxu0 %v9336_v15  ;;  %5697 = vmatpush3.msra.mxu1 %v9339_v8 }
 0x77c   :  { %3767 = vmatprep.subr.mxu0 %v9342_v14  ;;  %5698 = vmatprep.subr.mxu1 %v10214_v20 }
 0x77d   :  { %3768 = vmatpush1.msra.mxu0 %v9346_v60  ;;  %5699 = vmatpush3.msra.mxu1 %v9349_v61 }
 0x77e   :  { %3769 = vmatprep.subr.mxu0 %v9352_v33  ;;  %5700 = vmatprep.subr.mxu1 %v10214_v20 }
 0x77f   :  { %3770 = vmatpush1.msra.mxu0 %v9356_v48  ;;  %5701 = vmatpush3.msra.mxu1 %v9359_v16 }
 0x780   :  { %3771 = vmatprep.subr.mxu0 %v9362_v25  ;;  %5702 = vmatprep.subr.mxu1 %v10214_v20 }
 0x781   :  { %3772 = vmatpush1.msra.mxu0 %v9366_v55  ;;  %5703 = vmatpush3.msra.mxu1 %v9369_v29 }
 0x782   :  { %v5985_v18 = vpop.eup %5984  ;;  %3773 = vmatprep.subr.mxu0 %v9372_v54  ;;  %5704 = vmatprep.subr.mxu1 %v10214_v20 }
 0x783   :  { %v3566_v42 = vadd.f32 1.0, %v5985_v18  ;;  %3774 = vmatpush1.msra.mxu0 %v9376_v63  ;;  %5705 = vmatpush3.msra.mxu1 %v9379_v41  ;;  %v9407_v18 = vld [vmem:[#allocation8 + $0x170] sm:$0xff] }
 0x784   :  { %3775 = vmatprep.subr.mxu0 %v9382_v43  ;;  %5706 = vmatprep.subr.mxu1 %v10214_v20 }
 0x785   :  { %5988 = vrcp.f32 %v3566_v42  ;;  %3776 = vmatpush1.msra.mxu0 %v9386_v39  ;;  %5707 = vmatpush3.msra.mxu1 %v9389_v2  ;;  %v9411_v42 = vld [vmem:[#allocation8 + $0x168] sm:$0xff] }
 0x786   :  { %3777 = vmatprep.subr.mxu0 %v9392_v51  ;;  %5708 = vmatprep.subr.mxu1 %v10214_v20  ;;  %10681 = vst [vmem:[#allocation29_spill] sm:$0xff] %v9411_v42 }
 0x787   :  { %3778 = vmatpush1.msra.mxu0 %v9396_v19  ;;  %3811 = vmatprep.mubr.f32.mxu0 %v10214_v20 }
 0x788   :  { %5709 = vmatpush3.msra.mxu1 %v9400_v28  ;;  %5710 = vmatprep.mubr.msk.f32.mxu1 %vm6572_vm0, %v10214_v20 }
 0x789   :  { %3812 = vmatmul.mubr.f32.vlgmr.msra.gmra.mxu0 %v9236_v12  ;;  %5711 = vmatmul.mubr.f32.vlgmr.msra.gmra.mxu1 %v9236_v12  ;;  %v9427_v12 = vld [vmem:[#allocation8 + $0x140] sm:$0xff] }
 0x78a   :  { %3888 = vmatprep.subr.mxu0 %v9407_v18  ;;  %5713 = vmatprep.subr.mxu1 %v10214_v20  ;;  %10686 = vst [vmem:[#allocation21_spill] sm:$0xff] %v9427_v12 }
 0x78b   :  { %3889 = vmatpush1.msra.mxu0 %v9411_v42  ;;  %5714 = vmatpush3.msra.mxu1 %v9414_v23  ;;  %v9431_v23 = vld [vmem:[#allocation8 + $0x138] sm:$0xff]  ;;  %v9437_v42 = vld [vmem:[#allocation8 + $0x128] sm:$0xff] }
 0x78c   :  { %3890 = vmatprep.subr.mxu0 %v9417_v1  ;;  %5715 = vmatprep.subr.mxu1 %v10214_v20  ;;  %10687 = vst [vmem:[#allocation22_spill] sm:$0xff] %v9431_v23  ;;  %v9434_v1 = vld [vmem:[#allocation8 + $0x148] sm:$0xff]  ;;  %10689 = vst [vmem:[#allocation16_spill] sm:$0xff] %v9437_v42 }
 0x78d   :  { %3891 = vmatpush1.msra.mxu0 %v9421_v44  ;;  %5716 = vmatpush3.msra.mxu1 %v9424_v0  ;;  %10688 = vst [vmem:[#allocation31_spill] sm:$0xff] %v9434_v1  ;;  %v5987_v0 = vpop.eup %5986  ;;  %v9443_v44 = vld [vmem:[#allocation8 + $0x120] sm:$0xff] }
 0x78e   :  { %3892 = vmatprep.subr.mxu0 %v9427_v12  ;;  %5717 = vmatprep.subr.mxu1 %v10214_v20  ;;  %v3559_v12 = vadd.f32 %v9266_v5, %v10620_v26  ;;  %10690 = vst [vmem:[#allocation17_spill] sm:$0xff] %v9443_v44  ;;  %v9455_v5 = vld [vmem:[#allocation8 + $0x108] sm:$0xff]  ;;  %v9458_v26 = vld [vmem:[#allocation8 + $0x118] sm:$0xff] }
 0x78f   :  { %3893 = vmatpush1.msra.mxu0 %v9431_v23  ;;  %5718 = vmatpush3.msra.mxu1 %v9434_v1  ;;  %v9449_v1 = vld [vmem:[#allocation8 + $0x110] sm:$0xff] }
 0x790   :  { %3894 = vmatprep.subr.mxu0 %v9437_v42  ;;  %5719 = vmatprep.subr.mxu1 %v10214_v20  ;;  %10692 = vst [vmem:[#allocation38_spill] sm:$0xff] %v9449_v1  ;;  %v3418_v42 = vadd.f32 %v9231_v50, %v7604_v10  ;;  %v9471_v50 = vld [vmem:[#allocation8 + $0xe0] sm:$0xff]  ;;  %v9491_v10 = vld [vmem:[#allocation8 + $0xb0] sm:$0xff] }
 0x791   :  { %3895 = vmatpush1.msra.mxu0 %v9443_v44  ;;  %5720 = vmatpush3.msra.mxu1 %v9446_v56  ;;  %v9461_v56 = vld [vmem:[#allocation8 + $0xf8] sm:$0xff]  ;;  %v3573_v44 = vadd.f32 1.0, %v5987_v0  ;;  %10694 = vst [vmem:[#allocation40_spill] sm:$0xff] %v9471_v50  ;;  %v9481_v0 = vld [vmem:[#allocation8 + $0xc8] sm:$0xff]  ;;  %10700 = vst [vmem:[#allocation46_spill] sm:$0xff] %v9491_v10 }
 0x792   :  { %v5989_v23 = vpop.eup %5988  ;;  %3896 = vmatprep.subr.mxu0 %v9449_v1  ;;  %5721 = vmatprep.subr.mxu1 %v10214_v20  ;;  %10697 = vst [vmem:[#allocation43_spill] sm:$0xff] %v9481_v0 }
 0x793   :  { %v3576_v62 = vmul.f32 %v5989_v23, %v3559_v12  ;;  %3897 = vmatpush1.msra.mxu0 %v9455_v5  ;;  %5722 = vmatpush3.msra.mxu1 %v9458_v26  ;;  %v9468_v23 = vld [vmem:[#allocation8 + $0x100] sm:$0xff]  ;;  %v9475_v12 = vld [vmem:[#allocation8 + $0xd8] sm:$0xff] }
 0x794   :  { %3898 = vmatprep.subr.mxu0 %v9461_v56  ;;  %5723 = vmatprep.subr.mxu1 %v10214_v20  ;;  %10693 = vst [vmem:[#allocation39_spill] sm:$0xff] %v9468_v23  ;;  %10695 = vst [vmem:[#allocation41_spill] sm:$0xff] %v9475_v12 }
 0x795   :  { %v3577_v1 = vadd.f32 %v3576_v62, %v3418_v42  ;;  %3899 = vmatpush1.msra.mxu0 %v9465_v46  ;;  %5724 = vmatpush3.msra.mxu1 %v9468_v23  ;;  %v9478_v62 = vld [vmem:[#allocation8 + $0xe8] sm:$0xff]  ;;  %v9485_v42 = vld [vmem:[#allocation8 + $0xc0] sm:$0xff] }
 0x796   :  { %3900 = vmatprep.subr.mxu0 %v9471_v50  ;;  %5725 = vmatprep.subr.mxu1 %v10214_v20  ;;  %10696 = vst [vmem:[#allocation42_spill] sm:$0xff] %v9478_v62  ;;  %10698 = vst [vmem:[#allocation44_spill] sm:$0xff] %v9485_v42  ;;  %v9552_v50 = vld [vmem:[#allocation8 + $0x20] sm:$0xff]  ;;  %v9562_v23 = vld [vmem:[#allocation8 + $0x8] sm:$0xff] }
 0x797   :  { %5990 = vtanh.f32 %v3577_v1  ;;  %3901 = vmatpush1.msra.mxu0 %v9475_v12  ;;  %5726 = vmatpush3.msra.mxu1 %v9478_v62  ;;  %v9488_v1 = vld [vmem:[#allocation8 + $0xd0] sm:$0xff]  ;;  %v9495_v62 = vld [vmem:[#allocation8 + $0xa8] sm:$0xff]  ;;  %10717 = vst [vmem:[#allocation61_spill] sm:$0xff] %v9552_v50 }
 0x798   :  { %3902 = vmatprep.subr.mxu0 %v9481_v0  ;;  %5727 = vmatprep.subr.mxu1 %v10214_v20  ;;  %5992 = vrcp.f32 %v3573_v44  ;;  %10699 = vst [vmem:[#allocation45_spill] sm:$0xff] %v9488_v1  ;;  %10701 = vst [vmem:[#allocation47_spill] sm:$0xff] %v9495_v62  ;;  %v9498_v0 = vld [vmem:[#allocation8 + $0xb8] sm:$0xff] }
 0x799   :  { %3903 = vmatpush1.msra.mxu0 %v9485_v42  ;;  %5728 = vmatpush3.msra.mxu1 %v9488_v1  ;;  %10702 = vst [vmem:[#allocation48_spill] sm:$0xff] %v9498_v0  ;;  %v9501_v44 = vld [vmem:[#allocation8 + $0x98] sm:$0xff]  ;;  %v9505_v1 = vld [vmem:[#allocation8 + $0x90] sm:$0xff]  ;;  %v9511_v42 = vld [vmem:[#allocation8 + $0x80] sm:$0xff] }
 0x79a   :  { %3904 = vmatprep.subr.mxu0 %v9491_v10  ;;  %5729 = vmatprep.subr.mxu1 %v10214_v20  ;;  %10703 = vst [vmem:[#allocation49_spill] sm:$0xff] %v9501_v44  ;;  %10704 = vst [vmem:[#allocation50_spill] sm:$0xff] %v9505_v1  ;;  %v9508_v10 = vld [vmem:[#allocation8 + $0xa0] sm:$0xff] }
 0x79b   :  { %3905 = vmatpush1.msra.mxu0 %v9495_v62  ;;  %5730 = vmatpush3.msra.mxu1 %v9498_v0  ;;  %10705 = vst [vmem:[#allocation51_spill] sm:$0xff] %v9508_v10  ;;  %10706 = vst [vmem:[#allocation52_spill] sm:$0xff] %v9511_v42  ;;  %v9515_v0 = vld [vmem:[#allocation8 + $0x78] sm:$0xff]  ;;  %v9521_v62 = vld [vmem:[#allocation8 + $0x68] sm:$0xff] }
 0x79c   :  { %3906 = vmatprep.subr.mxu0 %v9501_v44  ;;  %5731 = vmatprep.subr.mxu1 %v10214_v20  ;;  %10707 = vst [vmem:[#allocation53_spill] sm:$0xff] %v9515_v0  ;;  %v9518_v44 = vld [vmem:[#allocation8 + $0x88] sm:$0xff]  ;;  %10709 = vst [vmem:[#allocation55_spill] sm:$0xff] %v9521_v62 }
 0x79d   :  { %3907 = vmatpush1.msra.mxu0 %v9505_v1  ;;  %5732 = vmatpush3.msra.mxu1 %v9508_v10  ;;  %10708 = vst [vmem:[#allocation54_spill] sm:$0xff] %v9518_v44  ;;  %v9525_v10 = vld [vmem:[#allocation8 + $0x60] sm:$0xff]  ;;  %v9531_v1 = vld [vmem:[#allocation8 + $0x50] sm:$0xff] }
 0x79e   :  { %3908 = vmatprep.subr.mxu0 %v9511_v42  ;;  %5733 = vmatprep.subr.mxu1 %v10214_v20  ;;  %10710 = vst [vmem:[#allocation56_spill] sm:$0xff] %v9525_v10  ;;  %v9528_v42 = vld [vmem:[#allocation8 + $0x70] sm:$0xff]  ;;  %10712 = vst [vmem:[#allocation57_spill] sm:$0xff] %v9531_v1 }
 0x79f   :  { %3909 = vmatpush1.msra.mxu0 %v9515_v0  ;;  %5734 = vmatpush3.msra.mxu1 %v9518_v44  ;;  %10711 = vst [vmem:[#allocation20_spill] sm:$0xff] %v9528_v42  ;;  %v9535_v44 = vld [vmem:[#allocation8 + $0x48] sm:$0xff] }
 0x7a0   :  { %3910 = vmatprep.subr.mxu0 %v9521_v62  ;;  %5735 = vmatprep.subr.mxu1 %v10214_v20  ;;  %10713 = vst [vmem:[#allocation59_spill] sm:$0xff] %v9535_v44  ;;  %v9538_v62 = vld [vmem:[#allocation8 + $0x58] sm:$0xff] }
 0x7a1   :  { %3911 = vmatpush1.msra.mxu0 %v9525_v10  ;;  %5736 = vmatpush3.msra.mxu1 %v9528_v42  ;;  %10714 = vst [vmem:[#allocation58_spill] sm:$0xff] %v9538_v62  ;;  %v9541_v10 = vld [vmem:[#allocation8 + $0x38] sm:$0xff]  ;;  %v9545_v42 = vld [vmem:[#allocation8 + $0x30] sm:$0xff] }
 0x7a2   :  { %3912 = vmatprep.subr.mxu0 %v9531_v1  ;;  %5737 = vmatprep.subr.mxu1 %v10214_v20  ;;  %10715 = vst [vmem:[#allocation60_spill] sm:$0xff] %v9541_v10  ;;  %10716 = vst [vmem:[#allocation62_spill] sm:$0xff] %v9545_v42  ;;  %v9548_v1 = vld [vmem:[#allocation8 + $0x40] sm:$0xff] }
 0x7a3   :  { %3913 = vmatpush1.msra.mxu0 %v9535_v44  ;;  %5738 = vmatpush3.msra.mxu1 %v9538_v62  ;;  %v9559_v62 = vld [vmem:[#allocation8 + $0x28] sm:$0xff] }
 0x7a4   :  { %v5991_v0 = vpop.eup %5990  ;;  %3914 = vmatprep.subr.mxu0 %v9541_v10  ;;  %5739 = vmatprep.subr.mxu1 %v10214_v20  ;;  %v9556_v10 = vld [vmem:[#allocation8 + $0x18] sm:$0xff] }
 0x7a5   :  { %3915 = vmatpush1.msra.mxu0 %v9545_v42  ;;  %5740 = vmatpush3.msra.mxu1 %v9548_v1  ;;  %v3579_v44 = vsub.f32 %v9166_v53, %v5991_v0  ;;  %v5993_v12 = vpop.eup %5992  ;;  %10718 = vst [vmem:[#allocation63_spill] sm:$0xff] %v9556_v10  ;;  %v9566_v53 = vld [vmem:[#allocation8] sm:$0xff] }
 0x7a6   :  { %3916 = vmatprep.subr.mxu0 %v9552_v50  ;;  %5741 = vmatprep.subr.mxu1 %v10214_v20 }
 0x7a7   :  { %3917 = vmatpush1.msra.mxu0 %v9556_v10  ;;  %5742 = vmatpush3.msra.mxu1 %v9559_v62  ;;  %v3580_v42 = vmul.f32 %v5993_v12, %v3579_v44  ;;  %v9572_v10 = vld [vmem:[#allocation8 + $0x10] sm:$0xff]  ;;  %v10737_v12 = vld [vmem:[#allocation17_spill] sm:$0xff]  ;;  %v10739_v44 = vld [vmem:[#allocation38_spill] sm:$0xff] }
 0x7a8   :  { %3918 = vmatprep.subr.mxu0 %v9562_v23  ;;  %5743 = vmatprep.subr.mxu1 %v10214_v20 }
 0x7a9   :  { %3919 = vmatpush1.msra.mxu0 %v9566_v53  ;;  %3952 = vmatprep.mubr.f32.mxu0 %v10214_v20  ;;  %v9570_v50 = vadd.f32 %v5991_v0, %v3580_v42  ;;  %v10738_v0 = vld [vmem:[#allocation28_spill] sm:$0xff] }
 0x7aa   :  { %5744 = vmatpush3.msra.mxu1 %v9572_v10  ;;  %5745 = vmatprep.mubr.msk.f32.mxu1 %vm6572_vm0, %v10214_v20 }
 0x7ab   :  { %3953 = vmatmul.mubr.f32.vlgmr.msra.gmra.mxu0 %v9570_v50  ;;  %5746 = vmatmul.mubr.f32.vlgmr.msra.gmra.mxu1 %v9570_v50 }
 0x7ac   :  { %4049 = vmatprep.subr.mxu0 %v9223_v31  ;;  %5748 = vmatprep.subr.mxu1 %v10214_v20 }
 0x7ad   :  { %4050 = vmatpush1.msra.mxu0 %v9240_v4  ;;  %5749 = vmatpush3.msra.mxu1 %v9243_v49  ;;  %v10719_v49 = vld [vmem:[#allocation26_spill] sm:$0xff] }
 0x7ae   :  { %4051 = vmatprep.subr.mxu0 %v9246_v52  ;;  %5750 = vmatprep.subr.mxu1 %v10214_v20 }
 0x7af   :  { %4052 = vmatpush1.msra.mxu0 %v9250_v27  ;;  %5751 = vmatpush3.msra.mxu1 %v9253_v36  ;;  %v10720_v36 = vld [vmem:[#allocation25_spill] sm:$0xff] }
 0x7b0   :  { %4053 = vmatprep.subr.mxu0 %v9256_v22  ;;  %5752 = vmatprep.subr.mxu1 %v10214_v20 }
 0x7b1   :  { %4054 = vmatpush1.msra.mxu0 %v9260_v38  ;;  %5753 = vmatpush3.msra.mxu1 %v9263_v30 }
 0x7b2   :  { %4055 = vmatprep.subr.mxu0 %v9268_v40  ;;  %5754 = vmatprep.subr.mxu1 %v10214_v20  ;;  %v10721_v40 = vld [vmem:[#allocation30_spill] sm:$0xff] }
 0x7b3   :  { %4056 = vmatpush1.msra.mxu0 %v9274_v47  ;;  %5755 = vmatpush3.msra.mxu1 %v9277_v24  ;;  %v10722_v24 = vld [vmem:[#allocation27_spill] sm:$0xff] }
 0x7b4   :  { %4057 = vmatprep.subr.mxu0 %v9280_v11  ;;  %5756 = vmatprep.subr.mxu1 %v10214_v20 }
 0x7b5   :  { %4058 = vmatpush1.msra.mxu0 %v9284_v17  ;;  %5757 = vmatpush3.msra.mxu1 %v9287_v32 }
 0x7b6   :  { %4059 = vmatprep.subr.mxu0 %v9290_v37  ;;  %5758 = vmatprep.subr.mxu1 %v10214_v20 }
 0x7b7   :  { %4060 = vmatpush1.msra.mxu0 %v9294_v57  ;;  %5759 = vmatpush3.msra.mxu1 %v9297_v45 }
 0x7b8   :  { %4061 = vmatprep.subr.mxu0 %v9300_v3  ;;  %5760 = vmatprep.subr.mxu1 %v10214_v20  ;;  %v10723_v3 = vld [vmem:[#allocation35_spill] sm:$0xff] }
 0x7b9   :  { %4062 = vmatpush1.msra.mxu0 %v9304_v34  ;;  %5761 = vmatpush3.msra.mxu1 %v9307_v7 }
 0x7ba   :  { %4063 = vmatprep.subr.mxu0 %v9310_v58  ;;  %5762 = vmatprep.subr.mxu1 %v10214_v20 }
 0x7bb   :  { %4064 = vmatpush1.msra.mxu0 %v9314_v9  ;;  %5763 = vmatpush3.msra.mxu1 %v9317_v13  ;;  %v10724_v13 = vld [vmem:[#allocation33_spill] sm:$0xff] }
 0x7bc   :  { %4065 = vmatprep.subr.mxu0 %v9321_v59  ;;  %5764 = vmatprep.subr.mxu1 %v10214_v20 }
 0x7bd   :  { %4066 = vmatpush1.msra.mxu0 %v9325_v21  ;;  %5765 = vmatpush3.msra.mxu1 %v9328_v6 }
 0x7be   :  { %4067 = vmatprep.subr.mxu0 %v9332_v35  ;;  %5766 = vmatprep.subr.mxu1 %v10214_v20  ;;  %v10725_v35 = vld [vmem:[#allocation15_spill] sm:$0xff] }
 0x7bf   :  { %4068 = vmatpush1.msra.mxu0 %v9336_v15  ;;  %5767 = vmatpush3.msra.mxu1 %v9339_v8 }
 0x7c0   :  { %4069 = vmatprep.subr.mxu0 %v9342_v14  ;;  %5768 = vmatprep.subr.mxu1 %v10214_v20 }
 0x7c1   :  { %4070 = vmatpush1.msra.mxu0 %v9346_v60  ;;  %5769 = vmatpush3.msra.mxu1 %v9349_v61 }
 0x7c2   :  { %4071 = vmatprep.subr.mxu0 %v9352_v33  ;;  %5770 = vmatprep.subr.mxu1 %v10214_v20  ;;  %v10726_v33 = vld [vmem:[#allocation29_spill] sm:$0xff] }
 0x7c3   :  { %4072 = vmatpush1.msra.mxu0 %v9356_v48  ;;  %5771 = vmatpush3.msra.mxu1 %v9359_v16  ;;  %v10727_v48 = vld [vmem:[#allocation125_spill] sm:$0xff]  ;;  %v10728_v16 = vld [vmem:[#allocation18_spill] sm:$0xff] }
 0x7c4   :  { %4073 = vmatprep.subr.mxu0 %v9362_v25  ;;  %5772 = vmatprep.subr.mxu1 %v10214_v20  ;;  %v10729_v25 = vld [vmem:[#allocation19_spill] sm:$0xff] }
 0x7c5   :  { %4074 = vmatpush1.msra.mxu0 %v9366_v55  ;;  %5773 = vmatpush3.msra.mxu1 %v9369_v29  ;;  %v10730_v55 = vld [vmem:[#allocation32_spill] sm:$0xff] }
 0x7c6   :  { %4075 = vmatprep.subr.mxu0 %v9372_v54  ;;  %5774 = vmatprep.subr.mxu1 %v10214_v20  ;;  %v10731_v54 = vld [vmem:[#allocation21_spill] sm:$0xff] }
 0x7c7   :  { %4076 = vmatpush1.msra.mxu0 %v9376_v63  ;;  %5775 = vmatpush3.msra.mxu1 %v9379_v41  ;;  %v10732_v63 = vld [vmem:[#allocation22_spill] sm:$0xff]  ;;  %v10733_v41 = vld [vmem:[#allocation31_spill] sm:$0xff] }
 0x7c8   :  { %4077 = vmatprep.subr.mxu0 %v9382_v43  ;;  %5776 = vmatprep.subr.mxu1 %v10214_v20 }
 0x7c9   :  { %4078 = vmatpush1.msra.mxu0 %v9386_v39  ;;  %5777 = vmatpush3.msra.mxu1 %v9389_v2  ;;  %v10734_v2 = vld [vmem:[#allocation16_spill] sm:$0xff] }
 0x7ca   :  { %4079 = vmatprep.subr.mxu0 %v9392_v51  ;;  %5778 = vmatprep.subr.mxu1 %v10214_v20  ;;  %v10735_v51 = vld [vmem:[#allocation121_spill] sm:$0xff] }
 0x7cb   :  { %4080 = vmatpush1.msra.mxu0 %v9396_v19  ;;  %4113 = vmatprep.mubr.f32.mxu0 %v10214_v20 }
 0x7cc   :  { %5779 = vmatpush3.msra.mxu1 %v9400_v28  ;;  %5780 = vmatprep.mubr.msk.f32.mxu1 %vm6572_vm0, %v10214_v20  ;;  %v10736_v28 = vld [vmem:[#allocation122_spill] sm:$0xff] }
 0x7cd   :  { %4190 = vmatprep.subr.mxu0 %v9407_v18  ;;  %5783 = vmatprep.subr.mxu1 %v10214_v20 }
 0x828   :  { %v3652_v31 = vpop.f32.mrf.mxu0  ;;  %v3723_v4 = vpop.f32.mrf.mxu1 }
 0x829   :  { %v3653_v52 = vadd.f32 %v3652_v31, %v10719_v49  ;;  %v3724_v34 = vadd.f32 %v3723_v4, %v10723_v3  ;;  %v10740_v49 = vld [vmem:[#allocation39_spill] sm:$0xff]  ;;  %v10755_v3 = vld [vmem:[#allocation52_spill] sm:$0xff] }
 0x82a   :  { %v5677_v27 = vpop.f32.mrf.mxu1  ;;  %v3654_v30 = vpop.f32.mrf.mxu0 }
 0x82b   :  { %v3727_v22 = vadd.f32 %v3653_v52, %v10720_v36  ;;  %v3655_v47 = vadd.f32 %v3654_v30, %v10721_v40  ;;  %v10741_v52 = vld [vmem:[#allocation40_spill] sm:$0xff]  ;;  %v10742_v36 = vld [vmem:[#allocation41_spill] sm:$0xff]  ;;  %v10748_v30 = vld [vmem:[#allocation46_spill] sm:$0xff] }
 0x82c   :  { %v10749_v40 = vld [vmem:[#allocation47_spill] sm:$0xff] }
 0x82d   :  { %v4478_v38 = vmul.f32 -1.442695, %v3727_v22  ;;  %v3734_v11 = vadd.f32 %v3655_v47, %v10722_v24  ;;  %v10746_v22 = vld [vmem:[#allocation45_spill] sm:$0xff]  ;;  %v10750_v47 = vld [vmem:[#allocation48_spill] sm:$0xff] }
 0x82e   :  { %v10751_v24 = vld [vmem:[#allocation124_spill] sm:$0xff] }
 0x82f   :  { %5994 = vpow2.f32 %v4478_v38  ;;  %v4479_v17 = vmul.f32 -1.442695, %v3734_v11 }
 0x831   :  { %5996 = vpow2.f32 %v4479_v17  ;;  %v10752_v17 = vld [vmem:[#allocation49_spill] sm:$0xff] }
 0x83c   :  { %v5995_v32 = vpop.eup %5994 }
 0x83d   :  { %v3731_v37 = vadd.f32 1.0, %v5995_v32  ;;  %v10753_v32 = vld [vmem:[#allocation50_spill] sm:$0xff] }
 0x83e   :  { %v5997_v45 = vpop.eup %5996 }
 0x83f   :  { %5998 = vrcp.f32 %v3731_v37  ;;  %v3738_v21 = vadd.f32 1.0, %v5997_v45  ;;  %v10754_v37 = vld [vmem:[#allocation51_spill] sm:$0xff] }
 0x849   :  { %v9652_v57 = vpop.f32.mrf.mxu1  ;;  %v3813_v61 = vpop.f32.mrf.mxu0 }
 0x84a   :  { %v3814_v19 = vadd.f32 %v3813_v61, %v10735_v51  ;;  %v10766_v61 = vld [vmem:[#allocation61_spill] sm:$0xff] }
 0x84b   :  { %v5712_v7 = vpop.f32.mrf.mxu1  ;;  %v3815_v29 = vpop.f32.mrf.mxu0 }
 0x84c   :  { %v5999_v58 = vpop.eup %5998  ;;  %v3816_v11 = vadd.f32 %v3815_v29, %v10751_v24  ;;  %v10757_v7 = vld [vmem:[#allocation54_spill] sm:$0xff] }
 0x84d   :  { %v3741_v9 = vmul.f32 %v5999_v58, %v3724_v34  ;;  %v10756_v34 = vld [vmem:[#allocation53_spill] sm:$0xff]  ;;  %v10758_v58 = vld [vmem:[#allocation55_spill] sm:$0xff] }
 0x84f   :  { %v3742_v59 = vadd.f32 %v3741_v9, %v10724_v13  ;;  %v10759_v9 = vld [vmem:[#allocation56_spill] sm:$0xff] }
 0x850   :  { %v10760_v13 = vld [vmem:[#allocation20_spill] sm:$0xff] }
 0x851   :  { %6000 = vtanh.f32 %v3742_v59 }
 0x852   :  { %6002 = vrcp.f32 %v3738_v21  ;;  %v10761_v21 = vld [vmem:[#allocation57_spill] sm:$0xff] }
 0x85e   :  { %v6001_v6 = vpop.eup %6000 }
 0x85f   :  { %v3744_v15 = vsub.f32 %v10725_v35, %v6001_v6  ;;  %v6003_v8 = vpop.eup %6002  ;;  %v10763_v35 = vld [vmem:[#allocation58_spill] sm:$0xff] }
 0x861   :  { %v3745_v14 = vmul.f32 %v6003_v8, %v3744_v15  ;;  %v10764_v8 = vld [vmem:[#allocation60_spill] sm:$0xff] }
 0x863   :  { %v3746_v60 = vadd.f32 %v6001_v6, %v3745_v14  ;;  %v10762_v6 = vld [vmem:[#allocation59_spill] sm:$0xff] }
 0x865   :  { %4114 = vmatmul.mubr.f32.vlgmr.msra.gmra.mxu0 %v3746_v60  ;;  %5781 = vmatmul.mubr.f32.vlgmr.msra.gmra.mxu1 %v3746_v60  ;;  %v10765_v60 = vld [vmem:[#allocation62_spill] sm:$0xff] }
 0x866   :  { %4191 = vmatpush1.msra.mxu0 %v10726_v33  ;;  %5784 = vmatpush3.msra.mxu1 %v10727_v48  ;;  %v10767_v33 = vld [vmem:[#allocation63_spill] sm:$0xff]  ;;  %v10768_v48 = vld [vmem:[#allocation36_spill] sm:$0xff] }
 0x867   :  { %4192 = vmatprep.subr.mxu0 %v10728_v16  ;;  %5785 = vmatprep.subr.mxu1 %v10214_v20 }
 0x868   :  { %4193 = vmatpush1.msra.mxu0 %v10729_v25  ;;  %5786 = vmatpush3.msra.mxu1 %v10730_v55  ;;  %v10769_v25 = vld [vmem:[#allocation37_spill] sm:$0xff] }
 0x869   :  { %4194 = vmatprep.subr.mxu0 %v10731_v54  ;;  %5787 = vmatprep.subr.mxu1 %v10214_v20 }
 0x86a   :  { %4195 = vmatpush1.msra.mxu0 %v10732_v63  ;;  %5788 = vmatpush3.msra.mxu1 %v10733_v41 }
 0x86b   :  { %v3954_v43 = vpop.f32.mrf.mxu0  ;;  %v9667_v39 = vpop.f32.mrf.mxu1  ;;  %4196 = vmatprep.subr.mxu0 %v10734_v2  ;;  %5789 = vmatprep.subr.mxu1 %v10214_v20  ;;  %v4363_v2 = vld [vmem:[#allocation10 + $0x60] sm:$0xff] }
 0x86c   :  { %v3955_v18 = vadd.f32 %v3954_v43, %v10736_v28  ;;  %4197 = vmatpush1.msra.mxu0 %v10737_v12  ;;  %5790 = vmatpush3.msra.mxu1 %v10738_v0  ;;  %v4026_v16 = vadd.f32 %v9667_v39, %v10768_v48  ;;  %v4365_v39 = vld [vmem:[#allocation10 + $0x70] sm:$0xff]  ;;  %v4360_v12 = vld [vmem:[#allocation10 + $0x48] sm:$0xff]  ;;  %v4359_v0 = vld [vmem:[#allocation10 + $0x40] sm:$0xff] }
 0x86d   :  { %v5747_v42 = vpop.f32.mrf.mxu1  ;;  %4198 = vmatprep.subr.mxu0 %v10739_v44  ;;  %5791 = vmatprep.subr.mxu1 %v10214_v20  ;;  %v3956_v27 = vpop.f32.mrf.mxu0  ;;  %v4357_v44 = vld [vmem:[#allocation10 + $0x30] sm:$0xff] }
 0x86e   :  { %v4029_v31 = vadd.f32 %v3955_v18, %v3814_v19  ;;  %4199 = vmatpush1.msra.mxu0 %v9455_v5  ;;  %5792 = vmatpush3.msra.mxu1 %v9458_v26  ;;  %v10743_v5 = vld [vmem:[#allocation42_spill] sm:$0xff]  ;;  %v10744_v26 = vld [vmem:[#allocation43_spill] sm:$0xff]  ;;  %v4362_v19 = vld [vmem:[#allocation10 + $0x58] sm:$0xff] }
 0x86f   :  { %4200 = vmatprep.subr.mxu0 %v9461_v56  ;;  %5793 = vmatprep.subr.mxu1 %v10214_v20  ;;  %v10745_v56 = vld [vmem:[#allocation44_spill] sm:$0xff]  ;;  %v4358_v42 = vld [vmem:[#allocation10 + $0x38] sm:$0xff] }
 0x870   :  { %v4480_v4 = vmul.f32 -1.442695, %v4029_v31  ;;  %4201 = vmatpush1.msra.mxu0 %v9465_v46  ;;  %5794 = vmatpush3.msra.mxu1 %v10740_v49  ;;  %v10747_v46 = vld [vmem:[#allocation123_spill] sm:$0xff]  ;;  %v4361_v18 = vld [vmem:[#allocation10 + $0x50] sm:$0xff]  ;;  %v4354_v49 = vld [vmem:[#allocation10 + $0x18] sm:$0xff] }
 0x871   :  { %4202 = vmatprep.subr.mxu0 %v10741_v52  ;;  %5795 = vmatprep.subr.mxu1 %v10214_v20  ;;  %v3957_v38 = vadd.f32 %v3956_v27, %v10747_v46  ;;  %v4356_v31 = vld [vmem:[#allocation10 + $0x28] sm:$0xff]  ;;  %v4353_v52 = vld [vmem:[#allocation10 + $0x10] sm:$0xff] }
 0x872   :  { %6004 = vpow2.f32 %v4480_v4  ;;  %4203 = vmatpush1.msra.mxu0 %v10742_v36  ;;  %5796 = vmatpush3.msra.mxu1 %v10743_v5  ;;  %v4355_v4 = vld [vmem:[#allocation10 + $0x20] sm:$0xff]  ;;  %v4352_v27 = vld [vmem:[#allocation10 + $0x8] sm:$0xff] }
 0x873   :  { %4204 = vmatprep.subr.mxu0 %v10744_v26  ;;  %5797 = vmatprep.subr.mxu1 %v10214_v20  ;;  %v4036_v45 = vadd.f32 %v3957_v38, %v3816_v11  ;;  %v4351_v36 = vld [vmem:[#allocation10] sm:$0xff] }
 0x874   :  { %4205 = vmatpush1.msra.mxu0 %v10745_v56  ;;  %5798 = vmatpush3.msra.mxu1 %v10746_v22 }
 0x875   :  { %4206 = vmatprep.subr.mxu0 %v10748_v30  ;;  %5799 = vmatprep.subr.mxu1 %v10214_v20  ;;  %v4481_v59 = vmul.f32 -1.442695, %v4036_v45 }
 0x876   :  { %4207 = vmatpush1.msra.mxu0 %v10749_v40  ;;  %5800 = vmatpush3.msra.mxu1 %v10750_v47 }
 0x877   :  { %4208 = vmatprep.subr.mxu0 %v10752_v17  ;;  %5801 = vmatprep.subr.mxu1 %v10214_v20  ;;  %6006 = vpow2.f32 %v4481_v59 }
 0x878   :  { %4209 = vmatpush1.msra.mxu0 %v10753_v32  ;;  %5802 = vmatpush3.msra.mxu1 %v10754_v37 }
 0x879   :  { %4210 = vmatprep.subr.mxu0 %v10755_v3  ;;  %5803 = vmatprep.subr.mxu1 %v10214_v20 }
 0x87a   :  { %4211 = vmatpush1.msra.mxu0 %v10756_v34  ;;  %5804 = vmatpush3.msra.mxu1 %v10757_v7 }
 0x87b   :  { %4212 = vmatprep.subr.mxu0 %v10758_v58  ;;  %5805 = vmatprep.subr.mxu1 %v10214_v20 }
 0x87c   :  { %4213 = vmatpush1.msra.mxu0 %v10759_v9  ;;  %5806 = vmatpush3.msra.mxu1 %v10760_v13 }
 0x87d   :  { %4214 = vmatprep.subr.mxu0 %v10761_v21  ;;  %5807 = vmatprep.subr.mxu1 %v10214_v20 }
 0x87e   :  { %4215 = vmatpush1.msra.mxu0 %v10762_v6  ;;  %5808 = vmatpush3.msra.mxu1 %v10763_v35 }
 0x87f   :  { %v6005_v15 = vpop.eup %6004  ;;  %4216 = vmatprep.subr.mxu0 %v10764_v8  ;;  %5809 = vmatprep.subr.mxu1 %v10214_v20 }
 0x880   :  { %v4033_v14 = vadd.f32 1.0, %v6005_v15  ;;  %4217 = vmatpush1.msra.mxu0 %v10765_v60  ;;  %5810 = vmatpush3.msra.mxu1 %v9548_v1 }
 0x881   :  { %4218 = vmatprep.subr.mxu0 %v10766_v61  ;;  %5811 = vmatprep.subr.mxu1 %v10214_v20 }
 0x882   :  { %6008 = vrcp.f32 %v4033_v14  ;;  %4219 = vmatpush1.msra.mxu0 %v10767_v33  ;;  %5812 = vmatpush3.msra.mxu1 %v9559_v62  ;;  %v4484_v14 = vld [vmem:[%s9778_s10] ss:$0 sm:$0xff] }
 0x883   :  { %4220 = vmatprep.subr.mxu0 %v9562_v23  ;;  %5813 = vmatprep.subr.mxu1 %v10214_v20  ;;  %v3885_v23 = vadd.f32 %v9652_v57, %v10769_v25  ;;  %v4366_v57 = vld [vmem:[#allocation10 + $0x78] sm:$0xff] }
 0x884   :  { %4221 = vmatpush1.msra.mxu0 %v9566_v53  ;;  %4254 = vmatprep.mubr.f32.mxu0 %v10214_v20  ;;  %v6007_v1 = vpop.eup %6006 }
 0x885   :  { %5814 = vmatpush3.msra.mxu1 %v9572_v10  ;;  %5815 = vmatprep.mubr.msk.f32.mxu1 %vm6572_vm0, %v10214_v20  ;;  %v4040_v53 = vadd.f32 1.0, %v6007_v1 }
 0x886   :  { %5818 = vmatprep.subr.mxu0 %v10214_v20 }
 0x88f   :  { %v6009_v62 = vpop.eup %6008 }
 0x890   :  { %v4043_v55 = vmul.f32 %v6009_v62, %v4026_v16 }
 0x892   :  { %v4044_v29 = vadd.f32 %v4043_v55, %v3885_v23 }
 0x894   :  { %6010 = vtanh.f32 %v4044_v29 }
 0x895   :  { %6012 = vrcp.f32 %v4040_v53 }
 0x8a1   :  { %v6011_v54 = vpop.eup %6010 }
 0x8a2   :  { %v4046_v10 = vsub.f32 %v9570_v50, %v6011_v54  ;;  %v6013_v63 = vpop.eup %6012  ;;  %v4364_v50 = vld [vmem:[#allocation10 + $0x68] sm:$0xff] }
 0x8a4   :  { %v4047_v41 = vmul.f32 %v6013_v63, %v4046_v10 }
 0x8a6   :  { %v9734_v43 = vadd.f32 %v6011_v54, %v4047_v41 }
 0x8a8   :  { %4255 = vmatmul.mubr.f32.vlgmr.msra.gmra.mxu0 %v9734_v43  ;;  %5816 = vmatmul.mubr.f32.vlgmr.msra.gmra.mxu1 %v9734_v43 }
 0x8a9   :  { %5850 = vmatprep.mubr.msk.f32.mxu0 %vm6572_vm0, %v10214_v20  ;;  %5819 = vmatpush3.msra.mxu0 %v4366_v57 }
 0x8aa   :  { %5820 = vmatprep.subr.mxu0 %v10214_v20 }
 0x8ab   :  { %5821 = vmatpush3.msra.mxu0 %v4365_v39 }
 0x8ac   :  { %5822 = vmatprep.subr.mxu0 %v10214_v20 }
 0x8ad   :  { %5823 = vmatpush3.msra.mxu0 %v4364_v50 }
 0x8ae   :  { %5824 = vmatprep.subr.mxu0 %v10214_v20 }
 0x8af   :  { %5825 = vmatpush3.msra.mxu0 %v4363_v2 }
 0x8b0   :  { %5826 = vmatprep.subr.mxu0 %v10214_v20 }
 0x8b1   :  { %5827 = vmatpush3.msra.mxu0 %v4362_v19 }
 0x8b2   :  { %5828 = vmatprep.subr.mxu0 %v10214_v20 }
 0x8b3   :  { %5829 = vmatpush3.msra.mxu0 %v4361_v18 }
 0x8b4   :  { %5830 = vmatprep.subr.mxu0 %v10214_v20 }
 0x8b5   :  { %5831 = vmatpush3.msra.mxu0 %v4360_v12 }
 0x8b6   :  { %5832 = vmatprep.subr.mxu0 %v10214_v20 }
 0x8b7   :  { %5833 = vmatpush3.msra.mxu0 %v4359_v0 }
 0x8b8   :  { %5834 = vmatprep.subr.mxu0 %v10214_v20 }
 0x8b9   :  { %5835 = vmatpush3.msra.mxu0 %v4358_v42 }
 0x8ba   :  { %5836 = vmatprep.subr.mxu0 %v10214_v20 }
 0x8bb   :  { %5837 = vmatpush3.msra.mxu0 %v4357_v44 }
 0x8bc   :  { %5838 = vmatprep.subr.mxu0 %v10214_v20 }
 0x8bd   :  { %5839 = vmatpush3.msra.mxu0 %v4356_v31 }
 0x8be   :  { %5840 = vmatprep.subr.mxu0 %v10214_v20 }
 0x8bf   :  { %5841 = vmatpush3.msra.mxu0 %v4355_v4 }
 0x8c0   :  { %5842 = vmatprep.subr.mxu0 %v10214_v20 }
 0x8c1   :  { %5843 = vmatpush3.msra.mxu0 %v4354_v49 }
 0x8c2   :  { %5844 = vmatprep.subr.mxu0 %v10214_v20 }
 0x8c3   :  { %5845 = vmatpush3.msra.mxu0 %v4353_v52 }
 0x8c4   :  { %5846 = vmatprep.subr.mxu0 %v10214_v20 }
 0x8c5   :  { %5847 = vmatpush3.msra.mxu0 %v4352_v27 }
 0x8c6   :  { %5848 = vmatprep.subr.mxu0 %v10214_v20 }
 0x8c7   :  { %5849 = vmatpush3.msra.mxu0 %v4351_v36 }
 0x925   :  { %v4186_v5 = vpop.f32.mrf.mxu1  ;;  %v4115_v56 = vpop.f32.mrf.mxu0 }
 0x926   :  { %v4116_v40 = vadd.f32 %v4115_v56, %v10735_v51 }
 0x927   :  { %v5782_v26 = vpop.f32.mrf.mxu1  ;;  %v4117_v22 = vpop.f32.mrf.mxu0 }
 0x928   :  { %v4118_v20 = vadd.f32 %v4117_v22, %v10751_v24 }
 0x968   :  { %v4256_v38 = vpop.f32.mrf.mxu0  ;;  %v4327_v30 = vpop.f32.mrf.mxu1 }
 0x969   :  { %v4257_v47 = vadd.f32 %v4256_v38, %v10736_v28  ;;  %v4328_v51 = vadd.f32 %v4327_v30, %v10768_v48  ;;  %v4187_v28 = vadd.f32 %v4186_v5, %v10769_v25 }
 0x96a   :  { %v5817_v11 = vpop.f32.mrf.mxu1  ;;  %v4258_v37 = vpop.f32.mrf.mxu0 }
 0x96b   :  { %v4331_v17 = vadd.f32 %v4257_v47, %v4116_v40  ;;  %v4259_v45 = vadd.f32 %v4258_v37, %v10747_v46 }
 0x96d   :  { %v4482_v32 = vmul.f32 -1.442695, %v4331_v17  ;;  %v4338_v3 = vadd.f32 %v4259_v45, %v4118_v20 }
 0x96f   :  { %6014 = vpow2.f32 %v4482_v32  ;;  %v4483_v34 = vmul.f32 -1.442695, %v4338_v3 }
 0x971   :  { %6016 = vpow2.f32 %v4483_v34 }
 0x97c   :  { %v6015_v7 = vpop.eup %6014 }
 0x97d   :  { %v4335_v58 = vadd.f32 1.0, %v6015_v7 }
 0x97e   :  { %v6017_v9 = vpop.eup %6016 }
 0x97f   :  { %6018 = vrcp.f32 %v4335_v58  ;;  %v4342_v6 = vadd.f32 1.0, %v6017_v9 }
 0x98c   :  { %v6019_v13 = vpop.eup %6018 }
 0x98d   :  { %v4345_v59 = vmul.f32 %v6019_v13, %v4328_v51 }
 0x98f   :  { %v4346_v21 = vadd.f32 %v4345_v59, %v4187_v28 }
 0x991   :  { %6020 = vtanh.f32 %v4346_v21 }
 0x992   :  { %6022 = vrcp.f32 %v4342_v6 }
 0x99e   :  { %v6021_v46 = vpop.eup %6020 }
 0x99f   :  { %v4348_v24 = vsub.f32 %v9734_v43, %v6021_v46  ;;  %v6023_v35 = vpop.eup %6022 }
 0x9a1   :  { %v4349_v15 = vmul.f32 %v6023_v35, %v4348_v24 }
 0x9a3   :  { %v4350_v8 = vadd.f32 %v6021_v46, %v4349_v15 }
 0x9a5   :  { %5851 = vmatmul.mubr.f32.vlgmr.msra.gmra.mxu0 %v4350_v8 }
 0xa65   :  { %v4440_v60 = vpop.f32.mrf.mxu0 }
 0xa66   :  { %v4441_v61 = vadd.f32 %v4484_v14, %v4440_v60 }
 0xa67   :  { %v5852_v33 = vpop.f32.mrf.mxu0 }
 0xa68   :  { %4444 = vst [vmem:[%s9779_s11] sm:$0xff] %v4441_v61 }
 0xa69   :  { %4449 = vsyncpa [#allocation4], 1 }
 0xa6a   :  { %4450 = vsyncpa [#allocation6], 1 }
 0xa6b   :  { %4451 = vsyncpa [#allocation9], 1 }

</bundles_post_ra>
